<compile_context>
chip_gen: v7x
topology: tpu7x:2x2x1
jax: 0.10.0
libtpu: 0.0.40
codegen_flags: <defaults>
</compile_context>

<pallas_src>
import functools

import jax
import jax.numpy as jnp
from jax import lax
from jax.experimental import pallas as pl
from jax.experimental.pallas import tpu as pltpu

# ---- static config (small but consistent with the module) ----
N_CLASS = 4
ROI_SIZE = 4            # pooled output is ROI_SIZE x ROI_SIZE
SPATIAL_SCALE = 0.5
FC_DIM = 4096           # hard-wired in Head: cls_loc/score consume 4096-d features


def _round_up(x, m):
    return (x + m - 1) // m * m


# -----------------------------------------------------------------------------
# ROI max-pool kernel (torchvision RoIPool semantics).
# Grid is one program per block of TN ROIs.  The batch indices and the packed
# per-bin integer window bounds are scalar-prefetched into SMEM; the feature
# map block index is constant, so it is DMA'd once and stays resident in VMEM.
# -----------------------------------------------------------------------------
def _roi_pool_kernel(bidx_ref, bounds_ref, x_ref, o_ref, *, R, TN, H, W):
    step = pl.program_id(0)
    C = x_ref.shape[1]
    neg_inf = jnp.float32(-jnp.inf)

    # Hoisted index planes -- no div/mod on the flattened map.
    h_iota = lax.broadcasted_iota(jnp.int32, (1, H, W), 1)      # h index plane
    w_iota = lax.broadcasted_iota(jnp.int32, (1, W), 1)         # w index row
    col_ids = lax.broadcasted_iota(jnp.int32, (1, R * R), 1)    # output bin lanes

    for j in range(TN):                      # unrolled: TN ROIs per grid step
        n = step * TN + j
        feat = x_ref[bidx_ref[n]]            # (C, H, W) dynamic batch select
        base = n * 4 * R                     # packed bounds: [hs*R | he*R | ws*R | we*R]

        # w-window masks are independent of ph -> compute once per ROI.
        w_masks, w_empty = [], []
        for pw in range(R):
            ws = bounds_ref[base + 2 * R + pw]
            we = bounds_ref[base + 3 * R + pw]
            w_masks.append((w_iota >= ws) & (w_iota < we))      # (1, W)
            w_empty.append(we <= ws)

        # Accumulate all R*R bin maxima into one (C, R*R) value, stored once.
        vals = jnp.zeros((C, R * R), jnp.float32)
        for ph in range(R):
            hs = bounds_ref[base + 0 * R + ph]
            he = bounds_ref[base + 1 * R + ph]
            h_mask = (h_iota >= hs) & (h_iota < he)             # (1, H, W)
            # Stage 1: row-window max over H (one sublane reduction per ph).
            row_max = jnp.max(jnp.where(h_mask, feat, neg_inf), axis=1)   # (C, W)
            h_empty = he <= hs
            for pw in range(R):
                # Stage 2: short lane reduction over W only.
                v = jnp.max(jnp.where(w_masks[pw], row_max, neg_inf),
                            axis=1, keepdims=True)              # (C, 1)
                empty = jnp.logical_or(h_empty, w_empty[pw])
                v = jnp.where(empty, jnp.zeros_like(v), v)      # empty bin -> 0
                b = ph * R + pw
                vals = jnp.where(col_ids == b, v, vals)         # place column b

        o_ref[j] = vals.astype(o_ref.dtype)                     # single store per ROI


def roi_pool(x, batch_idx, bounds, *, R, n_pad, tn):
    B, C, H, W = x.shape
    kernel = functools.partial(_roi_pool_kernel, R=R, TN=tn, H=H, W=W)
    # NOTE: for feature maps too large for VMEM, switch the x index_map to
    # select the per-batch slab via the prefetched batch index (sorted ROIs).
    return pl.pallas_call(
        kernel,
        out_shape=jax.ShapeDtypeStruct((n_pad, C, R * R), jnp.bfloat16),
        grid_spec=pltpu.PrefetchScalarGridSpec(
            num_scalar_prefetch=2,
            grid=(n_pad // tn,),
            in_specs=[pl.BlockSpec((B, C, H, W),
                                   lambda i, bidx, bnds: (0, 0, 0, 0))],
            out_specs=pl.BlockSpec((tn, C, R * R),
                                   lambda i, bidx, bnds: (i, 0, 0)),
        ),
        compiler_params=pltpu.CompilerParams(
            dimension_semantics=("parallel",)),
    )(batch_idx, bounds, x)


# -----------------------------------------------------------------------------
# Fused FC head: K-tiled classifier matmul (Linear + ReLU) with the cls_loc and
# score heads fused into a single 128-lane-padded second matmul.
# Standard accumulator pattern: f32 VMEM scratch, pl.when init/finalize,
# K axis "arbitrary" (last grid dim), N axis "parallel".
# -----------------------------------------------------------------------------
def _fc_head_kernel(x_ref, w1_ref, b1_ref, w2_ref, b2_ref, out_ref, acc_ref):
    k = pl.program_id(1)

    @pl.when(k == 0)
    def _():
        acc_ref[...] = jnp.zeros_like(acc_ref)

    acc_ref[...] += jnp.dot(x_ref[...], w1_ref[...],
                            preferred_element_type=jnp.float32)

    @pl.when(k == pl.num_programs(1) - 1)
    def _():
        fc7 = jnp.maximum(acc_ref[...] + b1_ref[...], 0.0)      # classifier ReLU
        fc7 = fc7.astype(w2_ref.dtype)                          # bf16 for the MXU
        out_ref[...] = (jnp.dot(fc7, w2_ref[...],
                                preferred_element_type=jnp.float32)
                        + b2_ref[...])


def _pick_k_tile(d):
    for t in (512, 256, 128):
        if d % t == 0:
            return t
    return d


def fc_head(x, w1, b1, w2, b2):
    n_pad, d = x.shape
    f = w1.shape[1]
    out_p = w2.shape[1]
    tm = n_pad if n_pad <= 128 else 128
    tk = _pick_k_tile(d)
    grid = (n_pad // tm, d // tk)
    return pl.pallas_call(
        _fc_head_kernel,
        out_shape=jax.ShapeDtypeStruct((n_pad, out_p), jnp.float32),
        grid_spec=pltpu.PrefetchScalarGridSpec(
            num_scalar_prefetch=0,
            grid=grid,
            in_specs=[
                pl.BlockSpec((tm, tk), lambda i, k: (i, k)),     # pooled acts (bf16)
                pl.BlockSpec((tk, f), lambda i, k: (k, 0)),      # classifier W (bf16)
                pl.BlockSpec((1, f), lambda i, k: (0, 0)),       # classifier b (f32)
                pl.BlockSpec((f, out_p), lambda i, k: (0, 0)),   # [loc|score] W (bf16)
                pl.BlockSpec((1, out_p), lambda i, k: (0, 0)),   # [loc|score] b (f32)
            ],
            out_specs=pl.BlockSpec((tm, out_p), lambda i, k: (i, 0)),
            scratch_shapes=[pltpu.VMEM((tm, f), jnp.float32)],
        ),
        compiler_params=pltpu.CompilerParams(
            dimension_semantics=("parallel", "arbitrary")),
    )(x, w1, b1, w2, b2)


# -----------------------------------------------------------------------------
# Head.forward
# -----------------------------------------------------------------------------
def head_forward(params, x, rois, roi_indices):
    B, C, H, W = x.shape
    R = ROI_SIZE
    N = rois.shape[0]

    # --- glue: t.cat([idx, rois]) + column reorder (y1,x1,y2,x2)->(x1,y1,x2,y2)
    # Batch indices stay int32 end-to-end (no float round-trip).
    rois_f = rois.astype(jnp.float32)
    batch_idx = roi_indices.astype(jnp.int32)
    y1, x1, y2, x2 = rois_f[:, 0], rois_f[:, 1], rois_f[:, 2], rois_f[:, 3]

    # torchvision RoIPool integer bin bounds.  floor(v+0.5) == std::round for
    # the non-negative coordinates produced by the proposal stage.
    rw0 = jnp.floor(x1 * SPATIAL_SCALE + 0.5).astype(jnp.int32)
    rh0 = jnp.floor(y1 * SPATIAL_SCALE + 0.5).astype(jnp.int32)
    rw1 = jnp.floor(x2 * SPATIAL_SCALE + 0.5).astype(jnp.int32)
    rh1 = jnp.floor(y2 * SPATIAL_SCALE + 0.5).astype(jnp.int32)
    roi_w = jnp.maximum(rw1 - rw0 + 1, 1).astype(jnp.float32)
    roi_h = jnp.maximum(rh1 - rh0 + 1, 1).astype(jnp.float32)
    bin_h = roi_h / R
    bin_w = roi_w / R
    pidx = jnp.arange(R, dtype=jnp.float32)
    hstart = jnp.clip(jnp.floor(pidx[None] * bin_h[:, None]).astype(jnp.int32)
                      + rh0[:, None], 0, H)
    hend = jnp.clip(jnp.ceil((pidx[None] + 1.0) * bin_h[:, None]).astype(jnp.int32)
                    + rh0[:, None], 0, H)
    wstart = jnp.clip(jnp.floor(pidx[None] * bin_w[:, None]).astype(jnp.int32)
                      + rw0[:, None], 0, W)
    wend = jnp.clip(jnp.ceil((pidx[None] + 1.0) * bin_w[:, None]).astype(jnp.int32)
                    + rw0[:, None], 0, W)

    # Pad the ROI count so the pool block and FC M-tile are sublane/MXU
    # friendly.  Padded rows have empty bins -> pooled rows of zeros.
    TN = 4                                                     # ROIs per pool grid step
    n_pad = _round_up(N, 8) if N <= 128 else _round_up(N, 128)
    n_pad = _round_up(n_pad, TN)
    pad = n_pad - N
    batch_idx = jnp.pad(batch_idx, (0, pad))
    bounds = jnp.stack([hstart, hend, wstart, wend], axis=1).reshape(N, 4 * R)
    bounds = jnp.pad(bounds, ((0, pad), (0, 0))).reshape(-1).astype(jnp.int32)

    # --- hot path 1: ROI max-pooling (Pallas), bf16 output ---
    pool = roi_pool(x, batch_idx, bounds, R=R, n_pad=n_pad, tn=TN)
    pool_flat = pool.reshape(n_pad, C * R * R)       # == pool.view(N, -1) (cheap XLA reshape)

    # --- fused FC weights: bf16 classifier + [cls_loc | score] padded to 128 lanes ---
    w1 = params["w_cls"].astype(jnp.bfloat16)
    b1 = params["b_cls"].astype(jnp.float32)
    n_loc = params["w_loc"].shape[1]
    n_out = n_loc + params["w_score"].shape[1]
    out_p = _round_up(n_out, 128)
    w2 = jnp.concatenate([params["w_loc"], params["w_score"]], axis=1)
    w2 = jnp.pad(w2, ((0, 0), (0, out_p - n_out))).astype(jnp.bfloat16)
    b2 = jnp.concatenate([params["b_loc"], params["b_score"]], axis=1)
    b2 = jnp.pad(b2, ((0, 0), (0, out_p - n_out))).astype(jnp.float32)

    # --- hot path 2: K-tiled classifier matmul + fused heads (Pallas) ---
    out = fc_head(pool_flat, w1, b1, w2, b2)         # (n_pad, out_p) f32
    roi_cls_locs = out[:N, :n_loc]
    roi_scores = out[:N, n_loc:n_out]
    return roi_cls_locs, roi_scores


def init_params(key, in_dim):
    # deterministic synthetic init; weights stored as (in, out) so the kernels
    # compute x @ W + b (equivalent to PyTorch Linear with W.T).
    k1, k2, k3 = jax.random.split(key, 3)
    return {
        # synthetic classifier (stands in for the injected VGG fc layers)
        "w_cls": jax.random.normal(k1, (in_dim, FC_DIM), jnp.float32) * 0.01,
        "b_cls": jnp.zeros((1, FC_DIM), jnp.float32),
        # normal_init(cls_loc, 0, 0.001), bias zero
        "w_loc": jax.random.normal(k2, (FC_DIM, N_CLASS * 4), jnp.float32) * 0.001,
        "b_loc": jnp.zeros((1, N_CLASS * 4), jnp.float32),
        # normal_init(score, 0, 0.01), bias zero
        "w_score": jax.random.normal(k3, (FC_DIM, N_CLASS), jnp.float32) * 0.01,
        "b_score": jnp.zeros((1, N_CLASS), jnp.float32),
    }


if __name__ == "__main__":
    key = jax.random.PRNGKey(0)
    kx, kr, ki, kp = jax.random.split(key, 4)

    B, C, H, W = 2, 8, 16, 16          # feature map (NCHW)
    N = 8                              # number of ROIs

    x = jax.random.normal(kx, (B, C, H, W), jnp.float32)

    img_size = H / SPATIAL_SCALE       # ROIs are given in image coordinates
    pts = jax.random.uniform(kr, (N, 4), minval=0.0, maxval=img_size - 1.0)
    y1 = jnp.minimum(pts[:, 0], pts[:, 2]); y2 = jnp.maximum(pts[:, 0], pts[:, 2])
    x1 = jnp.minimum(pts[:, 1], pts[:, 3]); x2 = jnp.maximum(pts[:, 1], pts[:, 3])
    rois = jnp.stack([y1, x1, y2, x2], axis=1)            # (N, 4) in (y1,x1,y2,x2)
    roi_indices = jax.random.randint(ki, (N,), 0, B).astype(jnp.int32)

    params = init_params(kp, C * ROI_SIZE * ROI_SIZE)

    roi_cls_locs, roi_scores = head_forward(params, x, rois, roi_indices)
    jax.block_until_ready((roi_cls_locs, roi_scores))

    assert roi_cls_locs.shape == (N, N_CLASS * 4)
    assert roi_scores.shape == (N, N_CLASS)
    assert bool(jnp.all(jnp.isfinite(roi_cls_locs)))
    assert bool(jnp.all(jnp.isfinite(roi_scores)))
    print("KERNEL_OK")
</pallas_src>

<mosaic_0001>
module attributes {stable_mosaic.version = 11 : i64} {
  func.func @_roi_pool_kernel(%arg0: i32, %arg1: memref<8xi32, #tpu.memory_space<smem>>, %arg2: memref<128xi32, #tpu.memory_space<smem>>, %arg3: memref<2x8x16x16xf32, #tpu.memory_space<vmem>>, %arg4: memref<4x8x16xbf16, #tpu.memory_space<vmem>>) attributes {dimension_semantics = [#tpu.dimension_semantics<parallel>], iteration_bounds = array<i64: 2>, scalar_prefetch = 2 : i64, scratch_operands = 0 : i64, tpu.core_type = #tpu.core_type<tc>, window_params = [{pipeline_mode = #tpu.pipeline_mode<synchronous>, transform_indices = @transform_0, window_bounds = array<i64: 2, 8, 16, 16>}, {transform_indices = @transform_1, window_bounds = array<i64: 4, 8, 16>}]} {
    %0 = tpu.iota {dimensions = array<i32: 1>} : vector<1x16x16xi32>
    %1 = tpu.iota {dimensions = array<i32: 1>} : vector<1x16xi32>
    %2 = tpu.iota {dimensions = array<i32: 1>} : vector<1x16xi32>
    %c4_i32 = arith.constant 4 : i32
    %3 = arith.muli %arg0, %c4_i32 : i32
    %c0_i32 = arith.constant 0 : i32
    %4 = arith.addi %3, %c0_i32 : i32
    %5 = arith.index_cast %4 : i32 to index
    %6 = memref.load %arg1[%5] : memref<8xi32, #tpu.memory_space<smem>>
    %7 = arith.index_cast %6 : i32 to index
    %c0 = arith.constant 0 : index
    %c0_0 = arith.constant 0 : index
    %c0_1 = arith.constant 0 : index
    %8 = vector.load %arg3[%7, %c0, %c0_0, %c0_1] : memref<2x8x16x16xf32, #tpu.memory_space<vmem>>, vector<1x8x16x16xf32>
    %9 = vector.shape_cast %8 : vector<1x8x16x16xf32> to vector<8x16x16xf32>
    %c4_i32_2 = arith.constant 4 : i32
    %10 = arith.muli %4, %c4_i32_2 : i32
    %c4_i32_3 = arith.constant 4 : i32
    %11 = arith.muli %10, %c4_i32_3 : i32
    %c8_i32 = arith.constant 8 : i32
    %12 = arith.addi %11, %c8_i32 : i32
    %c0_i32_4 = arith.constant 0 : i32
    %13 = arith.addi %12, %c0_i32_4 : i32
    %14 = arith.index_cast %13 : i32 to index
    %15 = memref.load %arg2[%14] : memref<128xi32, #tpu.memory_space<smem>>
    %c12_i32 = arith.constant 12 : i32
    %16 = arith.addi %11, %c12_i32 : i32
    %c0_i32_5 = arith.constant 0 : i32
    %17 = arith.addi %16, %c0_i32_5 : i32
    %18 = arith.index_cast %17 : i32 to index
    %19 = memref.load %arg2[%18] : memref<128xi32, #tpu.memory_space<smem>>
    %20 = vector.broadcast %15 : i32 to vector<1x16xi32>
    %21 = arith.cmpi sge, %1, %20 : vector<1x16xi32>
    %22 = vector.broadcast %19 : i32 to vector<1x16xi32>
    %23 = arith.cmpi slt, %1, %22 : vector<1x16xi32>
    %24 = arith.andi %21, %23 : vector<1x16xi1>
    %25 = arith.cmpi sle, %19, %15 : i32
    %c8_i32_6 = arith.constant 8 : i32
    %26 = arith.addi %11, %c8_i32_6 : i32
    %c1_i32 = arith.constant 1 : i32
    %27 = arith.addi %26, %c1_i32 : i32
    %28 = arith.index_cast %27 : i32 to index
    %29 = memref.load %arg2[%28] : memref<128xi32, #tpu.memory_space<smem>>
    %c12_i32_7 = arith.constant 12 : i32
    %30 = arith.addi %11, %c12_i32_7 : i32
    %c1_i32_8 = arith.constant 1 : i32
    %31 = arith.addi %30, %c1_i32_8 : i32
    %32 = arith.index_cast %31 : i32 to index
    %33 = memref.load %arg2[%32] : memref<128xi32, #tpu.memory_space<smem>>
    %34 = vector.broadcast %29 : i32 to vector<1x16xi32>
    %35 = arith.cmpi sge, %1, %34 : vector<1x16xi32>
    %36 = vector.broadcast %33 : i32 to vector<1x16xi32>
    %37 = arith.cmpi slt, %1, %36 : vector<1x16xi32>
    %38 = arith.andi %35, %37 : vector<1x16xi1>
    %39 = arith.cmpi sle, %33, %29 : i32
    %c8_i32_9 = arith.constant 8 : i32
    %40 = arith.addi %11, %c8_i32_9 : i32
    %c2_i32 = arith.constant 2 : i32
    %41 = arith.addi %40, %c2_i32 : i32
    %42 = arith.index_cast %41 : i32 to index
    %43 = memref.load %arg2[%42] : memref<128xi32, #tpu.memory_space<smem>>
    %c12_i32_10 = arith.constant 12 : i32
    %44 = arith.addi %11, %c12_i32_10 : i32
    %c2_i32_11 = arith.constant 2 : i32
    %45 = arith.addi %44, %c2_i32_11 : i32
    %46 = arith.index_cast %45 : i32 to index
    %47 = memref.load %arg2[%46] : memref<128xi32, #tpu.memory_space<smem>>
    %48 = vector.broadcast %43 : i32 to vector<1x16xi32>
    %49 = arith.cmpi sge, %1, %48 : vector<1x16xi32>
    %50 = vector.broadcast %47 : i32 to vector<1x16xi32>
    %51 = arith.cmpi slt, %1, %50 : vector<1x16xi32>
    %52 = arith.andi %49, %51 : vector<1x16xi1>
    %53 = arith.cmpi sle, %47, %43 : i32
    %c8_i32_12 = arith.constant 8 : i32
    %54 = arith.addi %11, %c8_i32_12 : i32
    %c3_i32 = arith.constant 3 : i32
    %55 = arith.addi %54, %c3_i32 : i32
    %56 = arith.index_cast %55 : i32 to index
    %57 = memref.load %arg2[%56] : memref<128xi32, #tpu.memory_space<smem>>
    %c12_i32_13 = arith.constant 12 : i32
    %58 = arith.addi %11, %c12_i32_13 : i32
    %c3_i32_14 = arith.constant 3 : i32
    %59 = arith.addi %58, %c3_i32_14 : i32
    %60 = arith.index_cast %59 : i32 to index
    %61 = memref.load %arg2[%60] : memref<128xi32, #tpu.memory_space<smem>>
    %62 = vector.broadcast %57 : i32 to vector<1x16xi32>
    %63 = arith.cmpi sge, %1, %62 : vector<1x16xi32>
    %64 = vector.broadcast %61 : i32 to vector<1x16xi32>
    %65 = arith.cmpi slt, %1, %64 : vector<1x16xi32>
    %66 = arith.andi %63, %65 : vector<1x16xi1>
    %67 = arith.cmpi sle, %61, %57 : i32
    %cst = arith.constant 0.000000e+00 : f32
    %68 = vector.broadcast %cst : f32 to vector<8x16xf32>
    %c0_i32_15 = arith.constant 0 : i32
    %69 = arith.addi %11, %c0_i32_15 : i32
    %c0_i32_16 = arith.constant 0 : i32
    %70 = arith.addi %69, %c0_i32_16 : i32
    %71 = arith.index_cast %70 : i32 to index
    %72 = memref.load %arg2[%71] : memref<128xi32, #tpu.memory_space<smem>>
    %c4_i32_17 = arith.constant 4 : i32
    %73 = arith.addi %11, %c4_i32_17 : i32
    %c0_i32_18 = arith.constant 0 : i32
    %74 = arith.addi %73, %c0_i32_18 : i32
    %75 = arith.index_cast %74 : i32 to index
    %76 = memref.load %arg2[%75] : memref<128xi32, #tpu.memory_space<smem>>
    %77 = vector.broadcast %72 : i32 to vector<1x16x16xi32>
    %78 = arith.cmpi sge, %0, %77 : vector<1x16x16xi32>
    %79 = vector.broadcast %76 : i32 to vector<1x16x16xi32>
    %80 = arith.cmpi slt, %0, %79 : vector<1x16x16xi32>
    %81 = arith.andi %78, %80 : vector<1x16x16xi1>
    %cst_19 = arith.constant 0xFF800000 : f32
    %82 = vector.shape_cast %81 : vector<1x16x16xi1> to vector<1x16x16xi1>
    %83 = vector.broadcast %82 : vector<1x16x16xi1> to vector<8x16x16xi1>
    %84 = vector.broadcast %cst_19 : f32 to vector<8x16x16xf32>
    %85 = arith.select %83, %9, %84 : vector<8x16x16xi1>, vector<8x16x16xf32>
    %cst_20 = arith.constant dense<0xFF800000> : vector<8x16xf32>
    %86 = vector.multi_reduction <maximumf>, %85, %cst_20 [1] : vector<8x16x16xf32> to vector<8x16xf32>
    %87 = arith.cmpi sle, %76, %72 : i32
    %cst_21 = arith.constant 0xFF800000 : f32
    %88 = vector.shape_cast %24 : vector<1x16xi1> to vector<1x16xi1>
    %89 = vector.broadcast %88 : vector<1x16xi1> to vector<8x16xi1>
    %90 = vector.broadcast %cst_21 : f32 to vector<8x16xf32>
    %91 = arith.select %89, %86, %90 : vector<8x16xi1>, vector<8x16xf32>
    %cst_22 = arith.constant dense<0xFF800000> : vector<8xf32>
    %92 = vector.multi_reduction <maximumf>, %91, %cst_22 [1] : vector<8x16xf32> to vector<8xf32>
    %93 = vector.shape_cast %92 : vector<8xf32> to vector<8x1xf32>
    %94 = arith.ori %87, %25 : i1
    %cst_23 = arith.constant 0.000000e+00 : f32
    %95 = vector.broadcast %cst_23 : f32 to vector<8x1xf32>
    %96 = arith.select %94, %95, %93 : vector<8x1xf32>
    %c0_i32_24 = arith.constant 0 : i32
    %97 = vector.broadcast %c0_i32_24 : i32 to vector<1x16xi32>
    %98 = arith.cmpi eq, %2, %97 : vector<1x16xi32>
    %99 = vector.shape_cast %98 : vector<1x16xi1> to vector<1x16xi1>
    %100 = vector.broadcast %99 : vector<1x16xi1> to vector<8x16xi1>
    %101 = vector.shape_cast %96 : vector<8x1xf32> to vector<8x1xf32>
    %102 = vector.broadcast %101 : vector<8x1xf32> to vector<8x16xf32>
    %103 = arith.select %100, %102, %68 : vector<8x16xi1>, vector<8x16xf32>
    %cst_25 = arith.constant 0xFF800000 : f32
    %104 = vector.shape_cast %38 : vector<1x16xi1> to vector<1x16xi1>
    %105 = vector.broadcast %104 : vector<1x16xi1> to vector<8x16xi1>
    %106 = vector.broadcast %cst_25 : f32 to vector<8x16xf32>
    %107 = arith.select %105, %86, %106 : vector<8x16xi1>, vector<8x16xf32>
    %cst_26 = arith.constant dense<0xFF800000> : vector<8xf32>
    %108 = vector.multi_reduction <maximumf>, %107, %cst_26 [1] : vector<8x16xf32> to vector<8xf32>
    %109 = vector.shape_cast %108 : vector<8xf32> to vector<8x1xf32>
    %110 = arith.ori %87, %39 : i1
    %cst_27 = arith.constant 0.000000e+00 : f32
    %111 = vector.broadcast %cst_27 : f32 to vector<8x1xf32>
    %112 = arith.select %110, %111, %109 : vector<8x1xf32>
    %c1_i32_28 = arith.constant 1 : i32
    %113 = vector.broadcast %c1_i32_28 : i32 to vector<1x16xi32>
    %114 = arith.cmpi eq, %2, %113 : vector<1x16xi32>
    %115 = vector.shape_cast %114 : vector<1x16xi1> to vector<1x16xi1>
    %116 = vector.broadcast %115 : vector<1x16xi1> to vector<8x16xi1>
    %117 = vector.shape_cast %112 : vector<8x1xf32> to vector<8x1xf32>
    %118 = vector.broadcast %117 : vector<8x1xf32> to vector<8x16xf32>
    %119 = arith.select %116, %118, %103 : vector<8x16xi1>, vector<8x16xf32>
    %cst_29 = arith.constant 0xFF800000 : f32
    %120 = vector.shape_cast %52 : vector<1x16xi1> to vector<1x16xi1>
    %121 = vector.broadcast %120 : vector<1x16xi1> to vector<8x16xi1>
    %122 = vector.broadcast %cst_29 : f32 to vector<8x16xf32>
    %123 = arith.select %121, %86, %122 : vector<8x16xi1>, vector<8x16xf32>
    %cst_30 = arith.constant dense<0xFF800000> : vector<8xf32>
    %124 = vector.multi_reduction <maximumf>, %123, %cst_30 [1] : vector<8x16xf32> to vector<8xf32>
    %125 = vector.shape_cast %124 : vector<8xf32> to vector<8x1xf32>
    %126 = arith.ori %87, %53 : i1
    %cst_31 = arith.constant 0.000000e+00 : f32
    %127 = vector.broadcast %cst_31 : f32 to vector<8x1xf32>
    %128 = arith.select %126, %127, %125 : vector<8x1xf32>
    %c2_i32_32 = arith.constant 2 : i32
    %129 = vector.broadcast %c2_i32_32 : i32 to vector<1x16xi32>
    %130 = arith.cmpi eq, %2, %129 : vector<1x16xi32>
    %131 = vector.shape_cast %130 : vector<1x16xi1> to vector<1x16xi1>
    %132 = vector.broadcast %131 : vector<1x16xi1> to vector<8x16xi1>
    %133 = vector.shape_cast %128 : vector<8x1xf32> to vector<8x1xf32>
    %134 = vector.broadcast %133 : vector<8x1xf32> to vector<8x16xf32>
    %135 = arith.select %132, %134, %119 : vector<8x16xi1>, vector<8x16xf32>
    %cst_33 = arith.constant 0xFF800000 : f32
    %136 = vector.shape_cast %66 : vector<1x16xi1> to vector<1x16xi1>
    %137 = vector.broadcast %136 : vector<1x16xi1> to vector<8x16xi1>
    %138 = vector.broadcast %cst_33 : f32 to vector<8x16xf32>
    %139 = arith.select %137, %86, %138 : vector<8x16xi1>, vector<8x16xf32>
    %cst_34 = arith.constant dense<0xFF800000> : vector<8xf32>
    %140 = vector.multi_reduction <maximumf>, %139, %cst_34 [1] : vector<8x16xf32> to vector<8xf32>
    %141 = vector.shape_cast %140 : vector<8xf32> to vector<8x1xf32>
    %142 = arith.ori %87, %67 : i1
    %cst_35 = arith.constant 0.000000e+00 : f32
    %143 = vector.broadcast %cst_35 : f32 to vector<8x1xf32>
    %144 = arith.select %142, %143, %141 : vector<8x1xf32>
    %c3_i32_36 = arith.constant 3 : i32
    %145 = vector.broadcast %c3_i32_36 : i32 to vector<1x16xi32>
    %146 = arith.cmpi eq, %2, %145 : vector<1x16xi32>
    %147 = vector.shape_cast %146 : vector<1x16xi1> to vector<1x16xi1>
    %148 = vector.broadcast %147 : vector<1x16xi1> to vector<8x16xi1>
    %149 = vector.shape_cast %144 : vector<8x1xf32> to vector<8x1xf32>
    %150 = vector.broadcast %149 : vector<8x1xf32> to vector<8x16xf32>
    %151 = arith.select %148, %150, %135 : vector<8x16xi1>, vector<8x16xf32>
    %c0_i32_37 = arith.constant 0 : i32
    %152 = arith.addi %11, %c0_i32_37 : i32
    %c1_i32_38 = arith.constant 1 : i32
    %153 = arith.addi %152, %c1_i32_38 : i32
    %154 = arith.index_cast %153 : i32 to index
    %155 = memref.load %arg2[%154] : memref<128xi32, #tpu.memory_space<smem>>
    %c4_i32_39 = arith.constant 4 : i32
    %156 = arith.addi %11, %c4_i32_39 : i32
    %c1_i32_40 = arith.constant 1 : i32
    %157 = arith.addi %156, %c1_i32_40 : i32
    %158 = arith.index_cast %157 : i32 to index
    %159 = memref.load %arg2[%158] : memref<128xi32, #tpu.memory_space<smem>>
    %160 = vector.broadcast %155 : i32 to vector<1x16x16xi32>
    %161 = arith.cmpi sge, %0, %160 : vector<1x16x16xi32>
    %162 = vector.broadcast %159 : i32 to vector<1x16x16xi32>
    %163 = arith.cmpi slt, %0, %162 : vector<1x16x16xi32>
    %164 = arith.andi %161, %163 : vector<1x16x16xi1>
    %cst_41 = arith.constant 0xFF800000 : f32
    %165 = vector.shape_cast %164 : vector<1x16x16xi1> to vector<1x16x16xi1>
    %166 = vector.broadcast %165 : vector<1x16x16xi1> to vector<8x16x16xi1>
    %167 = vector.broadcast %cst_41 : f32 to vector<8x16x16xf32>
    %168 = arith.select %166, %9, %167 : vector<8x16x16xi1>, vector<8x16x16xf32>
    %cst_42 = arith.constant dense<0xFF800000> : vector<8x16xf32>
    %169 = vector.multi_reduction <maximumf>, %168, %cst_42 [1] : vector<8x16x16xf32> to vector<8x16xf32>
    %170 = arith.cmpi sle, %159, %155 : i32
    %cst_43 = arith.constant 0xFF800000 : f32
    %171 = vector.shape_cast %24 : vector<1x16xi1> to vector<1x16xi1>
    %172 = vector.broadcast %171 : vector<1x16xi1> to vector<8x16xi1>
    %173 = vector.broadcast %cst_43 : f32 to vector<8x16xf32>
    %174 = arith.select %172, %169, %173 : vector<8x16xi1>, vector<8x16xf32>
    %cst_44 = arith.constant dense<0xFF800000> : vector<8xf32>
    %175 = vector.multi_reduction <maximumf>, %174, %cst_44 [1] : vector<8x16xf32> to vector<8xf32>
    %176 = vector.shape_cast %175 : vector<8xf32> to vector<8x1xf32>
    %177 = arith.ori %170, %25 : i1
    %cst_45 = arith.constant 0.000000e+00 : f32
    %178 = vector.broadcast %cst_45 : f32 to vector<8x1xf32>
    %179 = arith.select %177, %178, %176 : vector<8x1xf32>
    %c4_i32_46 = arith.constant 4 : i32
    %180 = vector.broadcast %c4_i32_46 : i32 to vector<1x16xi32>
    %181 = arith.cmpi eq, %2, %180 : vector<1x16xi32>
    %182 = vector.shape_cast %181 : vector<1x16xi1> to vector<1x16xi1>
    %183 = vector.broadcast %182 : vector<1x16xi1> to vector<8x16xi1>
    %184 = vector.shape_cast %179 : vector<8x1xf32> to vector<8x1xf32>
    %185 = vector.broadcast %184 : vector<8x1xf32> to vector<8x16xf32>
    %186 = arith.select %183, %185, %151 : vector<8x16xi1>, vector<8x16xf32>
    %cst_47 = arith.constant 0xFF800000 : f32
    %187 = vector.shape_cast %38 : vector<1x16xi1> to vector<1x16xi1>
    %188 = vector.broadcast %187 : vector<1x16xi1> to vector<8x16xi1>
    %189 = vector.broadcast %cst_47 : f32 to vector<8x16xf32>
    %190 = arith.select %188, %169, %189 : vector<8x16xi1>, vector<8x16xf32>
    %cst_48 = arith.constant dense<0xFF800000> : vector<8xf32>
    %191 = vector.multi_reduction <maximumf>, %190, %cst_48 [1] : vector<8x16xf32> to vector<8xf32>
    %192 = vector.shape_cast %191 : vector<8xf32> to vector<8x1xf32>
    %193 = arith.ori %170, %39 : i1
    %cst_49 = arith.constant 0.000000e+00 : f32
    %194 = vector.broadcast %cst_49 : f32 to vector<8x1xf32>
    %195 = arith.select %193, %194, %192 : vector<8x1xf32>
    %c5_i32 = arith.constant 5 : i32
    %196 = vector.broadcast %c5_i32 : i32 to vector<1x16xi32>
    %197 = arith.cmpi eq, %2, %196 : vector<1x16xi32>
    %198 = vector.shape_cast %197 : vector<1x16xi1> to vector<1x16xi1>
    %199 = vector.broadcast %198 : vector<1x16xi1> to vector<8x16xi1>
    %200 = vector.shape_cast %195 : vector<8x1xf32> to vector<8x1xf32>
    %201 = vector.broadcast %200 : vector<8x1xf32> to vector<8x16xf32>
    %202 = arith.select %199, %201, %186 : vector<8x16xi1>, vector<8x16xf32>
    %cst_50 = arith.constant 0xFF800000 : f32
    %203 = vector.shape_cast %52 : vector<1x16xi1> to vector<1x16xi1>
    %204 = vector.broadcast %203 : vector<1x16xi1> to vector<8x16xi1>
    %205 = vector.broadcast %cst_50 : f32 to vector<8x16xf32>
    %206 = arith.select %204, %169, %205 : vector<8x16xi1>, vector<8x16xf32>
    %cst_51 = arith.constant dense<0xFF800000> : vector<8xf32>
    %207 = vector.multi_reduction <maximumf>, %206, %cst_51 [1] : vector<8x16xf32> to vector<8xf32>
    %208 = vector.shape_cast %207 : vector<8xf32> to vector<8x1xf32>
    %209 = arith.ori %170, %53 : i1
    %cst_52 = arith.constant 0.000000e+00 : f32
    %210 = vector.broadcast %cst_52 : f32 to vector<8x1xf32>
    %211 = arith.select %209, %210, %208 : vector<8x1xf32>
    %c6_i32 = arith.constant 6 : i32
    %212 = vector.broadcast %c6_i32 : i32 to vector<1x16xi32>
    %213 = arith.cmpi eq, %2, %212 : vector<1x16xi32>
    %214 = vector.shape_cast %213 : vector<1x16xi1> to vector<1x16xi1>
    %215 = vector.broadcast %214 : vector<1x16xi1> to vector<8x16xi1>
    %216 = vector.shape_cast %211 : vector<8x1xf32> to vector<8x1xf32>
    %217 = vector.broadcast %216 : vector<8x1xf32> to vector<8x16xf32>
    %218 = arith.select %215, %217, %202 : vector<8x16xi1>, vector<8x16xf32>
    %cst_53 = arith.constant 0xFF800000 : f32
    %219 = vector.shape_cast %66 : vector<1x16xi1> to vector<1x16xi1>
    %220 = vector.broadcast %219 : vector<1x16xi1> to vector<8x16xi1>
    %221 = vector.broadcast %cst_53 : f32 to vector<8x16xf32>
    %222 = arith.select %220, %169, %221 : vector<8x16xi1>, vector<8x16xf32>
    %cst_54 = arith.constant dense<0xFF800000> : vector<8xf32>
    %223 = vector.multi_reduction <maximumf>, %222, %cst_54 [1] : vector<8x16xf32> to vector<8xf32>
    %224 = vector.shape_cast %223 : vector<8xf32> to vector<8x1xf32>
    %225 = arith.ori %170, %67 : i1
    %cst_55 = arith.constant 0.000000e+00 : f32
    %226 = vector.broadcast %cst_55 : f32 to vector<8x1xf32>
    %227 = arith.select %225, %226, %224 : vector<8x1xf32>
    %c7_i32 = arith.constant 7 : i32
    %228 = vector.broadcast %c7_i32 : i32 to vector<1x16xi32>
    %229 = arith.cmpi eq, %2, %228 : vector<1x16xi32>
    %230 = vector.shape_cast %229 : vector<1x16xi1> to vector<1x16xi1>
    %231 = vector.broadcast %230 : vector<1x16xi1> to vector<8x16xi1>
    %232 = vector.shape_cast %227 : vector<8x1xf32> to vector<8x1xf32>
    %233 = vector.broadcast %232 : vector<8x1xf32> to vector<8x16xf32>
    %234 = arith.select %231, %233, %218 : vector<8x16xi1>, vector<8x16xf32>
    %c0_i32_56 = arith.constant 0 : i32
    %235 = arith.addi %11, %c0_i32_56 : i32
    %c2_i32_57 = arith.constant 2 : i32
    %236 = arith.addi %235, %c2_i32_57 : i32
    %237 = arith.index_cast %236 : i32 to index
    %238 = memref.load %arg2[%237] : memref<128xi32, #tpu.memory_space<smem>>
    %c4_i32_58 = arith.constant 4 : i32
    %239 = arith.addi %11, %c4_i32_58 : i32
    %c2_i32_59 = arith.constant 2 : i32
    %240 = arith.addi %239, %c2_i32_59 : i32
    %241 = arith.index_cast %240 : i32 to index
    %242 = memref.load %arg2[%241] : memref<128xi32, #tpu.memory_space<smem>>
    %243 = vector.broadcast %238 : i32 to vector<1x16x16xi32>
    %244 = arith.cmpi sge, %0, %243 : vector<1x16x16xi32>
    %245 = vector.broadcast %242 : i32 to vector<1x16x16xi32>
    %246 = arith.cmpi slt, %0, %245 : vector<1x16x16xi32>
    %247 = arith.andi %244, %246 : vector<1x16x16xi1>
    %cst_60 = arith.constant 0xFF800000 : f32
    %248 = vector.shape_cast %247 : vector<1x16x16xi1> to vector<1x16x16xi1>
    %249 = vector.broadcast %248 : vector<1x16x16xi1> to vector<8x16x16xi1>
    %250 = vector.broadcast %cst_60 : f32 to vector<8x16x16xf32>
    %251 = arith.select %249, %9, %250 : vector<8x16x16xi1>, vector<8x16x16xf32>
    %cst_61 = arith.constant dense<0xFF800000> : vector<8x16xf32>
    %252 = vector.multi_reduction <maximumf>, %251, %cst_61 [1] : vector<8x16x16xf32> to vector<8x16xf32>
    %253 = arith.cmpi sle, %242, %238 : i32
    %cst_62 = arith.constant 0xFF800000 : f32
    %254 = vector.shape_cast %24 : vector<1x16xi1> to vector<1x16xi1>
    %255 = vector.broadcast %254 : vector<1x16xi1> to vector<8x16xi1>
    %256 = vector.broadcast %cst_62 : f32 to vector<8x16xf32>
    %257 = arith.select %255, %252, %256 : vector<8x16xi1>, vector<8x16xf32>
    %cst_63 = arith.constant dense<0xFF800000> : vector<8xf32>
    %258 = vector.multi_reduction <maximumf>, %257, %cst_63 [1] : vector<8x16xf32> to vector<8xf32>
    %259 = vector.shape_cast %258 : vector<8xf32> to vector<8x1xf32>
    %260 = arith.ori %253, %25 : i1
    %cst_64 = arith.constant 0.000000e+00 : f32
    %261 = vector.broadcast %cst_64 : f32 to vector<8x1xf32>
    %262 = arith.select %260, %261, %259 : vector<8x1xf32>
    %c8_i32_65 = arith.constant 8 : i32
    %263 = vector.broadcast %c8_i32_65 : i32 to vector<1x16xi32>
    %264 = arith.cmpi eq, %2, %263 : vector<1x16xi32>
    %265 = vector.shape_cast %264 : vector<1x16xi1> to vector<1x16xi1>
    %266 = vector.broadcast %265 : vector<1x16xi1> to vector<8x16xi1>
    %267 = vector.shape_cast %262 : vector<8x1xf32> to vector<8x1xf32>
    %268 = vector.broadcast %267 : vector<8x1xf32> to vector<8x16xf32>
    %269 = arith.select %266, %268, %234 : vector<8x16xi1>, vector<8x16xf32>
    %cst_66 = arith.constant 0xFF800000 : f32
    %270 = vector.shape_cast %38 : vector<1x16xi1> to vector<1x16xi1>
    %271 = vector.broadcast %270 : vector<1x16xi1> to vector<8x16xi1>
    %272 = vector.broadcast %cst_66 : f32 to vector<8x16xf32>
    %273 = arith.select %271, %252, %272 : vector<8x16xi1>, vector<8x16xf32>
    %cst_67 = arith.constant dense<0xFF800000> : vector<8xf32>
    %274 = vector.multi_reduction <maximumf>, %273, %cst_67 [1] : vector<8x16xf32> to vector<8xf32>
    %275 = vector.shape_cast %274 : vector<8xf32> to vector<8x1xf32>
    %276 = arith.ori %253, %39 : i1
    %cst_68 = arith.constant 0.000000e+00 : f32
    %277 = vector.broadcast %cst_68 : f32 to vector<8x1xf32>
    %278 = arith.select %276, %277, %275 : vector<8x1xf32>
    %c9_i32 = arith.constant 9 : i32
    %279 = vector.broadcast %c9_i32 : i32 to vector<1x16xi32>
    %280 = arith.cmpi eq, %2, %279 : vector<1x16xi32>
    %281 = vector.shape_cast %280 : vector<1x16xi1> to vector<1x16xi1>
    %282 = vector.broadcast %281 : vector<1x16xi1> to vector<8x16xi1>
    %283 = vector.shape_cast %278 : vector<8x1xf32> to vector<8x1xf32>
    %284 = vector.broadcast %283 : vector<8x1xf32> to vector<8x16xf32>
    %285 = arith.select %282, %284, %269 : vector<8x16xi1>, vector<8x16xf32>
    %cst_69 = arith.constant 0xFF800000 : f32
    %286 = vector.shape_cast %52 : vector<1x16xi1> to vector<1x16xi1>
    %287 = vector.broadcast %286 : vector<1x16xi1> to vector<8x16xi1>
    %288 = vector.broadcast %cst_69 : f32 to vector<8x16xf32>
    %289 = arith.select %287, %252, %288 : vector<8x16xi1>, vector<8x16xf32>
    %cst_70 = arith.constant dense<0xFF800000> : vector<8xf32>
    %290 = vector.multi_reduction <maximumf>, %289, %cst_70 [1] : vector<8x16xf32> to vector<8xf32>
    %291 = vector.shape_cast %290 : vector<8xf32> to vector<8x1xf32>
    %292 = arith.ori %253, %53 : i1
    %cst_71 = arith.constant 0.000000e+00 : f32
    %293 = vector.broadcast %cst_71 : f32 to vector<8x1xf32>
    %294 = arith.select %292, %293, %291 : vector<8x1xf32>
    %c10_i32 = arith.constant 10 : i32
    %295 = vector.broadcast %c10_i32 : i32 to vector<1x16xi32>
    %296 = arith.cmpi eq, %2, %295 : vector<1x16xi32>
    %297 = vector.shape_cast %296 : vector<1x16xi1> to vector<1x16xi1>
    %298 = vector.broadcast %297 : vector<1x16xi1> to vector<8x16xi1>
    %299 = vector.shape_cast %294 : vector<8x1xf32> to vector<8x1xf32>
    %300 = vector.broadcast %299 : vector<8x1xf32> to vector<8x16xf32>
    %301 = arith.select %298, %300, %285 : vector<8x16xi1>, vector<8x16xf32>
    %cst_72 = arith.constant 0xFF800000 : f32
    %302 = vector.shape_cast %66 : vector<1x16xi1> to vector<1x16xi1>
    %303 = vector.broadcast %302 : vector<1x16xi1> to vector<8x16xi1>
    %304 = vector.broadcast %cst_72 : f32 to vector<8x16xf32>
    %305 = arith.select %303, %252, %304 : vector<8x16xi1>, vector<8x16xf32>
    %cst_73 = arith.constant dense<0xFF800000> : vector<8xf32>
    %306 = vector.multi_reduction <maximumf>, %305, %cst_73 [1] : vector<8x16xf32> to vector<8xf32>
    %307 = vector.shape_cast %306 : vector<8xf32> to vector<8x1xf32>
    %308 = arith.ori %253, %67 : i1
    %cst_74 = arith.constant 0.000000e+00 : f32
    %309 = vector.broadcast %cst_74 : f32 to vector<8x1xf32>
    %310 = arith.select %308, %309, %307 : vector<8x1xf32>
    %c11_i32 = arith.constant 11 : i32
    %311 = vector.broadcast %c11_i32 : i32 to vector<1x16xi32>
    %312 = arith.cmpi eq, %2, %311 : vector<1x16xi32>
    %313 = vector.shape_cast %312 : vector<1x16xi1> to vector<1x16xi1>
    %314 = vector.broadcast %313 : vector<1x16xi1> to vector<8x16xi1>
    %315 = vector.shape_cast %310 : vector<8x1xf32> to vector<8x1xf32>
    %316 = vector.broadcast %315 : vector<8x1xf32> to vector<8x16xf32>
    %317 = arith.select %314, %316, %301 : vector<8x16xi1>, vector<8x16xf32>
    %c0_i32_75 = arith.constant 0 : i32
    %318 = arith.addi %11, %c0_i32_75 : i32
    %c3_i32_76 = arith.constant 3 : i32
    %319 = arith.addi %318, %c3_i32_76 : i32
    %320 = arith.index_cast %319 : i32 to index
    %321 = memref.load %arg2[%320] : memref<128xi32, #tpu.memory_space<smem>>
    %c4_i32_77 = arith.constant 4 : i32
    %322 = arith.addi %11, %c4_i32_77 : i32
    %c3_i32_78 = arith.constant 3 : i32
    %323 = arith.addi %322, %c3_i32_78 : i32
    %324 = arith.index_cast %323 : i32 to index
    %325 = memref.load %arg2[%324] : memref<128xi32, #tpu.memory_space<smem>>
    %326 = vector.broadcast %321 : i32 to vector<1x16x16xi32>
    %327 = arith.cmpi sge, %0, %326 : vector<1x16x16xi32>
    %328 = vector.broadcast %325 : i32 to vector<1x16x16xi32>
    %329 = arith.cmpi slt, %0, %328 : vector<1x16x16xi32>
    %330 = arith.andi %327, %329 : vector<1x16x16xi1>
    %cst_79 = arith.constant 0xFF800000 : f32
    %331 = vector.shape_cast %330 : vector<1x16x16xi1> to vector<1x16x16xi1>
    %332 = vector.broadcast %331 : vector<1x16x16xi1> to vector<8x16x16xi1>
    %333 = vector.broadcast %cst_79 : f32 to vector<8x16x16xf32>
    %334 = arith.select %332, %9, %333 : vector<8x16x16xi1>, vector<8x16x16xf32>
    %cst_80 = arith.constant dense<0xFF800000> : vector<8x16xf32>
    %335 = vector.multi_reduction <maximumf>, %334, %cst_80 [1] : vector<8x16x16xf32> to vector<8x16xf32>
    %336 = arith.cmpi sle, %325, %321 : i32
    %cst_81 = arith.constant 0xFF800000 : f32
    %337 = vector.shape_cast %24 : vector<1x16xi1> to vector<1x16xi1>
    %338 = vector.broadcast %337 : vector<1x16xi1> to vector<8x16xi1>
    %339 = vector.broadcast %cst_81 : f32 to vector<8x16xf32>
    %340 = arith.select %338, %335, %339 : vector<8x16xi1>, vector<8x16xf32>
    %cst_82 = arith.constant dense<0xFF800000> : vector<8xf32>
    %341 = vector.multi_reduction <maximumf>, %340, %cst_82 [1] : vector<8x16xf32> to vector<8xf32>
    %342 = vector.shape_cast %341 : vector<8xf32> to vector<8x1xf32>
    %343 = arith.ori %336, %25 : i1
    %cst_83 = arith.constant 0.000000e+00 : f32
    %344 = vector.broadcast %cst_83 : f32 to vector<8x1xf32>
    %345 = arith.select %343, %344, %342 : vector<8x1xf32>
    %c12_i32_84 = arith.constant 12 : i32
    %346 = vector.broadcast %c12_i32_84 : i32 to vector<1x16xi32>
    %347 = arith.cmpi eq, %2, %346 : vector<1x16xi32>
    %348 = vector.shape_cast %347 : vector<1x16xi1> to vector<1x16xi1>
    %349 = vector.broadcast %348 : vector<1x16xi1> to vector<8x16xi1>
    %350 = vector.shape_cast %345 : vector<8x1xf32> to vector<8x1xf32>
    %351 = vector.broadcast %350 : vector<8x1xf32> to vector<8x16xf32>
    %352 = arith.select %349, %351, %317 : vector<8x16xi1>, vector<8x16xf32>
    %cst_85 = arith.constant 0xFF800000 : f32
    %353 = vector.shape_cast %38 : vector<1x16xi1> to vector<1x16xi1>
    %354 = vector.broadcast %353 : vector<1x16xi1> to vector<8x16xi1>
    %355 = vector.broadcast %cst_85 : f32 to vector<8x16xf32>
    %356 = arith.select %354, %335, %355 : vector<8x16xi1>, vector<8x16xf32>
    %cst_86 = arith.constant dense<0xFF800000> : vector<8xf32>
    %357 = vector.multi_reduction <maximumf>, %356, %cst_86 [1] : vector<8x16xf32> to vector<8xf32>
    %358 = vector.shape_cast %357 : vector<8xf32> to vector<8x1xf32>
    %359 = arith.ori %336, %39 : i1
    %cst_87 = arith.constant 0.000000e+00 : f32
    %360 = vector.broadcast %cst_87 : f32 to vector<8x1xf32>
    %361 = arith.select %359, %360, %358 : vector<8x1xf32>
    %c13_i32 = arith.constant 13 : i32
    %362 = vector.broadcast %c13_i32 : i32 to vector<1x16xi32>
    %363 = arith.cmpi eq, %2, %362 : vector<1x16xi32>
    %364 = vector.shape_cast %363 : vector<1x16xi1> to vector<1x16xi1>
    %365 = vector.broadcast %364 : vector<1x16xi1> to vector<8x16xi1>
    %366 = vector.shape_cast %361 : vector<8x1xf32> to vector<8x1xf32>
    %367 = vector.broadcast %366 : vector<8x1xf32> to vector<8x16xf32>
    %368 = arith.select %365, %367, %352 : vector<8x16xi1>, vector<8x16xf32>
    %cst_88 = arith.constant 0xFF800000 : f32
    %369 = vector.shape_cast %52 : vector<1x16xi1> to vector<1x16xi1>
    %370 = vector.broadcast %369 : vector<1x16xi1> to vector<8x16xi1>
    %371 = vector.broadcast %cst_88 : f32 to vector<8x16xf32>
    %372 = arith.select %370, %335, %371 : vector<8x16xi1>, vector<8x16xf32>
    %cst_89 = arith.constant dense<0xFF800000> : vector<8xf32>
    %373 = vector.multi_reduction <maximumf>, %372, %cst_89 [1] : vector<8x16xf32> to vector<8xf32>
    %374 = vector.shape_cast %373 : vector<8xf32> to vector<8x1xf32>
    %375 = arith.ori %336, %53 : i1
    %cst_90 = arith.constant 0.000000e+00 : f32
    %376 = vector.broadcast %cst_90 : f32 to vector<8x1xf32>
    %377 = arith.select %375, %376, %374 : vector<8x1xf32>
    %c14_i32 = arith.constant 14 : i32
    %378 = vector.broadcast %c14_i32 : i32 to vector<1x16xi32>
    %379 = arith.cmpi eq, %2, %378 : vector<1x16xi32>
    %380 = vector.shape_cast %379 : vector<1x16xi1> to vector<1x16xi1>
    %381 = vector.broadcast %380 : vector<1x16xi1> to vector<8x16xi1>
    %382 = vector.shape_cast %377 : vector<8x1xf32> to vector<8x1xf32>
    %383 = vector.broadcast %382 : vector<8x1xf32> to vector<8x16xf32>
    %384 = arith.select %381, %383, %368 : vector<8x16xi1>, vector<8x16xf32>
    %cst_91 = arith.constant 0xFF800000 : f32
    %385 = vector.shape_cast %66 : vector<1x16xi1> to vector<1x16xi1>
    %386 = vector.broadcast %385 : vector<1x16xi1> to vector<8x16xi1>
    %387 = vector.broadcast %cst_91 : f32 to vector<8x16xf32>
    %388 = arith.select %386, %335, %387 : vector<8x16xi1>, vector<8x16xf32>
    %cst_92 = arith.constant dense<0xFF800000> : vector<8xf32>
    %389 = vector.multi_reduction <maximumf>, %388, %cst_92 [1] : vector<8x16xf32> to vector<8xf32>
    %390 = vector.shape_cast %389 : vector<8xf32> to vector<8x1xf32>
    %391 = arith.ori %336, %67 : i1
    %cst_93 = arith.constant 0.000000e+00 : f32
    %392 = vector.broadcast %cst_93 : f32 to vector<8x1xf32>
    %393 = arith.select %391, %392, %390 : vector<8x1xf32>
    %c15_i32 = arith.constant 15 : i32
    %394 = vector.broadcast %c15_i32 : i32 to vector<1x16xi32>
    %395 = arith.cmpi eq, %2, %394 : vector<1x16xi32>
    %396 = vector.shape_cast %395 : vector<1x16xi1> to vector<1x16xi1>
    %397 = vector.broadcast %396 : vector<1x16xi1> to vector<8x16xi1>
    %398 = vector.shape_cast %393 : vector<8x1xf32> to vector<8x1xf32>
    %399 = vector.broadcast %398 : vector<8x1xf32> to vector<8x16xf32>
    %400 = arith.select %397, %399, %384 : vector<8x16xi1>, vector<8x16xf32>
    %401 = arith.truncf %400 : vector<8x16xf32> to vector<8x16xbf16>
    %c0_94 = arith.constant 0 : index
    %c0_95 = arith.constant 0 : index
    %c0_96 = arith.constant 0 : index
    %402 = vector.load %arg4[%c0_94, %c0_95, %c0_96] : memref<4x8x16xbf16, #tpu.memory_space<vmem>>, vector<1x8x16xbf16>
    %403 = vector.shape_cast %402 : vector<1x8x16xbf16> to vector<8x16xbf16>
    %404 = vector.shape_cast %401 : vector<8x16xbf16> to vector<1x8x16xbf16>
    tpu.vector_store %arg4[%c0_94, %c0_95, %c0_96], %404 {strides = array<i32>} : memref<4x8x16xbf16, #tpu.memory_space<vmem>>, vector<1x8x16xbf16>,
    %c4_i32_97 = arith.constant 4 : i32
    %405 = arith.muli %arg0, %c4_i32_97 : i32
    %c1_i32_98 = arith.constant 1 : i32
    %406 = arith.addi %405, %c1_i32_98 : i32
    %407 = arith.index_cast %406 : i32 to index
    %408 = memref.load %arg1[%407] : memref<8xi32, #tpu.memory_space<smem>>
    %409 = arith.index_cast %408 : i32 to index
    %c0_99 = arith.constant 0 : index
    %c0_100 = arith.constant 0 : index
    %c0_101 = arith.constant 0 : index
    %410 = vector.load %arg3[%409, %c0_99, %c0_100, %c0_101] : memref<2x8x16x16xf32, #tpu.memory_space<vmem>>, vector<1x8x16x16xf32>
    %411 = vector.shape_cast %410 : vector<1x8x16x16xf32> to vector<8x16x16xf32>
    %c4_i32_102 = arith.constant 4 : i32
    %412 = arith.muli %406, %c4_i32_102 : i32
    %c4_i32_103 = arith.constant 4 : i32
    %413 = arith.muli %412, %c4_i32_103 : i32
    %c8_i32_104 = arith.constant 8 : i32
    %414 = arith.addi %413, %c8_i32_104 : i32
    %c0_i32_105 = arith.constant 0 : i32
    %415 = arith.addi %414, %c0_i32_105 : i32
    %416 = arith.index_cast %415 : i32 to index
    %417 = memref.load %arg2[%416] : memref<128xi32, #tpu.memory_space<smem>>
    %c12_i32_106 = arith.constant 12 : i32
    %418 = arith.addi %413, %c12_i32_106 : i32
    %c0_i32_107 = arith.constant 0 : i32
    %419 = arith.addi %418, %c0_i32_107 : i32
    %420 = arith.index_cast %419 : i32 to index
    %421 = memref.load %arg2[%420] : memref<128xi32, #tpu.memory_space<smem>>
    %422 = vector.broadcast %417 : i32 to vector<1x16xi32>
    %423 = arith.cmpi sge, %1, %422 : vector<1x16xi32>
    %424 = vector.broadcast %421 : i32 to vector<1x16xi32>
    %425 = arith.cmpi slt, %1, %424 : vector<1x16xi32>
    %426 = arith.andi %423, %425 : vector<1x16xi1>
    %427 = arith.cmpi sle, %421, %417 : i32
    %c8_i32_108 = arith.constant 8 : i32
    %428 = arith.addi %413, %c8_i32_108 : i32
    %c1_i32_109 = arith.constant 1 : i32
    %429 = arith.addi %428, %c1_i32_109 : i32
    %430 = arith.index_cast %429 : i32 to index
    %431 = memref.load %arg2[%430] : memref<128xi32, #tpu.memory_space<smem>>
    %c12_i32_110 = arith.constant 12 : i32
    %432 = arith.addi %413, %c12_i32_110 : i32
    %c1_i32_111 = arith.constant 1 : i32
    %433 = arith.addi %432, %c1_i32_111 : i32
    %434 = arith.index_cast %433 : i32 to index
    %435 = memref.load %arg2[%434] : memref<128xi32, #tpu.memory_space<smem>>
    %436 = vector.broadcast %431 : i32 to vector<1x16xi32>
    %437 = arith.cmpi sge, %1, %436 : vector<1x16xi32>
    %438 = vector.broadcast %435 : i32 to vector<1x16xi32>
    %439 = arith.cmpi slt, %1, %438 : vector<1x16xi32>
    %440 = arith.andi %437, %439 : vector<1x16xi1>
    %441 = arith.cmpi sle, %435, %431 : i32
    %c8_i32_112 = arith.constant 8 : i32
    %442 = arith.addi %413, %c8_i32_112 : i32
    %c2_i32_113 = arith.constant 2 : i32
    %443 = arith.addi %442, %c2_i32_113 : i32
    %444 = arith.index_cast %443 : i32 to index
    %445 = memref.load %arg2[%444] : memref<128xi32, #tpu.memory_space<smem>>
    %c12_i32_114 = arith.constant 12 : i32
    %446 = arith.addi %413, %c12_i32_114 : i32
    %c2_i32_115 = arith.constant 2 : i32
    %447 = arith.addi %446, %c2_i32_115 : i32
    %448 = arith.index_cast %447 : i32 to index
    %449 = memref.load %arg2[%448] : memref<128xi32, #tpu.memory_space<smem>>
    %450 = vector.broadcast %445 : i32 to vector<1x16xi32>
    %451 = arith.cmpi sge, %1, %450 : vector<1x16xi32>
    %452 = vector.broadcast %449 : i32 to vector<1x16xi32>
    %453 = arith.cmpi slt, %1, %452 : vector<1x16xi32>
    %454 = arith.andi %451, %453 : vector<1x16xi1>
    %455 = arith.cmpi sle, %449, %445 : i32
    %c8_i32_116 = arith.constant 8 : i32
    %456 = arith.addi %413, %c8_i32_116 : i32
    %c3_i32_117 = arith.constant 3 : i32
    %457 = arith.addi %456, %c3_i32_117 : i32
    %458 = arith.index_cast %457 : i32 to index
    %459 = memref.load %arg2[%458] : memref<128xi32, #tpu.memory_space<smem>>
    %c12_i32_118 = arith.constant 12 : i32
    %460 = arith.addi %413, %c12_i32_118 : i32
    %c3_i32_119 = arith.constant 3 : i32
    %461 = arith.addi %460, %c3_i32_119 : i32
    %462 = arith.index_cast %461 : i32 to index
    %463 = memref.load %arg2[%462] : memref<128xi32, #tpu.memory_space<smem>>
    %464 = vector.broadcast %459 : i32 to vector<1x16xi32>
    %465 = arith.cmpi sge, %1, %464 : vector<1x16xi32>
    %466 = vector.broadcast %463 : i32 to vector<1x16xi32>
    %467 = arith.cmpi slt, %1, %466 : vector<1x16xi32>
    %468 = arith.andi %465, %467 : vector<1x16xi1>
    %469 = arith.cmpi sle, %463, %459 : i32
    %cst_120 = arith.constant 0.000000e+00 : f32
    %470 = vector.broadcast %cst_120 : f32 to vector<8x16xf32>
    %c0_i32_121 = arith.constant 0 : i32
    %471 = arith.addi %413, %c0_i32_121 : i32
    %c0_i32_122 = arith.constant 0 : i32
    %472 = arith.addi %471, %c0_i32_122 : i32
    %473 = arith.index_cast %472 : i32 to index
    %474 = memref.load %arg2[%473] : memref<128xi32, #tpu.memory_space<smem>>
    %c4_i32_123 = arith.constant 4 : i32
    %475 = arith.addi %413, %c4_i32_123 : i32
    %c0_i32_124 = arith.constant 0 : i32
    %476 = arith.addi %475, %c0_i32_124 : i32
    %477 = arith.index_cast %476 : i32 to index
    %478 = memref.load %arg2[%477] : memref<128xi32, #tpu.memory_space<smem>>
    %479 = vector.broadcast %474 : i32 to vector<1x16x16xi32>
    %480 = arith.cmpi sge, %0, %479 : vector<1x16x16xi32>
    %481 = vector.broadcast %478 : i32 to vector<1x16x16xi32>
    %482 = arith.cmpi slt, %0, %481 : vector<1x16x16xi32>
    %483 = arith.andi %480, %482 : vector<1x16x16xi1>
    %cst_125 = arith.constant 0xFF800000 : f32
    %484 = vector.shape_cast %483 : vector<1x16x16xi1> to vector<1x16x16xi1>
    %485 = vector.broadcast %484 : vector<1x16x16xi1> to vector<8x16x16xi1>
    %486 = vector.broadcast %cst_125 : f32 to vector<8x16x16xf32>
    %487 = arith.select %485, %411, %486 : vector<8x16x16xi1>, vector<8x16x16xf32>
    %cst_126 = arith.constant dense<0xFF800000> : vector<8x16xf32>
    %488 = vector.multi_reduction <maximumf>, %487, %cst_126 [1] : vector<8x16x16xf32> to vector<8x16xf32>
    %489 = arith.cmpi sle, %478, %474 : i32
    %cst_127 = arith.constant 0xFF800000 : f32
    %490 = vector.shape_cast %426 : vector<1x16xi1> to vector<1x16xi1>
    %491 = vector.broadcast %490 : vector<1x16xi1> to vector<8x16xi1>
    %492 = vector.broadcast %cst_127 : f32 to vector<8x16xf32>
    %493 = arith.select %491, %488, %492 : vector<8x16xi1>, vector<8x16xf32>
    %cst_128 = arith.constant dense<0xFF800000> : vector<8xf32>
    %494 = vector.multi_reduction <maximumf>, %493, %cst_128 [1] : vector<8x16xf32> to vector<8xf32>
    %495 = vector.shape_cast %494 : vector<8xf32> to vector<8x1xf32>
    %496 = arith.ori %489, %427 : i1
    %cst_129 = arith.constant 0.000000e+00 : f32
    %497 = vector.broadcast %cst_129 : f32 to vector<8x1xf32>
    %498 = arith.select %496, %497, %495 : vector<8x1xf32>
    %c0_i32_130 = arith.constant 0 : i32
    %499 = vector.broadcast %c0_i32_130 : i32 to vector<1x16xi32>
    %500 = arith.cmpi eq, %2, %499 : vector<1x16xi32>
    %501 = vector.shape_cast %500 : vector<1x16xi1> to vector<1x16xi1>
    %502 = vector.broadcast %501 : vector<1x16xi1> to vector<8x16xi1>
    %503 = vector.shape_cast %498 : vector<8x1xf32> to vector<8x1xf32>
    %504 = vector.broadcast %503 : vector<8x1xf32> to vector<8x16xf32>
    %505 = arith.select %502, %504, %470 : vector<8x16xi1>, vector<8x16xf32>
    %cst_131 = arith.constant 0xFF800000 : f32
    %506 = vector.shape_cast %440 : vector<1x16xi1> to vector<1x16xi1>
    %507 = vector.broadcast %506 : vector<1x16xi1> to vector<8x16xi1>
    %508 = vector.broadcast %cst_131 : f32 to vector<8x16xf32>
    %509 = arith.select %507, %488, %508 : vector<8x16xi1>, vector<8x16xf32>
    %cst_132 = arith.constant dense<0xFF800000> : vector<8xf32>
    %510 = vector.multi_reduction <maximumf>, %509, %cst_132 [1] : vector<8x16xf32> to vector<8xf32>
    %511 = vector.shape_cast %510 : vector<8xf32> to vector<8x1xf32>
    %512 = arith.ori %489, %441 : i1
    %cst_133 = arith.constant 0.000000e+00 : f32
    %513 = vector.broadcast %cst_133 : f32 to vector<8x1xf32>
    %514 = arith.select %512, %513, %511 : vector<8x1xf32>
    %c1_i32_134 = arith.constant 1 : i32
    %515 = vector.broadcast %c1_i32_134 : i32 to vector<1x16xi32>
    %516 = arith.cmpi eq, %2, %515 : vector<1x16xi32>
    %517 = vector.shape_cast %516 : vector<1x16xi1> to vector<1x16xi1>
    %518 = vector.broadcast %517 : vector<1x16xi1> to vector<8x16xi1>
    %519 = vector.shape_cast %514 : vector<8x1xf32> to vector<8x1xf32>
    %520 = vector.broadcast %519 : vector<8x1xf32> to vector<8x16xf32>
    %521 = arith.select %518, %520, %505 : vector<8x16xi1>, vector<8x16xf32>
    %cst_135 = arith.constant 0xFF800000 : f32
    %522 = vector.shape_cast %454 : vector<1x16xi1> to vector<1x16xi1>
    %523 = vector.broadcast %522 : vector<1x16xi1> to vector<8x16xi1>
    %524 = vector.broadcast %cst_135 : f32 to vector<8x16xf32>
    %525 = arith.select %523, %488, %524 : vector<8x16xi1>, vector<8x16xf32>
    %cst_136 = arith.constant dense<0xFF800000> : vector<8xf32>
    %526 = vector.multi_reduction <maximumf>, %525, %cst_136 [1] : vector<8x16xf32> to vector<8xf32>
    %527 = vector.shape_cast %526 : vector<8xf32> to vector<8x1xf32>
    %528 = arith.ori %489, %455 : i1
    %cst_137 = arith.constant 0.000000e+00 : f32
    %529 = vector.broadcast %cst_137 : f32 to vector<8x1xf32>
    %530 = arith.select %528, %529, %527 : vector<8x1xf32>
    %c2_i32_138 = arith.constant 2 : i32
    %531 = vector.broadcast %c2_i32_138 : i32 to vector<1x16xi32>
    %532 = arith.cmpi eq, %2, %531 : vector<1x16xi32>
    %533 = vector.shape_cast %532 : vector<1x16xi1> to vector<1x16xi1>
    %534 = vector.broadcast %533 : vector<1x16xi1> to vector<8x16xi1>
    %535 = vector.shape_cast %530 : vector<8x1xf32> to vector<8x1xf32>
    %536 = vector.broadcast %535 : vector<8x1xf32> to vector<8x16xf32>
    %537 = arith.select %534, %536, %521 : vector<8x16xi1>, vector<8x16xf32>
    %cst_139 = arith.constant 0xFF800000 : f32
    %538 = vector.shape_cast %468 : vector<1x16xi1> to vector<1x16xi1>
    %539 = vector.broadcast %538 : vector<1x16xi1> to vector<8x16xi1>
    %540 = vector.broadcast %cst_139 : f32 to vector<8x16xf32>
    %541 = arith.select %539, %488, %540 : vector<8x16xi1>, vector<8x16xf32>
    %cst_140 = arith.constant dense<0xFF800000> : vector<8xf32>
    %542 = vector.multi_reduction <maximumf>, %541, %cst_140 [1] : vector<8x16xf32> to vector<8xf32>
    %543 = vector.shape_cast %542 : vector<8xf32> to vector<8x1xf32>
    %544 = arith.ori %489, %469 : i1
    %cst_141 = arith.constant 0.000000e+00 : f32
    %545 = vector.broadcast %cst_141 : f32 to vector<8x1xf32>
    %546 = arith.select %544, %545, %543 : vector<8x1xf32>
    %c3_i32_142 = arith.constant 3 : i32
    %547 = vector.broadcast %c3_i32_142 : i32 to vector<1x16xi32>
    %548 = arith.cmpi eq, %2, %547 : vector<1x16xi32>
    %549 = vector.shape_cast %548 : vector<1x16xi1> to vector<1x16xi1>
    %550 = vector.broadcast %549 : vector<1x16xi1> to vector<8x16xi1>
    %551 = vector.shape_cast %546 : vector<8x1xf32> to vector<8x1xf32>
    %552 = vector.broadcast %551 : vector<8x1xf32> to vector<8x16xf32>
    %553 = arith.select %550, %552, %537 : vector<8x16xi1>, vector<8x16xf32>
    %c0_i32_143 = arith.constant 0 : i32
    %554 = arith.addi %413, %c0_i32_143 : i32
    %c1_i32_144 = arith.constant 1 : i32
    %555 = arith.addi %554, %c1_i32_144 : i32
    %556 = arith.index_cast %555 : i32 to index
    %557 = memref.load %arg2[%556] : memref<128xi32, #tpu.memory_space<smem>>
    %c4_i32_145 = arith.constant 4 : i32
    %558 = arith.addi %413, %c4_i32_145 : i32
    %c1_i32_146 = arith.constant 1 : i32
    %559 = arith.addi %558, %c1_i32_146 : i32
    %560 = arith.index_cast %559 : i32 to index
    %561 = memref.load %arg2[%560] : memref<128xi32, #tpu.memory_space<smem>>
    %562 = vector.broadcast %557 : i32 to vector<1x16x16xi32>
    %563 = arith.cmpi sge, %0, %562 : vector<1x16x16xi32>
    %564 = vector.broadcast %561 : i32 to vector<1x16x16xi32>
    %565 = arith.cmpi slt, %0, %564 : vector<1x16x16xi32>
    %566 = arith.andi %563, %565 : vector<1x16x16xi1>
    %cst_147 = arith.constant 0xFF800000 : f32
    %567 = vector.shape_cast %566 : vector<1x16x16xi1> to vector<1x16x16xi1>
    %568 = vector.broadcast %567 : vector<1x16x16xi1> to vector<8x16x16xi1>
    %569 = vector.broadcast %cst_147 : f32 to vector<8x16x16xf32>
    %570 = arith.select %568, %411, %569 : vector<8x16x16xi1>, vector<8x16x16xf32>
    %cst_148 = arith.constant dense<0xFF800000> : vector<8x16xf32>
    %571 = vector.multi_reduction <maximumf>, %570, %cst_148 [1] : vector<8x16x16xf32> to vector<8x16xf32>
    %572 = arith.cmpi sle, %561, %557 : i32
    %cst_149 = arith.constant 0xFF800000 : f32
    %573 = vector.shape_cast %426 : vector<1x16xi1> to vector<1x16xi1>
    %574 = vector.broadcast %573 : vector<1x16xi1> to vector<8x16xi1>
    %575 = vector.broadcast %cst_149 : f32 to vector<8x16xf32>
    %576 = arith.select %574, %571, %575 : vector<8x16xi1>, vector<8x16xf32>
    %cst_150 = arith.constant dense<0xFF800000> : vector<8xf32>
    %577 = vector.multi_reduction <maximumf>, %576, %cst_150 [1] : vector<8x16xf32> to vector<8xf32>
    %578 = vector.shape_cast %577 : vector<8xf32> to vector<8x1xf32>
    %579 = arith.ori %572, %427 : i1
    %cst_151 = arith.constant 0.000000e+00 : f32
    %580 = vector.broadcast %cst_151 : f32 to vector<8x1xf32>
    %581 = arith.select %579, %580, %578 : vector<8x1xf32>
    %c4_i32_152 = arith.constant 4 : i32
    %582 = vector.broadcast %c4_i32_152 : i32 to vector<1x16xi32>
    %583 = arith.cmpi eq, %2, %582 : vector<1x16xi32>
    %584 = vector.shape_cast %583 : vector<1x16xi1> to vector<1x16xi1>
    %585 = vector.broadcast %584 : vector<1x16xi1> to vector<8x16xi1>
    %586 = vector.shape_cast %581 : vector<8x1xf32> to vector<8x1xf32>
    %587 = vector.broadcast %586 : vector<8x1xf32> to vector<8x16xf32>
    %588 = arith.select %585, %587, %553 : vector<8x16xi1>, vector<8x16xf32>
    %cst_153 = arith.constant 0xFF800000 : f32
    %589 = vector.shape_cast %440 : vector<1x16xi1> to vector<1x16xi1>
    %590 = vector.broadcast %589 : vector<1x16xi1> to vector<8x16xi1>
    %591 = vector.broadcast %cst_153 : f32 to vector<8x16xf32>
    %592 = arith.select %590, %571, %591 : vector<8x16xi1>, vector<8x16xf32>
    %cst_154 = arith.constant dense<0xFF800000> : vector<8xf32>
    %593 = vector.multi_reduction <maximumf>, %592, %cst_154 [1] : vector<8x16xf32> to vector<8xf32>
    %594 = vector.shape_cast %593 : vector<8xf32> to vector<8x1xf32>
    %595 = arith.ori %572, %441 : i1
    %cst_155 = arith.constant 0.000000e+00 : f32
    %596 = vector.broadcast %cst_155 : f32 to vector<8x1xf32>
    %597 = arith.select %595, %596, %594 : vector<8x1xf32>
    %c5_i32_156 = arith.constant 5 : i32
    %598 = vector.broadcast %c5_i32_156 : i32 to vector<1x16xi32>
    %599 = arith.cmpi eq, %2, %598 : vector<1x16xi32>
    %600 = vector.shape_cast %599 : vector<1x16xi1> to vector<1x16xi1>
    %601 = vector.broadcast %600 : vector<1x16xi1> to vector<8x16xi1>
    %602 = vector.shape_cast %597 : vector<8x1xf32> to vector<8x1xf32>
    %603 = vector.broadcast %602 : vector<8x1xf32> to vector<8x16xf32>
    %604 = arith.select %601, %603, %588 : vector<8x16xi1>, vector<8x16xf32>
    %cst_157 = arith.constant 0xFF800000 : f32
    %605 = vector.shape_cast %454 : vector<1x16xi1> to vector<1x16xi1>
    %606 = vector.broadcast %605 : vector<1x16xi1> to vector<8x16xi1>
    %607 = vector.broadcast %cst_157 : f32 to vector<8x16xf32>
    %608 = arith.select %606, %571, %607 : vector<8x16xi1>, vector<8x16xf32>
    %cst_158 = arith.constant dense<0xFF800000> : vector<8xf32>
    %609 = vector.multi_reduction <maximumf>, %608, %cst_158 [1] : vector<8x16xf32> to vector<8xf32>
    %610 = vector.shape_cast %609 : vector<8xf32> to vector<8x1xf32>
    %611 = arith.ori %572, %455 : i1
    %cst_159 = arith.constant 0.000000e+00 : f32
    %612 = vector.broadcast %cst_159 : f32 to vector<8x1xf32>
    %613 = arith.select %611, %612, %610 : vector<8x1xf32>
    %c6_i32_160 = arith.constant 6 : i32
    %614 = vector.broadcast %c6_i32_160 : i32 to vector<1x16xi32>
    %615 = arith.cmpi eq, %2, %614 : vector<1x16xi32>
    %616 = vector.shape_cast %615 : vector<1x16xi1> to vector<1x16xi1>
    %617 = vector.broadcast %616 : vector<1x16xi1> to vector<8x16xi1>
    %618 = vector.shape_cast %613 : vector<8x1xf32> to vector<8x1xf32>
    %619 = vector.broadcast %618 : vector<8x1xf32> to vector<8x16xf32>
    %620 = arith.select %617, %619, %604 : vector<8x16xi1>, vector<8x16xf32>
    %cst_161 = arith.constant 0xFF800000 : f32
    %621 = vector.shape_cast %468 : vector<1x16xi1> to vector<1x16xi1>
    %622 = vector.broadcast %621 : vector<1x16xi1> to vector<8x16xi1>
    %623 = vector.broadcast %cst_161 : f32 to vector<8x16xf32>
    %624 = arith.select %622, %571, %623 : vector<8x16xi1>, vector<8x16xf32>
    %cst_162 = arith.constant dense<0xFF800000> : vector<8xf32>
    %625 = vector.multi_reduction <maximumf>, %624, %cst_162 [1] : vector<8x16xf32> to vector<8xf32>
    %626 = vector.shape_cast %625 : vector<8xf32> to vector<8x1xf32>
    %627 = arith.ori %572, %469 : i1
    %cst_163 = arith.constant 0.000000e+00 : f32
    %628 = vector.broadcast %cst_163 : f32 to vector<8x1xf32>
    %629 = arith.select %627, %628, %626 : vector<8x1xf32>
    %c7_i32_164 = arith.constant 7 : i32
    %630 = vector.broadcast %c7_i32_164 : i32 to vector<1x16xi32>
    %631 = arith.cmpi eq, %2, %630 : vector<1x16xi32>
    %632 = vector.shape_cast %631 : vector<1x16xi1> to vector<1x16xi1>
    %633 = vector.broadcast %632 : vector<1x16xi1> to vector<8x16xi1>
    %634 = vector.shape_cast %629 : vector<8x1xf32> to vector<8x1xf32>
    %635 = vector.broadcast %634 : vector<8x1xf32> to vector<8x16xf32>
    %636 = arith.select %633, %635, %620 : vector<8x16xi1>, vector<8x16xf32>
    %c0_i32_165 = arith.constant 0 : i32
    %637 = arith.addi %413, %c0_i32_165 : i32
    %c2_i32_166 = arith.constant 2 : i32
    %638 = arith.addi %637, %c2_i32_166 : i32
    %639 = arith.index_cast %638 : i32 to index
    %640 = memref.load %arg2[%639] : memref<128xi32, #tpu.memory_space<smem>>
    %c4_i32_167 = arith.constant 4 : i32
    %641 = arith.addi %413, %c4_i32_167 : i32
    %c2_i32_168 = arith.constant 2 : i32
    %642 = arith.addi %641, %c2_i32_168 : i32
    %643 = arith.index_cast %642 : i32 to index
    %644 = memref.load %arg2[%643] : memref<128xi32, #tpu.memory_space<smem>>
    %645 = vector.broadcast %640 : i32 to vector<1x16x16xi32>
    %646 = arith.cmpi sge, %0, %645 : vector<1x16x16xi32>
    %647 = vector.broadcast %644 : i32 to vector<1x16x16xi32>
    %648 = arith.cmpi slt, %0, %647 : vector<1x16x16xi32>
    %649 = arith.andi %646, %648 : vector<1x16x16xi1>
    %cst_169 = arith.constant 0xFF800000 : f32
    %650 = vector.shape_cast %649 : vector<1x16x16xi1> to vector<1x16x16xi1>
    %651 = vector.broadcast %650 : vector<1x16x16xi1> to vector<8x16x16xi1>
    %652 = vector.broadcast %cst_169 : f32 to vector<8x16x16xf32>
    %653 = arith.select %651, %411, %652 : vector<8x16x16xi1>, vector<8x16x16xf32>
    %cst_170 = arith.constant dense<0xFF800000> : vector<8x16xf32>
    %654 = vector.multi_reduction <maximumf>, %653, %cst_170 [1] : vector<8x16x16xf32> to vector<8x16xf32>
    %655 = arith.cmpi sle, %644, %640 : i32
    %cst_171 = arith.constant 0xFF800000 : f32
    %656 = vector.shape_cast %426 : vector<1x16xi1> to vector<1x16xi1>
    %657 = vector.broadcast %656 : vector<1x16xi1> to vector<8x16xi1>
    %658 = vector.broadcast %cst_171 : f32 to vector<8x16xf32>
    %659 = arith.select %657, %654, %658 : vector<8x16xi1>, vector<8x16xf32>
    %cst_172 = arith.constant dense<0xFF800000> : vector<8xf32>
    %660 = vector.multi_reduction <maximumf>, %659, %cst_172 [1] : vector<8x16xf32> to vector<8xf32>
    %661 = vector.shape_cast %660 : vector<8xf32> to vector<8x1xf32>
    %662 = arith.ori %655, %427 : i1
    %cst_173 = arith.constant 0.000000e+00 : f32
    %663 = vector.broadcast %cst_173 : f32 to vector<8x1xf32>
    %664 = arith.select %662, %663, %661 : vector<8x1xf32>
    %c8_i32_174 = arith.constant 8 : i32
    %665 = vector.broadcast %c8_i32_174 : i32 to vector<1x16xi32>
    %666 = arith.cmpi eq, %2, %665 : vector<1x16xi32>
    %667 = vector.shape_cast %666 : vector<1x16xi1> to vector<1x16xi1>
    %668 = vector.broadcast %667 : vector<1x16xi1> to vector<8x16xi1>
    %669 = vector.shape_cast %664 : vector<8x1xf32> to vector<8x1xf32>
    %670 = vector.broadcast %669 : vector<8x1xf32> to vector<8x16xf32>
    %671 = arith.select %668, %670, %636 : vector<8x16xi1>, vector<8x16xf32>
    %cst_175 = arith.constant 0xFF800000 : f32
    %672 = vector.shape_cast %440 : vector<1x16xi1> to vector<1x16xi1>
    %673 = vector.broadcast %672 : vector<1x16xi1> to vector<8x16xi1>
    %674 = vector.broadcast %cst_175 : f32 to vector<8x16xf32>
    %675 = arith.select %673, %654, %674 : vector<8x16xi1>, vector<8x16xf32>
    %cst_176 = arith.constant dense<0xFF800000> : vector<8xf32>
    %676 = vector.multi_reduction <maximumf>, %675, %cst_176 [1] : vector<8x16xf32> to vector<8xf32>
    %677 = vector.shape_cast %676 : vector<8xf32> to vector<8x1xf32>
    %678 = arith.ori %655, %441 : i1
    %cst_177 = arith.constant 0.000000e+00 : f32
    %679 = vector.broadcast %cst_177 : f32 to vector<8x1xf32>
    %680 = arith.select %678, %679, %677 : vector<8x1xf32>
    %c9_i32_178 = arith.constant 9 : i32
    %681 = vector.broadcast %c9_i32_178 : i32 to vector<1x16xi32>
    %682 = arith.cmpi eq, %2, %681 : vector<1x16xi32>
    %683 = vector.shape_cast %682 : vector<1x16xi1> to vector<1x16xi1>
    %684 = vector.broadcast %683 : vector<1x16xi1> to vector<8x16xi1>
    %685 = vector.shape_cast %680 : vector<8x1xf32> to vector<8x1xf32>
    %686 = vector.broadcast %685 : vector<8x1xf32> to vector<8x16xf32>
    %687 = arith.select %684, %686, %671 : vector<8x16xi1>, vector<8x16xf32>
    %cst_179 = arith.constant 0xFF800000 : f32
    %688 = vector.shape_cast %454 : vector<1x16xi1> to vector<1x16xi1>
    %689 = vector.broadcast %688 : vector<1x16xi1> to vector<8x16xi1>
    %690 = vector.broadcast %cst_179 : f32 to vector<8x16xf32>
    %691 = arith.select %689, %654, %690 : vector<8x16xi1>, vector<8x16xf32>
    %cst_180 = arith.constant dense<0xFF800000> : vector<8xf32>
    %692 = vector.multi_reduction <maximumf>, %691, %cst_180 [1] : vector<8x16xf32> to vector<8xf32>
    %693 = vector.shape_cast %692 : vector<8xf32> to vector<8x1xf32>
    %694 = arith.ori %655, %455 : i1
    %cst_181 = arith.constant 0.000000e+00 : f32
    %695 = vector.broadcast %cst_181 : f32 to vector<8x1xf32>
    %696 = arith.select %694, %695, %693 : vector<8x1xf32>
    %c10_i32_182 = arith.constant 10 : i32
    %697 = vector.broadcast %c10_i32_182 : i32 to vector<1x16xi32>
    %698 = arith.cmpi eq, %2, %697 : vector<1x16xi32>
    %699 = vector.shape_cast %698 : vector<1x16xi1> to vector<1x16xi1>
    %700 = vector.broadcast %699 : vector<1x16xi1> to vector<8x16xi1>
    %701 = vector.shape_cast %696 : vector<8x1xf32> to vector<8x1xf32>
    %702 = vector.broadcast %701 : vector<8x1xf32> to vector<8x16xf32>
    %703 = arith.select %700, %702, %687 : vector<8x16xi1>, vector<8x16xf32>
    %cst_183 = arith.constant 0xFF800000 : f32
    %704 = vector.shape_cast %468 : vector<1x16xi1> to vector<1x16xi1>
    %705 = vector.broadcast %704 : vector<1x16xi1> to vector<8x16xi1>
    %706 = vector.broadcast %cst_183 : f32 to vector<8x16xf32>
    %707 = arith.select %705, %654, %706 : vector<8x16xi1>, vector<8x16xf32>
    %cst_184 = arith.constant dense<0xFF800000> : vector<8xf32>
    %708 = vector.multi_reduction <maximumf>, %707, %cst_184 [1] : vector<8x16xf32> to vector<8xf32>
    %709 = vector.shape_cast %708 : vector<8xf32> to vector<8x1xf32>
    %710 = arith.ori %655, %469 : i1
    %cst_185 = arith.constant 0.000000e+00 : f32
    %711 = vector.broadcast %cst_185 : f32 to vector<8x1xf32>
    %712 = arith.select %710, %711, %709 : vector<8x1xf32>
    %c11_i32_186 = arith.constant 11 : i32
    %713 = vector.broadcast %c11_i32_186 : i32 to vector<1x16xi32>
    %714 = arith.cmpi eq, %2, %713 : vector<1x16xi32>
    %715 = vector.shape_cast %714 : vector<1x16xi1> to vector<1x16xi1>
    %716 = vector.broadcast %715 : vector<1x16xi1> to vector<8x16xi1>
    %717 = vector.shape_cast %712 : vector<8x1xf32> to vector<8x1xf32>
    %718 = vector.broadcast %717 : vector<8x1xf32> to vector<8x16xf32>
    %719 = arith.select %716, %718, %703 : vector<8x16xi1>, vector<8x16xf32>
    %c0_i32_187 = arith.constant 0 : i32
    %720 = arith.addi %413, %c0_i32_187 : i32
    %c3_i32_188 = arith.constant 3 : i32
    %721 = arith.addi %720, %c3_i32_188 : i32
    %722 = arith.index_cast %721 : i32 to index
    %723 = memref.load %arg2[%722] : memref<128xi32, #tpu.memory_space<smem>>
    %c4_i32_189 = arith.constant 4 : i32
    %724 = arith.addi %413, %c4_i32_189 : i32
    %c3_i32_190 = arith.constant 3 : i32
    %725 = arith.addi %724, %c3_i32_190 : i32
    %726 = arith.index_cast %725 : i32 to index
    %727 = memref.load %arg2[%726] : memref<128xi32, #tpu.memory_space<smem>>
    %728 = vector.broadcast %723 : i32 to vector<1x16x16xi32>
    %729 = arith.cmpi sge, %0, %728 : vector<1x16x16xi32>
    %730 = vector.broadcast %727 : i32 to vector<1x16x16xi32>
    %731 = arith.cmpi slt, %0, %730 : vector<1x16x16xi32>
    %732 = arith.andi %729, %731 : vector<1x16x16xi1>
    %cst_191 = arith.constant 0xFF800000 : f32
    %733 = vector.shape_cast %732 : vector<1x16x16xi1> to vector<1x16x16xi1>
    %734 = vector.broadcast %733 : vector<1x16x16xi1> to vector<8x16x16xi1>
    %735 = vector.broadcast %cst_191 : f32 to vector<8x16x16xf32>
    %736 = arith.select %734, %411, %735 : vector<8x16x16xi1>, vector<8x16x16xf32>
    %cst_192 = arith.constant dense<0xFF800000> : vector<8x16xf32>
    %737 = vector.multi_reduction <maximumf>, %736, %cst_192 [1] : vector<8x16x16xf32> to vector<8x16xf32>
    %738 = arith.cmpi sle, %727, %723 : i32
    %cst_193 = arith.constant 0xFF800000 : f32
    %739 = vector.shape_cast %426 : vector<1x16xi1> to vector<1x16xi1>
    %740 = vector.broadcast %739 : vector<1x16xi1> to vector<8x16xi1>
    %741 = vector.broadcast %cst_193 : f32 to vector<8x16xf32>
    %742 = arith.select %740, %737, %741 : vector<8x16xi1>, vector<8x16xf32>
    %cst_194 = arith.constant dense<0xFF800000> : vector<8xf32>
    %743 = vector.multi_reduction <maximumf>, %742, %cst_194 [1] : vector<8x16xf32> to vector<8xf32>
    %744 = vector.shape_cast %743 : vector<8xf32> to vector<8x1xf32>
    %745 = arith.ori %738, %427 : i1
    %cst_195 = arith.constant 0.000000e+00 : f32
    %746 = vector.broadcast %cst_195 : f32 to vector<8x1xf32>
    %747 = arith.select %745, %746, %744 : vector<8x1xf32>
    %c12_i32_196 = arith.constant 12 : i32
    %748 = vector.broadcast %c12_i32_196 : i32 to vector<1x16xi32>
    %749 = arith.cmpi eq, %2, %748 : vector<1x16xi32>
    %750 = vector.shape_cast %749 : vector<1x16xi1> to vector<1x16xi1>
    %751 = vector.broadcast %750 : vector<1x16xi1> to vector<8x16xi1>
    %752 = vector.shape_cast %747 : vector<8x1xf32> to vector<8x1xf32>
    %753 = vector.broadcast %752 : vector<8x1xf32> to vector<8x16xf32>
    %754 = arith.select %751, %753, %719 : vector<8x16xi1>, vector<8x16xf32>
    %cst_197 = arith.constant 0xFF800000 : f32
    %755 = vector.shape_cast %440 : vector<1x16xi1> to vector<1x16xi1>
    %756 = vector.broadcast %755 : vector<1x16xi1> to vector<8x16xi1>
    %757 = vector.broadcast %cst_197 : f32 to vector<8x16xf32>
    %758 = arith.select %756, %737, %757 : vector<8x16xi1>, vector<8x16xf32>
    %cst_198 = arith.constant dense<0xFF800000> : vector<8xf32>
    %759 = vector.multi_reduction <maximumf>, %758, %cst_198 [1] : vector<8x16xf32> to vector<8xf32>
    %760 = vector.shape_cast %759 : vector<8xf32> to vector<8x1xf32>
    %761 = arith.ori %738, %441 : i1
    %cst_199 = arith.constant 0.000000e+00 : f32
    %762 = vector.broadcast %cst_199 : f32 to vector<8x1xf32>
    %763 = arith.select %761, %762, %760 : vector<8x1xf32>
    %c13_i32_200 = arith.constant 13 : i32
    %764 = vector.broadcast %c13_i32_200 : i32 to vector<1x16xi32>
    %765 = arith.cmpi eq, %2, %764 : vector<1x16xi32>
    %766 = vector.shape_cast %765 : vector<1x16xi1> to vector<1x16xi1>
    %767 = vector.broadcast %766 : vector<1x16xi1> to vector<8x16xi1>
    %768 = vector.shape_cast %763 : vector<8x1xf32> to vector<8x1xf32>
    %769 = vector.broadcast %768 : vector<8x1xf32> to vector<8x16xf32>
    %770 = arith.select %767, %769, %754 : vector<8x16xi1>, vector<8x16xf32>
    %cst_201 = arith.constant 0xFF800000 : f32
    %771 = vector.shape_cast %454 : vector<1x16xi1> to vector<1x16xi1>
    %772 = vector.broadcast %771 : vector<1x16xi1> to vector<8x16xi1>
    %773 = vector.broadcast %cst_201 : f32 to vector<8x16xf32>
    %774 = arith.select %772, %737, %773 : vector<8x16xi1>, vector<8x16xf32>
    %cst_202 = arith.constant dense<0xFF800000> : vector<8xf32>
    %775 = vector.multi_reduction <maximumf>, %774, %cst_202 [1] : vector<8x16xf32> to vector<8xf32>
    %776 = vector.shape_cast %775 : vector<8xf32> to vector<8x1xf32>
    %777 = arith.ori %738, %455 : i1
    %cst_203 = arith.constant 0.000000e+00 : f32
    %778 = vector.broadcast %cst_203 : f32 to vector<8x1xf32>
    %779 = arith.select %777, %778, %776 : vector<8x1xf32>
    %c14_i32_204 = arith.constant 14 : i32
    %780 = vector.broadcast %c14_i32_204 : i32 to vector<1x16xi32>
    %781 = arith.cmpi eq, %2, %780 : vector<1x16xi32>
    %782 = vector.shape_cast %781 : vector<1x16xi1> to vector<1x16xi1>
    %783 = vector.broadcast %782 : vector<1x16xi1> to vector<8x16xi1>
    %784 = vector.shape_cast %779 : vector<8x1xf32> to vector<8x1xf32>
    %785 = vector.broadcast %784 : vector<8x1xf32> to vector<8x16xf32>
    %786 = arith.select %783, %785, %770 : vector<8x16xi1>, vector<8x16xf32>
    %cst_205 = arith.constant 0xFF800000 : f32
    %787 = vector.shape_cast %468 : vector<1x16xi1> to vector<1x16xi1>
    %788 = vector.broadcast %787 : vector<1x16xi1> to vector<8x16xi1>
    %789 = vector.broadcast %cst_205 : f32 to vector<8x16xf32>
    %790 = arith.select %788, %737, %789 : vector<8x16xi1>, vector<8x16xf32>
    %cst_206 = arith.constant dense<0xFF800000> : vector<8xf32>
    %791 = vector.multi_reduction <maximumf>, %790, %cst_206 [1] : vector<8x16xf32> to vector<8xf32>
    %792 = vector.shape_cast %791 : vector<8xf32> to vector<8x1xf32>
    %793 = arith.ori %738, %469 : i1
    %cst_207 = arith.constant 0.000000e+00 : f32
    %794 = vector.broadcast %cst_207 : f32 to vector<8x1xf32>
    %795 = arith.select %793, %794, %792 : vector<8x1xf32>
    %c15_i32_208 = arith.constant 15 : i32
    %796 = vector.broadcast %c15_i32_208 : i32 to vector<1x16xi32>
    %797 = arith.cmpi eq, %2, %796 : vector<1x16xi32>
    %798 = vector.shape_cast %797 : vector<1x16xi1> to vector<1x16xi1>
    %799 = vector.broadcast %798 : vector<1x16xi1> to vector<8x16xi1>
    %800 = vector.shape_cast %795 : vector<8x1xf32> to vector<8x1xf32>
    %801 = vector.broadcast %800 : vector<8x1xf32> to vector<8x16xf32>
    %802 = arith.select %799, %801, %786 : vector<8x16xi1>, vector<8x16xf32>
    %803 = arith.truncf %802 : vector<8x16xf32> to vector<8x16xbf16>
    %c1 = arith.constant 1 : index
    %c0_209 = arith.constant 0 : index
    %c0_210 = arith.constant 0 : index
    %804 = vector.load %arg4[%c1, %c0_209, %c0_210] : memref<4x8x16xbf16, #tpu.memory_space<vmem>>, vector<1x8x16xbf16>
    %805 = vector.shape_cast %804 : vector<1x8x16xbf16> to vector<8x16xbf16>
    %806 = vector.shape_cast %803 : vector<8x16xbf16> to vector<1x8x16xbf16>
    tpu.vector_store %arg4[%c1, %c0_209, %c0_210], %806 {strides = array<i32>} : memref<4x8x16xbf16, #tpu.memory_space<vmem>>, vector<1x8x16xbf16>,
    %c4_i32_211 = arith.constant 4 : i32
    %807 = arith.muli %arg0, %c4_i32_211 : i32
    %c2_i32_212 = arith.constant 2 : i32
    %808 = arith.addi %807, %c2_i32_212 : i32
    %809 = arith.index_cast %808 : i32 to index
    %810 = memref.load %arg1[%809] : memref<8xi32, #tpu.memory_space<smem>>
    %811 = arith.index_cast %810 : i32 to index
    %c0_213 = arith.constant 0 : index
    %c0_214 = arith.constant 0 : index
    %c0_215 = arith.constant 0 : index
    %812 = vector.load %arg3[%811, %c0_213, %c0_214, %c0_215] : memref<2x8x16x16xf32, #tpu.memory_space<vmem>>, vector<1x8x16x16xf32>
    %813 = vector.shape_cast %812 : vector<1x8x16x16xf32> to vector<8x16x16xf32>
    %c4_i32_216 = arith.constant 4 : i32
    %814 = arith.muli %808, %c4_i32_216 : i32
    %c4_i32_217 = arith.constant 4 : i32
    %815 = arith.muli %814, %c4_i32_217 : i32
    %c8_i32_218 = arith.constant 8 : i32
    %816 = arith.addi %815, %c8_i32_218 : i32
    %c0_i32_219 = arith.constant 0 : i32
    %817 = arith.addi %816, %c0_i32_219 : i32
    %818 = arith.index_cast %817 : i32 to index
    %819 = memref.load %arg2[%818] : memref<128xi32, #tpu.memory_space<smem>>
    %c12_i32_220 = arith.constant 12 : i32
    %820 = arith.addi %815, %c12_i32_220 : i32
    %c0_i32_221 = arith.constant 0 : i32
    %821 = arith.addi %820, %c0_i32_221 : i32
    %822 = arith.index_cast %821 : i32 to index
    %823 = memref.load %arg2[%822] : memref<128xi32, #tpu.memory_space<smem>>
    %824 = vector.broadcast %819 : i32 to vector<1x16xi32>
    %825 = arith.cmpi sge, %1, %824 : vector<1x16xi32>
    %826 = vector.broadcast %823 : i32 to vector<1x16xi32>
    %827 = arith.cmpi slt, %1, %826 : vector<1x16xi32>
    %828 = arith.andi %825, %827 : vector<1x16xi1>
    %829 = arith.cmpi sle, %823, %819 : i32
    %c8_i32_222 = arith.constant 8 : i32
    %830 = arith.addi %815, %c8_i32_222 : i32
    %c1_i32_223 = arith.constant 1 : i32
    %831 = arith.addi %830, %c1_i32_223 : i32
    %832 = arith.index_cast %831 : i32 to index
    %833 = memref.load %arg2[%832] : memref<128xi32, #tpu.memory_space<smem>>
    %c12_i32_224 = arith.constant 12 : i32
    %834 = arith.addi %815, %c12_i32_224 : i32
    %c1_i32_225 = arith.constant 1 : i32
    %835 = arith.addi %834, %c1_i32_225 : i32
    %836 = arith.index_cast %835 : i32 to index
    %837 = memref.load %arg2[%836] : memref<128xi32, #tpu.memory_space<smem>>
    %838 = vector.broadcast %833 : i32 to vector<1x16xi32>
    %839 = arith.cmpi sge, %1, %838 : vector<1x16xi32>
    %840 = vector.broadcast %837 : i32 to vector<1x16xi32>
    %841 = arith.cmpi slt, %1, %840 : vector<1x16xi32>
    %842 = arith.andi %839, %841 : vector<1x16xi1>
    %843 = arith.cmpi sle, %837, %833 : i32
    %c8_i32_226 = arith.constant 8 : i32
    %844 = arith.addi %815, %c8_i32_226 : i32
    %c2_i32_227 = arith.constant 2 : i32
    %845 = arith.addi %844, %c2_i32_227 : i32
    %846 = arith.index_cast %845 : i32 to index
    %847 = memref.load %arg2[%846] : memref<128xi32, #tpu.memory_space<smem>>
    %c12_i32_228 = arith.constant 12 : i32
    %848 = arith.addi %815, %c12_i32_228 : i32
    %c2_i32_229 = arith.constant 2 : i32
    %849 = arith.addi %848, %c2_i32_229 : i32
    %850 = arith.index_cast %849 : i32 to index
    %851 = memref.load %arg2[%850] : memref<128xi32, #tpu.memory_space<smem>>
    %852 = vector.broadcast %847 : i32 to vector<1x16xi32>
    %853 = arith.cmpi sge, %1, %852 : vector<1x16xi32>
    %854 = vector.broadcast %851 : i32 to vector<1x16xi32>
    %855 = arith.cmpi slt, %1, %854 : vector<1x16xi32>
    %856 = arith.andi %853, %855 : vector<1x16xi1>
    %857 = arith.cmpi sle, %851, %847 : i32
    %c8_i32_230 = arith.constant 8 : i32
    %858 = arith.addi %815, %c8_i32_230 : i32
    %c3_i32_231 = arith.constant 3 : i32
    %859 = arith.addi %858, %c3_i32_231 : i32
    %860 = arith.index_cast %859 : i32 to index
    %861 = memref.load %arg2[%860] : memref<128xi32, #tpu.memory_space<smem>>
    %c12_i32_232 = arith.constant 12 : i32
    %862 = arith.addi %815, %c12_i32_232 : i32
    %c3_i32_233 = arith.constant 3 : i32
    %863 = arith.addi %862, %c3_i32_233 : i32
    %864 = arith.index_cast %863 : i32 to index
    %865 = memref.load %arg2[%864] : memref<128xi32, #tpu.memory_space<smem>>
    %866 = vector.broadcast %861 : i32 to vector<1x16xi32>
    %867 = arith.cmpi sge, %1, %866 : vector<1x16xi32>
    %868 = vector.broadcast %865 : i32 to vector<1x16xi32>
    %869 = arith.cmpi slt, %1, %868 : vector<1x16xi32>
    %870 = arith.andi %867, %869 : vector<1x16xi1>
    %871 = arith.cmpi sle, %865, %861 : i32
    %cst_234 = arith.constant 0.000000e+00 : f32
    %872 = vector.broadcast %cst_234 : f32 to vector<8x16xf32>
    %c0_i32_235 = arith.constant 0 : i32
    %873 = arith.addi %815, %c0_i32_235 : i32
    %c0_i32_236 = arith.constant 0 : i32
    %874 = arith.addi %873, %c0_i32_236 : i32
    %875 = arith.index_cast %874 : i32 to index
    %876 = memref.load %arg2[%875] : memref<128xi32, #tpu.memory_space<smem>>
    %c4_i32_237 = arith.constant 4 : i32
    %877 = arith.addi %815, %c4_i32_237 : i32
    %c0_i32_238 = arith.constant 0 : i32
    %878 = arith.addi %877, %c0_i32_238 : i32
    %879 = arith.index_cast %878 : i32 to index
    %880 = memref.load %arg2[%879] : memref<128xi32, #tpu.memory_space<smem>>
    %881 = vector.broadcast %876 : i32 to vector<1x16x16xi32>
    %882 = arith.cmpi sge, %0, %881 : vector<1x16x16xi32>
    %883 = vector.broadcast %880 : i32 to vector<1x16x16xi32>
    %884 = arith.cmpi slt, %0, %883 : vector<1x16x16xi32>
    %885 = arith.andi %882, %884 : vector<1x16x16xi1>
    %cst_239 = arith.constant 0xFF800000 : f32
    %886 = vector.shape_cast %885 : vector<1x16x16xi1> to vector<1x16x16xi1>
    %887 = vector.broadcast %886 : vector<1x16x16xi1> to vector<8x16x16xi1>
    %888 = vector.broadcast %cst_239 : f32 to vector<8x16x16xf32>
    %889 = arith.select %887, %813, %888 : vector<8x16x16xi1>, vector<8x16x16xf32>
    %cst_240 = arith.constant dense<0xFF800000> : vector<8x16xf32>
    %890 = vector.multi_reduction <maximumf>, %889, %cst_240 [1] : vector<8x16x16xf32> to vector<8x16xf32>
    %891 = arith.cmpi sle, %880, %876 : i32
    %cst_241 = arith.constant 0xFF800000 : f32
    %892 = vector.shape_cast %828 : vector<1x16xi1> to vector<1x16xi1>
    %893 = vector.broadcast %892 : vector<1x16xi1> to vector<8x16xi1>
    %894 = vector.broadcast %cst_241 : f32 to vector<8x16xf32>
    %895 = arith.select %893, %890, %894 : vector<8x16xi1>, vector<8x16xf32>
    %cst_242 = arith.constant dense<0xFF800000> : vector<8xf32>
    %896 = vector.multi_reduction <maximumf>, %895, %cst_242 [1] : vector<8x16xf32> to vector<8xf32>
    %897 = vector.shape_cast %896 : vector<8xf32> to vector<8x1xf32>
    %898 = arith.ori %891, %829 : i1
    %cst_243 = arith.constant 0.000000e+00 : f32
    %899 = vector.broadcast %cst_243 : f32 to vector<8x1xf32>
    %900 = arith.select %898, %899, %897 : vector<8x1xf32>
    %c0_i32_244 = arith.constant 0 : i32
    %901 = vector.broadcast %c0_i32_244 : i32 to vector<1x16xi32>
    %902 = arith.cmpi eq, %2, %901 : vector<1x16xi32>
    %903 = vector.shape_cast %902 : vector<1x16xi1> to vector<1x16xi1>
    %904 = vector.broadcast %903 : vector<1x16xi1> to vector<8x16xi1>
    %905 = vector.shape_cast %900 : vector<8x1xf32> to vector<8x1xf32>
    %906 = vector.broadcast %905 : vector<8x1xf32> to vector<8x16xf32>
    %907 = arith.select %904, %906, %872 : vector<8x16xi1>, vector<8x16xf32>
    %cst_245 = arith.constant 0xFF800000 : f32
    %908 = vector.shape_cast %842 : vector<1x16xi1> to vector<1x16xi1>
    %909 = vector.broadcast %908 : vector<1x16xi1> to vector<8x16xi1>
    %910 = vector.broadcast %cst_245 : f32 to vector<8x16xf32>
    %911 = arith.select %909, %890, %910 : vector<8x16xi1>, vector<8x16xf32>
    %cst_246 = arith.constant dense<0xFF800000> : vector<8xf32>
    %912 = vector.multi_reduction <maximumf>, %911, %cst_246 [1] : vector<8x16xf32> to vector<8xf32>
    %913 = vector.shape_cast %912 : vector<8xf32> to vector<8x1xf32>
    %914 = arith.ori %891, %843 : i1
    %cst_247 = arith.constant 0.000000e+00 : f32
    %915 = vector.broadcast %cst_247 : f32 to vector<8x1xf32>
    %916 = arith.select %914, %915, %913 : vector<8x1xf32>
    %c1_i32_248 = arith.constant 1 : i32
    %917 = vector.broadcast %c1_i32_248 : i32 to vector<1x16xi32>
    %918 = arith.cmpi eq, %2, %917 : vector<1x16xi32>
    %919 = vector.shape_cast %918 : vector<1x16xi1> to vector<1x16xi1>
    %920 = vector.broadcast %919 : vector<1x16xi1> to vector<8x16xi1>
    %921 = vector.shape_cast %916 : vector<8x1xf32> to vector<8x1xf32>
    %922 = vector.broadcast %921 : vector<8x1xf32> to vector<8x16xf32>
    %923 = arith.select %920, %922, %907 : vector<8x16xi1>, vector<8x16xf32>
    %cst_249 = arith.constant 0xFF800000 : f32
    %924 = vector.shape_cast %856 : vector<1x16xi1> to vector<1x16xi1>
    %925 = vector.broadcast %924 : vector<1x16xi1> to vector<8x16xi1>
    %926 = vector.broadcast %cst_249 : f32 to vector<8x16xf32>
    %927 = arith.select %925, %890, %926 : vector<8x16xi1>, vector<8x16xf32>
    %cst_250 = arith.constant dense<0xFF800000> : vector<8xf32>
    %928 = vector.multi_reduction <maximumf>, %927, %cst_250 [1] : vector<8x16xf32> to vector<8xf32>
    %929 = vector.shape_cast %928 : vector<8xf32> to vector<8x1xf32>
    %930 = arith.ori %891, %857 : i1
    %cst_251 = arith.constant 0.000000e+00 : f32
    %931 = vector.broadcast %cst_251 : f32 to vector<8x1xf32>
    %932 = arith.select %930, %931, %929 : vector<8x1xf32>
    %c2_i32_252 = arith.constant 2 : i32
    %933 = vector.broadcast %c2_i32_252 : i32 to vector<1x16xi32>
    %934 = arith.cmpi eq, %2, %933 : vector<1x16xi32>
    %935 = vector.shape_cast %934 : vector<1x16xi1> to vector<1x16xi1>
    %936 = vector.broadcast %935 : vector<1x16xi1> to vector<8x16xi1>
    %937 = vector.shape_cast %932 : vector<8x1xf32> to vector<8x1xf32>
    %938 = vector.broadcast %937 : vector<8x1xf32> to vector<8x16xf32>
    %939 = arith.select %936, %938, %923 : vector<8x16xi1>, vector<8x16xf32>
    %cst_253 = arith.constant 0xFF800000 : f32
    %940 = vector.shape_cast %870 : vector<1x16xi1> to vector<1x16xi1>
    %941 = vector.broadcast %940 : vector<1x16xi1> to vector<8x16xi1>
    %942 = vector.broadcast %cst_253 : f32 to vector<8x16xf32>
    %943 = arith.select %941, %890, %942 : vector<8x16xi1>, vector<8x16xf32>
    %cst_254 = arith.constant dense<0xFF800000> : vector<8xf32>
    %944 = vector.multi_reduction <maximumf>, %943, %cst_254 [1] : vector<8x16xf32> to vector<8xf32>
    %945 = vector.shape_cast %944 : vector<8xf32> to vector<8x1xf32>
    %946 = arith.ori %891, %871 : i1
    %cst_255 = arith.constant 0.000000e+00 : f32
    %947 = vector.broadcast %cst_255 : f32 to vector<8x1xf32>
    %948 = arith.select %946, %947, %945 : vector<8x1xf32>
    %c3_i32_256 = arith.constant 3 : i32
    %949 = vector.broadcast %c3_i32_256 : i32 to vector<1x16xi32>
    %950 = arith.cmpi eq, %2, %949 : vector<1x16xi32>
    %951 = vector.shape_cast %950 : vector<1x16xi1> to vector<1x16xi1>
    %952 = vector.broadcast %951 : vector<1x16xi1> to vector<8x16xi1>
    %953 = vector.shape_cast %948 : vector<8x1xf32> to vector<8x1xf32>
    %954 = vector.broadcast %953 : vector<8x1xf32> to vector<8x16xf32>
    %955 = arith.select %952, %954, %939 : vector<8x16xi1>, vector<8x16xf32>
    %c0_i32_257 = arith.constant 0 : i32
    %956 = arith.addi %815, %c0_i32_257 : i32
    %c1_i32_258 = arith.constant 1 : i32
    %957 = arith.addi %956, %c1_i32_258 : i32
    %958 = arith.index_cast %957 : i32 to index
    %959 = memref.load %arg2[%958] : memref<128xi32, #tpu.memory_space<smem>>
    %c4_i32_259 = arith.constant 4 : i32
    %960 = arith.addi %815, %c4_i32_259 : i32
    %c1_i32_260 = arith.constant 1 : i32
    %961 = arith.addi %960, %c1_i32_260 : i32
    %962 = arith.index_cast %961 : i32 to index
    %963 = memref.load %arg2[%962] : memref<128xi32, #tpu.memory_space<smem>>
    %964 = vector.broadcast %959 : i32 to vector<1x16x16xi32>
    %965 = arith.cmpi sge, %0, %964 : vector<1x16x16xi32>
    %966 = vector.broadcast %963 : i32 to vector<1x16x16xi32>
    %967 = arith.cmpi slt, %0, %966 : vector<1x16x16xi32>
    %968 = arith.andi %965, %967 : vector<1x16x16xi1>
    %cst_261 = arith.constant 0xFF800000 : f32
    %969 = vector.shape_cast %968 : vector<1x16x16xi1> to vector<1x16x16xi1>
    %970 = vector.broadcast %969 : vector<1x16x16xi1> to vector<8x16x16xi1>
    %971 = vector.broadcast %cst_261 : f32 to vector<8x16x16xf32>
    %972 = arith.select %970, %813, %971 : vector<8x16x16xi1>, vector<8x16x16xf32>
    %cst_262 = arith.constant dense<0xFF800000> : vector<8x16xf32>
    %973 = vector.multi_reduction <maximumf>, %972, %cst_262 [1] : vector<8x16x16xf32> to vector<8x16xf32>
    %974 = arith.cmpi sle, %963, %959 : i32
    %cst_263 = arith.constant 0xFF800000 : f32
    %975 = vector.shape_cast %828 : vector<1x16xi1> to vector<1x16xi1>
    %976 = vector.broadcast %975 : vector<1x16xi1> to vector<8x16xi1>
    %977 = vector.broadcast %cst_263 : f32 to vector<8x16xf32>
    %978 = arith.select %976, %973, %977 : vector<8x16xi1>, vector<8x16xf32>
    %cst_264 = arith.constant dense<0xFF800000> : vector<8xf32>
    %979 = vector.multi_reduction <maximumf>, %978, %cst_264 [1] : vector<8x16xf32> to vector<8xf32>
    %980 = vector.shape_cast %979 : vector<8xf32> to vector<8x1xf32>
    %981 = arith.ori %974, %829 : i1
    %cst_265 = arith.constant 0.000000e+00 : f32
    %982 = vector.broadcast %cst_265 : f32 to vector<8x1xf32>
    %983 = arith.select %981, %982, %980 : vector<8x1xf32>
    %c4_i32_266 = arith.constant 4 : i32
    %984 = vector.broadcast %c4_i32_266 : i32 to vector<1x16xi32>
    %985 = arith.cmpi eq, %2, %984 : vector<1x16xi32>
    %986 = vector.shape_cast %985 : vector<1x16xi1> to vector<1x16xi1>
    %987 = vector.broadcast %986 : vector<1x16xi1> to vector<8x16xi1>
    %988 = vector.shape_cast %983 : vector<8x1xf32> to vector<8x1xf32>
    %989 = vector.broadcast %988 : vector<8x1xf32> to vector<8x16xf32>
    %990 = arith.select %987, %989, %955 : vector<8x16xi1>, vector<8x16xf32>
    %cst_267 = arith.constant 0xFF800000 : f32
    %991 = vector.shape_cast %842 : vector<1x16xi1> to vector<1x16xi1>
    %992 = vector.broadcast %991 : vector<1x16xi1> to vector<8x16xi1>
    %993 = vector.broadcast %cst_267 : f32 to vector<8x16xf32>
    %994 = arith.select %992, %973, %993 : vector<8x16xi1>, vector<8x16xf32>
    %cst_268 = arith.constant dense<0xFF800000> : vector<8xf32>
    %995 = vector.multi_reduction <maximumf>, %994, %cst_268 [1] : vector<8x16xf32> to vector<8xf32>
    %996 = vector.shape_cast %995 : vector<8xf32> to vector<8x1xf32>
    %997 = arith.ori %974, %843 : i1
    %cst_269 = arith.constant 0.000000e+00 : f32
    %998 = vector.broadcast %cst_269 : f32 to vector<8x1xf32>
    %999 = arith.select %997, %998, %996 : vector<8x1xf32>
    %c5_i32_270 = arith.constant 5 : i32
    %1000 = vector.broadcast %c5_i32_270 : i32 to vector<1x16xi32>
    %1001 = arith.cmpi eq, %2, %1000 : vector<1x16xi32>
    %1002 = vector.shape_cast %1001 : vector<1x16xi1> to vector<1x16xi1>
    %1003 = vector.broadcast %1002 : vector<1x16xi1> to vector<8x16xi1>
    %1004 = vector.shape_cast %999 : vector<8x1xf32> to vector<8x1xf32>
    %1005 = vector.broadcast %1004 : vector<8x1xf32> to vector<8x16xf32>
    %1006 = arith.select %1003, %1005, %990 : vector<8x16xi1>, vector<8x16xf32>
    %cst_271 = arith.constant 0xFF800000 : f32
    %1007 = vector.shape_cast %856 : vector<1x16xi1> to vector<1x16xi1>
    %1008 = vector.broadcast %1007 : vector<1x16xi1> to vector<8x16xi1>
    %1009 = vector.broadcast %cst_271 : f32 to vector<8x16xf32>
    %1010 = arith.select %1008, %973, %1009 : vector<8x16xi1>, vector<8x16xf32>
    %cst_272 = arith.constant dense<0xFF800000> : vector<8xf32>
    %1011 = vector.multi_reduction <maximumf>, %1010, %cst_272 [1] : vector<8x16xf32> to vector<8xf32>
    %1012 = vector.shape_cast %1011 : vector<8xf32> to vector<8x1xf32>
    %1013 = arith.ori %974, %857 : i1
    %cst_273 = arith.constant 0.000000e+00 : f32
    %1014 = vector.broadcast %cst_273 : f32 to vector<8x1xf32>
    %1015 = arith.select %1013, %1014, %1012 : vector<8x1xf32>
    %c6_i32_274 = arith.constant 6 : i32
    %1016 = vector.broadcast %c6_i32_274 : i32 to vector<1x16xi32>
    %1017 = arith.cmpi eq, %2, %1016 : vector<1x16xi32>
    %1018 = vector.shape_cast %1017 : vector<1x16xi1> to vector<1x16xi1>
    %1019 = vector.broadcast %1018 : vector<1x16xi1> to vector<8x16xi1>
    %1020 = vector.shape_cast %1015 : vector<8x1xf32> to vector<8x1xf32>
    %1021 = vector.broadcast %1020 : vector<8x1xf32> to vector<8x16xf32>
    %1022 = arith.select %1019, %1021, %1006 : vector<8x16xi1>, vector<8x16xf32>
    %cst_275 = arith.constant 0xFF800000 : f32
    %1023 = vector.shape_cast %870 : vector<1x16xi1> to vector<1x16xi1>
    %1024 = vector.broadcast %1023 : vector<1x16xi1> to vector<8x16xi1>
    %1025 = vector.broadcast %cst_275 : f32 to vector<8x16xf32>
    %1026 = arith.select %1024, %973, %1025 : vector<8x16xi1>, vector<8x16xf32>
    %cst_276 = arith.constant dense<0xFF800000> : vector<8xf32>
    %1027 = vector.multi_reduction <maximumf>, %1026, %cst_276 [1] : vector<8x16xf32> to vector<8xf32>
    %1028 = vector.shape_cast %1027 : vector<8xf32> to vector<8x1xf32>
    %1029 = arith.ori %974, %871 : i1
    %cst_277 = arith.constant 0.000000e+00 : f32
    %1030 = vector.broadcast %cst_277 : f32 to vector<8x1xf32>
    %1031 = arith.select %1029, %1030, %1028 : vector<8x1xf32>
    %c7_i32_278 = arith.constant 7 : i32
    %1032 = vector.broadcast %c7_i32_278 : i32 to vector<1x16xi32>
    %1033 = arith.cmpi eq, %2, %1032 : vector<1x16xi32>
    %1034 = vector.shape_cast %1033 : vector<1x16xi1> to vector<1x16xi1>
    %1035 = vector.broadcast %1034 : vector<1x16xi1> to vector<8x16xi1>
    %1036 = vector.shape_cast %1031 : vector<8x1xf32> to vector<8x1xf32>
    %1037 = vector.broadcast %1036 : vector<8x1xf32> to vector<8x16xf32>
    %1038 = arith.select %1035, %1037, %1022 : vector<8x16xi1>, vector<8x16xf32>
    %c0_i32_279 = arith.constant 0 : i32
    %1039 = arith.addi %815, %c0_i32_279 : i32
    %c2_i32_280 = arith.constant 2 : i32
    %1040 = arith.addi %1039, %c2_i32_280 : i32
    %1041 = arith.index_cast %1040 : i32 to index
    %1042 = memref.load %arg2[%1041] : memref<128xi32, #tpu.memory_space<smem>>
    %c4_i32_281 = arith.constant 4 : i32
    %1043 = arith.addi %815, %c4_i32_281 : i32
    %c2_i32_282 = arith.constant 2 : i32
    %1044 = arith.addi %1043, %c2_i32_282 : i32
    %1045 = arith.index_cast %1044 : i32 to index
    %1046 = memref.load %arg2[%1045] : memref<128xi32, #tpu.memory_space<smem>>
    %1047 = vector.broadcast %1042 : i32 to vector<1x16x16xi32>
    %1048 = arith.cmpi sge, %0, %1047 : vector<1x16x16xi32>
    %1049 = vector.broadcast %1046 : i32 to vector<1x16x16xi32>
    %1050 = arith.cmpi slt, %0, %1049 : vector<1x16x16xi32>
    %1051 = arith.andi %1048, %1050 : vector<1x16x16xi1>
    %cst_283 = arith.constant 0xFF800000 : f32
    %1052 = vector.shape_cast %1051 : vector<1x16x16xi1> to vector<1x16x16xi1>
    %1053 = vector.broadcast %1052 : vector<1x16x16xi1> to vector<8x16x16xi1>
    %1054 = vector.broadcast %cst_283 : f32 to vector<8x16x16xf32>
    %1055 = arith.select %1053, %813, %1054 : vector<8x16x16xi1>, vector<8x16x16xf32>
    %cst_284 = arith.constant dense<0xFF800000> : vector<8x16xf32>
    %1056 = vector.multi_reduction <maximumf>, %1055, %cst_284 [1] : vector<8x16x16xf32> to vector<8x16xf32>
    %1057 = arith.cmpi sle, %1046, %1042 : i32
    %cst_285 = arith.constant 0xFF800000 : f32
    %1058 = vector.shape_cast %828 : vector<1x16xi1> to vector<1x16xi1>
    %1059 = vector.broadcast %1058 : vector<1x16xi1> to vector<8x16xi1>
    %1060 = vector.broadcast %cst_285 : f32 to vector<8x16xf32>
    %1061 = arith.select %1059, %1056, %1060 : vector<8x16xi1>, vector<8x16xf32>
    %cst_286 = arith.constant dense<0xFF800000> : vector<8xf32>
    %1062 = vector.multi_reduction <maximumf>, %1061, %cst_286 [1] : vector<8x16xf32> to vector<8xf32>
    %1063 = vector.shape_cast %1062 : vector<8xf32> to vector<8x1xf32>
    %1064 = arith.ori %1057, %829 : i1
    %cst_287 = arith.constant 0.000000e+00 : f32
    %1065 = vector.broadcast %cst_287 : f32 to vector<8x1xf32>
    %1066 = arith.select %1064, %1065, %1063 : vector<8x1xf32>
    %c8_i32_288 = arith.constant 8 : i32
    %1067 = vector.broadcast %c8_i32_288 : i32 to vector<1x16xi32>
    %1068 = arith.cmpi eq, %2, %1067 : vector<1x16xi32>
    %1069 = vector.shape_cast %1068 : vector<1x16xi1> to vector<1x16xi1>
    %1070 = vector.broadcast %1069 : vector<1x16xi1> to vector<8x16xi1>
    %1071 = vector.shape_cast %1066 : vector<8x1xf32> to vector<8x1xf32>
    %1072 = vector.broadcast %1071 : vector<8x1xf32> to vector<8x16xf32>
    %1073 = arith.select %1070, %1072, %1038 : vector<8x16xi1>, vector<8x16xf32>
    %cst_289 = arith.constant 0xFF800000 : f32
    %1074 = vector.shape_cast %842 : vector<1x16xi1> to vector<1x16xi1>
    %1075 = vector.broadcast %1074 : vector<1x16xi1> to vector<8x16xi1>
    %1076 = vector.broadcast %cst_289 : f32 to vector<8x16xf32>
    %1077 = arith.select %1075, %1056, %1076 : vector<8x16xi1>, vector<8x16xf32>
    %cst_290 = arith.constant dense<0xFF800000> : vector<8xf32>
    %1078 = vector.multi_reduction <maximumf>, %1077, %cst_290 [1] : vector<8x16xf32> to vector<8xf32>
    %1079 = vector.shape_cast %1078 : vector<8xf32> to vector<8x1xf32>
    %1080 = arith.ori %1057, %843 : i1
    %cst_291 = arith.constant 0.000000e+00 : f32
    %1081 = vector.broadcast %cst_291 : f32 to vector<8x1xf32>
    %1082 = arith.select %1080, %1081, %1079 : vector<8x1xf32>
    %c9_i32_292 = arith.constant 9 : i32
    %1083 = vector.broadcast %c9_i32_292 : i32 to vector<1x16xi32>
    %1084 = arith.cmpi eq, %2, %1083 : vector<1x16xi32>
    %1085 = vector.shape_cast %1084 : vector<1x16xi1> to vector<1x16xi1>
    %1086 = vector.broadcast %1085 : vector<1x16xi1> to vector<8x16xi1>
    %1087 = vector.shape_cast %1082 : vector<8x1xf32> to vector<8x1xf32>
    %1088 = vector.broadcast %1087 : vector<8x1xf32> to vector<8x16xf32>
    %1089 = arith.select %1086, %1088, %1073 : vector<8x16xi1>, vector<8x16xf32>
    %cst_293 = arith.constant 0xFF800000 : f32
    %1090 = vector.shape_cast %856 : vector<1x16xi1> to vector<1x16xi1>
    %1091 = vector.broadcast %1090 : vector<1x16xi1> to vector<8x16xi1>
    %1092 = vector.broadcast %cst_293 : f32 to vector<8x16xf32>
    %1093 = arith.select %1091, %1056, %1092 : vector<8x16xi1>, vector<8x16xf32>
    %cst_294 = arith.constant dense<0xFF800000> : vector<8xf32>
    %1094 = vector.multi_reduction <maximumf>, %1093, %cst_294 [1] : vector<8x16xf32> to vector<8xf32>
    %1095 = vector.shape_cast %1094 : vector<8xf32> to vector<8x1xf32>
    %1096 = arith.ori %1057, %857 : i1
    %cst_295 = arith.constant 0.000000e+00 : f32
    %1097 = vector.broadcast %cst_295 : f32 to vector<8x1xf32>
    %1098 = arith.select %1096, %1097, %1095 : vector<8x1xf32>
    %c10_i32_296 = arith.constant 10 : i32
    %1099 = vector.broadcast %c10_i32_296 : i32 to vector<1x16xi32>
    %1100 = arith.cmpi eq, %2, %1099 : vector<1x16xi32>
    %1101 = vector.shape_cast %1100 : vector<1x16xi1> to vector<1x16xi1>
    %1102 = vector.broadcast %1101 : vector<1x16xi1> to vector<8x16xi1>
    %1103 = vector.shape_cast %1098 : vector<8x1xf32> to vector<8x1xf32>
    %1104 = vector.broadcast %1103 : vector<8x1xf32> to vector<8x16xf32>
    %1105 = arith.select %1102, %1104, %1089 : vector<8x16xi1>, vector<8x16xf32>
    %cst_297 = arith.constant 0xFF800000 : f32
    %1106 = vector.shape_cast %870 : vector<1x16xi1> to vector<1x16xi1>
    %1107 = vector.broadcast %1106 : vector<1x16xi1> to vector<8x16xi1>
    %1108 = vector.broadcast %cst_297 : f32 to vector<8x16xf32>
    %1109 = arith.select %1107, %1056, %1108 : vector<8x16xi1>, vector<8x16xf32>
    %cst_298 = arith.constant dense<0xFF800000> : vector<8xf32>
    %1110 = vector.multi_reduction <maximumf>, %1109, %cst_298 [1] : vector<8x16xf32> to vector<8xf32>
    %1111 = vector.shape_cast %1110 : vector<8xf32> to vector<8x1xf32>
    %1112 = arith.ori %1057, %871 : i1
    %cst_299 = arith.constant 0.000000e+00 : f32
    %1113 = vector.broadcast %cst_299 : f32 to vector<8x1xf32>
    %1114 = arith.select %1112, %1113, %1111 : vector<8x1xf32>
    %c11_i32_300 = arith.constant 11 : i32
    %1115 = vector.broadcast %c11_i32_300 : i32 to vector<1x16xi32>
    %1116 = arith.cmpi eq, %2, %1115 : vector<1x16xi32>
    %1117 = vector.shape_cast %1116 : vector<1x16xi1> to vector<1x16xi1>
    %1118 = vector.broadcast %1117 : vector<1x16xi1> to vector<8x16xi1>
    %1119 = vector.shape_cast %1114 : vector<8x1xf32> to vector<8x1xf32>
    %1120 = vector.broadcast %1119 : vector<8x1xf32> to vector<8x16xf32>
    %1121 = arith.select %1118, %1120, %1105 : vector<8x16xi1>, vector<8x16xf32>
    %c0_i32_301 = arith.constant 0 : i32
    %1122 = arith.addi %815, %c0_i32_301 : i32
    %c3_i32_302 = arith.constant 3 : i32
    %1123 = arith.addi %1122, %c3_i32_302 : i32
    %1124 = arith.index_cast %1123 : i32 to index
    %1125 = memref.load %arg2[%1124] : memref<128xi32, #tpu.memory_space<smem>>
    %c4_i32_303 = arith.constant 4 : i32
    %1126 = arith.addi %815, %c4_i32_303 : i32
    %c3_i32_304 = arith.constant 3 : i32
    %1127 = arith.addi %1126, %c3_i32_304 : i32
    %1128 = arith.index_cast %1127 : i32 to index
    %1129 = memref.load %arg2[%1128] : memref<128xi32, #tpu.memory_space<smem>>
    %1130 = vector.broadcast %1125 : i32 to vector<1x16x16xi32>
    %1131 = arith.cmpi sge, %0, %1130 : vector<1x16x16xi32>
    %1132 = vector.broadcast %1129 : i32 to vector<1x16x16xi32>
    %1133 = arith.cmpi slt, %0, %1132 : vector<1x16x16xi32>
    %1134 = arith.andi %1131, %1133 : vector<1x16x16xi1>
    %cst_305 = arith.constant 0xFF800000 : f32
    %1135 = vector.shape_cast %1134 : vector<1x16x16xi1> to vector<1x16x16xi1>
    %1136 = vector.broadcast %1135 : vector<1x16x16xi1> to vector<8x16x16xi1>
    %1137 = vector.broadcast %cst_305 : f32 to vector<8x16x16xf32>
    %1138 = arith.select %1136, %813, %1137 : vector<8x16x16xi1>, vector<8x16x16xf32>
    %cst_306 = arith.constant dense<0xFF800000> : vector<8x16xf32>
    %1139 = vector.multi_reduction <maximumf>, %1138, %cst_306 [1] : vector<8x16x16xf32> to vector<8x16xf32>
    %1140 = arith.cmpi sle, %1129, %1125 : i32
    %cst_307 = arith.constant 0xFF800000 : f32
    %1141 = vector.shape_cast %828 : vector<1x16xi1> to vector<1x16xi1>
    %1142 = vector.broadcast %1141 : vector<1x16xi1> to vector<8x16xi1>
    %1143 = vector.broadcast %cst_307 : f32 to vector<8x16xf32>
    %1144 = arith.select %1142, %1139, %1143 : vector<8x16xi1>, vector<8x16xf32>
    %cst_308 = arith.constant dense<0xFF800000> : vector<8xf32>
    %1145 = vector.multi_reduction <maximumf>, %1144, %cst_308 [1] : vector<8x16xf32> to vector<8xf32>
    %1146 = vector.shape_cast %1145 : vector<8xf32> to vector<8x1xf32>
    %1147 = arith.ori %1140, %829 : i1
    %cst_309 = arith.constant 0.000000e+00 : f32
    %1148 = vector.broadcast %cst_309 : f32 to vector<8x1xf32>
    %1149 = arith.select %1147, %1148, %1146 : vector<8x1xf32>
    %c12_i32_310 = arith.constant 12 : i32
    %1150 = vector.broadcast %c12_i32_310 : i32 to vector<1x16xi32>
    %1151 = arith.cmpi eq, %2, %1150 : vector<1x16xi32>
    %1152 = vector.shape_cast %1151 : vector<1x16xi1> to vector<1x16xi1>
    %1153 = vector.broadcast %1152 : vector<1x16xi1> to vector<8x16xi1>
    %1154 = vector.shape_cast %1149 : vector<8x1xf32> to vector<8x1xf32>
    %1155 = vector.broadcast %1154 : vector<8x1xf32> to vector<8x16xf32>
    %1156 = arith.select %1153, %1155, %1121 : vector<8x16xi1>, vector<8x16xf32>
    %cst_311 = arith.constant 0xFF800000 : f32
    %1157 = vector.shape_cast %842 : vector<1x16xi1> to vector<1x16xi1>
    %1158 = vector.broadcast %1157 : vector<1x16xi1> to vector<8x16xi1>
    %1159 = vector.broadcast %cst_311 : f32 to vector<8x16xf32>
    %1160 = arith.select %1158, %1139, %1159 : vector<8x16xi1>, vector<8x16xf32>
    %cst_312 = arith.constant dense<0xFF800000> : vector<8xf32>
    %1161 = vector.multi_reduction <maximumf>, %1160, %cst_312 [1] : vector<8x16xf32> to vector<8xf32>
    %1162 = vector.shape_cast %1161 : vector<8xf32> to vector<8x1xf32>
    %1163 = arith.ori %1140, %843 : i1
    %cst_313 = arith.constant 0.000000e+00 : f32
    %1164 = vector.broadcast %cst_313 : f32 to vector<8x1xf32>
    %1165 = arith.select %1163, %1164, %1162 : vector<8x1xf32>
    %c13_i32_314 = arith.constant 13 : i32
    %1166 = vector.broadcast %c13_i32_314 : i32 to vector<1x16xi32>
    %1167 = arith.cmpi eq, %2, %1166 : vector<1x16xi32>
    %1168 = vector.shape_cast %1167 : vector<1x16xi1> to vector<1x16xi1>
    %1169 = vector.broadcast %1168 : vector<1x16xi1> to vector<8x16xi1>
    %1170 = vector.shape_cast %1165 : vector<8x1xf32> to vector<8x1xf32>
    %1171 = vector.broadcast %1170 : vector<8x1xf32> to vector<8x16xf32>
    %1172 = arith.select %1169, %1171, %1156 : vector<8x16xi1>, vector<8x16xf32>
    %cst_315 = arith.constant 0xFF800000 : f32
    %1173 = vector.shape_cast %856 : vector<1x16xi1> to vector<1x16xi1>
    %1174 = vector.broadcast %1173 : vector<1x16xi1> to vector<8x16xi1>
    %1175 = vector.broadcast %cst_315 : f32 to vector<8x16xf32>
    %1176 = arith.select %1174, %1139, %1175 : vector<8x16xi1>, vector<8x16xf32>
    %cst_316 = arith.constant dense<0xFF800000> : vector<8xf32>
    %1177 = vector.multi_reduction <maximumf>, %1176, %cst_316 [1] : vector<8x16xf32> to vector<8xf32>
    %1178 = vector.shape_cast %1177 : vector<8xf32> to vector<8x1xf32>
    %1179 = arith.ori %1140, %857 : i1
    %cst_317 = arith.constant 0.000000e+00 : f32
    %1180 = vector.broadcast %cst_317 : f32 to vector<8x1xf32>
    %1181 = arith.select %1179, %1180, %1178 : vector<8x1xf32>
    %c14_i32_318 = arith.constant 14 : i32
    %1182 = vector.broadcast %c14_i32_318 : i32 to vector<1x16xi32>
    %1183 = arith.cmpi eq, %2, %1182 : vector<1x16xi32>
    %1184 = vector.shape_cast %1183 : vector<1x16xi1> to vector<1x16xi1>
    %1185 = vector.broadcast %1184 : vector<1x16xi1> to vector<8x16xi1>
    %1186 = vector.shape_cast %1181 : vector<8x1xf32> to vector<8x1xf32>
    %1187 = vector.broadcast %1186 : vector<8x1xf32> to vector<8x16xf32>
    %1188 = arith.select %1185, %1187, %1172 : vector<8x16xi1>, vector<8x16xf32>
    %cst_319 = arith.constant 0xFF800000 : f32
    %1189 = vector.shape_cast %870 : vector<1x16xi1> to vector<1x16xi1>
    %1190 = vector.broadcast %1189 : vector<1x16xi1> to vector<8x16xi1>
    %1191 = vector.broadcast %cst_319 : f32 to vector<8x16xf32>
    %1192 = arith.select %1190, %1139, %1191 : vector<8x16xi1>, vector<8x16xf32>
    %cst_320 = arith.constant dense<0xFF800000> : vector<8xf32>
    %1193 = vector.multi_reduction <maximumf>, %1192, %cst_320 [1] : vector<8x16xf32> to vector<8xf32>
    %1194 = vector.shape_cast %1193 : vector<8xf32> to vector<8x1xf32>
    %1195 = arith.ori %1140, %871 : i1
    %cst_321 = arith.constant 0.000000e+00 : f32
    %1196 = vector.broadcast %cst_321 : f32 to vector<8x1xf32>
    %1197 = arith.select %1195, %1196, %1194 : vector<8x1xf32>
    %c15_i32_322 = arith.constant 15 : i32
    %1198 = vector.broadcast %c15_i32_322 : i32 to vector<1x16xi32>
    %1199 = arith.cmpi eq, %2, %1198 : vector<1x16xi32>
    %1200 = vector.shape_cast %1199 : vector<1x16xi1> to vector<1x16xi1>
    %1201 = vector.broadcast %1200 : vector<1x16xi1> to vector<8x16xi1>
    %1202 = vector.shape_cast %1197 : vector<8x1xf32> to vector<8x1xf32>
    %1203 = vector.broadcast %1202 : vector<8x1xf32> to vector<8x16xf32>
    %1204 = arith.select %1201, %1203, %1188 : vector<8x16xi1>, vector<8x16xf32>
    %1205 = arith.truncf %1204 : vector<8x16xf32> to vector<8x16xbf16>
    %c2 = arith.constant 2 : index
    %c0_323 = arith.constant 0 : index
    %c0_324 = arith.constant 0 : index
    %1206 = vector.load %arg4[%c2, %c0_323, %c0_324] : memref<4x8x16xbf16, #tpu.memory_space<vmem>>, vector<1x8x16xbf16>
    %1207 = vector.shape_cast %1206 : vector<1x8x16xbf16> to vector<8x16xbf16>
    %1208 = vector.shape_cast %1205 : vector<8x16xbf16> to vector<1x8x16xbf16>
    tpu.vector_store %arg4[%c2, %c0_323, %c0_324], %1208 {strides = array<i32>} : memref<4x8x16xbf16, #tpu.memory_space<vmem>>, vector<1x8x16xbf16>,
    %c4_i32_325 = arith.constant 4 : i32
    %1209 = arith.muli %arg0, %c4_i32_325 : i32
    %c3_i32_326 = arith.constant 3 : i32
    %1210 = arith.addi %1209, %c3_i32_326 : i32
    %1211 = arith.index_cast %1210 : i32 to index
    %1212 = memref.load %arg1[%1211] : memref<8xi32, #tpu.memory_space<smem>>
    %1213 = arith.index_cast %1212 : i32 to index
    %c0_327 = arith.constant 0 : index
    %c0_328 = arith.constant 0 : index
    %c0_329 = arith.constant 0 : index
    %1214 = vector.load %arg3[%1213, %c0_327, %c0_328, %c0_329] : memref<2x8x16x16xf32, #tpu.memory_space<vmem>>, vector<1x8x16x16xf32>
    %1215 = vector.shape_cast %1214 : vector<1x8x16x16xf32> to vector<8x16x16xf32>
    %c4_i32_330 = arith.constant 4 : i32
    %1216 = arith.muli %1210, %c4_i32_330 : i32
    %c4_i32_331 = arith.constant 4 : i32
    %1217 = arith.muli %1216, %c4_i32_331 : i32
    %c8_i32_332 = arith.constant 8 : i32
    %1218 = arith.addi %1217, %c8_i32_332 : i32
    %c0_i32_333 = arith.constant 0 : i32
    %1219 = arith.addi %1218, %c0_i32_333 : i32
    %1220 = arith.index_cast %1219 : i32 to index
    %1221 = memref.load %arg2[%1220] : memref<128xi32, #tpu.memory_space<smem>>
    %c12_i32_334 = arith.constant 12 : i32
    %1222 = arith.addi %1217, %c12_i32_334 : i32
    %c0_i32_335 = arith.constant 0 : i32
    %1223 = arith.addi %1222, %c0_i32_335 : i32
    %1224 = arith.index_cast %1223 : i32 to index
    %1225 = memref.load %arg2[%1224] : memref<128xi32, #tpu.memory_space<smem>>
    %1226 = vector.broadcast %1221 : i32 to vector<1x16xi32>
    %1227 = arith.cmpi sge, %1, %1226 : vector<1x16xi32>
    %1228 = vector.broadcast %1225 : i32 to vector<1x16xi32>
    %1229 = arith.cmpi slt, %1, %1228 : vector<1x16xi32>
    %1230 = arith.andi %1227, %1229 : vector<1x16xi1>
    %1231 = arith.cmpi sle, %1225, %1221 : i32
    %c8_i32_336 = arith.constant 8 : i32
    %1232 = arith.addi %1217, %c8_i32_336 : i32
    %c1_i32_337 = arith.constant 1 : i32
    %1233 = arith.addi %1232, %c1_i32_337 : i32
    %1234 = arith.index_cast %1233 : i32 to index
    %1235 = memref.load %arg2[%1234] : memref<128xi32, #tpu.memory_space<smem>>
    %c12_i32_338 = arith.constant 12 : i32
    %1236 = arith.addi %1217, %c12_i32_338 : i32
    %c1_i32_339 = arith.constant 1 : i32
    %1237 = arith.addi %1236, %c1_i32_339 : i32
    %1238 = arith.index_cast %1237 : i32 to index
    %1239 = memref.load %arg2[%1238] : memref<128xi32, #tpu.memory_space<smem>>
    %1240 = vector.broadcast %1235 : i32 to vector<1x16xi32>
    %1241 = arith.cmpi sge, %1, %1240 : vector<1x16xi32>
    %1242 = vector.broadcast %1239 : i32 to vector<1x16xi32>
    %1243 = arith.cmpi slt, %1, %1242 : vector<1x16xi32>
    %1244 = arith.andi %1241, %1243 : vector<1x16xi1>
    %1245 = arith.cmpi sle, %1239, %1235 : i32
    %c8_i32_340 = arith.constant 8 : i32
    %1246 = arith.addi %1217, %c8_i32_340 : i32
    %c2_i32_341 = arith.constant 2 : i32
    %1247 = arith.addi %1246, %c2_i32_341 : i32
    %1248 = arith.index_cast %1247 : i32 to index
    %1249 = memref.load %arg2[%1248] : memref<128xi32, #tpu.memory_space<smem>>
    %c12_i32_342 = arith.constant 12 : i32
    %1250 = arith.addi %1217, %c12_i32_342 : i32
    %c2_i32_343 = arith.constant 2 : i32
    %1251 = arith.addi %1250, %c2_i32_343 : i32
    %1252 = arith.index_cast %1251 : i32 to index
    %1253 = memref.load %arg2[%1252] : memref<128xi32, #tpu.memory_space<smem>>
    %1254 = vector.broadcast %1249 : i32 to vector<1x16xi32>
    %1255 = arith.cmpi sge, %1, %1254 : vector<1x16xi32>
    %1256 = vector.broadcast %1253 : i32 to vector<1x16xi32>
    %1257 = arith.cmpi slt, %1, %1256 : vector<1x16xi32>
    %1258 = arith.andi %1255, %1257 : vector<1x16xi1>
    %1259 = arith.cmpi sle, %1253, %1249 : i32
    %c8_i32_344 = arith.constant 8 : i32
    %1260 = arith.addi %1217, %c8_i32_344 : i32
    %c3_i32_345 = arith.constant 3 : i32
    %1261 = arith.addi %1260, %c3_i32_345 : i32
    %1262 = arith.index_cast %1261 : i32 to index
    %1263 = memref.load %arg2[%1262] : memref<128xi32, #tpu.memory_space<smem>>
    %c12_i32_346 = arith.constant 12 : i32
    %1264 = arith.addi %1217, %c12_i32_346 : i32
    %c3_i32_347 = arith.constant 3 : i32
    %1265 = arith.addi %1264, %c3_i32_347 : i32
    %1266 = arith.index_cast %1265 : i32 to index
    %1267 = memref.load %arg2[%1266] : memref<128xi32, #tpu.memory_space<smem>>
    %1268 = vector.broadcast %1263 : i32 to vector<1x16xi32>
    %1269 = arith.cmpi sge, %1, %1268 : vector<1x16xi32>
    %1270 = vector.broadcast %1267 : i32 to vector<1x16xi32>
    %1271 = arith.cmpi slt, %1, %1270 : vector<1x16xi32>
    %1272 = arith.andi %1269, %1271 : vector<1x16xi1>
    %1273 = arith.cmpi sle, %1267, %1263 : i32
    %cst_348 = arith.constant 0.000000e+00 : f32
    %1274 = vector.broadcast %cst_348 : f32 to vector<8x16xf32>
    %c0_i32_349 = arith.constant 0 : i32
    %1275 = arith.addi %1217, %c0_i32_349 : i32
    %c0_i32_350 = arith.constant 0 : i32
    %1276 = arith.addi %1275, %c0_i32_350 : i32
    %1277 = arith.index_cast %1276 : i32 to index
    %1278 = memref.load %arg2[%1277] : memref<128xi32, #tpu.memory_space<smem>>
    %c4_i32_351 = arith.constant 4 : i32
    %1279 = arith.addi %1217, %c4_i32_351 : i32
    %c0_i32_352 = arith.constant 0 : i32
    %1280 = arith.addi %1279, %c0_i32_352 : i32
    %1281 = arith.index_cast %1280 : i32 to index
    %1282 = memref.load %arg2[%1281] : memref<128xi32, #tpu.memory_space<smem>>
    %1283 = vector.broadcast %1278 : i32 to vector<1x16x16xi32>
    %1284 = arith.cmpi sge, %0, %1283 : vector<1x16x16xi32>
    %1285 = vector.broadcast %1282 : i32 to vector<1x16x16xi32>
    %1286 = arith.cmpi slt, %0, %1285 : vector<1x16x16xi32>
    %1287 = arith.andi %1284, %1286 : vector<1x16x16xi1>
    %cst_353 = arith.constant 0xFF800000 : f32
    %1288 = vector.shape_cast %1287 : vector<1x16x16xi1> to vector<1x16x16xi1>
    %1289 = vector.broadcast %1288 : vector<1x16x16xi1> to vector<8x16x16xi1>
    %1290 = vector.broadcast %cst_353 : f32 to vector<8x16x16xf32>
    %1291 = arith.select %1289, %1215, %1290 : vector<8x16x16xi1>, vector<8x16x16xf32>
    %cst_354 = arith.constant dense<0xFF800000> : vector<8x16xf32>
    %1292 = vector.multi_reduction <maximumf>, %1291, %cst_354 [1] : vector<8x16x16xf32> to vector<8x16xf32>
    %1293 = arith.cmpi sle, %1282, %1278 : i32
    %cst_355 = arith.constant 0xFF800000 : f32
    %1294 = vector.shape_cast %1230 : vector<1x16xi1> to vector<1x16xi1>
    %1295 = vector.broadcast %1294 : vector<1x16xi1> to vector<8x16xi1>
    %1296 = vector.broadcast %cst_355 : f32 to vector<8x16xf32>
    %1297 = arith.select %1295, %1292, %1296 : vector<8x16xi1>, vector<8x16xf32>
    %cst_356 = arith.constant dense<0xFF800000> : vector<8xf32>
    %1298 = vector.multi_reduction <maximumf>, %1297, %cst_356 [1] : vector<8x16xf32> to vector<8xf32>
    %1299 = vector.shape_cast %1298 : vector<8xf32> to vector<8x1xf32>
    %1300 = arith.ori %1293, %1231 : i1
    %cst_357 = arith.constant 0.000000e+00 : f32
    %1301 = vector.broadcast %cst_357 : f32 to vector<8x1xf32>
    %1302 = arith.select %1300, %1301, %1299 : vector<8x1xf32>
    %c0_i32_358 = arith.constant 0 : i32
    %1303 = vector.broadcast %c0_i32_358 : i32 to vector<1x16xi32>
    %1304 = arith.cmpi eq, %2, %1303 : vector<1x16xi32>
    %1305 = vector.shape_cast %1304 : vector<1x16xi1> to vector<1x16xi1>
    %1306 = vector.broadcast %1305 : vector<1x16xi1> to vector<8x16xi1>
    %1307 = vector.shape_cast %1302 : vector<8x1xf32> to vector<8x1xf32>
    %1308 = vector.broadcast %1307 : vector<8x1xf32> to vector<8x16xf32>
    %1309 = arith.select %1306, %1308, %1274 : vector<8x16xi1>, vector<8x16xf32>
    %cst_359 = arith.constant 0xFF800000 : f32
    %1310 = vector.shape_cast %1244 : vector<1x16xi1> to vector<1x16xi1>
    %1311 = vector.broadcast %1310 : vector<1x16xi1> to vector<8x16xi1>
    %1312 = vector.broadcast %cst_359 : f32 to vector<8x16xf32>
    %1313 = arith.select %1311, %1292, %1312 : vector<8x16xi1>, vector<8x16xf32>
    %cst_360 = arith.constant dense<0xFF800000> : vector<8xf32>
    %1314 = vector.multi_reduction <maximumf>, %1313, %cst_360 [1] : vector<8x16xf32> to vector<8xf32>
    %1315 = vector.shape_cast %1314 : vector<8xf32> to vector<8x1xf32>
    %1316 = arith.ori %1293, %1245 : i1
    %cst_361 = arith.constant 0.000000e+00 : f32
    %1317 = vector.broadcast %cst_361 : f32 to vector<8x1xf32>
    %1318 = arith.select %1316, %1317, %1315 : vector<8x1xf32>
    %c1_i32_362 = arith.constant 1 : i32
    %1319 = vector.broadcast %c1_i32_362 : i32 to vector<1x16xi32>
    %1320 = arith.cmpi eq, %2, %1319 : vector<1x16xi32>
    %1321 = vector.shape_cast %1320 : vector<1x16xi1> to vector<1x16xi1>
    %1322 = vector.broadcast %1321 : vector<1x16xi1> to vector<8x16xi1>
    %1323 = vector.shape_cast %1318 : vector<8x1xf32> to vector<8x1xf32>
    %1324 = vector.broadcast %1323 : vector<8x1xf32> to vector<8x16xf32>
    %1325 = arith.select %1322, %1324, %1309 : vector<8x16xi1>, vector<8x16xf32>
    %cst_363 = arith.constant 0xFF800000 : f32
    %1326 = vector.shape_cast %1258 : vector<1x16xi1> to vector<1x16xi1>
    %1327 = vector.broadcast %1326 : vector<1x16xi1> to vector<8x16xi1>
    %1328 = vector.broadcast %cst_363 : f32 to vector<8x16xf32>
    %1329 = arith.select %1327, %1292, %1328 : vector<8x16xi1>, vector<8x16xf32>
    %cst_364 = arith.constant dense<0xFF800000> : vector<8xf32>
    %1330 = vector.multi_reduction <maximumf>, %1329, %cst_364 [1] : vector<8x16xf32> to vector<8xf32>
    %1331 = vector.shape_cast %1330 : vector<8xf32> to vector<8x1xf32>
    %1332 = arith.ori %1293, %1259 : i1
    %cst_365 = arith.constant 0.000000e+00 : f32
    %1333 = vector.broadcast %cst_365 : f32 to vector<8x1xf32>
    %1334 = arith.select %1332, %1333, %1331 : vector<8x1xf32>
    %c2_i32_366 = arith.constant 2 : i32
    %1335 = vector.broadcast %c2_i32_366 : i32 to vector<1x16xi32>
    %1336 = arith.cmpi eq, %2, %1335 : vector<1x16xi32>
    %1337 = vector.shape_cast %1336 : vector<1x16xi1> to vector<1x16xi1>
    %1338 = vector.broadcast %1337 : vector<1x16xi1> to vector<8x16xi1>
    %1339 = vector.shape_cast %1334 : vector<8x1xf32> to vector<8x1xf32>
    %1340 = vector.broadcast %1339 : vector<8x1xf32> to vector<8x16xf32>
    %1341 = arith.select %1338, %1340, %1325 : vector<8x16xi1>, vector<8x16xf32>
    %cst_367 = arith.constant 0xFF800000 : f32
    %1342 = vector.shape_cast %1272 : vector<1x16xi1> to vector<1x16xi1>
    %1343 = vector.broadcast %1342 : vector<1x16xi1> to vector<8x16xi1>
    %1344 = vector.broadcast %cst_367 : f32 to vector<8x16xf32>
    %1345 = arith.select %1343, %1292, %1344 : vector<8x16xi1>, vector<8x16xf32>
    %cst_368 = arith.constant dense<0xFF800000> : vector<8xf32>
    %1346 = vector.multi_reduction <maximumf>, %1345, %cst_368 [1] : vector<8x16xf32> to vector<8xf32>
    %1347 = vector.shape_cast %1346 : vector<8xf32> to vector<8x1xf32>
    %1348 = arith.ori %1293, %1273 : i1
    %cst_369 = arith.constant 0.000000e+00 : f32
    %1349 = vector.broadcast %cst_369 : f32 to vector<8x1xf32>
    %1350 = arith.select %1348, %1349, %1347 : vector<8x1xf32>
    %c3_i32_370 = arith.constant 3 : i32
    %1351 = vector.broadcast %c3_i32_370 : i32 to vector<1x16xi32>
    %1352 = arith.cmpi eq, %2, %1351 : vector<1x16xi32>
    %1353 = vector.shape_cast %1352 : vector<1x16xi1> to vector<1x16xi1>
    %1354 = vector.broadcast %1353 : vector<1x16xi1> to vector<8x16xi1>
    %1355 = vector.shape_cast %1350 : vector<8x1xf32> to vector<8x1xf32>
    %1356 = vector.broadcast %1355 : vector<8x1xf32> to vector<8x16xf32>
    %1357 = arith.select %1354, %1356, %1341 : vector<8x16xi1>, vector<8x16xf32>
    %c0_i32_371 = arith.constant 0 : i32
    %1358 = arith.addi %1217, %c0_i32_371 : i32
    %c1_i32_372 = arith.constant 1 : i32
    %1359 = arith.addi %1358, %c1_i32_372 : i32
    %1360 = arith.index_cast %1359 : i32 to index
    %1361 = memref.load %arg2[%1360] : memref<128xi32, #tpu.memory_space<smem>>
    %c4_i32_373 = arith.constant 4 : i32
    %1362 = arith.addi %1217, %c4_i32_373 : i32
    %c1_i32_374 = arith.constant 1 : i32
    %1363 = arith.addi %1362, %c1_i32_374 : i32
    %1364 = arith.index_cast %1363 : i32 to index
    %1365 = memref.load %arg2[%1364] : memref<128xi32, #tpu.memory_space<smem>>
    %1366 = vector.broadcast %1361 : i32 to vector<1x16x16xi32>
    %1367 = arith.cmpi sge, %0, %1366 : vector<1x16x16xi32>
    %1368 = vector.broadcast %1365 : i32 to vector<1x16x16xi32>
    %1369 = arith.cmpi slt, %0, %1368 : vector<1x16x16xi32>
    %1370 = arith.andi %1367, %1369 : vector<1x16x16xi1>
    %cst_375 = arith.constant 0xFF800000 : f32
    %1371 = vector.shape_cast %1370 : vector<1x16x16xi1> to vector<1x16x16xi1>
    %1372 = vector.broadcast %1371 : vector<1x16x16xi1> to vector<8x16x16xi1>
    %1373 = vector.broadcast %cst_375 : f32 to vector<8x16x16xf32>
    %1374 = arith.select %1372, %1215, %1373 : vector<8x16x16xi1>, vector<8x16x16xf32>
    %cst_376 = arith.constant dense<0xFF800000> : vector<8x16xf32>
    %1375 = vector.multi_reduction <maximumf>, %1374, %cst_376 [1] : vector<8x16x16xf32> to vector<8x16xf32>
    %1376 = arith.cmpi sle, %1365, %1361 : i32
    %cst_377 = arith.constant 0xFF800000 : f32
    %1377 = vector.shape_cast %1230 : vector<1x16xi1> to vector<1x16xi1>
    %1378 = vector.broadcast %1377 : vector<1x16xi1> to vector<8x16xi1>
    %1379 = vector.broadcast %cst_377 : f32 to vector<8x16xf32>
    %1380 = arith.select %1378, %1375, %1379 : vector<8x16xi1>, vector<8x16xf32>
    %cst_378 = arith.constant dense<0xFF800000> : vector<8xf32>
    %1381 = vector.multi_reduction <maximumf>, %1380, %cst_378 [1] : vector<8x16xf32> to vector<8xf32>
    %1382 = vector.shape_cast %1381 : vector<8xf32> to vector<8x1xf32>
    %1383 = arith.ori %1376, %1231 : i1
    %cst_379 = arith.constant 0.000000e+00 : f32
    %1384 = vector.broadcast %cst_379 : f32 to vector<8x1xf32>
    %1385 = arith.select %1383, %1384, %1382 : vector<8x1xf32>
    %c4_i32_380 = arith.constant 4 : i32
    %1386 = vector.broadcast %c4_i32_380 : i32 to vector<1x16xi32>
    %1387 = arith.cmpi eq, %2, %1386 : vector<1x16xi32>
    %1388 = vector.shape_cast %1387 : vector<1x16xi1> to vector<1x16xi1>
    %1389 = vector.broadcast %1388 : vector<1x16xi1> to vector<8x16xi1>
    %1390 = vector.shape_cast %1385 : vector<8x1xf32> to vector<8x1xf32>
    %1391 = vector.broadcast %1390 : vector<8x1xf32> to vector<8x16xf32>
    %1392 = arith.select %1389, %1391, %1357 : vector<8x16xi1>, vector<8x16xf32>
    %cst_381 = arith.constant 0xFF800000 : f32
    %1393 = vector.shape_cast %1244 : vector<1x16xi1> to vector<1x16xi1>
    %1394 = vector.broadcast %1393 : vector<1x16xi1> to vector<8x16xi1>
    %1395 = vector.broadcast %cst_381 : f32 to vector<8x16xf32>
    %1396 = arith.select %1394, %1375, %1395 : vector<8x16xi1>, vector<8x16xf32>
    %cst_382 = arith.constant dense<0xFF800000> : vector<8xf32>
    %1397 = vector.multi_reduction <maximumf>, %1396, %cst_382 [1] : vector<8x16xf32> to vector<8xf32>
    %1398 = vector.shape_cast %1397 : vector<8xf32> to vector<8x1xf32>
    %1399 = arith.ori %1376, %1245 : i1
    %cst_383 = arith.constant 0.000000e+00 : f32
    %1400 = vector.broadcast %cst_383 : f32 to vector<8x1xf32>
    %1401 = arith.select %1399, %1400, %1398 : vector<8x1xf32>
    %c5_i32_384 = arith.constant 5 : i32
    %1402 = vector.broadcast %c5_i32_384 : i32 to vector<1x16xi32>
    %1403 = arith.cmpi eq, %2, %1402 : vector<1x16xi32>
    %1404 = vector.shape_cast %1403 : vector<1x16xi1> to vector<1x16xi1>
    %1405 = vector.broadcast %1404 : vector<1x16xi1> to vector<8x16xi1>
    %1406 = vector.shape_cast %1401 : vector<8x1xf32> to vector<8x1xf32>
    %1407 = vector.broadcast %1406 : vector<8x1xf32> to vector<8x16xf32>
    %1408 = arith.select %1405, %1407, %1392 : vector<8x16xi1>, vector<8x16xf32>
    %cst_385 = arith.constant 0xFF800000 : f32
    %1409 = vector.shape_cast %1258 : vector<1x16xi1> to vector<1x16xi1>
    %1410 = vector.broadcast %1409 : vector<1x16xi1> to vector<8x16xi1>
    %1411 = vector.broadcast %cst_385 : f32 to vector<8x16xf32>
    %1412 = arith.select %1410, %1375, %1411 : vector<8x16xi1>, vector<8x16xf32>
    %cst_386 = arith.constant dense<0xFF800000> : vector<8xf32>
    %1413 = vector.multi_reduction <maximumf>, %1412, %cst_386 [1] : vector<8x16xf32> to vector<8xf32>
    %1414 = vector.shape_cast %1413 : vector<8xf32> to vector<8x1xf32>
    %1415 = arith.ori %1376, %1259 : i1
    %cst_387 = arith.constant 0.000000e+00 : f32
    %1416 = vector.broadcast %cst_387 : f32 to vector<8x1xf32>
    %1417 = arith.select %1415, %1416, %1414 : vector<8x1xf32>
    %c6_i32_388 = arith.constant 6 : i32
    %1418 = vector.broadcast %c6_i32_388 : i32 to vector<1x16xi32>
    %1419 = arith.cmpi eq, %2, %1418 : vector<1x16xi32>
    %1420 = vector.shape_cast %1419 : vector<1x16xi1> to vector<1x16xi1>
    %1421 = vector.broadcast %1420 : vector<1x16xi1> to vector<8x16xi1>
    %1422 = vector.shape_cast %1417 : vector<8x1xf32> to vector<8x1xf32>
    %1423 = vector.broadcast %1422 : vector<8x1xf32> to vector<8x16xf32>
    %1424 = arith.select %1421, %1423, %1408 : vector<8x16xi1>, vector<8x16xf32>
    %cst_389 = arith.constant 0xFF800000 : f32
    %1425 = vector.shape_cast %1272 : vector<1x16xi1> to vector<1x16xi1>
    %1426 = vector.broadcast %1425 : vector<1x16xi1> to vector<8x16xi1>
    %1427 = vector.broadcast %cst_389 : f32 to vector<8x16xf32>
    %1428 = arith.select %1426, %1375, %1427 : vector<8x16xi1>, vector<8x16xf32>
    %cst_390 = arith.constant dense<0xFF800000> : vector<8xf32>
    %1429 = vector.multi_reduction <maximumf>, %1428, %cst_390 [1] : vector<8x16xf32> to vector<8xf32>
    %1430 = vector.shape_cast %1429 : vector<8xf32> to vector<8x1xf32>
    %1431 = arith.ori %1376, %1273 : i1
    %cst_391 = arith.constant 0.000000e+00 : f32
    %1432 = vector.broadcast %cst_391 : f32 to vector<8x1xf32>
    %1433 = arith.select %1431, %1432, %1430 : vector<8x1xf32>
    %c7_i32_392 = arith.constant 7 : i32
    %1434 = vector.broadcast %c7_i32_392 : i32 to vector<1x16xi32>
    %1435 = arith.cmpi eq, %2, %1434 : vector<1x16xi32>
    %1436 = vector.shape_cast %1435 : vector<1x16xi1> to vector<1x16xi1>
    %1437 = vector.broadcast %1436 : vector<1x16xi1> to vector<8x16xi1>
    %1438 = vector.shape_cast %1433 : vector<8x1xf32> to vector<8x1xf32>
    %1439 = vector.broadcast %1438 : vector<8x1xf32> to vector<8x16xf32>
    %1440 = arith.select %1437, %1439, %1424 : vector<8x16xi1>, vector<8x16xf32>
    %c0_i32_393 = arith.constant 0 : i32
    %1441 = arith.addi %1217, %c0_i32_393 : i32
    %c2_i32_394 = arith.constant 2 : i32
    %1442 = arith.addi %1441, %c2_i32_394 : i32
    %1443 = arith.index_cast %1442 : i32 to index
    %1444 = memref.load %arg2[%1443] : memref<128xi32, #tpu.memory_space<smem>>
    %c4_i32_395 = arith.constant 4 : i32
    %1445 = arith.addi %1217, %c4_i32_395 : i32
    %c2_i32_396 = arith.constant 2 : i32
    %1446 = arith.addi %1445, %c2_i32_396 : i32
    %1447 = arith.index_cast %1446 : i32 to index
    %1448 = memref.load %arg2[%1447] : memref<128xi32, #tpu.memory_space<smem>>
    %1449 = vector.broadcast %1444 : i32 to vector<1x16x16xi32>
    %1450 = arith.cmpi sge, %0, %1449 : vector<1x16x16xi32>
    %1451 = vector.broadcast %1448 : i32 to vector<1x16x16xi32>
    %1452 = arith.cmpi slt, %0, %1451 : vector<1x16x16xi32>
    %1453 = arith.andi %1450, %1452 : vector<1x16x16xi1>
    %cst_397 = arith.constant 0xFF800000 : f32
    %1454 = vector.shape_cast %1453 : vector<1x16x16xi1> to vector<1x16x16xi1>
    %1455 = vector.broadcast %1454 : vector<1x16x16xi1> to vector<8x16x16xi1>
    %1456 = vector.broadcast %cst_397 : f32 to vector<8x16x16xf32>
    %1457 = arith.select %1455, %1215, %1456 : vector<8x16x16xi1>, vector<8x16x16xf32>
    %cst_398 = arith.constant dense<0xFF800000> : vector<8x16xf32>
    %1458 = vector.multi_reduction <maximumf>, %1457, %cst_398 [1] : vector<8x16x16xf32> to vector<8x16xf32>
    %1459 = arith.cmpi sle, %1448, %1444 : i32
    %cst_399 = arith.constant 0xFF800000 : f32
    %1460 = vector.shape_cast %1230 : vector<1x16xi1> to vector<1x16xi1>
    %1461 = vector.broadcast %1460 : vector<1x16xi1> to vector<8x16xi1>
    %1462 = vector.broadcast %cst_399 : f32 to vector<8x16xf32>
    %1463 = arith.select %1461, %1458, %1462 : vector<8x16xi1>, vector<8x16xf32>
    %cst_400 = arith.constant dense<0xFF800000> : vector<8xf32>
    %1464 = vector.multi_reduction <maximumf>, %1463, %cst_400 [1] : vector<8x16xf32> to vector<8xf32>
    %1465 = vector.shape_cast %1464 : vector<8xf32> to vector<8x1xf32>
    %1466 = arith.ori %1459, %1231 : i1
    %cst_401 = arith.constant 0.000000e+00 : f32
    %1467 = vector.broadcast %cst_401 : f32 to vector<8x1xf32>
    %1468 = arith.select %1466, %1467, %1465 : vector<8x1xf32>
    %c8_i32_402 = arith.constant 8 : i32
    %1469 = vector.broadcast %c8_i32_402 : i32 to vector<1x16xi32>
    %1470 = arith.cmpi eq, %2, %1469 : vector<1x16xi32>
    %1471 = vector.shape_cast %1470 : vector<1x16xi1> to vector<1x16xi1>
    %1472 = vector.broadcast %1471 : vector<1x16xi1> to vector<8x16xi1>
    %1473 = vector.shape_cast %1468 : vector<8x1xf32> to vector<8x1xf32>
    %1474 = vector.broadcast %1473 : vector<8x1xf32> to vector<8x16xf32>
    %1475 = arith.select %1472, %1474, %1440 : vector<8x16xi1>, vector<8x16xf32>
    %cst_403 = arith.constant 0xFF800000 : f32
    %1476 = vector.shape_cast %1244 : vector<1x16xi1> to vector<1x16xi1>
    %1477 = vector.broadcast %1476 : vector<1x16xi1> to vector<8x16xi1>
    %1478 = vector.broadcast %cst_403 : f32 to vector<8x16xf32>
    %1479 = arith.select %1477, %1458, %1478 : vector<8x16xi1>, vector<8x16xf32>
    %cst_404 = arith.constant dense<0xFF800000> : vector<8xf32>
    %1480 = vector.multi_reduction <maximumf>, %1479, %cst_404 [1] : vector<8x16xf32> to vector<8xf32>
    %1481 = vector.shape_cast %1480 : vector<8xf32> to vector<8x1xf32>
    %1482 = arith.ori %1459, %1245 : i1
    %cst_405 = arith.constant 0.000000e+00 : f32
    %1483 = vector.broadcast %cst_405 : f32 to vector<8x1xf32>
    %1484 = arith.select %1482, %1483, %1481 : vector<8x1xf32>
    %c9_i32_406 = arith.constant 9 : i32
    %1485 = vector.broadcast %c9_i32_406 : i32 to vector<1x16xi32>
    %1486 = arith.cmpi eq, %2, %1485 : vector<1x16xi32>
    %1487 = vector.shape_cast %1486 : vector<1x16xi1> to vector<1x16xi1>
    %1488 = vector.broadcast %1487 : vector<1x16xi1> to vector<8x16xi1>
    %1489 = vector.shape_cast %1484 : vector<8x1xf32> to vector<8x1xf32>
    %1490 = vector.broadcast %1489 : vector<8x1xf32> to vector<8x16xf32>
    %1491 = arith.select %1488, %1490, %1475 : vector<8x16xi1>, vector<8x16xf32>
    %cst_407 = arith.constant 0xFF800000 : f32
    %1492 = vector.shape_cast %1258 : vector<1x16xi1> to vector<1x16xi1>
    %1493 = vector.broadcast %1492 : vector<1x16xi1> to vector<8x16xi1>
    %1494 = vector.broadcast %cst_407 : f32 to vector<8x16xf32>
    %1495 = arith.select %1493, %1458, %1494 : vector<8x16xi1>, vector<8x16xf32>
    %cst_408 = arith.constant dense<0xFF800000> : vector<8xf32>
    %1496 = vector.multi_reduction <maximumf>, %1495, %cst_408 [1] : vector<8x16xf32> to vector<8xf32>
    %1497 = vector.shape_cast %1496 : vector<8xf32> to vector<8x1xf32>
    %1498 = arith.ori %1459, %1259 : i1
    %cst_409 = arith.constant 0.000000e+00 : f32
    %1499 = vector.broadcast %cst_409 : f32 to vector<8x1xf32>
    %1500 = arith.select %1498, %1499, %1497 : vector<8x1xf32>
    %c10_i32_410 = arith.constant 10 : i32
    %1501 = vector.broadcast %c10_i32_410 : i32 to vector<1x16xi32>
    %1502 = arith.cmpi eq, %2, %1501 : vector<1x16xi32>
    %1503 = vector.shape_cast %1502 : vector<1x16xi1> to vector<1x16xi1>
    %1504 = vector.broadcast %1503 : vector<1x16xi1> to vector<8x16xi1>
    %1505 = vector.shape_cast %1500 : vector<8x1xf32> to vector<8x1xf32>
    %1506 = vector.broadcast %1505 : vector<8x1xf32> to vector<8x16xf32>
    %1507 = arith.select %1504, %1506, %1491 : vector<8x16xi1>, vector<8x16xf32>
    %cst_411 = arith.constant 0xFF800000 : f32
    %1508 = vector.shape_cast %1272 : vector<1x16xi1> to vector<1x16xi1>
    %1509 = vector.broadcast %1508 : vector<1x16xi1> to vector<8x16xi1>
    %1510 = vector.broadcast %cst_411 : f32 to vector<8x16xf32>
    %1511 = arith.select %1509, %1458, %1510 : vector<8x16xi1>, vector<8x16xf32>
    %cst_412 = arith.constant dense<0xFF800000> : vector<8xf32>
    %1512 = vector.multi_reduction <maximumf>, %1511, %cst_412 [1] : vector<8x16xf32> to vector<8xf32>
    %1513 = vector.shape_cast %1512 : vector<8xf32> to vector<8x1xf32>
    %1514 = arith.ori %1459, %1273 : i1
    %cst_413 = arith.constant 0.000000e+00 : f32
    %1515 = vector.broadcast %cst_413 : f32 to vector<8x1xf32>
    %1516 = arith.select %1514, %1515, %1513 : vector<8x1xf32>
    %c11_i32_414 = arith.constant 11 : i32
    %1517 = vector.broadcast %c11_i32_414 : i32 to vector<1x16xi32>
    %1518 = arith.cmpi eq, %2, %1517 : vector<1x16xi32>
    %1519 = vector.shape_cast %1518 : vector<1x16xi1> to vector<1x16xi1>
    %1520 = vector.broadcast %1519 : vector<1x16xi1> to vector<8x16xi1>
    %1521 = vector.shape_cast %1516 : vector<8x1xf32> to vector<8x1xf32>
    %1522 = vector.broadcast %1521 : vector<8x1xf32> to vector<8x16xf32>
    %1523 = arith.select %1520, %1522, %1507 : vector<8x16xi1>, vector<8x16xf32>
    %c0_i32_415 = arith.constant 0 : i32
    %1524 = arith.addi %1217, %c0_i32_415 : i32
    %c3_i32_416 = arith.constant 3 : i32
    %1525 = arith.addi %1524, %c3_i32_416 : i32
    %1526 = arith.index_cast %1525 : i32 to index
    %1527 = memref.load %arg2[%1526] : memref<128xi32, #tpu.memory_space<smem>>
    %c4_i32_417 = arith.constant 4 : i32
    %1528 = arith.addi %1217, %c4_i32_417 : i32
    %c3_i32_418 = arith.constant 3 : i32
    %1529 = arith.addi %1528, %c3_i32_418 : i32
    %1530 = arith.index_cast %1529 : i32 to index
    %1531 = memref.load %arg2[%1530] : memref<128xi32, #tpu.memory_space<smem>>
    %1532 = vector.broadcast %1527 : i32 to vector<1x16x16xi32>
    %1533 = arith.cmpi sge, %0, %1532 : vector<1x16x16xi32>
    %1534 = vector.broadcast %1531 : i32 to vector<1x16x16xi32>
    %1535 = arith.cmpi slt, %0, %1534 : vector<1x16x16xi32>
    %1536 = arith.andi %1533, %1535 : vector<1x16x16xi1>
    %cst_419 = arith.constant 0xFF800000 : f32
    %1537 = vector.shape_cast %1536 : vector<1x16x16xi1> to vector<1x16x16xi1>
    %1538 = vector.broadcast %1537 : vector<1x16x16xi1> to vector<8x16x16xi1>
    %1539 = vector.broadcast %cst_419 : f32 to vector<8x16x16xf32>
    %1540 = arith.select %1538, %1215, %1539 : vector<8x16x16xi1>, vector<8x16x16xf32>
    %cst_420 = arith.constant dense<0xFF800000> : vector<8x16xf32>
    %1541 = vector.multi_reduction <maximumf>, %1540, %cst_420 [1] : vector<8x16x16xf32> to vector<8x16xf32>
    %1542 = arith.cmpi sle, %1531, %1527 : i32
    %cst_421 = arith.constant 0xFF800000 : f32
    %1543 = vector.shape_cast %1230 : vector<1x16xi1> to vector<1x16xi1>
    %1544 = vector.broadcast %1543 : vector<1x16xi1> to vector<8x16xi1>
    %1545 = vector.broadcast %cst_421 : f32 to vector<8x16xf32>
    %1546 = arith.select %1544, %1541, %1545 : vector<8x16xi1>, vector<8x16xf32>
    %cst_422 = arith.constant dense<0xFF800000> : vector<8xf32>
    %1547 = vector.multi_reduction <maximumf>, %1546, %cst_422 [1] : vector<8x16xf32> to vector<8xf32>
    %1548 = vector.shape_cast %1547 : vector<8xf32> to vector<8x1xf32>
    %1549 = arith.ori %1542, %1231 : i1
    %cst_423 = arith.constant 0.000000e+00 : f32
    %1550 = vector.broadcast %cst_423 : f32 to vector<8x1xf32>
    %1551 = arith.select %1549, %1550, %1548 : vector<8x1xf32>
    %c12_i32_424 = arith.constant 12 : i32
    %1552 = vector.broadcast %c12_i32_424 : i32 to vector<1x16xi32>
    %1553 = arith.cmpi eq, %2, %1552 : vector<1x16xi32>
    %1554 = vector.shape_cast %1553 : vector<1x16xi1> to vector<1x16xi1>
    %1555 = vector.broadcast %1554 : vector<1x16xi1> to vector<8x16xi1>
    %1556 = vector.shape_cast %1551 : vector<8x1xf32> to vector<8x1xf32>
    %1557 = vector.broadcast %1556 : vector<8x1xf32> to vector<8x16xf32>
    %1558 = arith.select %1555, %1557, %1523 : vector<8x16xi1>, vector<8x16xf32>
    %cst_425 = arith.constant 0xFF800000 : f32
    %1559 = vector.shape_cast %1244 : vector<1x16xi1> to vector<1x16xi1>
    %1560 = vector.broadcast %1559 : vector<1x16xi1> to vector<8x16xi1>
    %1561 = vector.broadcast %cst_425 : f32 to vector<8x16xf32>
    %1562 = arith.select %1560, %1541, %1561 : vector<8x16xi1>, vector<8x16xf32>
    %cst_426 = arith.constant dense<0xFF800000> : vector<8xf32>
    %1563 = vector.multi_reduction <maximumf>, %1562, %cst_426 [1] : vector<8x16xf32> to vector<8xf32>
    %1564 = vector.shape_cast %1563 : vector<8xf32> to vector<8x1xf32>
    %1565 = arith.ori %1542, %1245 : i1
    %cst_427 = arith.constant 0.000000e+00 : f32
    %1566 = vector.broadcast %cst_427 : f32 to vector<8x1xf32>
    %1567 = arith.select %1565, %1566, %1564 : vector<8x1xf32>
    %c13_i32_428 = arith.constant 13 : i32
    %1568 = vector.broadcast %c13_i32_428 : i32 to vector<1x16xi32>
    %1569 = arith.cmpi eq, %2, %1568 : vector<1x16xi32>
    %1570 = vector.shape_cast %1569 : vector<1x16xi1> to vector<1x16xi1>
    %1571 = vector.broadcast %1570 : vector<1x16xi1> to vector<8x16xi1>
    %1572 = vector.shape_cast %1567 : vector<8x1xf32> to vector<8x1xf32>
    %1573 = vector.broadcast %1572 : vector<8x1xf32> to vector<8x16xf32>
    %1574 = arith.select %1571, %1573, %1558 : vector<8x16xi1>, vector<8x16xf32>
    %cst_429 = arith.constant 0xFF800000 : f32
    %1575 = vector.shape_cast %1258 : vector<1x16xi1> to vector<1x16xi1>
    %1576 = vector.broadcast %1575 : vector<1x16xi1> to vector<8x16xi1>
    %1577 = vector.broadcast %cst_429 : f32 to vector<8x16xf32>
    %1578 = arith.select %1576, %1541, %1577 : vector<8x16xi1>, vector<8x16xf32>
    %cst_430 = arith.constant dense<0xFF800000> : vector<8xf32>
    %1579 = vector.multi_reduction <maximumf>, %1578, %cst_430 [1] : vector<8x16xf32> to vector<8xf32>
    %1580 = vector.shape_cast %1579 : vector<8xf32> to vector<8x1xf32>
    %1581 = arith.ori %1542, %1259 : i1
    %cst_431 = arith.constant 0.000000e+00 : f32
    %1582 = vector.broadcast %cst_431 : f32 to vector<8x1xf32>
    %1583 = arith.select %1581, %1582, %1580 : vector<8x1xf32>
    %c14_i32_432 = arith.constant 14 : i32
    %1584 = vector.broadcast %c14_i32_432 : i32 to vector<1x16xi32>
    %1585 = arith.cmpi eq, %2, %1584 : vector<1x16xi32>
    %1586 = vector.shape_cast %1585 : vector<1x16xi1> to vector<1x16xi1>
    %1587 = vector.broadcast %1586 : vector<1x16xi1> to vector<8x16xi1>
    %1588 = vector.shape_cast %1583 : vector<8x1xf32> to vector<8x1xf32>
    %1589 = vector.broadcast %1588 : vector<8x1xf32> to vector<8x16xf32>
    %1590 = arith.select %1587, %1589, %1574 : vector<8x16xi1>, vector<8x16xf32>
    %cst_433 = arith.constant 0xFF800000 : f32
    %1591 = vector.shape_cast %1272 : vector<1x16xi1> to vector<1x16xi1>
    %1592 = vector.broadcast %1591 : vector<1x16xi1> to vector<8x16xi1>
    %1593 = vector.broadcast %cst_433 : f32 to vector<8x16xf32>
    %1594 = arith.select %1592, %1541, %1593 : vector<8x16xi1>, vector<8x16xf32>
    %cst_434 = arith.constant dense<0xFF800000> : vector<8xf32>
    %1595 = vector.multi_reduction <maximumf>, %1594, %cst_434 [1] : vector<8x16xf32> to vector<8xf32>
    %1596 = vector.shape_cast %1595 : vector<8xf32> to vector<8x1xf32>
    %1597 = arith.ori %1542, %1273 : i1
    %cst_435 = arith.constant 0.000000e+00 : f32
    %1598 = vector.broadcast %cst_435 : f32 to vector<8x1xf32>
    %1599 = arith.select %1597, %1598, %1596 : vector<8x1xf32>
    %c15_i32_436 = arith.constant 15 : i32
    %1600 = vector.broadcast %c15_i32_436 : i32 to vector<1x16xi32>
    %1601 = arith.cmpi eq, %2, %1600 : vector<1x16xi32>
    %1602 = vector.shape_cast %1601 : vector<1x16xi1> to vector<1x16xi1>
    %1603 = vector.broadcast %1602 : vector<1x16xi1> to vector<8x16xi1>
    %1604 = vector.shape_cast %1599 : vector<8x1xf32> to vector<8x1xf32>
    %1605 = vector.broadcast %1604 : vector<8x1xf32> to vector<8x16xf32>
    %1606 = arith.select %1603, %1605, %1590 : vector<8x16xi1>, vector<8x16xf32>
    %1607 = arith.truncf %1606 : vector<8x16xf32> to vector<8x16xbf16>
    %c3 = arith.constant 3 : index
    %c0_437 = arith.constant 0 : index
    %c0_438 = arith.constant 0 : index
    %1608 = vector.load %arg4[%c3, %c0_437, %c0_438] : memref<4x8x16xbf16, #tpu.memory_space<vmem>>, vector<1x8x16xbf16>
    %1609 = vector.shape_cast %1608 : vector<1x8x16xbf16> to vector<8x16xbf16>
    %1610 = vector.shape_cast %1607 : vector<8x16xbf16> to vector<1x8x16xbf16>
    tpu.vector_store %arg4[%c3, %c0_437, %c0_438], %1610 {strides = array<i32>} : memref<4x8x16xbf16, #tpu.memory_space<vmem>>, vector<1x8x16xbf16>,
    return
  }
  func.func @transform_0(%arg0: i32, %arg1: memref<8xi32, #tpu.memory_space<smem>>, %arg2: memref<128xi32, #tpu.memory_space<smem>>) -> (i32, i32, i32, i32) {
    %c0_i32 = arith.constant 0 : i32
    %c0_i32_0 = arith.constant 0 : i32
    %c0_i32_1 = arith.constant 0 : i32
    %c0_i32_2 = arith.constant 0 : i32
    %c0_i32_3 = arith.constant 0 : i32
    return %c0_i32, %c0_i32_0, %c0_i32_1, %c0_i32_2 : i32, i32, i32, i32
  }
  func.func @transform_1(%arg0: i32, %arg1: memref<8xi32, #tpu.memory_space<smem>>, %arg2: memref<128xi32, #tpu.memory_space<smem>>) -> (i32, i32, i32) {
    %c0_i32 = arith.constant 0 : i32
    %c0_i32_0 = arith.constant 0 : i32
    %c0_i32_1 = arith.constant 0 : i32
    return %arg0, %c0_i32, %c0_i32_0 : i32, i32, i32
  }
}

</mosaic_0001>

<bundles_post_ra>
// kernel: tpu_custom_call.1
= control target key start
LH: loop header
LB: loop body
LE: loop exit
PB: predicated region body
PF: predicated region fallthrough
CT: control target
= control target key end

     0   :  { %s7345_s0 = inlined_call_operand.hbm [shape: s32[8], index: 0, kind: input, shape index: {}]   ;;  %s7346_s2 = inlined_call_operand.hbm [shape: f32[2,8,16,16], index: 2, kind: input, shape index: {}]   ;;  %s7347_s3 = inlined_call_operand.hbm [shape: bf16[8,8,16], index: 3, kind: output, shape index: {}]   ;;  %s7348_s1 = inlined_call_operand.vmem [shape: s32[128], index: 1, kind: input, shape index: {}]  }
   0x1   :  { %7621 = sst [smem:[#allocation110_spill]] %s7346_s2  ;;  %s3295_s14 = scalar_lea.hbm %s7345_s0, 16 }
   0x2   :  { %7622 = sst [smem:[#allocation111_spill]] %s7347_s3  ;;  %p3296_p0 = scmp.ne.s32.totalorder %s7345_s0, %s3295_s14 }
   0x3   :  { %p3299_p1 = scmp.lt.u32.totalorder %s3295_s14, %s7345_s0 }
   0x5   :  { %p3301_p2 = pnand %p3299_p1, %p3296_p0 }
   0x7   :  { %3304 = shalt.err (!%p3301_p2)  }
   0x8   :  { %s3415_s19 = smov [#allocation3]   ;;  %s10_s24 = sshll.u32 %s7348_s1, 4  ;;  %s11_s24 = int_to_ptr.vmem [resolvable:$true] %s10_s24 }
   0x9   :  { %9 = dma.hbm_to_smem %s7345_s0, 16, %s3415_s19, [#allocation2] }
   0xa   :  { %s3305_s25 = scalar_lea.vmem %s11_s24, 16  ;;  %p3310_p4 = scmp.lt.s32.totalorder %s11_s24, %s11_s24 }
   0xb   :  { %p3306_p3 = scmp.ne.s32.totalorder %s11_s24, %s3305_s25  ;;  %p3311_p5 = scmp.lt.s32.totalorder %s3305_s25, %s3305_s25 }
   0xd   :  { %p3312_p6 = por %p3311_p5, %p3310_p4 }
   0xf   :  { %p3313_p7 = pnand %p3312_p6, %p3306_p3 }
  0x11   :  { %3316 = shalt.err (!%p3313_p7)  }
  0x12   :  { %s3416_s26 = smov [#allocation4]  }
  0x13   :  { %13 = dma.vmem_to_smem %s11_s24, 16, %s3416_s26, [#allocation2] }
  0x14   :  { %3389 = dma.done.wait [#allocation2], 32 }
  0x15   :  { %3390 = vsyncadd [#allocation2], 4294967264 }
  0x16   :  { %15 = sfence }
  0x17   :  { %16 = vsyncpa [#allocation6], 0 }
  0x18   :  { %17 = vsyncpa [#allocation7], 0 }
  0x19   :  { %19 = vsyncpa [#allocation7 + $0x1], 0  ;;  %s3458_s0 = smov 0   ;;  %s3460_s27 = smov 0  }
  0x1a   :  { %s3462_s1 = smov 0   ;;  %s3464_s28 = smov 0  }
  0x1b LB: > { %7623 = sst [smem:[#allocation12_spill]] %s3401_s0  ;;  %s3479_s29 = sadd.s32 4294967295, %s3413_s28   ;;  %s3413_s28 = sphi %s3464_s28, %s8541_s28   ;;  %s3409_s1 = sphi %s3462_s1, %s8544_s1   ;;  %s3405_s27 = sphi %s3460_s27, %s8543_s27   ;;  %s3401_s0 = sphi %s3458_s0, %s8542_s0  }
  0x1c   : > { %7624 = sst [smem:[#allocation13_spill]] %s3405_s27  ;;  %s3126_s30 = sadd.s32 4294967294, %s3413_s28  }
  0x1d   : > { %7625 = sst [smem:[#allocation14_spill]] %s3409_s1  ;;  %s3483_s4 = sadd.s32 1, %s3413_s28  }
  0x1e   : > { %7626 = sst [smem:[#allocation15_spill]] %s3413_s28  ;;  %s53_s5 = sadd.s32 1, %s3409_s1 }
  0x1f   : > { %7627 = sst [smem:[#allocation16_spill]] %s3479_s29  ;;  %s50_s6 = ssub.s32 %s3413_s28, %s3483_s4 }
  0x20   : > { %7628 = sst [smem:[#allocation17_spill]] %s3483_s4  ;;  %p63_p8 = scmp.ne.s32.totalorder %s3409_s1, %s3405_s27 }
  0x21   : > { %p51_p9 = scmp.eq.s32.totalorder %s50_s6, 0  ;;  %p64_p10 = scmp.eq.s32.totalorder %s3479_s29, 1 }
  0x22   : > { %p69_p11 = scmp.ne.s32.totalorder %s3405_s27, %s3401_s0  ;;  %p70_p12 = scmp.eq.s32.totalorder %s3126_s30, 1 }
  0x23   : > { %s3494_s7 = scalar_select %p51_p9, %s3409_s1, %s53_s5  }
  0x24   : > { %p3496_p13 = por %p64_p10, %p63_p8  ;;  %p3500_p0 = por %p70_p12, %p69_p11 }
  0x25   : > { %7629 = sst [smem:[#allocation18_spill]] %s3494_s7  ;;  %p3127_p1 = scmp.ge.s32.totalorder %s3413_s28, 1 }
  0x26   : > { %s7630_s8 = scalar_select %p3496_p13, 1, 0 }
  0x27   : > { %s7632_s9 = scalar_select %p3500_p0, 1, 0 }
  0x28   : > { %7631 = sst [smem:[#allocation19_spill]] %s7630_s8  ;;  %p77_p2 = scmp.lt.s32.totalorder %s3413_s28, 3 }
  0x29   : > { %7633 = sst [smem:[#allocation20_spill]] %s7632_s9  ;;  %p7349_p3 = scmp.eq.s32.totalorder %s3479_s29, 0 }
  0x2a   : > { %p3507_p4 = pnand %p3127_p1, %p77_p2  ;;  %s3417_s11 = smov [#allocation5]  }
  0x2b   : > { %s89_s12 = sshll.u32 %s3417_s11, 4  ;;  %s7636_s2 = sld [smem:[#allocation110_spill]]  ;;  %s90_s12 = int_to_ptr.vmem [resolvable:$true] %s89_s12 }
  0x2c   : > { %s7634_s10 = scalar_select %p3507_p4, 1, 0 }
  0x2d   : > { %p3165_p5 = pneg %p3507_p4 }
  0x2f   : > { %p3515_p6 = pnand %p7349_p3, %p3165_p5 }
  0x31   : > { %s3317_s16 = scalar_lea.hbm %s7636_s2, 4096  ;;  %p3319_p8 = pneg %p3515_p6 }
  0x32   : > { %p3318_p7 = scmp.ne.s32.totalorder %s7636_s2, %s3317_s16  ;;  %p3324_p11 = scmp.lt.u32.totalorder %s3317_s16, %s7636_s2 }
  0x34   : > { %p3320_p9 = pnand %p3319_p8, %p3318_p7 }
  0x36   : > { %p3321_p10 = pneg %p3320_p9 }
  0x38   : > { %p3326_p12 = pnand %p3324_p11, %p3321_p10 }
  0x3a   : > { %3329 = shalt.err (!%p3326_p12)
}
  0x3b   : > { %s3330_s21 = scalar_lea.vmem %s90_s12, 4096  ;;  %p3338_p3 = scmp.lt.s32.totalorder %s90_s12, %s90_s12 }
  0x3c   : > { %p3331_p1 = scmp.ne.s32.totalorder %s90_s12, %s3330_s21  ;;  %p3339_p0 = scmp.lt.s32.totalorder %s3330_s21, %s3330_s21 }
  0x3e   : > { %p3333_p2 = pnand %p3331_p1, %p3319_p8  ;;  %p3340_p13 = por %p3339_p0, %p3338_p3 }
  0x40   : > { %p3334_p5 = pneg %p3333_p2 }
  0x42   : > { %p3341_p4 = pnand %p3340_p13, %p3334_p5 }
  0x44   : > { %3344 = shalt.err (!%p3341_p4)
}
  0x45   : > { %s3418_s22 = smov 128   ;;  %s3419_s23 = smov 8  }
  0x46   : > { %3168 = dma.hbm_to_vmem [thread:$0]  (!%p3515_p6), %s7636_s2, 4096, %s90_s12, [#allocation6], %s3418_s22, %s3418_s22, %s3419_s23  }
  0x47   : > { %p7637_p7 = scmp.ne.s32.totalorder %s7634_s10, 0 }
  0x49   : > { %105 = sbr.rel (%p7637_p7) target bundleno = 789 (0x315), region = 24 }
  0x50   : > { %p7638_p9 = scmp.eq.s32.totalorder %s3479_s29, 0 }
  0x52   : > { %3392 = dma.done.wait (%p7638_p9), [#allocation6], 4096   ;;  %p7639_p8 = pmov %p7638_p9 }
  0x53   : > { %s3542_s26 = sshll.u32 %s3479_s29, 2  ;;  %s3545_s30 = sshll.u32 %s3479_s29, 6  ;;  %v121_v0 = vlaneseq  ;;  %vm7425_vm5 = vcmask 130048   ;;  %vm7423_vm7 = vcmask 1041409   ;;  %vm7355_vm8 = vcmask 1042434  }
  0x54   : > { %3394 = vsyncadd (%p7639_p8), [#allocation6], 4294963200  ;;  %s127_s5 = sld [smem:[#allocation3 + %s3542_s26]]  ;;  %s167_s6 = sadd.s32 10, %s3545_s30  ;;  %vm7354_vm9 = vcmask 1043459   ;;  %vm7353_vm10 = vcmask 1044484  }
  0x55   : > { %s3549_s10 = sld [smem:[#allocation4 + %s167_s6]]  ;;  %s169_s11 = sadd.s32 14, %s3545_s30  ;;  %v3559_v1 = vshrl.u32 %v121_v0, 7  ;;  %v3615_v22 = vand.u32 127, %v121_v0  ;;  %vm7352_vm13 = vcmask 1045509  }
  0x56   : > { %s3552_s12 = sld [smem:[#allocation4 + %s169_s11]]  ;;  %s188_s14 = sadd.s32 4, %s3545_s30 }
  0x57   : > { %s3555_s13 = sld [smem:[#allocation4 + %s3545_s30]]  ;;  %s147_s15 = sadd.s32 8, %s3545_s30  ;;  %v3572_v2 = vadd.s32 8, %v3559_v1  ;;  %7644 = vst [vmem:[#allocation21_spill] sm:$0xff] %v3615_v22 }
  0x58   : > { %s3561_s16 = sld [smem:[#allocation4 + %s188_s14]]  ;;  %s149_s18 = sadd.s32 12, %s3545_s30 }
  0x59   : > { %s3563_s17 = sld [smem:[#allocation4 + %s147_s15]]  ;;  %s177_s19 = sadd.s32 11, %s3545_s30 }
  0x5a   : > { %s3133_s20 = sshll.u32 %s127_s5, 7  ;;  %s3567_s21 = sld [smem:[#allocation4 + %s149_s18]] }
  0x5b   : > { %s3569_s22 = sld [smem:[#allocation4 + %s177_s19]]  ;;  %s129_s23 = scalar_lea.vmem [#allocation5], %s3133_s20  ;;  %v171_v11 = vstv %s3549_s10 }
  0x5c   : > { %v3575_v4 = vld [vmem:[%s129_s23] sm:$0xff]  ;;  %v3577_v5 = vld [vmem:[%s129_s23 + $0x10] sm:$0xff]  ;;  %v3580_v7 = vld [vmem:[%s129_s23 + $0x8] sm:$0xff]  ;;  %v173_v16 = vstv %s3552_s12  ;;  %s179_s24 = sadd.s32 15, %s3545_s30  ;;  %s157_s5 = sadd.s32 9, %s3545_s30  ;;  %vm3710_vm11 = vcmp.ge.s32.totalorder %v3615_v22, %v171_v11 }
  0x5d   : > { %v190_v3 = vstv %s3555_s13  ;;  %v3582_v8 = vld [vmem:[%s129_s23 + $0x18] sm:$0xff]  ;;  %v3584_v9 = vld [vmem:[%s129_s23 + $0x20] sm:$0xff]  ;;  %v3586_v10 = vld [vmem:[%s129_s23 + $0x28] sm:$0xff]  ;;  %s3702_s25 = sld [smem:[#allocation4 + %s179_s24]]  ;;  %s159_s6 = sadd.s32 13, %s3545_s30  ;;  %vm3717_vm12 = vcmp.lt.s32.totalorder %v3615_v22, %v173_v16 }
  0x5e   : > { %v193_v6 = vstv %s3561_s16  ;;  %vm3590_vm0 = vcmp.ge.s32.totalorder %v3559_v1, %v190_v3  ;;  %v3595_v13 = vld [vmem:[%s129_s23 + $0x30] sm:$0xff]  ;;  %v3597_v14 = vld [vmem:[%s129_s23 + $0x38] sm:$0xff]  ;;  %v3599_v15 = vld [vmem:[%s129_s23 + $0x40] sm:$0xff]  ;;  %vm3603_vm2 = vcmp.ge.s32.totalorder %v3572_v2, %v190_v3  ;;  %s375_s11 = sadd.s32 1, %s3545_s30  ;;  %s377_s14 = sadd.s32 5, %s3545_s30 }
  0x5f   : > { %vm194_vm1 = vcmp.lt.s32.totalorder %v3559_v1, %v193_v6  ;;  %vm195_vm3 = vcmp.lt.s32.totalorder %v3572_v2, %v193_v6  ;;  %v3608_v18 = vld [vmem:[%s129_s23 + $0x48] sm:$0xff]  ;;  %v3610_v19 = vld [vmem:[%s129_s23 + $0x50] sm:$0xff]  ;;  %v3612_v20 = vld [vmem:[%s129_s23 + $0x58] sm:$0xff]  ;;  %v151_v21 = vstv %s3563_s17  ;;  %s3737_s15 = sld [smem:[#allocation4 + %s157_s5]]  ;;  %s550_s5 = sadd.s32 6, %s3545_s30 }
  0x60   : > { %v3617_v23 = vld [vmem:[%s129_s23 + $0x60] sm:$0xff]  ;;  %v3619_v24 = vld [vmem:[%s129_s23 + $0x68] sm:$0xff]  ;;  %vm3623_vm4 = vmand %vm3590_vm0, %vm194_vm1  ;;  %v153_v26 = vstv %s3567_s21  ;;  %vm3726_vm14 = vcmp.ge.s32.totalorder %v3615_v22, %v151_v21  ;;  %s3740_s18 = sld [smem:[#allocation4 + %s159_s6]]  ;;  %vm7422_vm0 = vcmask 1046534   ;;  %s4269_s8 = sadd.s32 48, %s3545_s30 }
  0x61   : > { %v181_v27 = vstv %s3569_s22  ;;  %v3629_v28 = vld [vmem:[%s129_s23 + $0x70] sm:$0xff]  ;;  %v3631_v29 = vld [vmem:[%s129_s23 + $0x78] sm:$0xff]  ;;  %vm3635_vm6 = vmand %vm3603_vm2, %vm195_vm3  ;;  %v202_v31 = vsel %vm3623_vm4, %v3575_v4, -inf  ;;  %v204_v32 = vsel %vm3623_vm4, %v3577_v5, -inf  ;;  %v206_v33 = vsel %vm3623_vm4, %v3584_v9, -inf  ;;  %s3742_s19 = sld [smem:[#allocation4 + %s375_s11]]  ;;  %p7524_p13 = scmp.le.s32.totalorder %s3552_s12, %s3549_s10 }
  0x62   : > { %v208_v34 = vsel %vm3623_vm4, %v3595_v13, -inf  ;;  %v203_v35 = vsel %vm3635_vm6, %v3580_v7, -inf  ;;  %v205_v36 = vsel %vm3635_vm6, %v3582_v8, -inf  ;;  %v207_v37 = vsel %vm3635_vm6, %v3586_v10, -inf  ;;  %s3744_s20 = sld [smem:[#allocation4 + %s377_s14]]  ;;  %s548_s23 = sadd.s32 2, %s3545_s30  ;;  %vm3767_vm3 = vmand %vm3710_vm11, %vm3717_vm12 }
  0x63   : > { %v209_v38 = vsel %vm3635_vm6, %v3597_v14, -inf  ;;  %v210_v39 = vsel %vm3623_vm4, %v3599_v15, -inf  ;;  %v211_v40 = vsel %vm3635_vm6, %v3608_v18, -inf  ;;  %v212_v41 = vsel %vm3623_vm4, %v3610_v19, -inf  ;;  %s3747_s24 = sld [smem:[#allocation4 + %s548_s23]]  ;;  %s721_s11 = sadd.s32 3, %s3545_s30 }
  0x64   : > { %v213_v42 = vsel %vm3635_vm6, %v3612_v20, -inf  ;;  %v214_v43 = vsel %vm3623_vm4, %v3617_v23, -inf  ;;  %v215_v44 = vsel %vm3635_vm6, %v3619_v24, -inf  ;;  %v216_v45 = vsel %vm3623_vm4, %v3629_v28, -inf  ;;  %s3897_s6 = sld [smem:[#allocation4 + %s550_s5]]  ;;  %s723_s23 = sadd.s32 7, %s3545_s30 }
  0x65   : > { %v217_v46 = vsel %vm3635_vm6, %v3631_v29, -inf  ;;  %v219_v47 = vsel %vm7425_vm5, %v202_v31, -inf  ;;  %v220_v48 = vsel %vm7425_vm5, %v203_v35, -inf  ;;  %v228_v49 = vsel %vm7425_vm5, %v204_v32, -inf  ;;  %7657 = sst [smem:[#allocation22_spill]] %s3737_s15  ;;  %s4017_s5 = sadd.s32 16, %s3545_s30 }
  0x66   : > { %v229_v50 = vsel %vm7425_vm5, %v205_v36, -inf  ;;  %v221_v51 = vmax.f32 %v219_v47, %v220_v48  ;;  %v237_v53 = vsel %vm7425_vm5, %v206_v33, -inf  ;;  %v238_v54 = vsel %vm7425_vm5, %v207_v37, -inf  ;;  %7658 = sst [smem:[#allocation23_spill]] %s3740_s18  ;;  %s930_s2 = sadd.s32 13, %s4017_s5 }
  0x67   : > { %v230_v52 = vmax.f32 %v228_v49, %v229_v50  ;;  %v239_v55 = vmax.f32 %v237_v53, %v238_v54  ;;  %v246_v56 = vsel %vm7425_vm5, %v208_v34, -inf  ;;  %v247_v57 = vsel %vm7425_vm5, %v209_v38, -inf  ;;  %7659 = sst [smem:[#allocation24_spill]] %s3742_s19  ;;  %s959_s1 = sadd.s32 4, %s4017_s5 }
  0x68   : > { %v255_v58 = vsel %vm7425_vm5, %v210_v39, -inf  ;;  %v222_v59 = vrot.slane %v221_v51, 4  ;;  %v248_v61 = vmax.f32 %v246_v56, %v247_v57  ;;  %v256_v62 = vsel %vm7425_vm5, %v211_v40, -inf  ;;  %7660 = sst [smem:[#allocation25_spill]] %s3744_s20  ;;  %s920_s28 = sadd.s32 12, %s4017_s5 }
  0x69   : > { %v231_v60 = vrot.slane %v230_v52, 4  ;;  %v240_v63 = vrot.slane %v239_v55, 4  ;;  %v257_v0 = vmax.f32 %v255_v58, %v256_v62  ;;  %v264_v3 = vsel %vm7425_vm5, %v212_v41, -inf  ;;  %7661 = sst [smem:[#allocation26_spill]] %s3747_s24  ;;  %s2348_s27 = sadd.s32 8, %s4269_s8 }
  0x6a   : > { %v265_v6 = vsel %vm7425_vm5, %v213_v42, -inf  ;;  %v223_v12 = vmax.f32 %v221_v51, %v222_v59  ;;  %v249_v25 = vrot.slane %v248_v61, 4  ;;  %v273_v33 = vsel %vm7425_vm5, %v214_v43, -inf  ;;  %7680 = sst [smem:[#allocation27_spill]] %s3897_s6  ;;  %p291_p0 = scmp.le.s32.totalorder %s3561_s16, %s3555_s13 }
  0x6b   : > { %v232_v17 = vmax.f32 %v230_v52, %v231_v60  ;;  %v266_v30 = vmax.f32 %v264_v3, %v265_v6  ;;  %v241_v31 = vmax.f32 %v239_v55, %v240_v63  ;;  %v258_v32 = vrot.slane %v257_v0, 4  ;;  %s4012_s14 = sld [smem:[#allocation4 + %s721_s11]]  ;;  %s928_s11 = sadd.s32 9, %s4017_s5 }
  0x6c   : > { %v274_v34 = vsel %vm7425_vm5, %v215_v44, -inf  ;;  %v224_v35 = vrot.slane %v223_v12, 2  ;;  %v250_v37 = vmax.f32 %v248_v61, %v249_v25  ;;  %v282_v44 = vsel %vm7425_vm5, %v216_v45, -inf  ;;  %s4022_s7 = sld [smem:[#allocation4 + %s723_s23]]  ;;  %p7526_p3 = scmp.le.s32.totalorder %s3567_s21, %s3563_s17 }
  0x6d   : > { %v233_v36 = vrot.slane %v232_v17, 2  ;;  %v267_v38 = vrot.slane %v266_v30, 4  ;;  %v242_v41 = vrot.slane %v241_v31, 2  ;;  %v259_v42 = vmax.f32 %v257_v0, %v258_v32  ;;  %s4025_s4 = sld [smem:[#allocation4 + %s928_s11]]  ;;  %p7531_p4 = scmp.le.s32.totalorder %s3702_s25, %s3569_s22 }
  0x6e   : > { %v275_v43 = vmax.f32 %v273_v33, %v274_v34  ;;  %v225_v47 = vmax.f32 %v223_v12, %v224_v35  ;;  %v251_v49 = vrot.slane %v250_v37, 2  ;;  %vm3733_vm15 = vcmp.lt.s32.totalorder %v3615_v22, %v153_v26  ;;  %s4027_s9 = sld [smem:[#allocation4 + %s930_s2]]  ;;  %s897_s2 = sadd.s32 1, %s3542_s26 }
  0x6f   : > { %v234_v48 = vmax.f32 %v232_v17, %v233_v36  ;;  %v268_v11 = vmax.f32 %v266_v30, %v267_v38  ;;  %v243_v45 = vmax.f32 %v241_v31, %v242_v41  ;;  %v260_v51 = vrot.slane %v259_v42, 2  ;;  %vm3779_vm4 = vmand %vm3726_vm14, %vm3733_vm15  ;;  %s4030_s23 = sld [smem:[#allocation4 + %s4017_s5]]  ;;  %p5866_p6 = por %p291_p0, %p7524_p13 }
  0x70   : > { %v276_v52 = vrot.slane %v275_v43, 4  ;;  %v283_v53 = vsel %vm7425_vm5, %v217_v46, -inf  ;;  %v226_v21 = vrot.slane %v225_v47, 1  ;;  %v252_v55 = vmax.f32 %v250_v37, %v251_v49  ;;  %s4032_s0 = sld [smem:[#allocation4 + %s959_s1]]  ;;  %p5897_p11 = por %p291_p0, %p7526_p3 }
  0x71   : > { %v235_v54 = vrot.slane %v234_v48, 1  ;;  %v269_v56 = vrot.slane %v268_v11, 2  ;;  %v244_v26 = vrot.slane %v243_v45, 1  ;;  %v261_v57 = vmax.f32 %v259_v42, %v260_v51  ;;  %7693 = sst [smem:[#allocation28_spill]] %s4012_s14  ;;  %p5907_p12 = por %p291_p0, %p7531_p4 }
  0x72   : > { %v277_v58 = vmax.f32 %v275_v43, %v276_v52  ;;  %v284_v59 = vmax.f32 %v282_v44, %v283_v53  ;;  %v227_v60 = vmax.f32 %v225_v47, %v226_v21  ;;  %v253_v46 = vrot.slane %v252_v55, 1  ;;  %7694 = sst [smem:[#allocation29_spill]] %s4022_s7  ;;  %s8157_s16 = sld [smem:[#allocation26_spill]] }
  0x73   : > { %v236_v61 = vmax.f32 %v234_v48, %v235_v54  ;;  %v270_v62 = vmax.f32 %v268_v11, %v269_v56  ;;  %v245_v63 = vmax.f32 %v243_v45, %v244_v26  ;;  %v262_v0 = vrot.slane %v261_v57, 1  ;;  %7695 = sst [smem:[#allocation30_spill]] %s4025_s4 }
  0x74   : > { %v278_v3 = vrot.slane %v277_v58, 2  ;;  %v285_v6 = vrot.slane %v284_v59, 4  ;;  %v254_v12 = vmax.f32 %v252_v55, %v253_v46  ;;  %v183_v30 = vstv %s3702_s25  ;;  %7696 = sst [smem:[#allocation31_spill]] %s4027_s9 }
  0x75   : > { %v271_v17 = vrot.slane %v270_v62, 1  ;;  %v303_v25 = vsel %vm7423_vm7, %v236_v61, %v227_v60  ;;  %v263_v31 = vmax.f32 %v261_v57, %v262_v0  ;;  %vm3756_vm1 = vcmp.ge.s32.totalorder %v3615_v22, %v181_v27  ;;  %7697 = sst [smem:[#allocation32_spill]] %s4030_s23 }
  0x76   : > { %v279_v32 = vmax.f32 %v277_v58, %v278_v3  ;;  %v286_v33 = vmax.f32 %v284_v59, %v285_v6  ;;  %v305_v34 = vsel %vm7355_vm8, %v245_v63, %v303_v25  ;;  %v161_v38 = vstv %s3737_s15  ;;  %7698 = sst [smem:[#allocation33_spill]] %s4032_s0 }
  0x77   : > { %v272_v35 = vmax.f32 %v270_v62, %v271_v17  ;;  %v307_v36 = vsel %vm7354_vm9, %v254_v12, %v305_v34  ;;  %vm184_vm2 = vcmp.lt.s32.totalorder %v3615_v22, %v183_v30  ;;  %v163_v47 = vstv %s3740_s18  ;;  %s4133_s1 = sld [smem:[#allocation3 + %s897_s2]] }
  0x78   : > { %v280_v41 = vrot.slane %v279_v32, 1  ;;  %v287_v42 = vrot.slane %v286_v33, 2  ;;  %v309_v43 = vsel %vm7353_vm10, %v263_v31, %v307_v36  ;;  %v379_v48 = vstv %s3742_s19  ;;  %vm3791_vm12 = vmand %vm3756_vm1, %vm184_vm2 }
  0x79   : > { %v311_v27 = vsel %vm7352_vm13, %v272_v35, %v309_v43  ;;  %v382_v49 = vstv %s3744_s20  ;;  %vm3784_vm6 = vcmp.ge.s32.totalorder %v3615_v22, %v161_v38  ;;  %vm380_vm11 = vcmp.ge.s32.totalorder %v3559_v1, %v379_v48 }
  0x7a   : > { %v281_v11 = vmax.f32 %v279_v32, %v280_v41  ;;  %v288_v45 = vmax.f32 %v286_v33, %v287_v42  ;;  %vm3796_vm13 = vcmp.lt.s32.totalorder %v3615_v22, %v163_v47  ;;  %vm381_vm14 = vcmp.ge.s32.totalorder %v3572_v2, %v379_v48 }
  0x7b   : > { %vm383_vm15 = vcmp.lt.s32.totalorder %v3559_v1, %v382_v49  ;;  %vm384_vm10 = vcmp.lt.s32.totalorder %v3572_v2, %v382_v49  ;;  %vm7424_vm9 = vcmask 1047559   ;;  %v552_v21 = vstv %s3747_s24 }
  0x7c   : > { %v289_v16 = vrot.slane %v288_v45, 1  ;;  %v313_v52 = vsel %vm7422_vm0, %v281_v11, %v311_v27  ;;  %vm3804_vm8 = vmand %vm380_vm11, %vm383_vm15  ;;  %vm7685_vm2 = vcmask 1042434  }
  0x7d   : > { %vm3809_vm1 = vmand %vm381_vm14, %vm384_vm10  ;;  %v391_v55 = vsel %vm3804_vm8, %v3575_v4, -inf  ;;  %v393_v56 = vsel %vm3804_vm8, %v3577_v5, -inf  ;;  %v395_v26 = vsel %vm3804_vm8, %v3584_v9, -inf  ;;  %v397_v57 = vsel %vm3804_vm8, %v3595_v13, -inf  ;;  %s3135_s11 = sshll.u32 %s4133_s1, 7  ;;  %s2327_s1 = sadd.s32 3, %s3542_s26 }
  0x7e   : > { %v290_v58 = vmax.f32 %v288_v45, %v289_v16  ;;  %vm3829_vm10 = vmand %vm3784_vm6, %vm3796_vm13  ;;  %v392_v60 = vsel %vm3809_vm1, %v3580_v7, -inf  ;;  %v394_v61 = vsel %vm3809_vm1, %v3582_v8, -inf  ;;  %v396_v46 = vsel %vm3809_vm1, %v3586_v10, -inf  ;;  %s4146_s2 = scalar_lea.vmem [#allocation5], %s3135_s11  ;;  %s918_s11 = sadd.s32 8, %s4017_s5 }
  0x7f   : > { %v398_v62 = vsel %vm3809_vm1, %v3597_v14, -inf  ;;  %v399_v63 = vsel %vm3804_vm8, %v3599_v15, -inf  ;;  %v400_v0 = vsel %vm3809_vm1, %v3608_v18, -inf  ;;  %v401_v3 = vsel %vm3804_vm8, %v3610_v19, -inf  ;;  %s4266_s3 = sld [smem:[#allocation3 + %s2327_s1]] }
  0x80   : > { %v315_v6 = vsel %vm7424_vm9, %v290_v58, %v313_v52  ;;  %v402_v12 = vsel %vm3809_vm1, %v3612_v20, -inf  ;;  %v403_v17 = vsel %vm3804_vm8, %v3617_v23, -inf  ;;  %v404_v25 = vsel %vm3809_vm1, %v3619_v24, -inf  ;;  %s4271_s29 = sld [smem:[#allocation4 + %s918_s11]]  ;;  %s2350_s11 = sadd.s32 12, %s4269_s8 }
  0x81   : > { %v347_v30 = vsel %vm3767_vm3, %v315_v6, -inf  ;;  %v317_v31 = vsel %vm3779_vm4, %v315_v6, -inf  ;;  %v362_v32 = vsel %vm3791_vm12, %v315_v6, -inf  ;;  %v332_v33 = vsel %vm3829_vm10, %v315_v6, -inf  ;;  %s4275_s1 = sld [smem:[#allocation4 + %s920_s28]] }
  0x82   : > { %v348_v34 = vsel %vm7425_vm5, %v347_v30, -inf  ;;  %v318_v35 = vsel %vm7425_vm5, %v317_v31, -inf  ;;  %v363_v36 = vsel %vm7425_vm5, %v362_v32, -inf  ;;  %v333_v37 = vsel %vm7425_vm5, %v332_v33, -inf  ;;  %s4287_s28 = sld [smem:[#allocation4 + %s2348_s27]] }
  0x83   : > { %349 = vmax.xlane.f32.xlu1 %v348_v34  ;;  %319 = vmax.xlane.f32.xlu0 %v318_v35  ;;  %v405_v38 = vsel %vm3804_vm8, %v3629_v28, -inf  ;;  %v406_v41 = vsel %vm3809_vm1, %v3631_v29, -inf  ;;  %v407_v42 = vsel %vm7425_vm5, %v391_v55, -inf  ;;  %v408_v43 = vsel %vm7425_vm5, %v392_v60, -inf  ;;  %s4298_s20 = sld [smem:[#allocation4 + %s2350_s11]]  ;;  %s2358_s11 = sadd.s32 9, %s4269_s8 }
  0x84   : > { %v409_v27 = vmax.f32 %v407_v42, %v408_v43  ;;  %v416_v47 = vsel %vm7425_vm5, %v393_v56, -inf  ;;  %v417_v48 = vsel %vm7425_vm5, %v394_v61, -inf  ;;  %v425_v49 = vsel %vm7425_vm5, %v395_v26, -inf }
  0x85   : > { %v418_v11 = vmax.f32 %v416_v47, %v417_v48  ;;  %v426_v45 = vsel %vm7425_vm5, %v396_v46, -inf  ;;  %v434_v39 = vsel %vm7425_vm5, %v397_v57, -inf  ;;  %v435_v50 = vsel %vm7425_vm5, %v398_v62, -inf  ;;  %s3141_s27 = sshll.u32 %s4266_s3, 7 }
  0x86   : > { %v410_v16 = vrot.slane %v409_v27, 4  ;;  %v427_v52 = vmax.f32 %v425_v49, %v426_v45  ;;  %v436_v53 = vmax.f32 %v434_v39, %v435_v50  ;;  %v443_v54 = vsel %vm7425_vm5, %v399_v63, -inf  ;;  %7718 = sst [smem:[#allocation34_spill]] %s4271_s29 }
  0x87   : > { %364 = vmax.xlane.f32.xlu1 %v363_v36  ;;  %334 = vmax.xlane.f32.xlu0 %v333_v37  ;;  %v419_v55 = vrot.slane %v418_v11, 4  ;;  %v444_v56 = vsel %vm7425_vm5, %v400_v0, -inf  ;;  %v452_v58 = vsel %vm7425_vm5, %v401_v3, -inf  ;;  %v453_v26 = vsel %vm7425_vm5, %v402_v12, -inf  ;;  %7719 = sst [smem:[#allocation35_spill]] %s4275_s1 }
  0x88   : > { %v411_v60 = vmax.f32 %v409_v27, %v410_v16  ;;  %v428_v57 = vrot.slane %v427_v52, 4  ;;  %v437_v61 = vrot.slane %v436_v53, 4  ;;  %v445_v46 = vmax.f32 %v443_v54, %v444_v56  ;;  %7720 = sst [smem:[#allocation36_spill]] %s4287_s28 }
  0x89   : > { %v420_v62 = vmax.f32 %v418_v11, %v419_v55  ;;  %v454_v6 = vmax.f32 %v452_v58, %v453_v26  ;;  %v461_v63 = vsel %vm7425_vm5, %v403_v17, -inf  ;;  %v462_v30 = vsel %vm7425_vm5, %v404_v25, -inf  ;;  %7723 = sst [smem:[#allocation39_spill]] %s4298_s20 }
  0x8a   : > { %v412_v31 = vrot.slane %v411_v60, 2  ;;  %v429_v32 = vmax.f32 %v427_v52, %v428_v57  ;;  %v438_v0 = vmax.f32 %v436_v53, %v437_v61  ;;  %v446_v33 = vrot.slane %v445_v46, 4 }
  0x8b   : > { %vm3902_vm8 = vcmp.ge.s32.totalorder %v3559_v1, %v552_v21  ;;  %v421_v12 = vrot.slane %v420_v62, 2  ;;  %v455_v34 = vrot.slane %v454_v6, 4  ;;  %v463_v35 = vmax.f32 %v461_v63, %v462_v30 }
  0x8c   : > { %v470_v36 = vsel %vm7425_vm5, %v405_v38, -inf  ;;  %vm3910_vm13 = vcmp.ge.s32.totalorder %v3572_v2, %v552_v21  ;;  %v413_v25 = vmax.f32 %v411_v60, %v412_v31  ;;  %v430_v37 = vrot.slane %v429_v32, 2 }
  0x8d   : > { %v439_v42 = vrot.slane %v438_v0, 2  ;;  %v447_v43 = vmax.f32 %v445_v46, %v446_v33  ;;  %v422_v27 = vmax.f32 %v420_v62, %v421_v12  ;;  %v456_v47 = vmax.f32 %v454_v6, %v455_v34 }
  0x8e   : > { %v464_v48 = vrot.slane %v463_v35, 4  ;;  %v471_v49 = vsel %vm7425_vm5, %v406_v41, -inf  ;;  %v414_v11 = vrot.slane %v413_v25, 1  ;;  %v431_v45 = vmax.f32 %v429_v32, %v430_v37 }
  0x8f   : > { %v440_v39 = vmax.f32 %v438_v0, %v439_v42  ;;  %v448_v50 = vrot.slane %v447_v43, 2  ;;  %v423_v38 = vrot.slane %v422_v27, 1  ;;  %v457_v16 = vrot.slane %v456_v47, 2 }
  0x90   : > { %v465_v21 = vmax.f32 %v463_v35, %v464_v48  ;;  %v472_v52 = vmax.f32 %v470_v36, %v471_v49  ;;  %v415_v53 = vmax.f32 %v413_v25, %v414_v11  ;;  %v432_v54 = vrot.slane %v431_v45, 1 }
  0x91   : > { %v441_v55 = vrot.slane %v440_v39, 1  ;;  %v449_v56 = vmax.f32 %v447_v43, %v448_v50  ;;  %v424_v58 = vmax.f32 %v422_v27, %v423_v38  ;;  %v458_v26 = vmax.f32 %v456_v47, %v457_v16 }
  0x92   : > { %v466_v60 = vrot.slane %v465_v21, 2  ;;  %v473_v57 = vrot.slane %v472_v52, 4  ;;  %v433_v61 = vmax.f32 %v431_v45, %v432_v54  ;;  %v555_v62 = vstv %s3897_s6 }
  0x93   : > { %v442_v46 = vmax.f32 %v440_v39, %v441_v55  ;;  %v450_v41 = vrot.slane %v449_v56, 1  ;;  %v459_v6 = vrot.slane %v458_v26, 1  ;;  %v488_v31 = vsel %vm7423_vm7, %v424_v58, %v415_v53 }
  0x94   : > { %v467_v63 = vmax.f32 %v465_v21, %v466_v60  ;;  %v474_v30 = vmax.f32 %v472_v52, %v473_v57  ;;  %v489_v0 = vsel %vm7685_vm2, %v433_v61, %v488_v31  ;;  %vm556_vm6 = vcmp.lt.s32.totalorder %v3559_v1, %v555_v62 }
  0x95   : > { %v451_v32 = vmax.f32 %v449_v56, %v450_v41  ;;  %vm557_vm11 = vcmp.lt.s32.totalorder %v3572_v2, %v555_v62  ;;  %v460_v33 = vmax.f32 %v458_v26, %v459_v6  ;;  %vm7686_vm14 = vcmask 1043459   ;;  %vm3923_vm15 = vmand %vm3902_vm8, %vm556_vm6 }
  0x96   : > { %v468_v12 = vrot.slane %v467_v63, 1  ;;  %v475_v34 = vrot.slane %v474_v30, 2  ;;  %v490_v35 = vsel %vm7686_vm14, %v442_v46, %v489_v0  ;;  %vm7689_vm1 = vcmask 1044484   ;;  %vm3930_vm2 = vmand %vm3910_vm13, %vm557_vm11 }
  0x97   : > { %v491_v25 = vsel %vm7689_vm1, %v451_v32, %v490_v35  ;;  %v564_v42 = vsel %vm3923_vm15, %v3575_v4, -inf  ;;  %v566_v3 = vsel %vm3923_vm15, %v3577_v5, -inf  ;;  %v568_v43 = vsel %vm3923_vm15, %v3584_v9, -inf  ;;  %vm7700_vm6 = vmmov %vm7686_vm14 }
  0x98   : > { %v469_v27 = vmax.f32 %v467_v63, %v468_v12  ;;  %v476_v47 = vmax.f32 %v474_v30, %v475_v34  ;;  %vm7692_vm8 = vcmask 1045509   ;;  %v565_v48 = vsel %vm3930_vm2, %v3580_v7, -inf }
  0x99   : > { %v492_v17 = vsel %vm7692_vm8, %v460_v33, %v491_v25  ;;  %v567_v49 = vsel %vm3930_vm2, %v3582_v8, -inf  ;;  %v569_v11 = vsel %vm3930_vm2, %v3586_v10, -inf  ;;  %v570_v45 = vsel %vm3923_vm15, %v3595_v13, -inf }
  0x9a   : > { %v571_v39 = vsel %vm3930_vm2, %v3597_v14, -inf  ;;  %v477_v50 = vrot.slane %v476_v47, 1  ;;  %v493_v38 = vsel %vm7422_vm0, %v469_v27, %v492_v17  ;;  %v572_v16 = vsel %vm3923_vm15, %v3599_v15, -inf }
  0x9b   : > { %v573_v21 = vsel %vm3930_vm2, %v3608_v18, -inf  ;;  %v574_v52 = vsel %vm3923_vm15, %v3610_v19, -inf  ;;  %v575_v53 = vsel %vm3930_vm2, %v3612_v20, -inf  ;;  %v576_v54 = vsel %vm3923_vm15, %v3617_v23, -inf }
  0x9c   : > { %v577_v55 = vsel %vm3930_vm2, %v3619_v24, -inf  ;;  %v478_v56 = vmax.f32 %v476_v47, %v477_v50  ;;  %v578_v58 = vsel %vm3923_vm15, %v3629_v28, -inf  ;;  %v579_v26 = vsel %vm3930_vm2, %v3631_v29, -inf  ;;  %vm7703_vm15 = vmmov %vm7689_vm1 }
  0x9d   : > { %v580_v60 = vsel %vm7425_vm5, %v564_v42, -inf  ;;  %v581_v57 = vsel %vm7425_vm5, %v565_v48, -inf  ;;  %v589_v61 = vsel %vm7425_vm5, %v566_v3, -inf  ;;  %v590_v46 = vsel %vm7425_vm5, %v567_v49, -inf }
  0x9e   : > { %v598_v41 = vsel %vm7425_vm5, %v568_v43, -inf  ;;  %v494_v62 = vsel %vm7424_vm9, %v478_v56, %v493_v38  ;;  %v582_v6 = vmax.f32 %v580_v60, %v581_v57  ;;  %v591_v63 = vmax.f32 %v589_v61, %v590_v46 }
  0x9f   : > { %v599_v30 = vsel %vm7425_vm5, %v569_v11, -inf  ;;  %v509_v31 = vsel %vm3829_vm10, %v494_v62, -inf  ;;  %v496_v32 = vsel %vm3779_vm4, %v494_v62, -inf  ;;  %v535_v0 = vsel %vm3791_vm12, %v494_v62, -inf }
  0xa0   : > { %v522_v33 = vsel %vm3767_vm3, %v494_v62, -inf  ;;  %v510_v12 = vsel %vm7425_vm5, %v509_v31, -inf  ;;  %v497_v34 = vsel %vm7425_vm5, %v496_v32, -inf  ;;  %v536_v35 = vsel %vm7425_vm5, %v535_v0, -inf }
  0xa1   : > { %v523_v36 = vsel %vm7425_vm5, %v522_v33, -inf  ;;  %511 = vmax.xlane.f32.xlu1 %v510_v12  ;;  %498 = vmax.xlane.f32.xlu0 %v497_v34  ;;  %v583_v25 = vrot.slane %v582_v6, 4  ;;  %v592_v37 = vrot.slane %v591_v63, 4  ;;  %v600_v42 = vmax.f32 %v598_v41, %v599_v30 }
  0xa2   : > { %v607_v3 = vsel %vm7425_vm5, %v570_v45, -inf  ;;  %v608_v43 = vsel %vm7425_vm5, %v571_v39, -inf  ;;  %v616_v27 = vsel %vm7425_vm5, %v572_v16, -inf  ;;  %v617_v47 = vsel %vm7425_vm5, %v573_v21, -inf }
  0xa3   : > { %v625_v17 = vsel %vm7425_vm5, %v574_v52, -inf  ;;  %v584_v48 = vmax.f32 %v582_v6, %v583_v25  ;;  %v593_v49 = vmax.f32 %v591_v63, %v592_v37  ;;  %v601_v11 = vrot.slane %v600_v42, 4 }
  0xa4   : > { %v609_v50 = vmax.f32 %v607_v3, %v608_v43  ;;  %v618_v38 = vmax.f32 %v616_v27, %v617_v47  ;;  %v626_v56 = vsel %vm7425_vm5, %v575_v53, -inf  ;;  %v634_v45 = vsel %vm7425_vm5, %v576_v54, -inf }
  0xa5   : > { %v635_v39 = vsel %vm7425_vm5, %v577_v55, -inf  ;;  %537 = vmax.xlane.f32.xlu1 %v536_v35  ;;  %524 = vmax.xlane.f32.xlu0 %v523_v36  ;;  %v585_v16 = vrot.slane %v584_v48, 2  ;;  %v594_v21 = vrot.slane %v593_v49, 2  ;;  %v602_v60 = vmax.f32 %v600_v42, %v601_v11 }
  0xa6   : > { %v610_v52 = vrot.slane %v609_v50, 4  ;;  %v619_v57 = vrot.slane %v618_v38, 4  ;;  %v627_v61 = vmax.f32 %v625_v17, %v626_v56  ;;  %v636_v46 = vmax.f32 %v634_v45, %v635_v39 }
  0xa7   : > { %v643_v41 = vsel %vm7425_vm5, %v578_v58, -inf  ;;  %v586_v53 = vmax.f32 %v584_v48, %v585_v16  ;;  %v595_v54 = vmax.f32 %v593_v49, %v594_v21  ;;  %v603_v55 = vrot.slane %v602_v60, 2 }
  0xa8   : > { %v611_v62 = vmax.f32 %v609_v50, %v610_v52  ;;  %v620_v6 = vmax.f32 %v618_v38, %v619_v57  ;;  %v628_v63 = vrot.slane %v627_v61, 4  ;;  %v637_v30 = vrot.slane %v636_v46, 4 }
  0xa9   : > { %v644_v31 = vsel %vm7425_vm5, %v579_v26, -inf  ;;  %v587_v32 = vrot.slane %v586_v53, 1  ;;  %v596_v0 = vrot.slane %v595_v54, 1  ;;  %v604_v58 = vmax.f32 %v602_v60, %v603_v55 }
  0xaa   : > { %v612_v33 = vrot.slane %v611_v62, 2  ;;  %v621_v12 = vrot.slane %v620_v6, 2  ;;  %v629_v34 = vmax.f32 %v627_v61, %v628_v63  ;;  %v638_v35 = vmax.f32 %v636_v46, %v637_v30 }
  0xab   : > { %v645_v36 = vmax.f32 %v643_v41, %v644_v31  ;;  %v588_v25 = vmax.f32 %v586_v53, %v587_v32  ;;  %v597_v37 = vmax.f32 %v595_v54, %v596_v0  ;;  %v605_v42 = vrot.slane %v604_v58, 1 }
  0xac   : > { %v613_v3 = vmax.f32 %v611_v62, %v612_v33  ;;  %v622_v26 = vmax.f32 %v620_v6, %v621_v12  ;;  %v630_v43 = vrot.slane %v629_v34, 2  ;;  %v639_v27 = vrot.slane %v638_v35, 2 }
  0xad   : > { %v646_v47 = vrot.slane %v645_v36, 4  ;;  %v606_v17 = vmax.f32 %v604_v58, %v605_v42  ;;  %v661_v49 = vsel %vm7423_vm7, %v597_v37, %v588_v25  ;;  %v725_v11 = vstv %s4012_s14 }
  0xae   : > { %v614_v48 = vrot.slane %v613_v3, 1  ;;  %v623_v50 = vrot.slane %v622_v26, 1  ;;  %v631_v38 = vmax.f32 %v629_v34, %v630_v43  ;;  %v640_v56 = vmax.f32 %v638_v35, %v639_v27 }
  0xaf   : > { %v647_v45 = vmax.f32 %v645_v36, %v646_v47  ;;  %vm7699_vm13 = vcmask 1042434   ;;  %vm726_vm11 = vcmp.ge.s32.totalorder %v3559_v1, %v725_v11  ;;  %vm4040_vm14 = vcmp.ge.s32.totalorder %v3572_v2, %v725_v11 }
  0xb0   : > { %v615_v39 = vmax.f32 %v613_v3, %v614_v48  ;;  %v662_v16 = vsel %vm7699_vm13, %v606_v17, %v661_v49  ;;  %v624_v21 = vmax.f32 %v622_v26, %v623_v50  ;;  %v632_v60 = vrot.slane %v631_v38, 1 }
  0xb1   : > { %v641_v52 = vrot.slane %v640_v56, 1  ;;  %v648_v57 = vrot.slane %v647_v45, 2  ;;  %v728_v41 = vstv %s4022_s7  ;;  %v932_v6 = vstv %s4025_s4  ;;  %s4290_s7 = sld [smem:[#allocation4 + %s4269_s8]] }
  0xb2   : > { %v663_v61 = vsel %vm7700_vm6, %v615_v39, %v662_v16  ;;  %v633_v53 = vmax.f32 %v631_v38, %v632_v60  ;;  %vm729_vm1 = vcmp.lt.s32.totalorder %v3559_v1, %v728_v41  ;;  %vm730_vm2 = vcmp.lt.s32.totalorder %v3572_v2, %v728_v41 }
  0xb3   : > { %v642_v54 = vmax.f32 %v640_v56, %v641_v52  ;;  %v649_v55 = vmax.f32 %v647_v45, %v648_v57  ;;  %v664_v62 = vsel %vm7703_vm15, %v624_v21, %v663_v61  ;;  %v934_v63 = vstv %s4027_s9  ;;  %vm4051_vm13 = vmand %vm726_vm11, %vm729_vm1  ;;  %s2370_s9 = sadd.s32 14, %s4269_s8 }
  0xb4   : > { %v665_v31 = vsel %vm7692_vm8, %v633_v53, %v664_v62  ;;  %v961_v0 = vstv %s4030_s23  ;;  %v964_v58 = vstv %s4032_s0  ;;  %vm4060_vm6 = vmand %vm4040_vm14, %vm730_vm2  ;;  %v737_v34 = vsel %vm4051_vm13, %v3575_v4, -inf  ;;  %s2389_s0 = sadd.s32 4, %s4269_s8  ;;  %s4285_s23 = sadd.s32 32, %s3545_s30 }
  0xb5   : > { %v650_v30 = vrot.slane %v649_v55, 1  ;;  %v666_v33 = vsel %vm7422_vm0, %v642_v54, %v665_v31  ;;  %v739_v35 = vsel %vm4051_vm13, %v3577_v5, -inf  ;;  %v741_v36 = vsel %vm4051_vm13, %v3584_v9, -inf  ;;  %s4292_s14 = sld [smem:[#allocation4 + %s2389_s0]]  ;;  %s1633_s30 = sadd.s32 8, %s4285_s23 }
  0xb6   : > { %v738_v37 = vsel %vm4060_vm6, %v3580_v7, -inf  ;;  %v740_v42 = vsel %vm4060_vm6, %v3582_v8, -inf  ;;  %v742_v4 = vsel %vm4060_vm6, %v3586_v10, -inf  ;;  %v743_v5 = vsel %vm4051_vm13, %v3595_v13, -inf  ;;  %s1635_s6 = sadd.s32 12, %s4285_s23  ;;  %s1674_s24 = sadd.s32 4, %s4285_s23 }
  0xb7   : > { %v651_v25 = vmax.f32 %v649_v55, %v650_v30  ;;  %v744_v9 = vsel %vm4060_vm6, %v3597_v14, -inf  ;;  %v745_v7 = vsel %vm4051_vm13, %v3599_v15, -inf  ;;  %v746_v8 = vsel %vm4060_vm6, %v3608_v18, -inf  ;;  %7721 = sst [smem:[#allocation37_spill]] %s4290_s7  ;;  %s1843_s15 = sadd.s32 5, %s4285_s23 }
  0xb8   : > { %v747_v10 = vsel %vm4051_vm13, %v3610_v19, -inf  ;;  %v748_v13 = vsel %vm4060_vm6, %v3612_v20, -inf  ;;  %v749_v14 = vsel %vm4051_vm13, %v3617_v23, -inf  ;;  %v750_v47 = vsel %vm4060_vm6, %v3619_v24, -inf  ;;  %s4301_s0 = sld [smem:[#allocation4 + %s1633_s30]] }
  0xb9   : > { %v667_v3 = vsel %vm7424_vm9, %v651_v25, %v666_v33  ;;  %v751_v17 = vsel %vm4051_vm13, %v3629_v28, -inf  ;;  %v752_v48 = vsel %vm4060_vm6, %v3631_v29, -inf  ;;  %v753_v49 = vsel %vm7425_vm5, %v737_v34, -inf  ;;  %s4304_s19 = sld [smem:[#allocation4 + %s4285_s23]] }
  0xba   : > { %v682_v15 = vsel %vm3829_vm10, %v667_v3, -inf  ;;  %v669_v18 = vsel %vm3779_vm4, %v667_v3, -inf  ;;  %v708_v26 = vsel %vm3791_vm12, %v667_v3, -inf  ;;  %v695_v19 = vsel %vm3767_vm3, %v667_v3, -inf  ;;  %s4307_s18 = sld [smem:[#allocation4 + %s1635_s6]]  ;;  %s1612_s6 = sadd.s32 2, %s3542_s26 }
  0xbb   : > { %v683_v43 = vsel %vm7425_vm5, %v682_v15, -inf  ;;  %v670_v20 = vsel %vm7425_vm5, %v669_v18, -inf  ;;  %v709_v27 = vsel %vm7425_vm5, %v708_v26, -inf  ;;  %v696_v23 = vsel %vm7425_vm5, %v695_v19, -inf  ;;  %7722 = sst [smem:[#allocation38_spill]] %s4292_s14 }
  0xbc   : > { %684 = vmax.xlane.f32.xlu1 %v683_v43  ;;  %671 = vmax.xlane.f32.xlu0 %v670_v20  ;;  %v754_v11 = vsel %vm7425_vm5, %v738_v37, -inf  ;;  %v762_v50 = vsel %vm7425_vm5, %v739_v35, -inf  ;;  %v763_v38 = vsel %vm7425_vm5, %v740_v42, -inf  ;;  %v771_v56 = vsel %vm7425_vm5, %v741_v36, -inf  ;;  %s4309_s3 = sld [smem:[#allocation4 + %s1674_s24]]  ;;  %s4340_s24 = scalar_lea.vmem [#allocation5], %s3141_s27 }
  0xbd   : > { %v755_v45 = vmax.f32 %v753_v49, %v754_v11  ;;  %v764_v24 = vmax.f32 %v762_v50, %v763_v38  ;;  %v772_v39 = vsel %vm7425_vm5, %v742_v4, -inf  ;;  %v780_v28 = vsel %vm7425_vm5, %v743_v5, -inf  ;;  %s4453_s26 = sld [smem:[#allocation3 + %s1612_s6]] }
  0xbe   : > { %v773_v16 = vmax.f32 %v771_v56, %v772_v39  ;;  %v781_v29 = vsel %vm7425_vm5, %v744_v9, -inf  ;;  %v789_v21 = vsel %vm7425_vm5, %v745_v7, -inf  ;;  %v790_v60 = vsel %vm7425_vm5, %v746_v8, -inf  ;;  %7724 = sst [smem:[#allocation40_spill]] %s4301_s0 }
  0xbf   : > { %v756_v52 = vrot.slane %v755_v45, 4  ;;  %v765_v57 = vrot.slane %v764_v24, 4  ;;  %v782_v61 = vmax.f32 %v780_v28, %v781_v29  ;;  %v791_v46 = vmax.f32 %v789_v21, %v790_v60  ;;  %v901_v21 = vld [vmem:[%s4146_s2] sm:$0xff]  ;;  %v902_v60 = vld [vmem:[%s4146_s2 + $0x8] sm:$0xff]  ;;  %7725 = sst [smem:[#allocation41_spill]] %s4304_s19 }
  0xc0   : > { %710 = vmax.xlane.f32.xlu1 %v709_v27  ;;  %697 = vmax.xlane.f32.xlu0 %v696_v23  ;;  %v774_v41 = vrot.slane %v773_v16, 4  ;;  %v798_v53 = vsel %vm7425_vm5, %v747_v10, -inf  ;;  %v799_v54 = vsel %vm7425_vm5, %v748_v13, -inf  ;;  %v807_v55 = vsel %vm7425_vm5, %v749_v14, -inf  ;;  %7726 = sst [smem:[#allocation42_spill]] %s4307_s18 }
  0xc1   : > { %v757_v62 = vmax.f32 %v755_v45, %v756_v52  ;;  %v766_v30 = vmax.f32 %v764_v24, %v765_v57  ;;  %v783_v31 = vrot.slane %v782_v61, 4  ;;  %v792_v32 = vrot.slane %v791_v46, 4  ;;  %s4465_s27 = sld [smem:[#allocation4 + %s2358_s11]]  ;;  %s1643_s11 = sadd.s32 9, %s4285_s23 }
  0xc2   : > { %v775_v33 = vmax.f32 %v773_v16, %v774_v41  ;;  %v800_v12 = vmax.f32 %v798_v53, %v799_v54  ;;  %v808_v34 = vsel %vm7425_vm5, %v750_v47, -inf  ;;  %v816_v35 = vsel %vm7425_vm5, %v751_v17, -inf  ;;  %v903_v53 = vld [vmem:[%s4146_s2 + $0x10] sm:$0xff]  ;;  %v905_v54 = vld [vmem:[%s4146_s2 + $0x20] sm:$0xff]  ;;  %7727 = sst [smem:[#allocation43_spill]] %s4309_s3 }
  0xc3   : > { %v758_v36 = vrot.slane %v757_v62, 2  ;;  %v767_v25 = vrot.slane %v766_v30, 2  ;;  %v784_v37 = vmax.f32 %v782_v61, %v783_v31  ;;  %v793_v42 = vmax.f32 %v791_v46, %v792_v32  ;;  %v906_v31 = vld [vmem:[%s4146_s2 + $0x28] sm:$0xff]  ;;  %v908_v32 = vld [vmem:[%s4146_s2 + $0x38] sm:$0xff]  ;;  %s3138_s30 = sshll.u32 %s4453_s26, 7  ;;  %s2360_s26 = sadd.s32 13, %s4269_s8 }
  0xc4   : > { %v776_v4 = vrot.slane %v775_v33, 2  ;;  %v801_v5 = vrot.slane %v800_v12, 4  ;;  %v809_v9 = vmax.f32 %v807_v55, %v808_v34  ;;  %v817_v7 = vsel %vm7425_vm5, %v752_v48, -inf  ;;  %v4161_v55 = vld [vmem:[%s4146_s2 + $0x30] sm:$0xff]  ;;  %s4489_s6 = scalar_lea.vmem [#allocation5], %s3138_s30  ;;  %s4648_s30 = sld [smem:[#allocation4 + %s2360_s26]] }
  0xc5   : > { %v759_v8 = vmax.f32 %v757_v62, %v758_v36  ;;  %v768_v3 = vmax.f32 %v766_v30, %v767_v25  ;;  %v785_v10 = vrot.slane %v784_v37, 2  ;;  %v794_v13 = vrot.slane %v793_v42, 2  ;;  %v904_v30 = vld [vmem:[%s4146_s2 + $0x18] sm:$0xff]  ;;  %v909_v36 = vld [vmem:[%s4146_s2 + $0x40] sm:$0xff]  ;;  %v910_v25 = vld [vmem:[%s4146_s2 + $0x48] sm:$0xff]  ;;  %s1655_s26 = sadd.s32 14, %s4285_s23 }
  0xc6   : > { %v777_v14 = vmax.f32 %v775_v33, %v776_v4  ;;  %v802_v15 = vmax.f32 %v800_v12, %v801_v5  ;;  %v810_v18 = vrot.slane %v809_v9, 4  ;;  %v818_v26 = vmax.f32 %v816_v35, %v817_v7 }
  0xc7   : > { %v760_v19 = vrot.slane %v759_v8, 1  ;;  %v769_v43 = vrot.slane %v768_v3, 1  ;;  %v786_v20 = vmax.f32 %v784_v37, %v785_v10  ;;  %v795_v27 = vmax.f32 %v793_v42, %v794_v13  ;;  %v911_v37 = vld [vmem:[%s4146_s2 + $0x50] sm:$0xff]  ;;  %v912_v42 = vld [vmem:[%s4146_s2 + $0x58] sm:$0xff]  ;;  %v913_v13 = vld [vmem:[%s4146_s2 + $0x60] sm:$0xff]  ;;  %7752 = sst [smem:[#allocation46_spill]] %s4465_s27 }
  0xc8   : > { %v778_v23 = vrot.slane %v777_v14, 1  ;;  %v803_v47 = vrot.slane %v802_v15, 2  ;;  %v811_v17 = vmax.f32 %v809_v9, %v810_v18  ;;  %v819_v49 = vrot.slane %v818_v26, 4 }
  0xc9   : > { %v761_v11 = vmax.f32 %v759_v8, %v760_v19  ;;  %v770_v48 = vmax.f32 %v768_v3, %v769_v43  ;;  %v787_v50 = vrot.slane %v786_v20, 1  ;;  %v796_v38 = vrot.slane %v795_v27, 1 }
  0xca   : > { %v779_v56 = vmax.f32 %v777_v14, %v778_v23  ;;  %v804_v45 = vmax.f32 %v802_v15, %v803_v47  ;;  %v812_v24 = vrot.slane %v811_v17, 2  ;;  %v820_v39 = vmax.f32 %v818_v26, %v819_v49  ;;  %v914_v14 = vld [vmem:[%s4146_s2 + $0x68] sm:$0xff]  ;;  %v4204_v15 = vld [vmem:[%s4146_s2 + $0x70] sm:$0xff]  ;;  %v4209_v26 = vld [vmem:[%s4146_s2 + $0x78] sm:$0xff]  ;;  %7772 = sst [smem:[#allocation48_spill]] %s4648_s30 }
  0xcb   : > { %v788_v28 = vmax.f32 %v786_v20, %v787_v50  ;;  %v797_v16 = vmax.f32 %v795_v27, %v796_v38  ;;  %v834_v29 = vsel %vm7423_vm7, %v770_v48, %v761_v11  ;;  %vm4153_vm11 = vcmp.ge.s32.totalorder %v3559_v1, %v961_v0 }
  0xcc   : > { %v805_v57 = vrot.slane %v804_v45, 1  ;;  %v813_v61 = vmax.f32 %v811_v17, %v812_v24  ;;  %v821_v46 = vrot.slane %v820_v39, 2  ;;  %vm7710_vm14 = vcmask 1042434  }
  0xcd   : > { %v835_v41 = vsel %vm7710_vm14, %v779_v56, %v834_v29  ;;  %vm7711_vm15 = vcmask 1043459   ;;  %vm963_vm1 = vcmp.ge.s32.totalorder %v3572_v2, %v961_v0  ;;  %vm965_vm2 = vcmp.lt.s32.totalorder %v3559_v1, %v964_v58 }
  0xce   : > { %v836_v62 = vsel %vm7711_vm15, %v788_v28, %v835_v41  ;;  %vm966_vm8 = vcmp.lt.s32.totalorder %v3572_v2, %v964_v58  ;;  %v806_v33 = vmax.f32 %v804_v45, %v805_v57  ;;  %v814_v12 = vrot.slane %v813_v61, 1  ;;  %vm4181_vm6 = vmand %vm4153_vm11, %vm965_vm2 }
  0xcf   : > { %v822_v34 = vmax.f32 %v820_v39, %v821_v46  ;;  %vm7712_vm13 = vcmask 1044484   ;;  %vm4187_vm14 = vmand %vm963_vm1, %vm966_vm8  ;;  %v973_v4 = vsel %vm4181_vm6, %v901_v21, -inf  ;;  %v975_v5 = vsel %vm4181_vm6, %v903_v53, -inf }
  0xd0   : > { %v837_v35 = vsel %vm7712_vm13, %v797_v16, %v836_v62  ;;  %v977_v9 = vsel %vm4181_vm6, %v905_v54, -inf  ;;  %v979_v7 = vsel %vm4181_vm6, %v4161_v55, -inf  ;;  %v815_v8 = vmax.f32 %v813_v61, %v814_v12 }
  0xd1   : > { %v823_v3 = vrot.slane %v822_v34, 1  ;;  %vm7717_vm11 = vcmask 1045509   ;;  %v974_v18 = vsel %vm4187_vm14, %v902_v60, -inf  ;;  %v976_v19 = vsel %vm4187_vm14, %v904_v30, -inf }
  0xd2   : > { %v838_v10 = vsel %vm7717_vm11, %v806_v33, %v837_v35  ;;  %v978_v43 = vsel %vm4187_vm14, %v906_v31, -inf  ;;  %v980_v20 = vsel %vm4187_vm14, %v908_v32, -inf  ;;  %v981_v27 = vsel %vm4181_vm6, %v909_v36, -inf  ;;  %vm7737_vm2 = vmmov %vm7717_vm11 }
  0xd3   : > { %v824_v23 = vmax.f32 %v822_v34, %v823_v3  ;;  %v839_v47 = vsel %vm7422_vm0, %v815_v8, %v838_v10  ;;  %v982_v17 = vsel %vm4187_vm14, %v910_v25, -inf  ;;  %v983_v49 = vsel %vm4181_vm6, %v911_v37, -inf }
  0xd4   : > { %v984_v11 = vsel %vm4187_vm14, %v912_v42, -inf  ;;  %v985_v48 = vsel %vm4181_vm6, %v913_v13, -inf  ;;  %v986_v50 = vsel %vm4187_vm14, %v914_v14, -inf  ;;  %v987_v38 = vsel %vm4181_vm6, %v4204_v15, -inf }
  0xd5   : > { %v840_v56 = vsel %vm7424_vm9, %v824_v23, %v839_v47  ;;  %v988_v45 = vsel %vm4187_vm14, %v4209_v26, -inf  ;;  %v989_v24 = vsel %vm7425_vm5, %v973_v4, -inf  ;;  %v990_v39 = vsel %vm7425_vm5, %v974_v18, -inf }
  0xd6   : > { %v855_v28 = vsel %vm3829_vm10, %v840_v56, -inf  ;;  %v842_v16 = vsel %vm3779_vm4, %v840_v56, -inf  ;;  %v881_v29 = vsel %vm3791_vm12, %v840_v56, -inf  ;;  %v868_v21 = vsel %vm3767_vm3, %v840_v56, -inf  ;;  %vm7729_vm4 = vmmov %vm7711_vm15 }
  0xd7   : > { %v856_v60 = vsel %vm7425_vm5, %v855_v28, -inf  ;;  %v843_v52 = vsel %vm7425_vm5, %v842_v16, -inf  ;;  %v882_v57 = vsel %vm7425_vm5, %v881_v29, -inf  ;;  %v869_v61 = vsel %vm7425_vm5, %v868_v21, -inf  ;;  %vm7734_vm15 = vmmov %vm7712_vm13 }
  0xd8   : > { %857 = vmax.xlane.f32.xlu1 %v856_v60  ;;  %844 = vmax.xlane.f32.xlu0 %v843_v52  ;;  %v991_v59 = vmax.f32 %v989_v24, %v990_v39  ;;  %v998_v40 = vsel %vm7425_vm5, %v975_v5, -inf  ;;  %v999_v51 = vsel %vm7425_vm5, %v976_v19, -inf  ;;  %v1007_v44 = vsel %vm7425_vm5, %v977_v9, -inf }
  0xd9   : > { %v1000_v46 = vmax.f32 %v998_v40, %v999_v51  ;;  %v1008_v41 = vsel %vm7425_vm5, %v978_v43, -inf  ;;  %v1016_v53 = vsel %vm7425_vm5, %v979_v7, -inf  ;;  %v1017_v54 = vsel %vm7425_vm5, %v980_v20, -inf }
  0xda   : > { %v992_v55 = vrot.slane %v991_v59, 4  ;;  %v1009_v62 = vmax.f32 %v1007_v44, %v1008_v41  ;;  %v1018_v30 = vmax.f32 %v1016_v53, %v1017_v54  ;;  %v1025_v31 = vsel %vm7425_vm5, %v981_v27, -inf }
  0xdb   : > { %v1001_v32 = vrot.slane %v1000_v46, 4  ;;  %v1026_v33 = vsel %vm7425_vm5, %v982_v17, -inf  ;;  %v1034_v12 = vsel %vm7425_vm5, %v983_v49, -inf  ;;  %v1035_v34 = vsel %vm7425_vm5, %v984_v11, -inf }
  0xdc   : > { %883 = vmax.xlane.f32.xlu1 %v882_v57  ;;  %870 = vmax.xlane.f32.xlu0 %v869_v61  ;;  %v993_v35 = vmax.f32 %v991_v59, %v992_v55  ;;  %v1010_v36 = vrot.slane %v1009_v62, 4  ;;  %v1019_v25 = vrot.slane %v1018_v30, 4  ;;  %v1027_v0 = vmax.f32 %v1025_v31, %v1026_v33 }
  0xdd   : > { %v1002_v37 = vmax.f32 %v1000_v46, %v1001_v32  ;;  %v1036_v42 = vmax.f32 %v1034_v12, %v1035_v34  ;;  %v1043_v4 = vsel %vm7425_vm5, %v985_v48, -inf  ;;  %v1044_v5 = vsel %vm7425_vm5, %v986_v50, -inf }
  0xde   : > { %v994_v9 = vrot.slane %v993_v35, 2  ;;  %v1011_v7 = vmax.f32 %v1009_v62, %v1010_v36  ;;  %v1020_v8 = vmax.f32 %v1018_v30, %v1019_v25  ;;  %v1028_v3 = vrot.slane %v1027_v0, 4 }
  0xdf   : > { %v1003_v10 = vrot.slane %v1002_v37, 2  ;;  %v1037_v13 = vrot.slane %v1036_v42, 4  ;;  %v1045_v14 = vmax.f32 %v1043_v4, %v1044_v5  ;;  %v1052_v15 = vsel %vm7425_vm5, %v987_v38, -inf  ;;  %v2335_v4 = vld [vmem:[%s4340_s24 + $0x20] sm:$0xff] }
  0xe0   : > { %v995_v18 = vmax.f32 %v993_v35, %v994_v9  ;;  %v1012_v19 = vrot.slane %v1011_v7, 2  ;;  %v1021_v43 = vrot.slane %v1020_v8, 2  ;;  %v1029_v20 = vmax.f32 %v1027_v0, %v1028_v3  ;;  %v2333_v0 = vld [vmem:[%s4340_s24 + $0x10] sm:$0xff] }
  0xe1   : > { %v1004_v27 = vmax.f32 %v1002_v37, %v1003_v10  ;;  %v1038_v23 = vmax.f32 %v1036_v42, %v1037_v13  ;;  %v1046_v47 = vrot.slane %v1045_v14, 4  ;;  %v1053_v17 = vsel %vm7425_vm5, %v988_v45, -inf  ;;  %v2332_v37 = vld [vmem:[%s4340_s24 + $0x8] sm:$0xff]  ;;  %v2334_v42 = vld [vmem:[%s4340_s24 + $0x18] sm:$0xff]  ;;  %v2337_v13 = vld [vmem:[%s4340_s24 + $0x30] sm:$0xff] }
  0xe2   : > { %v996_v49 = vrot.slane %v995_v18, 1  ;;  %v1013_v11 = vmax.f32 %v1011_v7, %v1012_v19  ;;  %v1022_v48 = vmax.f32 %v1020_v8, %v1021_v43  ;;  %v1030_v50 = vrot.slane %v1029_v20, 2  ;;  %v2336_v10 = vld [vmem:[%s4340_s24 + $0x28] sm:$0xff]  ;;  %v2338_v43 = vld [vmem:[%s4340_s24 + $0x38] sm:$0xff] }
  0xe3   : > { %v1005_v38 = vrot.slane %v1004_v27, 1  ;;  %v1039_v58 = vrot.slane %v1038_v23, 2  ;;  %v1047_v26 = vmax.f32 %v1045_v14, %v1046_v47  ;;  %v1054_v56 = vmax.f32 %v1052_v15, %v1053_v17  ;;  %v2340_v47 = vld [vmem:[%s4340_s24 + $0x48] sm:$0xff] }
  0xe4   : > { %v997_v45 = vmax.f32 %v995_v18, %v996_v49  ;;  %v1014_v24 = vrot.slane %v1013_v11, 1  ;;  %v1023_v39 = vrot.slane %v1022_v48, 1  ;;  %v1031_v28 = vmax.f32 %v1029_v20, %v1030_v50  ;;  %v2339_v20 = vld [vmem:[%s4340_s24 + $0x40] sm:$0xff]  ;;  %v2341_v50 = vld [vmem:[%s4340_s24 + $0x50] sm:$0xff] }
  0xe5   : > { %v1006_v16 = vmax.f32 %v1004_v27, %v1005_v38  ;;  %v1040_v29 = vmax.f32 %v1038_v23, %v1039_v58  ;;  %v1048_v21 = vrot.slane %v1047_v26, 2  ;;  %v1055_v60 = vrot.slane %v1054_v56, 4  ;;  %v2342_v38 = vld [vmem:[%s4340_s24 + $0x58] sm:$0xff] }
  0xe6   : > { %v1015_v52 = vmax.f32 %v1013_v11, %v1014_v24  ;;  %v1024_v57 = vmax.f32 %v1022_v48, %v1023_v39  ;;  %v1032_v61 = vrot.slane %v1031_v28, 1  ;;  %v922_v59 = vstv %s4271_s29 }
  0xe7   : > { %v1041_v40 = vrot.slane %v1040_v29, 1  ;;  %v1049_v51 = vmax.f32 %v1047_v26, %v1048_v21  ;;  %v1056_v44 = vmax.f32 %v1054_v56, %v1055_v60  ;;  %v1072_v46 = vsel %vm7423_vm7, %v1006_v16, %v997_v45  ;;  %v2344_v16 = vld [vmem:[%s4340_s24 + $0x68] sm:$0xff] }
  0xe8   : > { %v1033_v41 = vmax.f32 %v1031_v28, %v1032_v61  ;;  %vm7728_vm3 = vcmask 1042434   ;;  %v924_v54 = vstv %s4275_s1  ;;  %vm4317_vm12 = vcmp.ge.s32.totalorder %v3615_v22, %v932_v6  ;;  %v2343_v28 = vld [vmem:[%s4340_s24 + $0x60] sm:$0xff] }
  0xe9   : > { %v1073_v53 = vsel %vm7728_vm3, %v1015_v52, %v1072_v46  ;;  %v1042_v55 = vmax.f32 %v1040_v29, %v1041_v40  ;;  %v1050_v62 = vrot.slane %v1049_v51, 1  ;;  %v1057_v30 = vrot.slane %v1056_v44, 2  ;;  %v2345_v29 = vld [vmem:[%s4340_s24 + $0x70] sm:$0xff] }
  0xea   : > { %v1074_v31 = vsel %vm7729_vm4, %v1024_v57, %v1073_v53  ;;  %vm4324_vm10 = vcmp.lt.s32.totalorder %v3615_v22, %v934_v63  ;;  %vm4330_vm1 = vcmp.ge.s32.totalorder %v3615_v22, %v922_v59  ;;  %vm4336_vm8 = vcmp.lt.s32.totalorder %v3615_v22, %v924_v54  ;;  %v2331_v63 = vld [vmem:[%s4340_s24] sm:$0xff]  ;;  %v2346_v59 = vld [vmem:[%s4340_s24 + $0x78] sm:$0xff] }
  0xeb   : > { %v1075_v12 = vsel %vm7734_vm15, %v1033_v41, %v1074_v31  ;;  %v1051_v35 = vmax.f32 %v1049_v51, %v1050_v62  ;;  %v1058_v36 = vmax.f32 %v1056_v44, %v1057_v30  ;;  %v2352_v5 = vstv %s4287_s28  ;;  %vm4354_vm13 = vmand %vm4317_vm12, %vm4324_vm10 }
  0xec   : > { %v1076_v6 = vsel %vm7737_vm2, %v1042_v55, %v1075_v12  ;;  %v2391_v9 = vstv %s4290_s7  ;;  %v2394_v7 = vstv %s4292_s14  ;;  %v7740_v8 = vmov 0  ;;  %vm4372_vm11 = vmand %vm4330_vm1, %vm4336_vm8  ;;  %s1653_s14 = sadd.s32 10, %s4285_s23  ;;  %s4654_s7 = sld [smem:[#allocation4 + %s1643_s11]] }
  0xed   : > { %v7741_v8 = vsel %vm4354_vm13, 4294967295, %v7740_v8  ;;  %v1059_v3 = vrot.slane %v1058_v36, 1  ;;  %v2354_v14 = vstv %s4298_s20  ;;  %vm2392_vm6 = vcmp.ge.s32.totalorder %v3559_v1, %v2391_v9  ;;  %s940_s20 = sadd.s32 14, %s4017_s5  ;;  %s4662_s1 = sld [smem:[#allocation4 + %s1653_s14]] }
  0xee   : > { %7742 = vst [vmem:[#allocation44_spill] sm:$0xff] %v7741_v8  ;;  %vm4363_vm14 = vcmp.ge.s32.totalorder %v3572_v2, %v2391_v9  ;;  %v1077_v18 = vsel %vm7422_vm0, %v1051_v35, %v1076_v6  ;;  %v7745_v19 = vmov 0  ;;  %vm2395_vm3 = vcmp.lt.s32.totalorder %v3559_v1, %v2394_v7  ;;  %s948_s14 = sadd.s32 11, %s4017_s5 }
  0xef   : > { %v7746_v19 = vsel %vm4372_vm11, 4294967295, %v7745_v19  ;;  %vm2396_vm4 = vcmp.lt.s32.totalorder %v3572_v2, %v2394_v7  ;;  %v1637_v27 = vstv %s4301_s0  ;;  %v1060_v23 = vmax.f32 %v1058_v36, %v1059_v3  ;;  %vm4382_vm12 = vmand %vm2392_vm6, %vm2395_vm3  ;;  %s950_s0 = sadd.s32 15, %s4017_s5  ;;  %s4692_s29 = sld [smem:[#allocation4 + %s948_s14]] }
  0xf0   : > { %7747 = vst [vmem:[#allocation45_spill] sm:$0xff] %v7746_v19  ;;  %v1639_v49 = vstv %s4307_s18  ;;  %v1676_v11 = vstv %s4304_s19  ;;  %v1679_v48 = vstv %s4309_s3  ;;  %vm4393_vm10 = vmand %vm4363_vm14, %vm2396_vm4  ;;  %v2403_v26 = vsel %vm4382_vm12, %v2331_v63, -inf  ;;  %s1645_s19 = sadd.s32 13, %s4285_s23  ;;  %s938_s3 = sadd.s32 10, %s4017_s5 }
  0xf1   : > { %v2405_v56 = vsel %vm4382_vm12, %v2333_v0, -inf  ;;  %v2407_v45 = vsel %vm4382_vm12, %v2335_v4, -inf  ;;  %v2409_v24 = vsel %vm4382_vm12, %v2337_v13, -inf  ;;  %v4406_v39 = vsel %vm7424_vm9, %v1060_v23, %v1077_v18  ;;  %s4660_s28 = sld [smem:[#allocation4 + %s1645_s19]] }
  0xf2   : > { %v2404_v21 = vsel %vm4393_vm10, %v2332_v37, -inf  ;;  %v2406_v60 = vsel %vm4393_vm10, %v2334_v42, -inf  ;;  %v2408_v52 = vsel %vm4393_vm10, %v2336_v10, -inf  ;;  %v1092_v57 = vsel %vm4354_vm13, %v4406_v39, -inf  ;;  %7773 = sst [smem:[#allocation49_spill]] %s4654_s7 }
  0xf3   : > { %v1080_v61 = vsel %vm4372_vm11, %v4406_v39, -inf  ;;  %v2410_v40 = vsel %vm4393_vm10, %v2338_v43, -inf  ;;  %v2411_v51 = vsel %vm4382_vm12, %v2339_v20, -inf  ;;  %v1093_v44 = vsel %vm7425_vm5, %v1092_v57, -inf  ;;  %7775 = sst [smem:[#allocation51_spill]] %s4662_s1 }
  0xf4   : > { %v1081_v46 = vsel %vm7425_vm5, %v1080_v61, -inf  ;;  %v2412_v41 = vsel %vm4393_vm10, %v2340_v47, -inf  ;;  %v2413_v53 = vsel %vm4382_vm12, %v2341_v50, -inf  ;;  %1094 = vmax.xlane.f32.xlu1 %v1093_v44  ;;  %v2414_v54 = vsel %vm4393_vm10, %v2342_v38, -inf  ;;  %s4683_s19 = sld [smem:[#allocation4 + %s1655_s26]]  ;;  %s2368_s26 = sadd.s32 10, %s4269_s8 }
  0xf5   : > { %1082 = vmax.xlane.f32.xlu0 %v1081_v46  ;;  %v2415_v55 = vsel %vm4382_vm12, %v2343_v28, -inf  ;;  %v2416_v62 = vsel %vm4393_vm10, %v2344_v16, -inf  ;;  %v2417_v30 = vsel %vm4382_vm12, %v2345_v29, -inf  ;;  %v2418_v31 = vsel %vm4393_vm10, %v2346_v59, -inf  ;;  %s4686_s11 = sld [smem:[#allocation4 + %s938_s3]]  ;;  %s2380_s3 = sadd.s32 15, %s4269_s8 }
  0xf6   : > { %v2419_v32 = vsel %vm7425_vm5, %v2403_v26, -inf  ;;  %v2420_v33 = vsel %vm7425_vm5, %v2404_v21, -inf  ;;  %v2428_v12 = vsel %vm7425_vm5, %v2405_v56, -inf  ;;  %v2429_v35 = vsel %vm7425_vm5, %v2406_v60, -inf  ;;  %s4688_s18 = sld [smem:[#allocation4 + %s940_s20]]  ;;  %s2378_s20 = sadd.s32 11, %s4269_s8 }
  0xf7   : > { %v2421_v34 = vmax.f32 %v2419_v32, %v2420_v33  ;;  %v2437_v36 = vsel %vm7425_vm5, %v2407_v45, -inf  ;;  %v2438_v6 = vsel %vm7425_vm5, %v2408_v52, -inf  ;;  %v2430_v25 = vmax.f32 %v2428_v12, %v2429_v35  ;;  %7774 = sst [smem:[#allocation50_spill]] %s4660_s28 }
  0xf8   : > { %v2439_v63 = vmax.f32 %v2437_v36, %v2438_v6  ;;  %v2446_v0 = vsel %vm7425_vm5, %v2409_v24, -inf  ;;  %v2447_v37 = vsel %vm7425_vm5, %v2410_v40, -inf  ;;  %v2455_v9 = vsel %vm7425_vm5, %v2411_v51, -inf  ;;  %7783 = sst [smem:[#allocation55_spill]] %s4692_s29 }
  0xf9   : > { %v2422_v42 = vrot.slane %v2421_v34, 4  ;;  %v2448_v4 = vmax.f32 %v2446_v0, %v2447_v37  ;;  %v2456_v7 = vsel %vm7425_vm5, %v2412_v41, -inf  ;;  %v2431_v3 = vrot.slane %v2430_v25, 4  ;;  %s4705_s14 = sld [smem:[#allocation4 + %s950_s0]] }
  0xfa   : > { %v2440_v10 = vrot.slane %v2439_v63, 4  ;;  %v2457_v13 = vmax.f32 %v2455_v9, %v2456_v7  ;;  %v2464_v15 = vsel %vm7425_vm5, %v2413_v53, -inf  ;;  %v2465_v20 = vsel %vm7425_vm5, %v2414_v54, -inf  ;;  %v4492_v7 = vld [vmem:[%s4489_s6] sm:$0xff]  ;;  %7780 = sst [smem:[#allocation52_spill]] %s4683_s19 }
  0xfb   : > { %v2423_v18 = vmax.f32 %v2421_v34, %v2422_v42  ;;  %v2449_v43 = vrot.slane %v2448_v4, 4  ;;  %v2473_v23 = vsel %vm7425_vm5, %v2415_v55, -inf  ;;  %v2432_v47 = vmax.f32 %v2430_v25, %v2431_v3  ;;  %v4495_v3 = vld [vmem:[%s4489_s6 + $0x8] sm:$0xff]  ;;  %7781 = sst [smem:[#allocation53_spill]] %s4686_s11 }
  0xfc   : > { %v2441_v17 = vmax.f32 %v2439_v63, %v2440_v10  ;;  %v2458_v50 = vrot.slane %v2457_v13, 4  ;;  %v2466_v38 = vmax.f32 %v2464_v15, %v2465_v20  ;;  %v2474_v56 = vsel %vm7425_vm5, %v2416_v62, -inf  ;;  %v4498_v10 = vld [vmem:[%s4489_s6 + $0x10] sm:$0xff]  ;;  %v4509_v20 = vld [vmem:[%s4489_s6 + $0x18] sm:$0xff]  ;;  %7782 = sst [smem:[#allocation54_spill]] %s4688_s18 }
  0xfd   : > { %v2424_v58 = vrot.slane %v2423_v18, 2  ;;  %v2450_v26 = vmax.f32 %v2448_v4, %v2449_v43  ;;  %v2482_v45 = vsel %vm7425_vm5, %v2417_v30, -inf  ;;  %v2433_v24 = vrot.slane %v2432_v47, 2  ;;  %s4707_s4 = sld [smem:[#allocation4 + %s2368_s26]] }
  0xfe   : > { %v2442_v28 = vrot.slane %v2441_v17, 2  ;;  %v2459_v16 = vmax.f32 %v2457_v13, %v2458_v50  ;;  %v2467_v29 = vrot.slane %v2466_v38, 4  ;;  %v2475_v52 = vmax.f32 %v2473_v23, %v2474_v56  ;;  %v4512_v23 = vld [vmem:[%s4489_s6 + $0x20] sm:$0xff]  ;;  %v4522_v50 = vld [vmem:[%s4489_s6 + $0x30] sm:$0xff]  ;;  %s4716_s0 = sld [smem:[#allocation4 + %s2378_s20]]  ;;  %s7798_s20 = sadd.s32 1, %s4285_s23 }
  0xff   : > { %v2425_v21 = vmax.f32 %v2423_v18, %v2424_v58  ;;  %v2451_v60 = vrot.slane %v2450_v26, 2  ;;  %v2483_v57 = vsel %vm7425_vm5, %v2418_v31, -inf  ;;  %v2434_v61 = vmax.f32 %v2432_v47, %v2433_v24  ;;  %v4515_v47 = vld [vmem:[%s4489_s6 + $0x28] sm:$0xff]  ;;  %7786 = sst [smem:[#allocation56_spill]] %s4705_s14 }
 0x100   : > { %v2443_v59 = vmax.f32 %v2441_v17, %v2442_v28  ;;  %v2460_v40 = vrot.slane %v2459_v16, 2  ;;  %v2468_v51 = vmax.f32 %v2466_v38, %v2467_v29  ;;  %v2476_v41 = vrot.slane %v2475_v52, 4  ;;  %v4525_v38 = vld [vmem:[%s4489_s6 + $0x38] sm:$0xff]  ;;  %v4539_v28 = vld [vmem:[%s4489_s6 + $0x40] sm:$0xff]  ;;  %s4718_s26 = sld [smem:[#allocation4 + %s2380_s3]] }
 0x101   : > { %v2426_v44 = vrot.slane %v2425_v21, 1  ;;  %v2452_v46 = vmax.f32 %v2450_v26, %v2451_v60  ;;  %v2484_v53 = vmax.f32 %v2482_v45, %v2483_v57  ;;  %vm4470_vm15 = vcmp.ge.s32.totalorder %v3615_v22, %v2352_v5  ;;  %v4555_v60 = vld [vmem:[%s4489_s6 + $0x50] sm:$0xff]  ;;  %v4561_v57 = vld [vmem:[%s4489_s6 + $0x60] sm:$0xff]  ;;  %s4745_s3 = sld [smem:[#allocation4 + %s7798_s20]] }
 0x102   : > { %vm4477_vm1 = vcmp.lt.s32.totalorder %v3615_v22, %v2354_v14  ;;  %v2435_v62 = vrot.slane %v2434_v61, 1  ;;  %v2444_v30 = vrot.slane %v2443_v59, 1  ;;  %v2461_v31 = vmax.f32 %v2459_v16, %v2460_v40  ;;  %v4542_v16 = vld [vmem:[%s4489_s6 + $0x48] sm:$0xff] }
 0x103   : > { %v2469_v32 = vrot.slane %v2468_v51, 2  ;;  %v2427_v33 = vmax.f32 %v2425_v21, %v2426_v44  ;;  %v2453_v12 = vrot.slane %v2452_v46, 1  ;;  %v2477_v34 = vmax.f32 %v2475_v52, %v2476_v41  ;;  %v4558_v52 = vld [vmem:[%s4489_s6 + $0x58] sm:$0xff]  ;;  %v4576_v41 = vld [vmem:[%s4489_s6 + $0x70] sm:$0xff]  ;;  %7787 = sst [smem:[#allocation57_spill]] %s4707_s4 }
 0x104   : > { %v2485_v35 = vrot.slane %v2484_v53, 4  ;;  %v2436_v5 = vmax.f32 %v2434_v61, %v2435_v62  ;;  %v2445_v36 = vmax.f32 %v2443_v59, %v2444_v30  ;;  %v2462_v6 = vrot.slane %v2461_v31, 1  ;;  %7791 = sst [smem:[#allocation59_spill]] %s4716_s0 }
 0x105   : > { %v2470_v25 = vmax.f32 %v2468_v51, %v2469_v32  ;;  %v2454_v63 = vmax.f32 %v2452_v46, %v2453_v12  ;;  %v2478_v0 = vrot.slane %v2477_v34, 2  ;;  %vm4484_vm2 = vcmp.ge.s32.totalorder %v3559_v1, %v1676_v11  ;;  %v4573_v46 = vld [vmem:[%s4489_s6 + $0x68] sm:$0xff] }
 0x106   : > { %v2486_v14 = vmax.f32 %v2484_v53, %v2485_v35  ;;  %v2463_v42 = vmax.f32 %v2461_v31, %v2462_v6  ;;  %v2502_v9 = vsel %vm7423_vm7, %v2436_v5, %v2427_v33  ;;  %vm4503_vm8 = vcmp.ge.s32.totalorder %v3572_v2, %v1676_v11  ;;  %v4579_v53 = vld [vmem:[%s4489_s6 + $0x78] sm:$0xff]  ;;  %7792 = sst [smem:[#allocation60_spill]] %s4718_s26 }
 0x107   : > { %v2471_v4 = vrot.slane %v2470_v25, 1  ;;  %v2479_v15 = vmax.f32 %v2477_v34, %v2478_v0  ;;  %vm7761_vm6 = vcmask 1042434   ;;  %vm1680_vm14 = vcmp.lt.s32.totalorder %v3559_v1, %v1679_v48  ;;  %7799 = sst [smem:[#allocation62_spill]] %s4745_s3 }
 0x108   : > { %v2487_v18 = vrot.slane %v2486_v14, 2  ;;  %v2503_v43 = vsel %vm7761_vm6, %v2445_v36, %v2502_v9  ;;  %vm7762_vm3 = vcmask 1043459   ;;  %vm1681_vm4 = vcmp.lt.s32.totalorder %v3572_v2, %v1679_v48  ;;  %vm4532_vm12 = vmand %vm4484_vm2, %vm1680_vm14 }
 0x109   : > { %v2472_v11 = vmax.f32 %v2470_v25, %v2471_v4  ;;  %v2504_v17 = vsel %vm7762_vm3, %v2454_v63, %v2503_v43  ;;  %v2362_v26 = vstv %s4465_s27  ;;  %v2480_v56 = vrot.slane %v2479_v15, 1  ;;  %vm4546_vm6 = vmand %vm4503_vm8, %vm1681_vm4  ;;  %s4711_s27 = sld [smem:[#allocation4 + %s2370_s9]]  ;;  %s1663_s9 = sadd.s32 11, %s4285_s23 }
 0x10a   : > { %v2488_v45 = vmax.f32 %v2486_v14, %v2487_v18  ;;  %vm7765_vm10 = vcmask 1044484   ;;  %v1688_v29 = vsel %vm4532_vm12, %v4492_v7, -inf  ;;  %vm7768_vm2 = vcmask 1045509   ;;  %vm4603_vm8 = vmand %vm4470_vm15, %vm4477_vm1 }
 0x10b   : > { %v2505_v24 = vsel %vm7765_vm10, %v2463_v42, %v2504_v17  ;;  %v1689_v61 = vsel %vm4546_vm6, %v4495_v3, -inf  ;;  %v1690_v59 = vsel %vm4532_vm12, %v4498_v10, -inf  ;;  %v1691_v40 = vsel %vm4546_vm6, %v4509_v20, -inf }
 0x10c   : > { %v2506_v21 = vsel %vm7768_vm2, %v2472_v11, %v2505_v24  ;;  %v2481_v51 = vmax.f32 %v2479_v15, %v2480_v56  ;;  %v2489_v44 = vrot.slane %v2488_v45, 1  ;;  %v1692_v62 = vsel %vm4532_vm12, %v4512_v23, -inf }
 0x10d   : > { %v1693_v30 = vsel %vm4546_vm6, %v4515_v47, -inf  ;;  %v1694_v31 = vsel %vm4532_vm12, %v4522_v50, -inf  ;;  %v1695_v32 = vsel %vm4546_vm6, %v4525_v38, -inf  ;;  %v1696_v33 = vsel %vm4532_vm12, %v4539_v28, -inf }
 0x10e   : > { %v1697_v12 = vsel %vm4546_vm6, %v4542_v16, -inf  ;;  %v7769_v34 = vmov 0  ;;  %v2490_v35 = vmax.f32 %v2488_v45, %v2489_v44  ;;  %v2507_v5 = vsel %vm7422_vm0, %v2481_v51, %v2506_v21 }
 0x10f   : > { %v7770_v34 = vsel %vm4603_vm8, 4294967295, %v7769_v34  ;;  %v1698_v36 = vsel %vm4532_vm12, %v4555_v60, -inf  ;;  %v1699_v6 = vsel %vm4546_vm6, %v4558_v52, -inf  ;;  %v1700_v55 = vsel %vm4532_vm12, %v4561_v57, -inf  ;;  %7789 = sst [smem:[#allocation58_spill]] %s4711_s27 }
 0x110   : > { %7771 = vst [vmem:[#allocation47_spill] sm:$0xff] %v7770_v34  ;;  %v1701_v54 = vsel %vm4546_vm6, %v4573_v46, -inf  ;;  %v1702_v25 = vsel %vm4532_vm12, %v4576_v41, -inf  ;;  %v1703_v63 = vsel %vm4546_vm6, %v4579_v53, -inf  ;;  %v4627_v0 = vsel %vm7424_vm9, %v2490_v35, %v2507_v5 }
 0x111   : > { %v1704_v14 = vsel %vm7425_vm5, %v1688_v29, -inf  ;;  %v1705_v37 = vsel %vm7425_vm5, %v1689_v61, -inf  ;;  %v1713_v42 = vsel %vm7425_vm5, %v1690_v59, -inf  ;;  %v2510_v4 = vsel %vm4603_vm8, %v4627_v0, -inf }
 0x112   : > { %v1706_v9 = vmax.f32 %v1704_v14, %v1705_v37  ;;  %v1714_v13 = vsel %vm7425_vm5, %v1691_v40, -inf  ;;  %v1722_v15 = vsel %vm7425_vm5, %v1692_v62, -inf  ;;  %v2511_v18 = vsel %vm7425_vm5, %v2510_v4, -inf }
 0x113   : > { %v1715_v43 = vmax.f32 %v1713_v42, %v1714_v13  ;;  %v1723_v11 = vsel %vm7425_vm5, %v1693_v30, -inf  ;;  %v1731_v17 = vsel %vm7425_vm5, %v1694_v31, -inf  ;;  %2512 = vmax.xlane.f32.xlu1 %v2511_v18  ;;  %v1732_v45 = vsel %vm7425_vm5, %v1695_v32, -inf }
 0x114   : > { %v1707_v58 = vrot.slane %v1706_v9, 4  ;;  %v1724_v56 = vmax.f32 %v1722_v15, %v1723_v11  ;;  %v1740_v24 = vsel %vm7425_vm5, %v1696_v33, -inf  ;;  %v1733_v21 = vmax.f32 %v1731_v17, %v1732_v45 }
 0x115   : > { %v1716_v29 = vrot.slane %v1715_v43, 4  ;;  %v1741_v61 = vsel %vm7425_vm5, %v1697_v12, -inf  ;;  %v1749_v59 = vsel %vm7425_vm5, %v1698_v36, -inf  ;;  %v1750_v62 = vsel %vm7425_vm5, %v1699_v6, -inf }
 0x116   : > { %v1708_v40 = vmax.f32 %v1706_v9, %v1707_v58  ;;  %v1725_v51 = vrot.slane %v1724_v56, 4  ;;  %v1742_v44 = vmax.f32 %v1740_v24, %v1741_v61  ;;  %v1734_v31 = vrot.slane %v1733_v21, 4 }
 0x117   : > { %v1717_v30 = vmax.f32 %v1715_v43, %v1716_v29  ;;  %v1751_v32 = vmax.f32 %v1749_v59, %v1750_v62  ;;  %v1758_v33 = vsel %vm7425_vm5, %v1700_v55, -inf  ;;  %v1759_v36 = vsel %vm7425_vm5, %v1701_v54, -inf }
 0x118   : > { %v1709_v12 = vrot.slane %v1708_v40, 2  ;;  %v1726_v35 = vmax.f32 %v1724_v56, %v1725_v51  ;;  %v1743_v5 = vrot.slane %v1742_v44, 4  ;;  %v1735_v14 = vmax.f32 %v1733_v21, %v1734_v31 }
 0x119   : > { %v1718_v6 = vrot.slane %v1717_v30, 2  ;;  %v1752_v37 = vrot.slane %v1751_v32, 4  ;;  %v1760_v42 = vmax.f32 %v1758_v33, %v1759_v36  ;;  %v1767_v13 = vsel %vm7425_vm5, %v1702_v25, -inf }
 0x11a   : > { %v1710_v55 = vmax.f32 %v1708_v40, %v1709_v12  ;;  %v1727_v4 = vrot.slane %v1726_v35, 2  ;;  %v1744_v9 = vmax.f32 %v1742_v44, %v1743_v5  ;;  %v1736_v15 = vrot.slane %v1735_v14, 2 }
 0x11b   : > { %v1719_v54 = vmax.f32 %v1717_v30, %v1718_v6  ;;  %v1753_v18 = vmax.f32 %v1751_v32, %v1752_v37  ;;  %v1761_v43 = vrot.slane %v1760_v42, 4  ;;  %vm4667_vm15 = vcmp.ge.s32.totalorder %v3615_v22, %v1637_v27 }
 0x11c   : > { %vm4674_vm1 = vcmp.lt.s32.totalorder %v3615_v22, %v1639_v49  ;;  %v1711_v17 = vrot.slane %v1710_v55, 1  ;;  %v1728_v58 = vmax.f32 %v1726_v35, %v1727_v4  ;;  %v1745_v56 = vrot.slane %v1744_v9, 2 }
 0x11d   : > { %v1768_v27 = vsel %vm7425_vm5, %v1703_v63, -inf  ;;  %v1720_v45 = vrot.slane %v1719_v54, 1  ;;  %v1737_v24 = vmax.f32 %v1735_v14, %v1736_v15  ;;  %v1754_v49 = vrot.slane %v1753_v18, 2 }
 0x11e   : > { %v1762_v29 = vmax.f32 %v1760_v42, %v1761_v43  ;;  %v1712_v21 = vmax.f32 %v1710_v55, %v1711_v17  ;;  %v1729_v48 = vrot.slane %v1728_v58, 1  ;;  %v1746_v61 = vmax.f32 %v1744_v9, %v1745_v56 }
 0x11f   : > { %v1769_v59 = vmax.f32 %v1767_v13, %v1768_v27  ;;  %v1721_v63 = vmax.f32 %v1719_v54, %v1720_v45  ;;  %v1738_v40 = vrot.slane %v1737_v24, 1  ;;  %v1755_v51 = vmax.f32 %v1753_v18, %v1754_v49 }
 0x120   : > { %v1763_v44 = vrot.slane %v1762_v29, 2  ;;  %v1730_v62 = vmax.f32 %v1728_v58, %v1729_v48  ;;  %v1747_v30 = vrot.slane %v1746_v61, 1  ;;  %vm4698_vm14 = vcmp.ge.s32.totalorder %v3615_v22, %v2362_v26 }
 0x121   : > { %v1770_v31 = vrot.slane %v1769_v59, 4  ;;  %v1739_v33 = vmax.f32 %v1737_v24, %v1738_v40  ;;  %v1756_v12 = vrot.slane %v1755_v51, 1  ;;  %v1787_v5 = vsel %vm7423_vm7, %v1721_v63, %v1712_v21 }
 0x122   : > { %v1764_v35 = vmax.f32 %v1762_v29, %v1763_v44  ;;  %v1748_v36 = vmax.f32 %v1746_v61, %v1747_v30  ;;  %vm7788_vm3 = vcmask 1042434   ;;  %v2364_v14 = vstv %s4648_s30  ;;  %s1665_s30 = sadd.s32 15, %s4285_s23 }
 0x123   : > { %v1771_v6 = vmax.f32 %v1769_v59, %v1770_v31  ;;  %v1788_v26 = vsel %vm7788_vm3, %v1730_v62, %v1787_v5  ;;  %v1757_v37 = vmax.f32 %v1755_v51, %v1756_v12  ;;  %vm7790_vm4 = vcmask 1043459   ;;  %s4763_s20 = sld [smem:[#allocation4 + %s1665_s30]] }
 0x124   : > { %v1765_v42 = vrot.slane %v1764_v35, 1  ;;  %v1789_v55 = vsel %vm7790_vm4, %v1739_v33, %v1788_v26  ;;  %vm2365_vm12 = vcmp.lt.s32.totalorder %v3615_v22, %v2364_v14  ;;  %v7793_v13 = vmov 0  ;;  %vm4753_vm4 = vmand %vm4667_vm15, %vm4674_vm1 }
 0x125   : > { %v1772_v4 = vrot.slane %v1771_v6, 2  ;;  %v1790_v9 = vsel %vm7765_vm10, %v1748_v36, %v1789_v55  ;;  %vm4723_vm6 = vmand %vm4698_vm14, %vm2365_vm12  ;;  %v1647_v54 = vstv %s4654_s7  ;;  %v1649_v15 = vstv %s4660_s28  ;;  %s4747_s28 = sld [smem:[#allocation4 + %s1843_s15]] }
 0x126   : > { %v7794_v13 = vsel %vm4723_vm6, 4294967295, %v7793_v13  ;;  %v1766_v18 = vmax.f32 %v1764_v35, %v1765_v42  ;;  %v1791_v43 = vsel %vm7768_vm2, %v1757_v37, %v1790_v9  ;;  %v2522_v17 = vsel %vm4723_vm6, %v4627_v0, -inf  ;;  %s4761_s15 = sld [smem:[#allocation4 + %s1663_s9]] }
 0x127   : > { %7795 = vst [vmem:[#allocation61_spill] sm:$0xff] %v7794_v13  ;;  %vm4736_vm3 = vcmp.ge.s32.totalorder %v3615_v22, %v1647_v54  ;;  %v1773_v56 = vmax.f32 %v1771_v6, %v1772_v4  ;;  %v2523_v27 = vsel %vm7425_vm5, %v2522_v17, -inf  ;;  %vm1650_vm14 = vcmp.lt.s32.totalorder %v3615_v22, %v1649_v15 }
 0x128   : > { %v1657_v45 = vstv %s4662_s1  ;;  %v7801_v24 = vmov 0  ;;  %v1792_v49 = vsel %vm7422_vm0, %v1766_v18, %v1791_v43  ;;  %2524 = vmax.xlane.f32.xlu1 %v2523_v27  ;;  %v1659_v29 = vstv %s4683_s19  ;;  %vm4767_vm15 = vmand %vm4736_vm3, %vm1650_vm14  ;;  %s1126_s19 = sadd.s32 1, %s4017_s5 }
 0x129   : > { %v7802_v24 = vsel %vm4753_vm4, 4294967295, %v7801_v24  ;;  %vm1658_vm12 = vcmp.ge.s32.totalorder %v3615_v22, %v1657_v45  ;;  %v942_v21 = vstv %s4686_s11  ;;  %7804 = sst [smem:[#allocation65_spill]] %s4763_s20  ;;  %v1774_v25 = vrot.slane %v1773_v56, 1  ;;  %s1128_s11 = sadd.s32 5, %s4017_s5 }
 0x12a   : > { %v7805_v11 = vmov 0  ;;  %vm1660_vm1 = vcmp.lt.s32.totalorder %v3615_v22, %v1659_v29  ;;  %vm943_vm10 = vcmp.ge.s32.totalorder %v3615_v22, %v942_v21  ;;  %v944_v48 = vstv %s4688_s18  ;;  %s4797_s30 = sld [smem:[#allocation4 + %s1126_s19]]  ;;  %s2556_s19 = sadd.s32 1, %s4269_s8 }
 0x12b   : > { %7800 = sst [smem:[#allocation63_spill]] %s4747_s28  ;;  %v7806_v11 = vsel %vm4767_vm15, 4294967295, %v7805_v11  ;;  %vm4776_vm2 = vmand %vm1658_vm12, %vm1660_vm1  ;;  %vm945_vm0 = vcmp.lt.s32.totalorder %v3615_v22, %v944_v48  ;;  %v952_v59 = vstv %s4692_s29  ;;  %v954_v63 = vstv %s4705_s14 }
 0x12c   : > { %7803 = sst [smem:[#allocation64_spill]] %s4761_s15  ;;  %7807 = vst [vmem:[#allocation66_spill] sm:$0xff] %v7806_v11  ;;  %v2372_v40 = vstv %s4707_s4  ;;  %v1775_v51 = vmax.f32 %v1773_v56, %v1774_v25  ;;  %vm4784_vm3 = vmand %vm943_vm10, %vm945_vm0  ;;  %v7810_v44 = vmov 0  ;;  %vm953_vm14 = vcmp.ge.s32.totalorder %v3615_v22, %v952_v59 }
 0x12d   : > { %v7811_v44 = vsel %vm4784_vm3, 4294967295, %v7810_v44  ;;  %vm955_vm7 = vcmp.lt.s32.totalorder %v3615_v22, %v954_v63  ;;  %vm2373_vm12 = vcmp.ge.s32.totalorder %v3615_v22, %v2372_v40  ;;  %v7812_v62 = vmov 0  ;;  %s4799_s9 = sld [smem:[#allocation4 + %s1128_s11]] }
 0x12e   : > { %vm4791_vm1 = vmand %vm953_vm14, %vm955_vm7  ;;  %v2374_v30 = vstv %s4711_s27  ;;  %v2382_v31 = vstv %s4716_s0  ;;  %v1793_v32 = vsel %vm7424_vm9, %v1775_v51, %v1792_v49  ;;  %v2384_v12 = vstv %s4718_s26  ;;  %s5081_s11 = sld [smem:[#allocation4 + %s2556_s19]]  ;;  %s8164_s0 = sadd.s32 3, %s4269_s8 }
 0x12f   : > { %v7813_v62 = vsel %vm4791_vm1, 4294967295, %v7812_v62  ;;  %v1116_v33 = vsel %vm4791_vm1, %v4406_v39, -inf  ;;  %vm2375_vm0 = vcmp.lt.s32.totalorder %v3615_v22, %v2374_v30  ;;  %v1795_v35 = vsel %vm4753_vm4, %v1793_v32, -inf }
 0x130   : > { %7814 = sst [smem:[#allocation67_spill]] %s4797_s30  ;;  %v1807_v5 = vsel %vm4767_vm15, %v1793_v32, -inf  ;;  %v1819_v36 = vsel %vm4776_vm2, %v1793_v32, -inf  ;;  %v1104_v6 = vsel %vm4784_vm3, %v4406_v39, -inf  ;;  %vm4816_vm7 = vmand %vm2373_vm12, %vm2375_vm0  ;;  %v7816_v26 = vmov 0 }
 0x131   : > { %v7817_v26 = vsel %vm4816_vm7, 4294967295, %v7816_v26  ;;  %v1796_v14 = vsel %vm7425_vm5, %v1795_v35, -inf  ;;  %v1808_v37 = vsel %vm7425_vm5, %v1807_v5, -inf  ;;  %v1820_v42 = vsel %vm7425_vm5, %v1819_v36, -inf }
 0x132   : > { %7818 = vst [vmem:[#allocation69_spill] sm:$0xff] %v7817_v26  ;;  %v1117_v55 = vsel %vm7425_vm5, %v1116_v33, -inf  ;;  %1797 = vmax.xlane.f32.xlu0 %v1796_v14  ;;  %1821 = vmax.xlane.f32.xlu1 %v1820_v42  ;;  %v2534_v4 = vsel %vm4816_vm7, %v4627_v0, -inf  ;;  %vm2383_vm10 = vcmp.ge.s32.totalorder %v3615_v22, %v2382_v31  ;;  %vm2385_vm14 = vcmp.lt.s32.totalorder %v3615_v22, %v2384_v12 }
 0x133   : > { %7815 = sst [smem:[#allocation68_spill]] %s4799_s9  ;;  %v1667_v39 = vstv %s4761_s15  ;;  %vm4830_vm12 = vmand %vm2383_vm10, %vm2385_vm14  ;;  %v7819_v9 = vmov 0  ;;  %v1669_v54 = vstv %s4763_s20  ;;  %v1845_v15 = vstv %s4745_s3  ;;  %s1289_s3 = sadd.s32 6, %s4017_s5 }
 0x134   : > { %v7820_v9 = vsel %vm4830_vm12, 4294967295, %v7819_v9  ;;  %vm1668_vm0 = vcmp.ge.s32.totalorder %v3615_v22, %v1667_v39  ;;  %v1848_v18 = vstv %s4747_s28  ;;  %v2546_v43 = vsel %vm4830_vm12, %v4627_v0, -inf  ;;  %7877 = sst [smem:[#allocation71_spill]] %s5081_s11  ;;  %s1287_s28 = sadd.s32 2, %s4017_s5 }
 0x135   : > { %7821 = vst [vmem:[#allocation70_spill] sm:$0xff] %v7820_v9  ;;  %vm1670_vm9 = vcmp.lt.s32.totalorder %v3615_v22, %v1669_v54  ;;  %vm1846_vm5 = vcmp.ge.s32.totalorder %v3559_v1, %v1845_v15  ;;  %vm1847_vm10 = vcmp.ge.s32.totalorder %v3572_v2, %v1845_v15  ;;  %vm7822_vm14 = vcmask 130048   ;;  %v5197_v22 = vld [vmem:[%s4340_s24 + $0x68] sm:$0xff]  ;;  %s2717_s20 = sadd.s32 2, %s4269_s8 }
 0x136   : > { %v1105_v17 = vsel %vm7822_vm14, %v1104_v6, -inf  ;;  %vm7823_vm7 = vmmov %vm7822_vm14  ;;  %v7824_v56 = vmov 0  ;;  %vm1849_vm8 = vcmp.lt.s32.totalorder %v3559_v1, %v1848_v18  ;;  %vm1850_vm1 = vcmp.lt.s32.totalorder %v3572_v2, %v1848_v18  ;;  %1809 = vmax.xlane.f32.xlu0 %v1808_v37  ;;  %1118 = vmax.xlane.f32.xlu1 %v1117_v55  ;;  %7902 = vst [vmem:[#allocation82_spill] sm:$0xff] %v5197_v22  ;;  %s5254_s15 = sld [smem:[#allocation4 + %s2717_s20]]  ;;  %s2165_s20 = sadd.s32 7, %s4285_s23 }
 0x137   : > { %v2535_v58 = vsel %vm7823_vm7, %v2534_v4, -inf  ;;  %vm4846_vm6 = vmand %vm1668_vm0, %vm1670_vm9  ;;  %v1130_v49 = vstv %s4797_s30  ;;  %v1133_v29 = vstv %s4799_s9  ;;  %s2558_s9 = sadd.s32 5, %s4269_s8 }
 0x138   : > { %v7825_v56 = vsel %vm4846_vm6, 4294967295, %v7824_v56  ;;  %vm7826_vm12 = vmmov %vm7823_vm7  ;;  %v1831_v27 = vsel %vm4846_vm6, %v1793_v32, -inf  ;;  %s5087_s19 = sld [smem:[#allocation4 + %s2558_s9]]  ;;  %s2002_s9 = sadd.s32 2, %s4285_s23 }
 0x139   : > { %v2547_v0 = vsel %vm7826_vm12, %v2546_v43, -inf  ;;  %vm4855_vm3 = vmand %vm1846_vm5, %vm1849_vm8 }
 0x13a   : > { %vm7829_vm9 = vmmov %vm7823_vm7  ;;  %v1857_v48 = vsel %vm4855_vm3, %v4492_v7, -inf  ;;  %v1859_v59 = vsel %vm4855_vm3, %v4498_v10, -inf  ;;  %v1861_v63 = vsel %vm4855_vm3, %v4512_v23, -inf  ;;  %v1863_v10 = vsel %vm4855_vm3, %v4522_v50, -inf  ;;  %1106 = vmax.xlane.f32.xlu0 %v1105_v17  ;;  %2548 = vmax.xlane.f32.xlu1 %v2547_v0 }
 0x13b   : > { %v1832_v21 = vsel %vm7829_vm9, %v1831_v27, -inf  ;;  %vm4862_vm7 = vmand %vm1847_vm10, %vm1850_vm1 }
 0x13c   : > { %v1858_v40 = vsel %vm4862_vm7, %v4495_v3, -inf  ;;  %v1860_v51 = vsel %vm4862_vm7, %v4509_v20, -inf  ;;  %v1862_v7 = vsel %vm4862_vm7, %v4515_v47, -inf  ;;  %v1864_v23 = vsel %vm4862_vm7, %v4525_v38, -inf  ;;  %vm7832_vm5 = vmmov %vm7829_vm9  ;;  %7926 = sst [smem:[#allocation89_spill]] %s5254_s15 }
 0x13d   : > { %v1865_v3 = vsel %vm4855_vm3, %v4539_v28, -inf  ;;  %v1866_v20 = vsel %vm4862_vm7, %v4542_v16, -inf  ;;  %v1867_v47 = vsel %vm4855_vm3, %v4555_v60, -inf  ;;  %v1868_v50 = vsel %vm4862_vm7, %v4558_v52, -inf  ;;  %vm7833_vm8 = vmmov %vm7832_vm5 }
 0x13e   : > { %v1869_v38 = vsel %vm4855_vm3, %v4561_v57, -inf  ;;  %v1870_v28 = vsel %vm4862_vm7, %v4573_v46, -inf  ;;  %v1871_v16 = vsel %vm4855_vm3, %v4576_v41, -inf  ;;  %v1872_v60 = vsel %vm4862_vm7, %v4579_v53, -inf  ;;  %vm7834_vm1 = vmmov %vm7832_vm5  ;;  %2536 = vmax.xlane.f32.xlu0 %v2535_v58  ;;  %7880 = sst [smem:[#allocation72_spill]] %s5087_s19 }
 0x13f   : > { %v1873_v30 = vsel %vm7832_vm5, %v1857_v48, -inf  ;;  %v1874_v52 = vsel %vm7833_vm8, %v1858_v40, -inf  ;;  %v1882_v31 = vsel %vm7834_vm1, %v1859_v59, -inf  ;;  %vm7835_vm12 = vmmov %vm7834_vm1 }
 0x140   : > { %v1875_v32 = vmax.f32 %v1873_v30, %v1874_v52  ;;  %v1883_v57 = vsel %vm7835_vm12, %v1860_v51, -inf  ;;  %vm7836_vm0 = vmmov %vm7834_vm1  ;;  %vm4928_vm12 = vcmp.ge.s32.totalorder %v3559_v1, %v1130_v49 }
 0x141   : > { %v1891_v33 = vsel %vm7836_vm0, %v1861_v63, -inf  ;;  %vm7837_vm10 = vmmov %vm7836_vm0  ;;  %v1884_v12 = vmax.f32 %v1882_v31, %v1883_v57 }
 0x142   : > { %v1892_v46 = vsel %vm7837_vm10, %v1862_v7, -inf  ;;  %vm7838_vm3 = vmmov %vm7836_vm0  ;;  %v1876_v53 = vrot.slane %v1875_v32, 4  ;;  %1833 = vmax.xlane.f32.xlu0 %v1832_v21 }
 0x143   : > { %v1893_v35 = vmax.f32 %v1891_v33, %v1892_v46  ;;  %v1900_v41 = vsel %vm7838_vm3, %v1863_v10, -inf  ;;  %vm7839_vm14 = vmmov %vm7836_vm0  ;;  %v1885_v37 = vrot.slane %v1884_v12, 4 }
 0x144   : > { %v1901_v5 = vsel %vm7839_vm14, %v1864_v23, -inf  ;;  %vm7840_vm9 = vmmov %vm7836_vm0  ;;  %v1877_v39 = vmax.f32 %v1875_v32, %v1876_v53 }
 0x145   : > { %v1902_v36 = vmax.f32 %v1900_v41, %v1901_v5  ;;  %v1909_v6 = vsel %vm7840_vm9, %v1865_v3, -inf  ;;  %vm7841_vm7 = vmmov %vm7836_vm0  ;;  %v1894_v42 = vrot.slane %v1893_v35, 4  ;;  %v1886_v17 = vmax.f32 %v1884_v12, %v1885_v37 }
 0x146   : > { %v1910_v14 = vsel %vm7841_vm7, %v1866_v20, -inf  ;;  %vm7842_vm5 = vmmov %vm7836_vm0  ;;  %v1878_v25 = vrot.slane %v1877_v39, 2  ;;  %vm1134_vm9 = vcmp.lt.s32.totalorder %v3559_v1, %v1133_v29  ;;  %vm7852_vm7 = vcmask 1041409  }
 0x147   : > { %v1911_v55 = vmax.f32 %v1909_v6, %v1910_v14  ;;  %v1918_v4 = vsel %vm7842_vm5, %v1867_v47, -inf  ;;  %v1903_v54 = vrot.slane %v1902_v36, 4  ;;  %vm7843_vm8 = vmmov %vm7836_vm0  ;;  %v1895_v58 = vmax.f32 %v1893_v35, %v1894_v42 }
 0x148   : > { %v1919_v15 = vsel %vm7843_vm8, %v1868_v50, -inf  ;;  %vm7844_vm1 = vmmov %vm7836_vm0  ;;  %vm4933_vm0 = vcmp.ge.s32.totalorder %v3572_v2, %v1130_v49  ;;  %v1887_v40 = vrot.slane %v1886_v17, 2  ;;  %v1879_v23 = vmax.f32 %v1877_v39, %v1878_v25  ;;  %v4974_v25 = vld [vmem:[%s4146_s2 + $0x10] sm:$0xff] }
 0x149   : > { %v1927_v18 = vsel %vm7844_vm1, %v1869_v38, -inf  ;;  %v1912_v0 = vrot.slane %v1911_v55, 4  ;;  %v1920_v27 = vmax.f32 %v1918_v4, %v1919_v15  ;;  %v1904_v48 = vmax.f32 %v1902_v36, %v1903_v54  ;;  %vm7849_vm10 = vmmov %vm7844_vm1 }
 0x14a   : > { %v1928_v59 = vsel %vm7849_vm10, %v1870_v28, -inf  ;;  %vm7850_vm3 = vmmov %vm7844_vm1  ;;  %v1896_v51 = vrot.slane %v1895_v58, 2  ;;  %v1888_v49 = vmax.f32 %v1886_v17, %v1887_v40  ;;  %v1880_v21 = vrot.slane %v1879_v23, 1 }
 0x14b   : > { %v1936_v63 = vsel %vm7850_vm3, %v1871_v16, -inf  ;;  %v1913_v7 = vmax.f32 %v1911_v55, %v1912_v0  ;;  %v1921_v10 = vrot.slane %v1920_v27, 4  ;;  %v1905_v3 = vrot.slane %v1904_v48, 2  ;;  %vm7851_vm14 = vmmov %vm7844_vm1 }
 0x14c   : > { %v1929_v20 = vmax.f32 %v1927_v18, %v1928_v59  ;;  %v1937_v47 = vsel %vm7851_vm14, %v1872_v60, -inf  ;;  %v1897_v50 = vmax.f32 %v1895_v58, %v1896_v51  ;;  %v1889_v28 = vrot.slane %v1888_v49, 1  ;;  %vm4949_vm8 = vmand %vm4928_vm12, %vm1134_vm9  ;;  %v4961_v58 = vld [vmem:[%s4146_s2] sm:$0xff]  ;;  %v4981_v51 = vld [vmem:[%s4146_s2 + $0x18] sm:$0xff] }
 0x14d   : > { %v1914_v38 = vrot.slane %v1913_v7, 2  ;;  %v1922_v30 = vmax.f32 %v1920_v27, %v1921_v10  ;;  %v1906_v52 = vmax.f32 %v1904_v48, %v1905_v3  ;;  %v1938_v32 = vmax.f32 %v1936_v63, %v1937_v47  ;;  %v4968_v27 = vld [vmem:[%s4146_s2 + $0x8] sm:$0xff] }
 0x14e   : > { %v1930_v31 = vrot.slane %v1929_v20, 4  ;;  %v1898_v16 = vrot.slane %v1897_v50, 1  ;;  %v1881_v46 = vmax.f32 %v1879_v23, %v1880_v21  ;;  %v1890_v5 = vmax.f32 %v1888_v49, %v1889_v28  ;;  %v4988_v23 = vld [vmem:[%s4146_s2 + $0x20] sm:$0xff]  ;;  %v5000_v49 = vld [vmem:[%s4146_s2 + $0x30] sm:$0xff]  ;;  %v5006_v21 = vld [vmem:[%s4146_s2 + $0x38] sm:$0xff] }
 0x14f   : > { %v1915_v57 = vmax.f32 %v1913_v7, %v1914_v38  ;;  %v1923_v33 = vrot.slane %v1922_v30, 2  ;;  %v1907_v12 = vrot.slane %v1906_v52, 1  ;;  %v1939_v41 = vrot.slane %v1938_v32, 4  ;;  %v5018_v28 = vld [vmem:[%s4146_s2 + $0x48] sm:$0xff] }
 0x150   : > { %v1931_v35 = vmax.f32 %v1929_v20, %v1930_v31  ;;  %v1899_v60 = vmax.f32 %v1897_v50, %v1898_v16  ;;  %v1954_v4 = vsel %vm7852_vm7, %v1890_v5, %v1881_v46  ;;  %vm1135_vm5 = vcmp.lt.s32.totalorder %v3572_v2, %v1133_v29  ;;  %v4994_v20 = vld [vmem:[%s4146_s2 + $0x28] sm:$0xff]  ;;  %v5012_v31 = vld [vmem:[%s4146_s2 + $0x40] sm:$0xff]  ;;  %v5030_v46 = vld [vmem:[%s4146_s2 + $0x58] sm:$0xff] }
 0x151   : > { %v1916_v53 = vrot.slane %v1915_v57, 1  ;;  %v1924_v36 = vmax.f32 %v1922_v30, %v1923_v33  ;;  %v1908_v6 = vmax.f32 %v1906_v52, %v1907_v12  ;;  %v1940_v37 = vmax.f32 %v1938_v32, %v1939_v41  ;;  %vm4956_vm10 = vmand %vm4933_vm0, %vm1135_vm5 }
 0x152   : > { %v1932_v14 = vrot.slane %v1931_v35, 2  ;;  %vm7855_vm1 = vcmask 1042434   ;;  %v1142_v29 = vsel %vm4949_vm8, %v4961_v58, -inf  ;;  %vm7858_vm12 = vcmask 1043459  }
 0x153   : > { %v1917_v42 = vmax.f32 %v1915_v57, %v1916_v53  ;;  %v1925_v55 = vrot.slane %v1924_v36, 1  ;;  %v1941_v15 = vrot.slane %v1940_v37, 2  ;;  %v1955_v18 = vsel %vm7855_vm1, %v1899_v60, %v1954_v4  ;;  %v5024_v57 = vld [vmem:[%s4146_s2 + $0x50] sm:$0xff]  ;;  %v5043_v53 = vld [vmem:[%s4146_s2 + $0x68] sm:$0xff] }
 0x154   : > { %v1933_v54 = vmax.f32 %v1931_v35, %v1932_v14  ;;  %v1956_v0 = vsel %vm7858_vm12, %v1908_v6, %v1955_v18  ;;  %v1143_v45 = vsel %vm4956_vm10, %v4968_v27, -inf  ;;  %v1144_v48 = vsel %vm4949_vm8, %v4974_v25, -inf  ;;  %v5036_v35 = vld [vmem:[%s4146_s2 + $0x60] sm:$0xff]  ;;  %v5049_v6 = vld [vmem:[%s4146_s2 + $0x70] sm:$0xff] }
 0x155   : > { %v1926_v43 = vmax.f32 %v1924_v36, %v1925_v55  ;;  %v1942_v63 = vmax.f32 %v1940_v37, %v1941_v15  ;;  %vm7859_vm0 = vcmask 1044484   ;;  %v1145_v7 = vsel %vm4956_vm10, %v4981_v51, -inf  ;;  %v5055_v37 = vld [vmem:[%s4146_s2 + $0x78] sm:$0xff] }
 0x156   : > { %v1934_v59 = vrot.slane %v1933_v54, 1  ;;  %v1957_v40 = vsel %vm7859_vm0, %v1917_v42, %v1956_v0  ;;  %vm7860_vm3 = vcmask 1045509   ;;  %v1146_v3 = vsel %vm4949_vm8, %v4988_v23, -inf }
 0x157   : > { %v1958_v10 = vsel %vm7860_vm3, %v1926_v43, %v1957_v40  ;;  %v1147_v47 = vsel %vm4956_vm10, %v4994_v20, -inf  ;;  %v1148_v50 = vsel %vm4949_vm8, %v5000_v49, -inf  ;;  %v1943_v30 = vrot.slane %v1942_v63, 1 }
 0x158   : > { %v1935_v38 = vmax.f32 %v1933_v54, %v1934_v59  ;;  %v1149_v52 = vsel %vm4956_vm10, %v5006_v21, -inf  ;;  %v1150_v32 = vsel %vm4949_vm8, %v5012_v31, -inf  ;;  %v1151_v16 = vsel %vm4956_vm10, %v5018_v28, -inf }
 0x159   : > { %v1152_v33 = vsel %vm4949_vm8, %v5024_v57, -inf  ;;  %v1153_v12 = vsel %vm4956_vm10, %v5030_v46, -inf  ;;  %v1154_v41 = vsel %vm4949_vm8, %v5036_v35, -inf  ;;  %v1944_v5 = vmax.f32 %v1942_v63, %v1943_v30 }
 0x15a   : > { %vm7861_vm14 = vcmask 1046534   ;;  %v1155_v36 = vsel %vm4956_vm10, %v5043_v53, -inf  ;;  %v1156_v14 = vsel %vm4949_vm8, %v5049_v6, -inf  ;;  %v1157_v42 = vsel %vm4956_vm10, %v5055_v37, -inf }
 0x15b   : > { %v1959_v60 = vsel %vm7861_vm14, %v1935_v38, %v1958_v10  ;;  %vm7862_vm9 = vcmask 130048   ;;  %vm7865_vm1 = vcmask 1047559  }
 0x15c   : > { %v1158_v55 = vsel %vm7862_vm9, %v1142_v29, -inf  ;;  %vm7863_vm7 = vmmov %vm7862_vm9  ;;  %v5064_v15 = vsel %vm7865_vm1, %v1944_v5, %v1959_v60 }
 0x15d   : > { %v1159_v4 = vsel %vm7863_vm7, %v1143_v45, -inf  ;;  %vm7864_vm5 = vmmov %vm7863_vm7  ;;  %v1962_v17 = vsel %vm4753_vm4, %v5064_v15, -inf }
 0x15e   : > { %v1167_v54 = vsel %vm7864_vm5, %v1144_v48, -inf  ;;  %v1160_v18 = vmax.f32 %v1158_v55, %v1159_v4  ;;  %vm7866_vm12 = vmmov %vm7864_vm5 }
 0x15f   : > { %v1168_v39 = vsel %vm7866_vm12, %v1145_v7, -inf  ;;  %vm7867_vm8 = vmmov %vm7864_vm5 }
 0x160   : > { %v1176_v43 = vsel %vm7867_vm8, %v1146_v3, -inf  ;;  %v1169_v0 = vmax.f32 %v1167_v54, %v1168_v39  ;;  %vm7868_vm10 = vmmov %vm7864_vm5  ;;  %v1161_v59 = vrot.slane %v1160_v18, 4 }
 0x161   : > { %v1177_v29 = vsel %vm7868_vm10, %v1147_v47, -inf  ;;  %vm7869_vm0 = vmmov %vm7864_vm5 }
 0x162   : > { %v1185_v45 = vsel %vm7869_vm0, %v1148_v50, -inf  ;;  %vm7870_vm3 = vmmov %vm7869_vm0  ;;  %v1178_v63 = vmax.f32 %v1176_v43, %v1177_v29  ;;  %v1170_v10 = vrot.slane %v1169_v0, 4  ;;  %v1162_v30 = vmax.f32 %v1160_v18, %v1161_v59 }
 0x163   : > { %v1963_v48 = vsel %vm7870_vm3, %v1962_v17, -inf  ;;  %vm7871_vm14 = vmmov %vm7869_vm0  ;;  %vm7881_vm3 = vcmask 1041409  }
 0x164   : > { %v1186_v40 = vsel %vm7871_vm14, %v1149_v52, -inf  ;;  %1964 = vmax.xlane.f32.xlu1 %v1963_v48  ;;  %vm7872_vm9 = vmmov %vm7869_vm0  ;;  %v1179_v5 = vrot.slane %v1178_v63, 4  ;;  %v1171_v60 = vmax.f32 %v1169_v0, %v1170_v10  ;;  %v1163_v54 = vrot.slane %v1162_v30, 2 }
 0x165   : > { %v1187_v7 = vmax.f32 %v1185_v45, %v1186_v40  ;;  %v1194_v3 = vsel %vm7872_vm9, %v1150_v32, -inf  ;;  %vm7873_vm7 = vmmov %vm7869_vm0  ;;  %vm7882_vm14 = vcmask 1042434  }
 0x166   : > { %v1195_v38 = vsel %vm7873_vm7, %v1151_v16, -inf  ;;  %vm7874_vm5 = vmmov %vm7869_vm0  ;;  %v1180_v39 = vmax.f32 %v1178_v63, %v1179_v5  ;;  %v1172_v32 = vrot.slane %v1171_v60, 2  ;;  %v1222_v63 = vsel %vm7869_vm0, %v1157_v42, -inf }
 0x167   : > { %v1196_v47 = vmax.f32 %v1194_v3, %v1195_v38  ;;  %v1203_v50 = vsel %vm7874_vm5, %v1152_v33, -inf  ;;  %v1188_v55 = vrot.slane %v1187_v7, 4  ;;  %vm7875_vm1 = vmmov %vm7869_vm0  ;;  %v1164_v33 = vmax.f32 %v1162_v30, %v1163_v54 }
 0x168   : > { %v1204_v4 = vsel %vm7875_vm1, %v1153_v12, -inf  ;;  %vm7876_vm12 = vmmov %vm7869_vm0  ;;  %v1181_v0 = vrot.slane %v1180_v39, 2  ;;  %v1173_v12 = vmax.f32 %v1171_v60, %v1172_v32  ;;  %vm7883_vm7 = vcmask 1043459  }
 0x169   : > { %v1212_v52 = vsel %vm7876_vm12, %v1154_v41, -inf  ;;  %v1197_v43 = vrot.slane %v1196_v47, 4  ;;  %v1205_v17 = vmax.f32 %v1203_v50, %v1204_v4  ;;  %v1189_v16 = vmax.f32 %v1187_v7, %v1188_v55  ;;  %vm7878_vm8 = vmmov %vm7869_vm0 }
 0x16a   : > { %v1213_v18 = vsel %vm7878_vm8, %v1155_v36, -inf  ;;  %vm7879_vm10 = vmmov %vm7869_vm0  ;;  %v1165_v40 = vrot.slane %v1164_v33, 1  ;;  %v1182_v10 = vmax.f32 %v1180_v39, %v1181_v0  ;;  %v1174_v36 = vrot.slane %v1173_v12, 1 }
 0x16b   : > { %v1221_v29 = vsel %vm7879_vm10, %v1156_v14, -inf  ;;  %v1198_v45 = vmax.f32 %v1196_v47, %v1197_v43  ;;  %v1206_v48 = vrot.slane %v1205_v17, 4  ;;  %v1190_v59 = vrot.slane %v1189_v16, 2 }
 0x16c   : > { %v1214_v41 = vmax.f32 %v1212_v52, %v1213_v18  ;;  %v1223_v5 = vmax.f32 %v1221_v29, %v1222_v63  ;;  %v1166_v30 = vmax.f32 %v1164_v33, %v1165_v40  ;;  %v1183_v50 = vrot.slane %v1182_v10, 1 }
 0x16d   : > { %v1199_v3 = vrot.slane %v1198_v45, 2  ;;  %v1207_v38 = vmax.f32 %v1205_v17, %v1206_v48  ;;  %v1191_v7 = vmax.f32 %v1189_v16, %v1190_v59  ;;  %v1175_v60 = vmax.f32 %v1173_v12, %v1174_v36 }
 0x16e   : > { %v1215_v14 = vrot.slane %v1214_v41, 4  ;;  %v1224_v54 = vrot.slane %v1223_v5, 4  ;;  %v1184_v42 = vmax.f32 %v1182_v10, %v1183_v50  ;;  %v2560_v17 = vstv %s5081_s11  ;;  %s5240_s11 = sld [smem:[#allocation4 + %s2002_s9]] }
 0x16f   : > { %v1200_v47 = vmax.f32 %v1198_v45, %v1199_v3  ;;  %v1208_v55 = vrot.slane %v1207_v38, 2  ;;  %v1192_v4 = vrot.slane %v1191_v7, 1  ;;  %v1239_v16 = vsel %vm7881_vm3, %v1175_v60, %v1166_v30  ;;  %v5121_v60 = vld [vmem:[%s4340_s24 + $0x10] sm:$0xff]  ;;  %s5247_s9 = sld [smem:[#allocation4 + %s1287_s28]]  ;;  %s2719_s28 = sadd.s32 6, %s4269_s8 }
 0x170   : > { %v1216_v52 = vmax.f32 %v1214_v41, %v1215_v14  ;;  %v1225_v0 = vmax.f32 %v1223_v5, %v1224_v54  ;;  %v1240_v33 = vsel %vm7882_vm14, %v1184_v42, %v1239_v16  ;;  %vm2561_vm9 = vcmp.ge.s32.totalorder %v3559_v1, %v2560_v17  ;;  %v5133_v42 = vld [vmem:[%s4340_s24 + $0x18] sm:$0xff] }
 0x171   : > { %v1201_v43 = vrot.slane %v1200_v47, 1  ;;  %v1209_v39 = vmax.f32 %v1207_v38, %v1208_v55  ;;  %v1193_v32 = vmax.f32 %v1191_v7, %v1192_v4  ;;  %vm2562_vm5 = vcmp.ge.s32.totalorder %v3572_v2, %v2560_v17  ;;  %7891 = vst [vmem:[#allocation73_spill] sm:$0xff] %v5133_v42 }
 0x172   : > { %v1217_v18 = vrot.slane %v1216_v52, 2  ;;  %v1226_v12 = vrot.slane %v1225_v0, 2  ;;  %vm7884_vm1 = vcmask 1044484   ;;  %v2563_v40 = vstv %s5087_s19  ;;  %s2004_s19 = sadd.s32 6, %s4285_s23 }
 0x173   : > { %v1202_v48 = vmax.f32 %v1200_v47, %v1201_v43  ;;  %v1210_v29 = vrot.slane %v1209_v39, 1  ;;  %v1241_v59 = vsel %vm7883_vm7, %v1193_v32, %v1240_v33  ;;  %v1972_v10 = vsel %vm4767_vm15, %v5064_v15, -inf  ;;  %v5115_v47 = vld [vmem:[%s4340_s24] sm:$0xff]  ;;  %v5145_v32 = vld [vmem:[%s4340_s24 + $0x28] sm:$0xff]  ;;  %v5158_v33 = vld [vmem:[%s4340_s24 + $0x38] sm:$0xff]  ;;  %s5242_s30 = sld [smem:[#allocation4 + %s2004_s19]] }
 0x174   : > { %v1218_v45 = vmax.f32 %v1216_v52, %v1217_v18  ;;  %v1227_v38 = vmax.f32 %v1225_v0, %v1226_v12  ;;  %vm2564_vm12 = vcmp.lt.s32.totalorder %v3559_v1, %v2563_v40  ;;  %vm2565_vm8 = vcmp.lt.s32.totalorder %v3572_v2, %v2563_v40  ;;  %v5127_v52 = vld [vmem:[%s4340_s24 + $0x8] sm:$0xff]  ;;  %7892 = vst [vmem:[#allocation74_spill] sm:$0xff] %v5145_v32  ;;  %v5164_v12 = vld [vmem:[%s4340_s24 + $0x40] sm:$0xff]  ;;  %v5176_v40 = vld [vmem:[%s4340_s24 + $0x50] sm:$0xff]  ;;  %7922 = sst [smem:[#allocation85_spill]] %s5240_s11 }
 0x175   : > { %v1211_v41 = vmax.f32 %v1209_v39, %v1210_v29  ;;  %v1242_v63 = vsel %vm7884_vm1, %v1202_v48, %v1241_v59  ;;  %vm7885_vm10 = vcmask 1045509   ;;  %vm5103_vm0 = vmand %vm2561_vm9, %vm2564_vm12  ;;  %vm7888_vm3 = vcmask 130048   ;;  %v5139_v39 = vld [vmem:[%s4340_s24 + $0x20] sm:$0xff]  ;;  %v5152_v48 = vld [vmem:[%s4340_s24 + $0x30] sm:$0xff]  ;;  %7895 = vst [vmem:[#allocation76_spill] sm:$0xff] %v5158_v33  ;;  %7924 = sst [smem:[#allocation87_spill]] %s5247_s9 }
 0x176   : > { %v1219_v3 = vrot.slane %v1218_v45, 1  ;;  %v5108_v14 = vsel %vm7888_vm3, %v1972_v10, -inf  ;;  %v1228_v30 = vrot.slane %v1227_v38, 1  ;;  %vm5110_vm14 = vmand %vm2562_vm5, %vm2565_vm8  ;;  %v2572_v55 = vsel %vm5103_vm0, %v5115_v47, -inf  ;;  %7894 = vst [vmem:[#allocation75_spill] sm:$0xff] %v5152_v48  ;;  %s5252_s19 = sld [smem:[#allocation4 + %s1289_s3]] }
 0x177   : > { %v1243_v36 = vsel %vm7885_vm10, %v1211_v41, %v1242_v63  ;;  %v2574_v4 = vsel %vm5103_vm0, %v5121_v60, -inf  ;;  %v2573_v54 = vsel %vm5110_vm14, %v5127_v52, -inf  ;;  %v2575_v43 = vsel %vm5110_vm14, %v5133_v42, -inf  ;;  %7896 = vst [vmem:[#allocation77_spill] sm:$0xff] %v5164_v12  ;;  %v5170_v41 = vld [vmem:[%s4340_s24 + $0x48] sm:$0xff]  ;;  %7898 = vst [vmem:[#allocation79_spill] sm:$0xff] %v5176_v40 }
 0x178   : > { %v1220_v5 = vmax.f32 %v1218_v45, %v1219_v3  ;;  %v2576_v17 = vsel %vm5103_vm0, %v5139_v39, -inf  ;;  %v2577_v18 = vsel %vm5110_vm14, %v5145_v32, -inf  ;;  %v1229_v0 = vmax.f32 %v1227_v38, %v1228_v30  ;;  %7897 = vst [vmem:[#allocation78_spill] sm:$0xff] %v5170_v41  ;;  %v5182_v3 = vld [vmem:[%s4340_s24 + $0x58] sm:$0xff]  ;;  %vm7905_vm5 = vmmov %vm7888_vm3  ;;  %s2163_s3 = sadd.s32 3, %s4285_s23 }
 0x179   : > { %vm7893_vm9 = vcmask 1046534   ;;  %v2578_v29 = vsel %vm5103_vm0, %v5152_v48, -inf  ;;  %v2579_v45 = vsel %vm5110_vm14, %v5158_v33, -inf  ;;  %v2580_v59 = vsel %vm5103_vm0, %v5164_v12, -inf  ;;  %7899 = vst [vmem:[#allocation80_spill] sm:$0xff] %v5182_v3  ;;  %vm7906_vm1 = vmmov %vm7888_vm3  ;;  %7923 = sst [smem:[#allocation86_spill]] %s5242_s30 }
 0x17a   : > { %v1244_v16 = vsel %vm7893_vm9, %v1220_v5, %v1243_v36  ;;  %v2581_v63 = vsel %vm5110_vm14, %v5170_v41, -inf  ;;  %v2582_v10 = vsel %vm5103_vm0, %v5176_v40, -inf  ;;  %v2583_v38 = vsel %vm5110_vm14, %v5182_v3, -inf  ;;  %v5191_v5 = vld [vmem:[%s4340_s24 + $0x60] sm:$0xff]  ;;  %v5203_v40 = vld [vmem:[%s4340_s24 + $0x70] sm:$0xff]  ;;  %vm7907_vm12 = vmmov %vm7906_vm1 }
 0x17b   : > { %vm7900_vm7 = vcmask 1047559   ;;  %7901 = vst [vmem:[#allocation81_spill] sm:$0xff] %v5191_v5  ;;  %v2584_v30 = vsel %vm5103_vm0, %v5191_v5, -inf  ;;  %v2585_v11 = vsel %vm5110_vm14, %v5197_v22, -inf  ;;  %7903 = vst [vmem:[#allocation83_spill] sm:$0xff] %v5203_v40  ;;  %v2586_v3 = vsel %vm5103_vm0, %v5203_v40, -inf }
 0x17c   : > { %v5188_v36 = vsel %vm7900_vm7, %v1229_v0, %v1244_v16  ;;  %v5215_v5 = vld [vmem:[%s4340_s24 + $0x78] sm:$0xff]  ;;  %v2588_v41 = vsel %vm7905_vm5, %v2572_v55, -inf  ;;  %vm7908_vm8 = vmmov %vm7906_vm1  ;;  %7925 = sst [smem:[#allocation88_spill]] %s5252_s19 }
 0x17d   : > { %v1247_v0 = vsel %vm4372_vm11, %v5188_v36, -inf  ;;  %v1257_v16 = vsel %vm4354_vm13, %v5188_v36, -inf  ;;  %7904 = vst [vmem:[#allocation84_spill] sm:$0xff] %v5215_v5  ;;  %v2587_v22 = vsel %vm5110_vm14, %v5215_v5, -inf  ;;  %v2589_v40 = vsel %vm7908_vm8, %v2573_v54, -inf  ;;  %vm7909_vm10 = vmmov %vm7906_vm1 }
 0x17e   : > { %v1248_v12 = vsel %vm7906_vm1, %v1247_v0, -inf  ;;  %v1258_v7 = vsel %vm7907_vm12, %v1257_v16, -inf  ;;  %v2597_v19 = vsel %vm7909_vm10, %v2574_v4, -inf  ;;  %v2590_v8 = vmax.f32 %v2588_v41, %v2589_v40  ;;  %vm7910_vm0 = vmmov %vm7906_vm1 }
 0x17f   : > { %1249 = vmax.xlane.f32.xlu0 %v1248_v12  ;;  %1259 = vmax.xlane.f32.xlu1 %v1258_v7  ;;  %v2598_v33 = vsel %vm7910_vm0, %v2575_v43, -inf  ;;  %vm7911_vm3 = vmmov %vm7910_vm0 }
 0x180   : > { %v2606_v48 = vsel %vm7911_vm3, %v2576_v17, -inf  ;;  %vm7912_vm9 = vmmov %vm7910_vm0  ;;  %v2599_v5 = vmax.f32 %v2597_v19, %v2598_v33  ;;  %v2591_v16 = vrot.slane %v2590_v8, 4 }
 0x181   : > { %v2607_v50 = vsel %vm7912_vm9, %v2577_v18, -inf  ;;  %vm7913_vm14 = vmmov %vm7910_vm0 }
 0x182   : > { %v2608_v32 = vmax.f32 %v2606_v48, %v2607_v50  ;;  %v2615_v55 = vsel %vm7913_vm14, %v2578_v29, -inf  ;;  %vm7914_vm7 = vmmov %vm7910_vm0  ;;  %v2600_v12 = vrot.slane %v2599_v5, 4  ;;  %v2592_v40 = vmax.f32 %v2590_v8, %v2591_v16 }
 0x183   : > { %v2616_v0 = vsel %vm7914_vm7, %v2579_v45, -inf  ;;  %vm7915_vm5 = vmmov %vm7910_vm0  ;;  %vm7927_vm14 = vcmask 1041409   ;;  %vm7928_vm7 = vnez %v7811_v44 }
 0x184   : > { %v2617_v42 = vmax.f32 %v2615_v55, %v2616_v0  ;;  %v2624_v54 = vsel %vm7915_vm5, %v2580_v59, -inf  ;;  %vm7916_vm1 = vmmov %vm7910_vm0  ;;  %v2609_v41 = vrot.slane %v2608_v32, 4  ;;  %v2601_v29 = vmax.f32 %v2599_v5, %v2600_v12 }
 0x185   : > { %v2625_v4 = vsel %vm7916_vm1, %v2581_v63, -inf  ;;  %vm7917_vm12 = vmmov %vm7910_vm0  ;;  %v2593_v59 = vrot.slane %v2592_v40, 2  ;;  %v2643_v63 = vsel %vm7910_vm0, %v2585_v11, -inf  ;;  %vm7929_vm5 = vcmask 1042434  }
 0x186   : > { %v2626_v43 = vmax.f32 %v2624_v54, %v2625_v4  ;;  %v2633_v17 = vsel %vm7917_vm12, %v2582_v10, -inf  ;;  %v2618_v18 = vrot.slane %v2617_v42, 4  ;;  %vm7918_vm8 = vmmov %vm7910_vm0  ;;  %v2610_v33 = vmax.f32 %v2608_v32, %v2609_v41 }
 0x187   : > { %v2634_v19 = vsel %vm7918_vm8, %v2583_v38, -inf  ;;  %vm7919_vm10 = vmmov %vm7910_vm0  ;;  %v2602_v0 = vrot.slane %v2601_v29, 2  ;;  %v2594_v38 = vmax.f32 %v2592_v40, %v2593_v59  ;;  %vm7930_vm1 = vcmask 1043459  }
 0x188   : > { %v2642_v48 = vsel %vm7919_vm10, %v2584_v30, -inf  ;;  %v2627_v45 = vrot.slane %v2626_v43, 4  ;;  %v2635_v7 = vmax.f32 %v2633_v17, %v2634_v19  ;;  %v2619_v50 = vmax.f32 %v2617_v42, %v2618_v18  ;;  %vm7920_vm3 = vmmov %vm7910_vm0 }
 0x189   : > { %v2651_v55 = vsel %vm7920_vm3, %v2586_v3, -inf  ;;  %v2611_v10 = vrot.slane %v2610_v33, 2  ;;  %v2644_v30 = vmax.f32 %v2642_v48, %v2643_v63  ;;  %vm7921_vm9 = vmmov %vm7910_vm0  ;;  %v2603_v5 = vmax.f32 %v2601_v29, %v2602_v0 }
 0x18a   : > { %v2628_v8 = vmax.f32 %v2626_v43, %v2627_v45  ;;  %v2636_v16 = vrot.slane %v2635_v7, 4  ;;  %v2620_v54 = vrot.slane %v2619_v50, 2  ;;  %v2652_v32 = vsel %vm7921_vm9, %v2587_v22, -inf  ;;  %vm7931_vm12 = vmmov %vm7910_vm0 }
 0x18b   : > { %v2612_v42 = vmax.f32 %v2610_v33, %v2611_v10  ;;  %v2595_v3 = vrot.slane %v2594_v38, 1  ;;  %v2645_v41 = vrot.slane %v2644_v30, 4  ;;  %v2653_v43 = vmax.f32 %v2651_v55, %v2652_v32  ;;  %vm7932_vm8 = vmmov %vm7910_vm0 }
 0x18c   : > { %v2629_v4 = vrot.slane %v2628_v8, 2  ;;  %v2637_v11 = vmax.f32 %v2635_v7, %v2636_v16  ;;  %v2621_v12 = vmax.f32 %v2619_v50, %v2620_v54  ;;  %v2604_v17 = vrot.slane %v2603_v5, 1  ;;  %vm7936_vm9 = vmmov %vm7932_vm8 }
 0x18d   : > { %v2613_v40 = vrot.slane %v2612_v42, 1  ;;  %v2596_v22 = vmax.f32 %v2594_v38, %v2595_v3  ;;  %v2646_v29 = vmax.f32 %v2644_v30, %v2645_v41  ;;  %v2654_v33 = vrot.slane %v2653_v43, 4 }
 0x18e   : > { %v2630_v18 = vmax.f32 %v2628_v8, %v2629_v4  ;;  %v2638_v19 = vrot.slane %v2637_v11, 2  ;;  %v2622_v48 = vrot.slane %v2621_v12, 1  ;;  %v2605_v45 = vmax.f32 %v2603_v5, %v2604_v17 }
 0x18f   : > { %v2614_v7 = vmax.f32 %v2612_v42, %v2613_v40  ;;  %v2647_v55 = vrot.slane %v2646_v29, 2  ;;  %v2655_v0 = vmax.f32 %v2653_v43, %v2654_v33  ;;  %v1982_v10 = vsel %vm4776_vm2, %v5064_v15, -inf }
 0x190   : > { %v2631_v59 = vrot.slane %v2630_v18, 1  ;;  %v2639_v63 = vmax.f32 %v2637_v11, %v2638_v19  ;;  %v2623_v50 = vmax.f32 %v2621_v12, %v2622_v48  ;;  %v2669_v38 = vsel %vm7927_vm14, %v2605_v45, %v2596_v22 }
 0x191   : > { %v1267_v54 = vsel %vm7928_vm7, %v5188_v36, -inf  ;;  %v2648_v30 = vmax.f32 %v2646_v29, %v2647_v55  ;;  %v2656_v32 = vrot.slane %v2655_v0, 2  ;;  %v2670_v5 = vsel %vm7929_vm5, %v2614_v7, %v2669_v38  ;;  %v5313_v38 = vld [vmem:[%s4489_s6 + $0x20] sm:$0xff] }
 0x192   : > { %v2632_v8 = vmax.f32 %v2630_v18, %v2631_v59  ;;  %v2640_v16 = vrot.slane %v2639_v63, 1  ;;  %v1992_v42 = vsel %vm4846_vm6, %v5064_v15, -inf  ;;  %v2671_v11 = vsel %vm7930_vm1, %v2623_v50, %v2670_v5  ;;  %vm7937_vm1 = vmmov %vm7932_vm8  ;;  %v5360_v50 = vld [vmem:[%s4489_s6 + $0x38] sm:$0xff] }
 0x193   : > { %v5266_v3 = vsel %vm7931_vm12, %v1982_v10, -inf  ;;  %v5269_v12 = vsel %vm7932_vm8, %v1267_v54, -inf  ;;  %v2649_v41 = vrot.slane %v2648_v30, 1  ;;  %v2657_v43 = vmax.f32 %v2655_v0, %v2656_v32  ;;  %v5301_v0 = vld [vmem:[%s4489_s6] sm:$0xff]  ;;  %7956 = vst [vmem:[#allocation94_spill] sm:$0xff] %v5360_v50 }
 0x194   : > { %v2641_v4 = vmax.f32 %v2639_v63, %v2640_v16  ;;  %vm7933_vm10 = vcmask 1044484   ;;  %vm7934_vm0 = vnez %v7813_v62  ;;  %vm7935_vm3 = vcmask 1045509   ;;  %v5384_v63 = vld [vmem:[%s4489_s6 + $0x58] sm:$0xff] }
 0x195   : > { %v2672_v17 = vsel %vm7933_vm10, %v2632_v8, %v2671_v11  ;;  %v1277_v40 = vsel %vm7934_vm0, %v5188_v36, -inf  ;;  %v5277_v18 = vsel %vm7936_vm9, %v1992_v42, -inf  ;;  %v2006_v19 = vstv %s5240_s11  ;;  %v5307_v8 = vld [vmem:[%s4489_s6 + $0x10] sm:$0xff]  ;;  %v5326_v42 = vld [vmem:[%s4489_s6 + $0x8] sm:$0xff]  ;;  %v5332_v11 = vld [vmem:[%s4489_s6 + $0x18] sm:$0xff]  ;;  %7960 = vst [vmem:[#allocation98_spill] sm:$0xff] %v5384_v63 }
 0x196   : > { %v2673_v15 = vsel %vm7935_vm3, %v2641_v4, %v2672_v17  ;;  %v2009_v22 = vstv %s5242_s30  ;;  %v2650_v48 = vmax.f32 %v2648_v30, %v2649_v41  ;;  %v2658_v29 = vrot.slane %v2657_v43, 1  ;;  %v5319_v30 = vld [vmem:[%s4489_s6 + $0x30] sm:$0xff]  ;;  %7945 = vst [vmem:[#allocation91_spill] sm:$0xff] %v5326_v42  ;;  %7946 = vst [vmem:[#allocation92_spill] sm:$0xff] %v5332_v11  ;;  %s8141_s30 = sld [smem:[#allocation25_spill]] }
 0x197   : > { %vm2007_vm14 = vcmp.ge.s32.totalorder %v3559_v1, %v2006_v19  ;;  %vm2008_vm5 = vcmp.ge.s32.totalorder %v3572_v2, %v2006_v19  ;;  %v5284_v36 = vsel %vm7937_vm1, %v1277_v40, -inf  ;;  %vm2010_vm12 = vcmp.lt.s32.totalorder %v3559_v1, %v2009_v22  ;;  %7943 = vst [vmem:[#allocation90_spill] sm:$0xff] %v5319_v30 }
 0x198   : > { %vm2011_vm8 = vcmp.lt.s32.totalorder %v3572_v2, %v2009_v22  ;;  %v2659_v45 = vmax.f32 %v2657_v43, %v2658_v29  ;;  %vm7938_vm10 = vcmask 1046534   ;;  %vm5290_vm3 = vmand %vm2007_vm14, %vm2010_vm12  ;;  %vm7944_vm14 = vcmask 1047559   ;;  %v5338_v43 = vld [vmem:[%s4489_s6 + $0x28] sm:$0xff] }
 0x199   : > { %v2674_v7 = vsel %vm7938_vm10, %v2650_v48, %v2673_v15  ;;  %vm5296_vm9 = vmand %vm2008_vm5, %vm2011_vm8  ;;  %v2018_v10 = vsel %vm5290_vm3, %v5301_v0, -inf  ;;  %v2020_v16 = vsel %vm5290_vm3, %v5307_v8, -inf  ;;  %v2022_v54 = vsel %vm5290_vm3, %v5313_v38, -inf  ;;  %7947 = vst [vmem:[#allocation93_spill] sm:$0xff] %v5338_v43 }
 0x19a   : > { %v2024_v32 = vsel %vm5290_vm3, %v5319_v30, -inf  ;;  %v2675_v5 = vsel %vm7944_vm14, %v2659_v45, %v2674_v7  ;;  %v2019_v4 = vsel %vm5296_vm9, %v5326_v42, -inf  ;;  %v2021_v41 = vsel %vm5296_vm9, %v5332_v11, -inf  ;;  %v5396_v30 = vld [vmem:[%s4489_s6 + $0x68] sm:$0xff]  ;;  %v5408_v11 = vld [vmem:[%s4489_s6 + $0x78] sm:$0xff] }
 0x19b   : > { %v2023_v17 = vsel %vm5296_vm9, %v5338_v43, -inf  ;;  %vm7948_vm5 = vnez %v7770_v34  ;;  %vm7949_vm1 = vnez %v7794_v13  ;;  %vm7950_vm12 = vnez %v7817_v26  ;;  %7962 = vst [vmem:[#allocation100_spill] sm:$0xff] %v5396_v30  ;;  %v5402_v43 = vld [vmem:[%s4489_s6 + $0x70] sm:$0xff]  ;;  %7964 = vst [vmem:[#allocation102_spill] sm:$0xff] %v5408_v11 }
 0x19c   : > { %v2677_v40 = vsel %vm7948_vm5, %v2675_v5, -inf  ;;  %v2687_v15 = vsel %vm7949_vm1, %v2675_v5, -inf  ;;  %v2697_v19 = vsel %vm7950_vm12, %v2675_v5, -inf  ;;  %vm7951_vm8 = vnez %v7820_v9  ;;  %7963 = vst [vmem:[#allocation101_spill] sm:$0xff] %v5402_v43 }
 0x19d   : > { %v2707_v22 = vsel %vm7951_vm8, %v2675_v5, -inf  ;;  %vm7952_vm10 = vcmask 130048   ;;  %v2025_v5 = vsel %vm5296_vm9, %v5360_v50, -inf  ;;  %v2029_v33 = vsel %vm5296_vm9, %v5384_v63, -inf  ;;  %v5390_v50 = vld [vmem:[%s4489_s6 + $0x60] sm:$0xff] }
 0x19e   : > { %v2678_v48 = vsel %vm7952_vm10, %v2677_v40, -inf  ;;  %vm7953_vm14 = vmmov %vm7952_vm10  ;;  %v5366_v40 = vld [vmem:[%s4489_s6 + $0x40] sm:$0xff]  ;;  %7961 = vst [vmem:[#allocation99_spill] sm:$0xff] %v5390_v50  ;;  %v2033_v63 = vsel %vm5296_vm9, %v5408_v11, -inf }
 0x19f   : > { %v2688_v29 = vsel %vm7953_vm14, %v2687_v15, -inf  ;;  %vm7954_vm6 = vmmov %vm7952_vm10  ;;  %2679 = vmax.xlane.f32.xlu0 %v2678_v48  ;;  %7957 = vst [vmem:[#allocation95_spill] sm:$0xff] %v5366_v40  ;;  %v2026_v15 = vsel %vm5290_vm3, %v5366_v40, -inf  ;;  %v5378_v48 = vld [vmem:[%s4489_s6 + $0x50] sm:$0xff]  ;;  %v2030_v40 = vsel %vm5290_vm3, %v5390_v50, -inf }
 0x1a0   : > { %v5354_v45 = vsel %vm7954_vm6, %v2697_v19, -inf  ;;  %vm7955_vm5 = vmmov %vm7954_vm6  ;;  %2689 = vmax.xlane.f32.xlu1 %v2688_v29  ;;  %v5372_v19 = vld [vmem:[%s4489_s6 + $0x48] sm:$0xff]  ;;  %7959 = vst [vmem:[#allocation97_spill] sm:$0xff] %v5378_v48  ;;  %v2028_v29 = vsel %vm5290_vm3, %v5378_v48, -inf  ;;  %v2032_v48 = vsel %vm5290_vm3, %v5402_v43, -inf  ;;  %s5546_s6 = sld [smem:[#allocation4 + %s2719_s28]] }
 0x1a1   : > { %v5357_v7 = vsel %vm7955_vm5, %v2707_v22, -inf  ;;  %7958 = vst [vmem:[#allocation96_spill] sm:$0xff] %v5372_v19  ;;  %v2027_v22 = vsel %vm5296_vm9, %v5372_v19, -inf  ;;  %v2031_v19 = vsel %vm5296_vm9, %v5396_v30, -inf  ;;  %vm7965_vm6 = vmmov %vm7955_vm5  ;;  %v2035_v42 = vsel %vm7955_vm5, %v2019_v4, -inf  ;;  %s5654_s28 = sld [smem:[#allocation4 + %s2163_s3]] }
 0x1a2   : > { %v2034_v50 = vsel %vm7965_vm6, %v2018_v10, -inf  ;;  %vm7966_vm10 = vmmov %vm7955_vm5 }
 0x1a3   : > { %v2043_v9 = vsel %vm7966_vm10, %v2020_v16, -inf  ;;  %v2036_v26 = vmax.f32 %v2034_v50, %v2035_v42  ;;  %vm7967_vm14 = vmmov %vm7955_vm5  ;;  %1974 = vmax.xlane.f32.xlu0 %v5108_v14 }
 0x1a4   : > { %v2044_v30 = vsel %vm7967_vm14, %v2021_v41, -inf  ;;  %vm7968_vm8 = vmmov %vm7955_vm5  ;;  %1984 = vmax.xlane.f32.xlu1 %v5266_v3 }
 0x1a5   : > { %v2052_v13 = vsel %vm7968_vm8, %v2022_v54, -inf  ;;  %vm7969_vm12 = vmmov %vm7955_vm5  ;;  %v2045_v43 = vmax.f32 %v2043_v9, %v2044_v30  ;;  %v2037_v11 = vrot.slane %v2036_v26, 4 }
 0x1a6   : > { %v2053_v59 = vsel %vm7969_vm12, %v2023_v17, -inf  ;;  %vm7970_vm3 = vmmov %vm7955_vm5  ;;  %8014 = sst [smem:[#allocation103_spill]] %s5546_s6 }
 0x1a7   : > { %v2054_v55 = vmax.f32 %v2052_v13, %v2053_v59  ;;  %v2061_v10 = vsel %vm7970_vm3, %v2024_v32, -inf  ;;  %vm7971_vm9 = vmmov %vm7970_vm3  ;;  %v2046_v54 = vrot.slane %v2045_v43, 4  ;;  %v2038_v3 = vmax.f32 %v2036_v26, %v2037_v11  ;;  %1269 = vmax.xlane.f32.xlu0 %v5269_v12  ;;  %8061 = sst [smem:[#allocation104_spill]] %s5654_s28 }
 0x1a8   : > { %v2062_v4 = vsel %vm7971_vm9, %v2025_v5, -inf  ;;  %vm7972_vm6 = vmmov %vm7970_vm3  ;;  %v7977_v32 = vstv %s5247_s9  ;;  %1279 = vmax.xlane.f32.xlu1 %v5284_v36  ;;  %s8140_s9 = sld [smem:[#allocation24_spill]] }
 0x1a9   : > { %v2063_v16 = vmax.f32 %v2061_v10, %v2062_v4  ;;  %v2070_v50 = vsel %vm7972_vm6, %v2026_v15, -inf  ;;  %vm7973_vm5 = vmmov %vm7970_vm3  ;;  %v2055_v41 = vrot.slane %v2054_v55, 4  ;;  %vm5431_vm14 = vcmp.ge.s32.totalorder %v3559_v1, %v7977_v32 }
 0x1aa   : > { %v2071_v42 = vsel %vm7973_vm5, %v2027_v22, -inf  ;;  %vm7974_vm12 = vmmov %vm7970_vm3  ;;  %v2047_v15 = vmax.f32 %v2045_v43, %v2046_v54  ;;  %v7980_v26 = vmov %v7977_v32  ;;  %v2039_v11 = vrot.slane %v2038_v3, 2 }
 0x1ab   : > { %v2072_v17 = vmax.f32 %v2070_v50, %v2071_v42  ;;  %v2079_v14 = vsel %vm7974_vm12, %v2028_v29, -inf  ;;  %v2064_v9 = vrot.slane %v2063_v16, 4  ;;  %vm7975_vm8 = vmmov %vm7970_vm3  ;;  %v2056_v22 = vmax.f32 %v2054_v55, %v2055_v41  ;;  %2699 = vmax.xlane.f32.xlu0 %v5354_v45 }
 0x1ac   : > { %v2080_v13 = vsel %vm7975_vm8, %v2029_v33, -inf  ;;  %vm7976_vm10 = vmmov %vm7970_vm3  ;;  %vm5440_vm3 = vcmp.ge.s32.totalorder %v3572_v2, %v7980_v26  ;;  %v2048_v50 = vrot.slane %v2047_v15, 2  ;;  %v2040_v43 = vmax.f32 %v2038_v3, %v2039_v11  ;;  %2709 = vmax.xlane.f32.xlu1 %v5357_v7 }
 0x1ad   : > { %v2088_v30 = vsel %vm7976_vm10, %v2030_v40, -inf  ;;  %v2073_v59 = vrot.slane %v2072_v17, 4  ;;  %v2081_v29 = vmax.f32 %v2079_v14, %v2080_v13  ;;  %v2065_v40 = vmax.f32 %v2063_v16, %v2064_v9  ;;  %vm7983_vm9 = vmmov %vm7973_vm5 }
 0x1ae   : > { %v2089_v10 = vsel %vm7983_vm9, %v2031_v19, -inf  ;;  %vm7984_vm6 = vmmov %vm7973_vm5  ;;  %v2057_v12 = vrot.slane %v2056_v22, 2  ;;  %v2098_v41 = vsel %vm7973_vm5, %v2033_v63, -inf  ;;  %v2049_v14 = vmax.f32 %v2047_v15, %v2048_v50  ;;  %p479_p2 = scmp.le.s32.totalorder %s8141_s30, %s8140_s9  ;;  %s8174_s9 = sadd.s32 7, %s4269_s8 }
 0x1af   : > { %v2097_v4 = vsel %vm7984_vm6, %v2032_v48, -inf  ;;  %v2074_v42 = vmax.f32 %v2072_v17, %v2073_v59  ;;  %v2082_v36 = vrot.slane %v2081_v29, 4  ;;  %v2066_v55 = vrot.slane %v2065_v40, 2  ;;  %1994 = vmax.xlane.f32.xlu0 %v5277_v18 }
 0x1b0   : > { %v2090_v54 = vmax.f32 %v2088_v30, %v2089_v10  ;;  %v2058_v13 = vmax.f32 %v2056_v22, %v2057_v12  ;;  %v2041_v19 = vrot.slane %v2040_v43, 1  ;;  %v2099_v26 = vmax.f32 %v2097_v4, %v2098_v41  ;;  %p6003_p7 = por %p479_p2, %p7526_p3  ;;  %p6020_p9 = por %p479_p2, %p7531_p4 }
 0x1b1   : > { %v2075_v16 = vrot.slane %v2074_v42, 2  ;;  %v2083_v9 = vmax.f32 %v2081_v29, %v2082_v36  ;;  %v2067_v32 = vmax.f32 %v2065_v40, %v2066_v55  ;;  %v2050_v34 = vrot.slane %v2049_v14, 1  ;;  %p6032_p8 = por %p479_p2, %p7524_p13 }
 0x1b2   : > { %v2091_v48 = vrot.slane %v2090_v54, 4  ;;  %v2059_v17 = vrot.slane %v2058_v13, 1  ;;  %v2042_v30 = vmax.f32 %v2040_v43, %v2041_v19  ;;  %v2100_v45 = vrot.slane %v2099_v26, 4  ;;  %s8159_s26 = scalar_select %p6003_p7, 1, 0 }
 0x1b3   : > { %v2076_v3 = vmax.f32 %v2074_v42, %v2075_v16  ;;  %v2084_v59 = vrot.slane %v2083_v9, 2  ;;  %v2068_v63 = vrot.slane %v2067_v32, 1  ;;  %v2051_v7 = vmax.f32 %v2049_v14, %v2050_v34  ;;  %s8166_s13 = scalar_select %p6020_p9, 1, 0 }
 0x1b4   : > { %v2092_v11 = vmax.f32 %v2090_v54, %v2091_v48  ;;  %v2060_v15 = vmax.f32 %v2058_v13, %v2059_v17  ;;  %v2101_v50 = vmax.f32 %v2099_v26, %v2100_v45  ;;  %v7985_v4 = vstv %s5252_s19  ;;  %s5658_s19 = sld [smem:[#allocation4 + %s2165_s20]] }
 0x1b5   : > { %v2077_v22 = vrot.slane %v2076_v3, 1  ;;  %v2085_v29 = vmax.f32 %v2083_v9, %v2084_v59  ;;  %v2069_v10 = vmax.f32 %v2067_v32, %v2068_v63  ;;  %vm1295_vm12 = vcmp.lt.s32.totalorder %v3559_v1, %v7985_v4  ;;  %8160 = sst [smem:[#allocation24_spill]] %s8159_s26 }
 0x1b6   : > { %v2093_v40 = vrot.slane %v2092_v11, 2  ;;  %vm7986_vm8 = vcmask 1041409   ;;  %v7987_v43 = vmov %v7985_v4  ;;  %vm5459_vm9 = vmand %vm5431_vm14, %vm1295_vm12  ;;  %v2102_v55 = vrot.slane %v2101_v50, 2  ;;  %8167 = sst [smem:[#allocation26_spill]] %s8166_s13  ;;  %s8178_s13 = sld [smem:[#allocation29_spill]] }
 0x1b7   : > { %v2078_v12 = vmax.f32 %v2076_v3, %v2077_v22  ;;  %v2086_v42 = vrot.slane %v2085_v29, 1  ;;  %v2115_v36 = vsel %vm7986_vm8, %v2051_v7, %v2042_v30  ;;  %vm1296_vm10 = vcmp.lt.s32.totalorder %v3572_v2, %v7987_v43  ;;  %s8168_s27 = scalar_select %p6032_p8, 1, 0 }
 0x1b8   : > { %v2094_v18 = vmax.f32 %v2092_v11, %v2093_v40  ;;  %vm7990_vm6 = vcmask 1042434   ;;  %vm5466_vm5 = vmand %vm5440_vm3, %vm1296_vm10  ;;  %v1303_v14 = vsel %vm5459_vm9, %v4961_v58, -inf  ;;  %vm7993_vm8 = vcmask 1043459   ;;  %s8310_s3 = scalar_select %p6003_p7, 1, 0 }
 0x1b9   : > { %v2116_v54 = vsel %vm7990_vm6, %v2060_v15, %v2115_v36  ;;  %v2087_v13 = vmax.f32 %v2085_v29, %v2086_v42  ;;  %v1304_v16 = vsel %vm5466_vm5, %v4968_v27, -inf  ;;  %v1305_v9 = vsel %vm5459_vm9, %v4974_v25, -inf }
 0x1ba   : > { %v2117_v5 = vsel %vm7993_vm8, %v2069_v10, %v2116_v54  ;;  %v2095_v33 = vrot.slane %v2094_v18, 1  ;;  %v2103_v19 = vmax.f32 %v2101_v50, %v2102_v55  ;;  %vm7994_vm14 = vcmask 1044484   ;;  %8062 = sst [smem:[#allocation105_spill]] %s5658_s19 }
 0x1bb   : > { %v2118_v32 = vsel %vm7994_vm14, %v2078_v12, %v2117_v5  ;;  %v1306_v48 = vsel %vm5466_vm5, %v4981_v51, -inf  ;;  %vm7995_vm3 = vcmask 1045509   ;;  %v1307_v26 = vsel %vm5459_vm9, %v4988_v23, -inf }
 0x1bc   : > { %v2119_v58 = vsel %vm7995_vm3, %v2087_v13, %v2118_v32  ;;  %v1308_v27 = vsel %vm5466_vm5, %v4994_v20, -inf  ;;  %v1309_v25 = vsel %vm5459_vm9, %v5000_v49, -inf  ;;  %v2096_v17 = vmax.f32 %v2094_v18, %v2095_v33 }
 0x1bd   : > { %v2104_v3 = vrot.slane %v2103_v19, 1  ;;  %v1310_v51 = vsel %vm5466_vm5, %v5006_v21, -inf  ;;  %v1311_v59 = vsel %vm5459_vm9, %v5012_v31, -inf  ;;  %v1312_v23 = vsel %vm5466_vm5, %v5018_v28, -inf }
 0x1be   : > { %v1313_v20 = vsel %vm5459_vm9, %v5024_v57, -inf  ;;  %v1314_v49 = vsel %vm5466_vm5, %v5030_v46, -inf  ;;  %v1315_v21 = vsel %vm5459_vm9, %v5036_v35, -inf  ;;  %vm7996_vm12 = vcmask 1046534  }
 0x1bf   : > { %v2105_v30 = vmax.f32 %v2103_v19, %v2104_v3  ;;  %v2120_v63 = vsel %vm7996_vm12, %v2096_v17, %v2119_v58  ;;  %v1316_v31 = vsel %vm5466_vm5, %v5043_v53, -inf  ;;  %v1317_v28 = vsel %vm5459_vm9, %v5049_v6, -inf }
 0x1c0   : > { %v1318_v57 = vsel %vm5466_vm5, %v5055_v37, -inf  ;;  %vm7997_vm10 = vcmask 130048   ;;  %vm8000_vm14 = vcmask 1047559  }
 0x1c1   : > { %v1319_v46 = vsel %vm7997_vm10, %v1303_v14, -inf  ;;  %vm7998_vm6 = vmmov %vm7997_vm10  ;;  %v5526_v45 = vsel %vm8000_vm14, %v2105_v30, %v2120_v63 }
 0x1c2   : > { %v1320_v11 = vsel %vm7998_vm6, %v1304_v16, -inf  ;;  %vm7999_vm8 = vmmov %vm7998_vm6  ;;  %v2123_v6 = vsel %vm4753_vm4, %v5526_v45, -inf }
 0x1c3   : > { %v1328_v35 = vsel %vm7999_vm8, %v1305_v9, -inf  ;;  %v1321_v7 = vmax.f32 %v1319_v46, %v1320_v11  ;;  %vm8001_vm3 = vmmov %vm7998_vm6 }
 0x1c4   : > { %v1329_v53 = vsel %vm8001_vm3, %v1306_v48, -inf  ;;  %vm8002_vm12 = vmmov %vm8001_vm3  ;;  %v1364_v54 = vsel %vm8001_vm3, %v1313_v20, -inf }
 0x1c5   : > { %v1337_v15 = vsel %vm8002_vm12, %v1307_v26, -inf  ;;  %v1330_v22 = vmax.f32 %v1328_v35, %v1329_v53  ;;  %vm8003_vm9 = vmmov %vm8001_vm3  ;;  %v1322_v40 = vrot.slane %v1321_v7, 4 }
 0x1c6   : > { %v1338_v37 = vsel %vm8003_vm9, %v1308_v27, -inf  ;;  %vm8004_vm5 = vmmov %vm8001_vm3 }
 0x1c7   : > { %v1346_v29 = vsel %vm8004_vm5, %v1309_v25, -inf  ;;  %vm8005_vm10 = vmmov %vm8001_vm3  ;;  %v1339_v50 = vmax.f32 %v1337_v15, %v1338_v37  ;;  %v1331_v12 = vrot.slane %v1330_v22, 4  ;;  %v1323_v34 = vmax.f32 %v1321_v7, %v1322_v40 }
 0x1c8   : > { %v2124_v10 = vsel %vm8005_vm10, %v2123_v6, -inf  ;;  %vm8006_vm6 = vmmov %vm8001_vm3 }
 0x1c9   : > { %v1347_v4 = vsel %vm8006_vm6, %v1310_v51, -inf  ;;  %2125 = vmax.xlane.f32.xlu1 %v2124_v10  ;;  %vm8007_vm8 = vmmov %vm8001_vm3  ;;  %v1340_v18 = vrot.slane %v1339_v50, 4  ;;  %v1332_v41 = vmax.f32 %v1330_v22, %v1331_v12  ;;  %v1324_v16 = vrot.slane %v1323_v34, 2 }
 0x1ca   : > { %v1348_v42 = vmax.f32 %v1346_v29, %v1347_v4  ;;  %v1355_v36 = vsel %vm8007_vm8, %v1311_v59, -inf  ;;  %vm8008_vm14 = vmmov %vm8001_vm3 }
 0x1cb   : > { %v1356_v43 = vsel %vm8008_vm14, %v1312_v23, -inf  ;;  %vm8009_vm12 = vmmov %vm8001_vm3  ;;  %v1341_v9 = vmax.f32 %v1339_v50, %v1340_v18  ;;  %v1333_v32 = vrot.slane %v1332_v41, 2  ;;  %v1325_v27 = vmax.f32 %v1323_v34, %v1324_v16 }
 0x1cc   : > { %v1357_v55 = vmax.f32 %v1355_v36, %v1356_v43  ;;  %v1349_v14 = vrot.slane %v1348_v42, 4  ;;  %v1365_v13 = vsel %vm8009_vm12, %v1314_v49, -inf  ;;  %vm8010_vm9 = vmmov %vm8001_vm3  ;;  %v8015_v50 = vstv %s5254_s15  ;;  %s1450_s15 = sadd.s32 7, %s4017_s5 }
 0x1cd   : > { %v1373_v5 = vsel %vm8010_vm9, %v1315_v21, -inf  ;;  %v1366_v19 = vmax.f32 %v1364_v54, %v1365_v13  ;;  %vm8011_vm5 = vmmov %vm8001_vm3  ;;  %v1342_v25 = vrot.slane %v1341_v9, 2  ;;  %v1334_v51 = vmax.f32 %v1332_v41, %v1333_v32 }
 0x1ce   : > { %v1358_v33 = vrot.slane %v1357_v55, 4  ;;  %v1350_v48 = vmax.f32 %v1348_v42, %v1349_v14  ;;  %v1374_v58 = vsel %vm8011_vm5, %v1316_v31, -inf  ;;  %vm8012_vm10 = vmmov %vm8001_vm3  ;;  %v1326_v49 = vrot.slane %v1325_v27, 1 }
 0x1cf   : > { %v1382_v26 = vsel %vm8012_vm10, %v1317_v28, -inf  ;;  %v1367_v3 = vrot.slane %v1366_v19, 4  ;;  %v1375_v23 = vmax.f32 %v1373_v5, %v1374_v58  ;;  %vm8013_vm6 = vmmov %vm8001_vm3  ;;  %v1343_v21 = vmax.f32 %v1341_v9, %v1342_v25 }
 0x1d0   : > { %v1359_v17 = vmax.f32 %v1357_v55, %v1358_v33  ;;  %v1351_v59 = vrot.slane %v1350_v48, 2  ;;  %v1383_v20 = vsel %vm8013_vm6, %v1318_v57, -inf  ;;  %v1335_v46 = vrot.slane %v1334_v51, 1 }
 0x1d1   : > { %v1368_v63 = vmax.f32 %v1366_v19, %v1367_v3  ;;  %v1376_v11 = vrot.slane %v1375_v23, 4  ;;  %v1384_v28 = vmax.f32 %v1382_v26, %v1383_v20  ;;  %v1327_v35 = vmax.f32 %v1325_v27, %v1326_v49  ;;  %v8029_v20 = vld [vmem:[#allocation74_spill] sm:$0xff]  ;;  %v8030_v49 = vld [vmem:[#allocation75_spill] sm:$0xff] }
 0x1d2   : > { %v1360_v30 = vrot.slane %v1359_v17, 2  ;;  %v1352_v31 = vmax.f32 %v1350_v48, %v1351_v59  ;;  %v1344_v7 = vrot.slane %v1343_v21, 1  ;;  %v1336_v6 = vmax.f32 %v1334_v51, %v1335_v46  ;;  %v8028_v59 = vld [vmem:[#allocation73_spill] sm:$0xff] }
 0x1d3   : > { %v1369_v15 = vrot.slane %v1368_v63, 2  ;;  %v1377_v37 = vmax.f32 %v1375_v23, %v1376_v11  ;;  %v1385_v57 = vrot.slane %v1384_v28, 4  ;;  %vm5551_vm8 = vcmp.ge.s32.totalorder %v3559_v1, %v8015_v50 }
 0x1d4   : > { %v1361_v53 = vmax.f32 %v1359_v17, %v1360_v30  ;;  %v1353_v22 = vrot.slane %v1352_v31, 1  ;;  %v1345_v29 = vmax.f32 %v1343_v21, %v1344_v7  ;;  %vm8018_vm14 = vcmask 1041409   ;;  %v8031_v21 = vld [vmem:[#allocation76_spill] sm:$0xff]  ;;  %v8032_v30 = vld [vmem:[#allocation77_spill] sm:$0xff] }
 0x1d5   : > { %v1370_v40 = vmax.f32 %v1368_v63, %v1369_v15  ;;  %v1378_v42 = vrot.slane %v1377_v37, 2  ;;  %v1386_v36 = vmax.f32 %v1384_v28, %v1385_v57  ;;  %v1400_v43 = vsel %vm8018_vm14, %v1336_v6, %v1327_v35  ;;  %v8035_v28 = vld [vmem:[#allocation79_spill] sm:$0xff]  ;;  %v8036_v7 = vld [vmem:[#allocation80_spill] sm:$0xff]  ;;  %v8037_v15 = vld [vmem:[#allocation81_spill] sm:$0xff] }
 0x1d6   : > { %v1362_v10 = vrot.slane %v1361_v53, 1  ;;  %v1354_v12 = vmax.f32 %v1352_v31, %v1353_v22  ;;  %vm8019_vm3 = vcmask 1042434   ;;  %v8020_v54 = vmov %v8015_v50  ;;  %v8034_v31 = vld [vmem:[#allocation78_spill] sm:$0xff]  ;;  %v8039_v57 = vld [vmem:[#allocation83_spill] sm:$0xff] }
 0x1d7   : > { %v1371_v18 = vrot.slane %v1370_v40, 1  ;;  %v1401_v55 = vsel %vm8019_vm3, %v1345_v29, %v1400_v43  ;;  %vm2723_vm12 = vcmp.ge.s32.totalorder %v3572_v2, %v8020_v54  ;;  %v1379_v41 = vmax.f32 %v1377_v37, %v1378_v42  ;;  %v8038_v22 = vld [vmem:[#allocation82_spill] sm:$0xff] }
 0x1d8   : > { %v1363_v34 = vmax.f32 %v1361_v53, %v1362_v10  ;;  %v1387_v14 = vrot.slane %v1386_v36, 2  ;;  %vm8021_vm9 = vcmask 1043459   ;;  %v2724_v5 = vstv %s5546_s6  ;;  %s1448_s6 = sadd.s32 3, %s4017_s5  ;;  %s5666_s5 = sld [smem:[#allocation4 + %s1450_s15]] }
 0x1d9   : > { %v1402_v13 = vsel %vm8021_vm9, %v1354_v12, %v1401_v55  ;;  %v1372_v16 = vmax.f32 %v1370_v40, %v1371_v18  ;;  %vm8022_vm5 = vcmask 1044484   ;;  %vm2725_vm10 = vcmp.lt.s32.totalorder %v3559_v1, %v2724_v5  ;;  %v8041_v40 = vld [vmem:[#allocation84_spill] sm:$0xff]  ;;  %s5664_s23 = sld [smem:[#allocation4 + %s1448_s6]] }
 0x1da   : > { %v1403_v9 = vsel %vm8022_vm5, %v1363_v34, %v1402_v13  ;;  %vm2726_vm6 = vcmp.lt.s32.totalorder %v3572_v2, %v2724_v5  ;;  %v1380_v33 = vrot.slane %v1379_v41, 1  ;;  %v1388_v19 = vmax.f32 %v1386_v36, %v1387_v14  ;;  %vm5567_vm14 = vmand %vm5551_vm8, %vm2725_vm10  ;;  %s8130_s15 = sld [smem:[#allocation22_spill]]  ;;  %s8131_s6 = sld [smem:[#allocation23_spill]] }
 0x1db   : > { %vm8025_vm3 = vcmask 1045509   ;;  %vm5572_vm4 = vmand %vm2723_vm12, %vm2726_vm6  ;;  %v2733_v26 = vsel %vm5567_vm14, %v5115_v47, -inf  ;;  %v2735_v27 = vsel %vm5567_vm14, %v5121_v60, -inf  ;;  %v2737_v25 = vsel %vm5567_vm14, %v5139_v39, -inf }
 0x1dc   : > { %v1404_v48 = vsel %vm8025_vm3, %v1372_v16, %v1403_v9  ;;  %v1381_v17 = vmax.f32 %v1379_v41, %v1380_v33  ;;  %v1389_v3 = vrot.slane %v1388_v19, 1  ;;  %v2734_v51 = vsel %vm5572_vm4, %v5127_v52, -inf }
 0x1dd   : > { %v2736_v23 = vsel %vm5572_vm4, %v8028_v59, -inf  ;;  %v2738_v47 = vsel %vm5572_vm4, %v8029_v20, -inf  ;;  %v2739_v60 = vsel %vm5567_vm14, %v8030_v49, -inf  ;;  %v2740_v39 = vsel %vm5572_vm4, %v8031_v21, -inf }
 0x1de   : > { %v2741_v52 = vsel %vm5567_vm14, %v8032_v30, -inf  ;;  %v1390_v63 = vmax.f32 %v1388_v19, %v1389_v3  ;;  %vm8033_vm8 = vcmask 1046534   ;;  %v2742_v11 = vsel %vm5572_vm4, %v8034_v31, -inf  ;;  %8066 = sst [smem:[#allocation107_spill]] %s5666_s5 }
 0x1df   : > { %v1405_v46 = vsel %vm8033_vm8, %v1381_v17, %v1404_v48  ;;  %v2743_v35 = vsel %vm5567_vm14, %v8035_v28, -inf  ;;  %v2744_v53 = vsel %vm5572_vm4, %v8036_v7, -inf  ;;  %v2745_v6 = vsel %vm5567_vm14, %v8037_v15, -inf  ;;  %8065 = sst [smem:[#allocation106_spill]] %s5664_s23 }
 0x1e0   : > { %v2746_v37 = vsel %vm5572_vm4, %v8038_v22, -inf  ;;  %v2747_v29 = vsel %vm5567_vm14, %v8039_v57, -inf  ;;  %vm8040_vm12 = vcmask 1047559   ;;  %v2748_v50 = vsel %vm5572_vm4, %v8041_v40, -inf  ;;  %p7525_p10 = scmp.le.s32.totalorder %s8131_s6, %s8130_s15 }
 0x1e1   : > { %v5623_v10 = vsel %vm8040_vm12, %v1390_v63, %v1405_v46  ;;  %vm8042_vm9 = vcmask 130048  }
 0x1e2   : > { %v2749_v4 = vsel %vm8042_vm9, %v2733_v26, -inf  ;;  %vm8043_vm5 = vmmov %vm8042_vm9  ;;  %v1408_v36 = vsel %vm4372_vm11, %v5623_v10, -inf  ;;  %v1418_v34 = vsel %vm4354_vm13, %v5623_v10, -inf  ;;  %p5935_p1 = por %p291_p0, %p7525_p10  ;;  %p5991_p5 = por %p479_p2, %p7525_p10 }
 0x1e3   : > { %v2750_v12 = vsel %vm8043_vm5, %v2734_v51, -inf  ;;  %vm8046_vm10 = vmmov %vm8043_vm5 }
 0x1e4   : > { %v2751_v18 = vmax.f32 %v2749_v4, %v2750_v12  ;;  %v2758_v55 = vsel %vm8046_vm10, %v2735_v27, -inf  ;;  %vm8047_vm6 = vmmov %vm8043_vm5  ;;  %s8142_s11 = scalar_select %p5935_p1, 1, 0 }
 0x1e5   : > { %v1409_v54 = vsel %vm8047_vm6, %v1408_v36, -inf  ;;  %vm8048_vm14 = vmmov %vm8043_vm5 }
 0x1e6   : > { %v1419_v41 = vsel %vm8048_vm14, %v1418_v34, -inf  ;;  %vm8049_vm4 = vmmov %vm8043_vm5  ;;  %1410 = vmax.xlane.f32.xlu0 %v1409_v54  ;;  %v2752_v5 = vrot.slane %v2751_v18, 4  ;;  %8143 = sst [smem:[#allocation22_spill]] %s8142_s11 }
 0x1e7   : > { %v2759_v14 = vsel %vm8049_vm4, %v2736_v23, -inf  ;;  %vm8050_vm3 = vmmov %vm8049_vm4  ;;  %1420 = vmax.xlane.f32.xlu1 %v1419_v41  ;;  %s6012_s11 = sld [smem:[#allocation4 + %s8164_s0]] }
 0x1e8   : > { %v2767_v13 = vsel %vm8050_vm3, %v2737_v25, -inf  ;;  %v2760_v16 = vmax.f32 %v2758_v55, %v2759_v14  ;;  %vm8051_vm8 = vmmov %vm8050_vm3  ;;  %v2753_v26 = vmax.f32 %v2751_v18, %v2752_v5  ;;  %v2804_v30 = vsel %vm8050_vm3, %v2746_v37, -inf  ;;  %s6059_s0 = sld [smem:[#allocation4 + %s8174_s9]] }
 0x1e9   : > { %v2768_v9 = vsel %vm8051_vm8, %v2738_v47, -inf  ;;  %vm8052_vm12 = vmmov %vm8050_vm3 }
 0x1ea   : > { %v2776_v33 = vsel %vm8052_vm12, %v2739_v60, -inf  ;;  %v2769_v19 = vmax.f32 %v2767_v13, %v2768_v9  ;;  %vm8053_vm9 = vmmov %vm8050_vm3  ;;  %v2761_v27 = vrot.slane %v2760_v16, 4  ;;  %v2754_v20 = vrot.slane %v2753_v26, 2 }
 0x1eb   : > { %v2777_v32 = vsel %vm8053_vm9, %v2740_v39, -inf  ;;  %vm8054_vm5 = vmmov %vm8050_vm3  ;;  %vm8063_vm9 = vcmask 1041409  }
 0x1ec   : > { %v2785_v48 = vsel %vm8054_vm5, %v2741_v52, -inf  ;;  %vm8055_vm10 = vmmov %vm8050_vm3  ;;  %v2778_v17 = vmax.f32 %v2776_v33, %v2777_v32  ;;  %v2770_v25 = vrot.slane %v2769_v19, 4  ;;  %v2762_v47 = vmax.f32 %v2760_v16, %v2761_v27 }
 0x1ed   : > { %v2786_v58 = vsel %vm8055_vm10, %v2742_v11, -inf  ;;  %vm8056_vm6 = vmmov %vm8050_vm3  ;;  %v2755_v63 = vmax.f32 %v2753_v26, %v2754_v20  ;;  %v2133_v27 = vsel %vm4767_vm15, %v5526_v45, -inf  ;;  %vm8067_vm5 = vcmask 1042434   ;;  %8165 = sst [smem:[#allocation25_spill]] %s6012_s11  ;;  %v3279_v26 = vld [vmem:[%s4340_s24] sm:$0xff] }
 0x1ee   : > { %v2787_v3 = vmax.f32 %v2785_v48, %v2786_v58  ;;  %v2794_v51 = vsel %vm8056_vm6, %v2743_v35, -inf  ;;  %vm8057_vm14 = vmmov %vm8050_vm3  ;;  %v2779_v49 = vrot.slane %v2778_v17, 4  ;;  %v2771_v21 = vmax.f32 %v2769_v19, %v2770_v25  ;;  %8175 = sst [smem:[#allocation108_spill]] %s6059_s0 }
 0x1ef   : > { %v2795_v59 = vsel %vm8057_vm14, %v2744_v53, -inf  ;;  %vm8058_vm4 = vmmov %vm8050_vm3  ;;  %v2763_v46 = vrot.slane %v2762_v47, 2  ;;  %v2756_v15 = vrot.slane %v2755_v63, 1  ;;  %vm8068_vm10 = vcmask 1043459  }
 0x1f0   : > { %v2803_v23 = vsel %vm8058_vm4, %v2745_v6, -inf  ;;  %v2788_v60 = vrot.slane %v2787_v3, 4  ;;  %v2796_v39 = vmax.f32 %v2794_v51, %v2795_v59  ;;  %vm8059_vm8 = vmmov %vm8050_vm3  ;;  %v2780_v31 = vmax.f32 %v2778_v17, %v2779_v49 }
 0x1f1   : > { %v2812_v52 = vsel %vm8059_vm8, %v2747_v29, -inf  ;;  %v2772_v28 = vrot.slane %v2771_v21, 2  ;;  %v2805_v7 = vmax.f32 %v2803_v23, %v2804_v30  ;;  %vm8060_vm12 = vmmov %vm8050_vm3  ;;  %v2764_v6 = vmax.f32 %v2762_v47, %v2763_v46 }
 0x1f2   : > { %v2789_v11 = vmax.f32 %v2787_v3, %v2788_v60  ;;  %v2797_v35 = vrot.slane %v2796_v39, 4  ;;  %v2813_v53 = vsel %vm8060_vm12, %v2748_v50, -inf  ;;  %v2781_v22 = vrot.slane %v2780_v31, 2  ;;  %vm8070_vm14 = vmmov %vm8050_vm3 }
 0x1f3   : > { %v2773_v37 = vmax.f32 %v2771_v21, %v2772_v28  ;;  %v2806_v29 = vrot.slane %v2805_v7, 4  ;;  %v2814_v4 = vmax.f32 %v2812_v52, %v2813_v53  ;;  %v2757_v12 = vmax.f32 %v2755_v63, %v2756_v15 }
 0x1f4   : > { %v2790_v57 = vrot.slane %v2789_v11, 2  ;;  %v2798_v40 = vmax.f32 %v2796_v39, %v2797_v35  ;;  %v2765_v36 = vrot.slane %v2764_v6, 1  ;;  %v2782_v34 = vmax.f32 %v2780_v31, %v2781_v22 }
 0x1f5   : > { %v2774_v55 = vrot.slane %v2773_v37, 1  ;;  %v2807_v54 = vmax.f32 %v2805_v7, %v2806_v29  ;;  %v2815_v41 = vrot.slane %v2814_v4, 4  ;;  %v2143_v23 = vsel %vm4776_vm2, %v5526_v45, -inf }
 0x1f6   : > { %v2791_v18 = vmax.f32 %v2789_v11, %v2790_v57  ;;  %v2799_v50 = vrot.slane %v2798_v40, 2  ;;  %v2766_v14 = vmax.f32 %v2764_v6, %v2765_v36  ;;  %v2783_v13 = vrot.slane %v2782_v34, 1 }
 0x1f7   : > { %v2775_v16 = vmax.f32 %v2773_v37, %v2774_v55  ;;  %v2808_v33 = vrot.slane %v2807_v54, 2  ;;  %v2816_v19 = vmax.f32 %v2814_v4, %v2815_v41  ;;  %v1428_v20 = vsel %vm7928_vm7, %v5623_v10, -inf  ;;  %v5706_v37 = vpop.xlane.xlu1 %349 }
 0x1f8   : > { %v2792_v5 = vrot.slane %v2791_v18, 1  ;;  %v2800_v9 = vmax.f32 %v2798_v40, %v2799_v50  ;;  %v2784_v32 = vmax.f32 %v2782_v34, %v2783_v13  ;;  %v2830_v58 = vsel %vm8063_vm9, %v2766_v14, %v2757_v12  ;;  %vm8073_vm9 = vmmov %vm8060_vm12  ;;  %v8082_v34 = vld [vmem:[#allocation47_spill] sm:$0xff] }
 0x1f9   : > { %v2809_v3 = vmax.f32 %v2807_v54, %v2808_v33  ;;  %v2817_v25 = vrot.slane %v2816_v19, 2  ;;  %v2831_v51 = vsel %vm8067_vm5, %v2775_v16, %v2830_v58  ;;  %vm8069_vm6 = vcmask 1044484   ;;  %v8085_v54 = vld [vmem:[#allocation69_spill] sm:$0xff]  ;;  %v8087_v14 = vld [vmem:[#allocation70_spill] sm:$0xff]  ;;  %v8092_v16 = vld [vmem:[#allocation91_spill] sm:$0xff] }
 0x1fa   : > { %v2793_v48 = vmax.f32 %v2791_v18, %v2792_v5  ;;  %v2801_v17 = vrot.slane %v2800_v9, 1  ;;  %v2832_v59 = vsel %vm8068_vm10, %v2784_v32, %v2831_v51  ;;  %v2134_v39 = vsel %vm8070_vm14, %v2133_v27, -inf  ;;  %v8093_v33 = vld [vmem:[#allocation92_spill] sm:$0xff]  ;;  %v8094_v32 = vld [vmem:[#allocation93_spill] sm:$0xff]  ;;  %v8095_v58 = vld [vmem:[#allocation90_spill] sm:$0xff] }
 0x1fb   : > { %v2810_v49 = vrot.slane %v2809_v3, 1  ;;  %v2818_v60 = vmax.f32 %v2816_v19, %v2817_v25  ;;  %v1438_v30 = vsel %vm7934_vm0, %v5623_v10, -inf  ;;  %vm8071_vm4 = vnez %v7825_v56  ;;  %v8097_v25 = vld [vmem:[#allocation95_spill] sm:$0xff] }
 0x1fc   : > { %v2802_v47 = vmax.f32 %v2800_v9, %v2801_v17  ;;  %v2833_v21 = vsel %vm8069_vm6, %v2793_v48, %v2832_v59  ;;  %v2153_v52 = vsel %vm8071_vm4, %v5526_v45, -inf  ;;  %v2167_v63 = vstv %s5654_s28  ;;  %vm8075_vm4 = vmmov %vm8073_vm9  ;;  %v8096_v17 = vld [vmem:[#allocation94_spill] sm:$0xff]  ;;  %v8098_v59 = vld [vmem:[#allocation96_spill] sm:$0xff]  ;;  %s8212_s28 = sld [smem:[#allocation35_spill]] }
 0x1fd   : > { %v2811_v46 = vmax.f32 %v2809_v3, %v2810_v49  ;;  %v2819_v31 = vrot.slane %v2818_v60, 1  ;;  %vm8072_vm3 = vcmask 1045509   ;;  %vm2168_vm8 = vcmp.ge.s32.totalorder %v3559_v1, %v2167_v63  ;;  %v5762_v49 = vpop.xlane.xlu0 %319 }
 0x1fe   : > { %v2834_v11 = vsel %vm8072_vm3, %v2802_v47, %v2833_v21  ;;  %v2144_v28 = vsel %vm8060_vm12, %v2143_v23, -inf  ;;  %v5689_v35 = vsel %vm8073_vm9, %v1428_v20, -inf  ;;  %vm2169_vm5 = vcmp.ge.s32.totalorder %v3572_v2, %v2167_v63  ;;  %vm8076_vm3 = vmmov %vm8075_vm4  ;;  %v8099_v20 = vld [vmem:[#allocation97_spill] sm:$0xff]  ;;  %v8102_v63 = vld [vmem:[#allocation100_spill] sm:$0xff] }
 0x1ff   : > { %v2170_v10 = vstv %s5658_s19  ;;  %v2820_v7 = vmax.f32 %v2818_v60, %v2819_v31  ;;  %vm8074_vm10 = vcmask 1046534   ;;  %v1439_v53 = vsel %vm8075_vm4, %v1438_v30, -inf  ;;  %v8100_v60 = vld [vmem:[#allocation98_spill] sm:$0xff]  ;;  %v8101_v30 = vld [vmem:[#allocation99_spill] sm:$0xff]  ;;  %v8103_v31 = vld [vmem:[#allocation101_spill] sm:$0xff]  ;;  %s8221_s19 = sld [smem:[#allocation39_spill]] }
 0x200   : > { %v2835_v45 = vsel %vm8074_vm10, %v2811_v46, %v2834_v11  ;;  %vm2171_vm6 = vcmp.lt.s32.totalorder %v3559_v1, %v2170_v10  ;;  %vm2172_vm14 = vcmp.lt.s32.totalorder %v3572_v2, %v2170_v10  ;;  %v5698_v15 = vsel %vm8076_vm3, %v2153_v52, -inf  ;;  %vm8089_vm10 = vmmov %vm8076_vm3  ;;  %v5776_v10 = vpop.xlane.xlu1 %364 }
 0x201   : > { %vm5700_vm0 = vmand %vm2168_vm8, %vm2171_vm6  ;;  %v1452_v22 = vstv %s5664_s23  ;;  %v1455_v57 = vstv %s5666_s5  ;;  %vm8079_vm12 = vcmask 1047559   ;;  %vm8083_vm4 = vnez %v8082_v34  ;;  %s8158_s23 = sld [smem:[#allocation27_spill]] }
 0x202   : > { %v2836_v40 = vsel %vm8079_vm12, %v2820_v7, %v2835_v45  ;;  %vm5709_vm9 = vmand %vm2169_vm5, %vm2172_vm14  ;;  %v2179_v4 = vsel %vm5700_vm0, %v5301_v0, -inf  ;;  %v2181_v12 = vsel %vm5700_vm0, %v5307_v8, -inf  ;;  %v2183_v36 = vsel %vm5700_vm0, %v5313_v38, -inf  ;;  %v8104_v7 = vld [vmem:[#allocation102_spill] sm:$0xff]  ;;  %8169 = sst [smem:[#allocation27_spill]] %s8168_s27  ;;  %s8177_s27 = sld [smem:[#allocation28_spill]] }
 0x203   : > { %v2838_v18 = vsel %vm8083_vm4, %v2836_v40, -inf  ;;  %v2848_v50 = vsel %vm7949_vm1, %v2836_v40, -inf  ;;  %vm8086_vm8 = vnez %v8085_v54  ;;  %vm8088_vm5 = vnez %v8087_v14  ;;  %vm8090_vm6 = vmmov %vm8076_vm3  ;;  %s8284_s5 = scalar_select %p5935_p1, 1, 0 }
 0x204   : > { %v2858_v41 = vsel %vm8086_vm8, %v2836_v40, -inf  ;;  %v2868_v0 = vsel %vm8088_vm5, %v2836_v40, -inf  ;;  %v2839_v13 = vsel %vm8089_vm10, %v2838_v18, -inf  ;;  %v2849_v8 = vsel %vm8090_vm6, %v2848_v50, -inf  ;;  %vm8091_vm14 = vmmov %vm8076_vm3 }
 0x205   : > { %v5733_v5 = vsel %vm8091_vm14, %v2858_v41, -inf  ;;  %v5736_v38 = vsel %vm8076_vm3, %v2868_v0, -inf  ;;  %2840 = vmax.xlane.f32.xlu0 %v2839_v13  ;;  %2850 = vmax.xlane.f32.xlu1 %v2849_v8  ;;  %v2180_v9 = vsel %vm5709_vm9, %v8092_v16, -inf  ;;  %v2182_v19 = vsel %vm5709_vm9, %v8093_v33, -inf  ;;  %vm8105_vm12 = vmmov %vm8076_vm3  ;;  %v3263_v16 = vld [vmem:[%s4146_s2] sm:$0xff] }
 0x206   : > { %v2184_v48 = vsel %vm5709_vm9, %v8094_v32, -inf  ;;  %v2185_v27 = vsel %vm5700_vm0, %v8095_v58, -inf  ;;  %v2186_v3 = vsel %vm5709_vm9, %v8096_v17, -inf  ;;  %v2187_v51 = vsel %vm5700_vm0, %v8097_v25, -inf  ;;  %vm8106_vm10 = vmmov %vm8076_vm3 }
 0x207   : > { %v2188_v23 = vsel %vm5709_vm9, %v8098_v59, -inf  ;;  %v2189_v47 = vsel %vm5700_vm0, %v8099_v20, -inf  ;;  %v2190_v21 = vsel %vm5709_vm9, %v8100_v60, -inf  ;;  %v2191_v52 = vsel %vm5700_vm0, %v8101_v30, -inf  ;;  %vm8107_vm6 = vmmov %vm8076_vm3  ;;  %v5817_v20 = vpop.xlane.xlu1 %511  ;;  %p652_p0 = scmp.le.s32.totalorder %s8158_s23, %s8157_s16  ;;  %s8209_s23 = sld [smem:[#allocation33_spill]] }
 0x208   : > { %v2192_v46 = vsel %vm5709_vm9, %v8102_v63, -inf  ;;  %v2193_v11 = vsel %vm5700_vm0, %v8103_v31, -inf  ;;  %v2194_v45 = vsel %vm5709_vm9, %v8104_v7, -inf  ;;  %v2195_v40 = vsel %vm8105_vm12, %v2179_v4, -inf  ;;  %vm8108_vm14 = vmmov %vm8076_vm3  ;;  %p825_p9 = scmp.le.s32.totalorder %s8178_s13, %s8177_s27  ;;  %s8242_s13 = sld [smem:[#allocation40_spill]] }
 0x209   : > { %v2196_v18 = vsel %vm8106_vm10, %v2180_v9, -inf  ;;  %v2204_v50 = vsel %vm8107_vm6, %v2181_v12, -inf  ;;  %2135 = vmax.xlane.f32.xlu0 %v2134_v39  ;;  %2145 = vmax.xlane.f32.xlu1 %v2144_v28  ;;  %v2205_v0 = vsel %vm8108_vm14, %v2182_v19, -inf  ;;  %v2213_v6 = vsel %vm8076_vm3, %v2183_v36, -inf  ;;  %vm8109_vm0 = vmmov %vm8076_vm3  ;;  %p6067_p2 = por %p652_p0, %p7525_p10  ;;  %p6079_p13 = por %p652_p0, %p7526_p3 }
 0x20a   : > { %v2197_v41 = vmax.f32 %v2195_v40, %v2196_v18  ;;  %v2214_v13 = vsel %vm8109_vm0, %v2184_v48, -inf  ;;  %vm5788_vm5 = vcmp.ge.s32.totalorder %v3559_v1, %v1452_v22  ;;  %vm5793_vm9 = vcmp.lt.s32.totalorder %v3559_v1, %v1455_v57  ;;  %vm8114_vm12 = vmmov %vm8109_vm0  ;;  %p6091_p10 = por %p652_p0, %p7531_p4  ;;  %p8181_p3 = scmp.le.s32.totalorder %s3552_s12, %s3549_s10 }
 0x20b   : > { %v2206_v4 = vmax.f32 %v2204_v50, %v2205_v0  ;;  %v2215_v39 = vmax.f32 %v2213_v6, %v2214_v13  ;;  %v2222_v28 = vsel %vm8114_vm12, %v2185_v27, -inf  ;;  %vm8115_vm10 = vmmov %vm8109_vm0  ;;  %vm5800_vm6 = vcmp.ge.s32.totalorder %v3572_v2, %v1452_v22  ;;  %v5812_v22 = vpop.xlane.xlu0 %334  ;;  %s8179_s8 = scalar_select %p6079_p13, 1, 0 }
 0x20c   : > { %v2223_v12 = vsel %vm8115_vm10, %v2186_v3, -inf  ;;  %vm5805_vm14 = vcmp.lt.s32.totalorder %v3572_v2, %v1455_v57  ;;  %v2198_v9 = vrot.slane %v2197_v41, 4  ;;  %vm8120_vm3 = vmmov %vm8109_vm0  ;;  %v2232_v32 = vsel %vm8109_vm0, %v2188_v23, -inf  ;;  %s8180_s9 = scalar_select %p6091_p10, 1, 0 }
 0x20d   : > { %v2224_v33 = vmax.f32 %v2222_v28, %v2223_v12  ;;  %v2231_v19 = vsel %vm8120_vm3, %v2187_v51, -inf  ;;  %v2207_v48 = vrot.slane %v2206_v4, 4  ;;  %v2216_v58 = vrot.slane %v2215_v39, 4  ;;  %vm8121_vm12 = vmmov %vm8109_vm0  ;;  %1430 = vmax.xlane.f32.xlu0 %v5689_v35  ;;  %1440 = vmax.xlane.f32.xlu1 %v1439_v53  ;;  %p6101_p8 = por %p652_p0, %p8181_p3  ;;  %p8190_p3 = scmp.le.s32.totalorder %s8131_s6, %s8130_s15 }
 0x20e   : > { %v2233_v27 = vmax.f32 %v2231_v19, %v2232_v32  ;;  %v2240_v17 = vsel %vm8121_vm12, %v2189_v47, -inf  ;;  %v2199_v57 = vmax.f32 %v2197_v41, %v2198_v9  ;;  %vm8122_vm10 = vmmov %vm8109_vm0  ;;  %v2258_v7 = vsel %vm8109_vm0, %v2193_v11, -inf  ;;  %p8193_p4 = scmp.le.s32.totalorder %s3567_s21, %s3563_s17  ;;  %s8206_s6 = sld [smem:[#allocation31_spill]] }
 0x20f   : > { %v2225_v3 = vrot.slane %v2224_v33, 4  ;;  %v2241_v25 = vsel %vm8122_vm10, %v2190_v21, -inf  ;;  %vm8123_vm8 = vmmov %vm8109_vm0  ;;  %v2208_v51 = vmax.f32 %v2206_v4, %v2207_v48  ;;  %v2217_v23 = vmax.f32 %v2215_v39, %v2216_v58  ;;  %v5824_v13 = vpop.xlane.xlu0 %498  ;;  %s8182_s26 = scalar_select %p6101_p8, 1, 0 }
 0x210   : > { %v2249_v59 = vsel %vm8123_vm8, %v2191_v52, -inf  ;;  %v2234_v60 = vrot.slane %v2233_v27, 4  ;;  %v2242_v30 = vmax.f32 %v2240_v17, %v2241_v25  ;;  %v2200_v63 = vrot.slane %v2199_v57, 2  ;;  %vm8124_vm3 = vmmov %vm8109_vm0  ;;  %p6135_p0 = por %p825_p9, %p8190_p3  ;;  %p6148_p10 = por %p825_p9, %p8193_p4 }
 0x211   : > { %v2226_v31 = vmax.f32 %v2224_v33, %v2225_v3  ;;  %v2250_v47 = vsel %vm8124_vm3, %v2192_v46, -inf  ;;  %v2209_v35 = vrot.slane %v2208_v51, 2  ;;  %v2218_v53 = vrot.slane %v2217_v23, 2  ;;  %2860 = vmax.xlane.f32.xlu0 %v5733_v5  ;;  %2870 = vmax.xlane.f32.xlu1 %v5736_v38  ;;  %vm8125_vm8 = vmmov %vm8109_vm0  ;;  %v5826_v38 = vpop.xlane.xlu1 %537  ;;  %p8200_p4 = scmp.le.s32.totalorder %s3702_s25, %s3569_s22  ;;  %s8205_s25 = sld [smem:[#allocation30_spill]] }
 0x212   : > { %v2235_v40 = vmax.f32 %v2233_v27, %v2234_v60  ;;  %v2243_v18 = vrot.slane %v2242_v30, 4  ;;  %v2201_v21 = vmax.f32 %v2199_v57, %v2200_v63  ;;  %v2251_v50 = vmax.f32 %v2249_v59, %v2250_v47  ;;  %vm5832_vm12 = vmand %vm5788_vm5, %vm5793_vm9  ;;  %s8191_s16 = scalar_select %p6135_p0, 1, 0 }
 0x213   : > { %v2227_v52 = vrot.slane %v2226_v31, 2  ;;  %v2259_v41 = vsel %vm8125_vm8, %v2194_v45, -inf  ;;  %v2210_v0 = vmax.f32 %v2208_v51, %v2209_v35  ;;  %v2219_v46 = vmax.f32 %v2217_v23, %v2218_v53  ;;  %vm5845_vm5 = vmand %vm5800_vm6, %vm5805_vm14  ;;  %v3265_v53 = vld [vmem:[%s4146_s2 + $0x10] sm:$0xff]  ;;  %s8194_s15 = scalar_select %p6148_p10, 1, 0 }
 0x214   : > { %v2236_v11 = vrot.slane %v2235_v40, 2  ;;  %v2244_v6 = vmax.f32 %v2242_v30, %v2243_v18  ;;  %v2202_v4 = vrot.slane %v2201_v21, 1  ;;  %v2252_v5 = vrot.slane %v2251_v50, 4  ;;  %v3264_v30 = vld [vmem:[%s4146_s2 + $0x8] sm:$0xff]  ;;  %8192 = sst [smem:[#allocation28_spill]] %s8191_s16  ;;  %p6175_p3 = por %p825_p9, %p8200_p4 }
 0x215   : > { %v2228_v39 = vmax.f32 %v2226_v31, %v2227_v52  ;;  %v2260_v28 = vmax.f32 %v2258_v7, %v2259_v41  ;;  %v2211_v12 = vrot.slane %v2210_v0, 1  ;;  %v2220_v9 = vrot.slane %v2219_v46, 1  ;;  %2155 = vmax.xlane.f32.xlu0 %v5698_v15  ;;  %v5870_v31 = vpop.xlane.xlu0 %524  ;;  %v5878_v18 = vpop.xlane.xlu1 %684  ;;  %8195 = sst [smem:[#allocation29_spill]] %s8194_s15  ;;  %s8208_s17 = sld [smem:[#allocation32_spill]] }
 0x216   : > { %v2237_v33 = vmax.f32 %v2235_v40, %v2236_v11  ;;  %v2245_v45 = vrot.slane %v2244_v6, 2  ;;  %v2203_v32 = vmax.f32 %v2201_v21, %v2202_v4  ;;  %v2253_v58 = vmax.f32 %v2251_v50, %v2252_v5  ;;  %v3266_v50 = vld [vmem:[%s4146_s2 + $0x18] sm:$0xff]  ;;  %s8201_s21 = scalar_select %p6175_p3, 1, 0 }
 0x217   : > { %v2229_v48 = vrot.slane %v2228_v39, 1  ;;  %v2261_v27 = vrot.slane %v2260_v28, 4  ;;  %v2212_v29 = vmax.f32 %v2210_v0, %v2211_v12  ;;  %v2221_v15 = vmax.f32 %v2219_v46, %v2220_v9  ;;  %v3267_v0 = vld [vmem:[%s4146_s2 + $0x20] sm:$0xff]  ;;  %v3269_v12 = vld [vmem:[%s4146_s2 + $0x30] sm:$0xff]  ;;  %s8211_s22 = sld [smem:[#allocation34_spill]]  ;;  %p8217_p8 = scmp.le.s32.totalorder %s3552_s12, %s3549_s10 }
 0x218   : > { %v2238_v17 = vrot.slane %v2237_v33, 1  ;;  %v2246_v57 = vmax.f32 %v2244_v6, %v2245_v45  ;;  %v2254_v25 = vrot.slane %v2253_v58, 2  ;;  %v1464_v36 = vsel %vm5832_vm12, %v3263_v16, -inf  ;;  %8202 = sst [smem:[#allocation109_spill]] %s8201_s21  ;;  %s8224_s15 = sld [smem:[#allocation38_spill]] }
 0x219   : > { %v2230_v3 = vmax.f32 %v2228_v39, %v2229_v48  ;;  %v2262_v59 = vmax.f32 %v2260_v28, %v2261_v27  ;;  %vm8132_vm9 = vcmask 1041409   ;;  %v1465_v63 = vsel %vm5845_vm5, %v3264_v30, -inf  ;;  %v3268_v39 = vld [vmem:[%s4146_s2 + $0x28] sm:$0xff]  ;;  %v5966_v19 = vpop.xlane.xlu1 %710  ;;  %p6268_p4 = por %p825_p9, %p8217_p8  ;;  %s8223_s21 = sld [smem:[#allocation37_spill]] }
 0x21a   : > { %v2239_v51 = vmax.f32 %v2237_v33, %v2238_v17  ;;  %v2247_v23 = vrot.slane %v2246_v57, 1  ;;  %v2276_v60 = vsel %vm8132_vm9, %v2212_v29, %v2203_v32  ;;  %v2255_v47 = vmax.f32 %v2253_v58, %v2254_v25  ;;  %v3270_v33 = vld [vmem:[%s4146_s2 + $0x38] sm:$0xff]  ;;  %v3271_v32 = vld [vmem:[%s4146_s2 + $0x40] sm:$0xff]  ;;  %v3272_v29 = vld [vmem:[%s4146_s2 + $0x48] sm:$0xff]  ;;  %p8225_p3 = scmp.le.s32.totalorder %s8206_s6, %s8205_s25  ;;  %s8243_s25 = sld [smem:[#allocation42_spill]] }
 0x21b   : > { %v2263_v7 = vrot.slane %v2262_v59, 2  ;;  %vm8134_vm6 = vcmask 1042434   ;;  %v1466_v40 = vsel %vm5832_vm12, %v3265_v53, -inf  ;;  %vm8135_vm14 = vcmask 1043459   ;;  %v3273_v17 = vld [vmem:[%s4146_s2 + $0x50] sm:$0xff]  ;;  %v5958_v53 = vld [vmem:[%s4146_s2 + $0x78] sm:$0xff]  ;;  %vm8146_vm9 = vmmov %vm8125_vm8  ;;  %p8226_p9 = scmp.le.s32.totalorder %s8209_s23, %s8208_s17 }
 0x21c   : > { %v2277_v35 = vsel %vm8134_vm6, %v2221_v15, %v2276_v60  ;;  %v2248_v21 = vmax.f32 %v2246_v57, %v2247_v23  ;;  %v1467_v41 = vsel %vm5845_vm5, %v3266_v50, -inf  ;;  %v1468_v46 = vsel %vm5832_vm12, %v3267_v0, -inf  ;;  %v3277_v60 = vld [vmem:[%s4146_s2 + $0x70] sm:$0xff]  ;;  %vm8147_vm6 = vmmov %vm8125_vm8  ;;  %s8246_s27 = sld [smem:[#allocation46_spill]]  ;;  %s8247_s16 = sld [smem:[#allocation48_spill]] }
 0x21d   : > { %v2278_v52 = vsel %vm8135_vm14, %v2230_v3, %v2277_v35  ;;  %v2256_v11 = vrot.slane %v2255_v47, 1  ;;  %v2264_v6 = vmax.f32 %v2262_v59, %v2263_v7  ;;  %vm8136_vm10 = vcmask 1044484   ;;  %v3274_v3 = vld [vmem:[%s4146_s2 + $0x58] sm:$0xff]  ;;  %v3275_v59 = vld [vmem:[%s4146_s2 + $0x60] sm:$0xff]  ;;  %vm8148_vm14 = vmmov %vm8147_vm6  ;;  %p6285_p8 = por %p8226_p9, %p8225_p3  ;;  %p8232_p10 = scmp.le.s32.totalorder %s8212_s28, %s8211_s22 }
 0x21e   : > { %v2279_v4 = vsel %vm8136_vm10, %v2239_v51, %v2278_v52  ;;  %v1469_v5 = vsel %vm5845_vm5, %v3268_v39, -inf  ;;  %vm8139_vm3 = vcmask 1045509   ;;  %v1470_v9 = vsel %vm5832_vm12, %v3269_v12, -inf  ;;  %v3276_v51 = vld [vmem:[%s4146_s2 + $0x68] sm:$0xff]  ;;  %s8154_s2 = scalar_select %p5991_p5, 1, 0 }
 0x21f   : > { %v2280_v28 = vsel %vm8139_vm3, %v2248_v21, %v2279_v4  ;;  %v1471_v45 = vsel %vm5845_vm5, %v3270_v33, -inf  ;;  %v1472_v48 = vsel %vm5832_vm12, %v3271_v32, -inf  ;;  %v2257_v58 = vmax.f32 %v2255_v47, %v2256_v11  ;;  %v5954_v47 = vpop.xlane.xlu0 %671  ;;  %vm8150_vm3 = vmmov %vm8147_vm6  ;;  %s8227_s10 = scalar_select %p6285_p8, 1, 0 }
 0x220   : > { %v2265_v27 = vrot.slane %v2264_v6, 1  ;;  %v1473_v15 = vsel %vm5845_vm5, %v3272_v29, -inf  ;;  %v1474_v57 = vsel %vm5832_vm12, %v3273_v17, -inf  ;;  %v1475_v25 = vsel %vm5845_vm5, %v3274_v3, -inf  ;;  %8155 = sst [smem:[#allocation23_spill]] %s8154_s2  ;;  %s8220_s2 = sld [smem:[#allocation36_spill]] }
 0x221   : > { %v1476_v16 = vsel %vm5832_vm12, %v3275_v59, -inf  ;;  %v1477_v23 = vsel %vm5845_vm5, %v3276_v51, -inf  ;;  %v1478_v30 = vsel %vm5832_vm12, %v3277_v60, -inf  ;;  %vm8144_vm0 = vcmask 1046534   ;;  %vm8145_vm12 = vmmov %vm8125_vm8  ;;  %8228 = sst [smem:[#allocation33_spill]] %s8227_s10  ;;  %p8233_p0 = pmov %p8226_p9 }
 0x222   : > { %v2266_v7 = vmax.f32 %v2264_v6, %v2265_v27  ;;  %v2281_v35 = vsel %vm8144_vm0, %v2257_v58, %v2280_v28  ;;  %v1479_v21 = vsel %vm5845_vm5, %v5958_v53, -inf  ;;  %v1480_v52 = vsel %vm8125_vm8, %v1464_v36, -inf  ;;  %vm8152_vm8 = vmmov %vm8150_vm3  ;;  %p7553_p9 = scmp.le.s32.totalorder %s8224_s15, %s8223_s21  ;;  %s8244_s22 = sld [smem:[#allocation41_spill]] }
 0x223   : > { %v1481_v50 = vsel %vm8145_vm12, %v1465_v63, -inf  ;;  %v1489_v0 = vsel %vm8146_vm9, %v1466_v40, -inf  ;;  %v1490_v11 = vsel %vm8147_vm6, %v1467_v41, -inf  ;;  %v1498_v6 = vsel %vm8148_vm14, %v1468_v46, -inf  ;;  %vm8153_vm12 = vmmov %vm8150_vm3  ;;  %v6024_v27 = vpop.xlane.xlu0 %697  ;;  %p6298_p13 = por %p8233_p0, %p8232_p10  ;;  %s8245_s28 = sld [smem:[#allocation43_spill]] }
 0x224   : > { %vm8149_vm10 = vcmask 1047559   ;;  %v1482_v4 = vmax.f32 %v1480_v52, %v1481_v50  ;;  %v1491_v39 = vmax.f32 %v1489_v0, %v1490_v11  ;;  %v1499_v63 = vsel %vm8150_vm3, %v1469_v5, -inf  ;;  %vm8156_vm9 = vmmov %vm8150_vm3  ;;  %s8252_s10 = sld [smem:[#allocation50_spill]]  ;;  %p7558_p0 = scmp.le.s32.totalorder %s8243_s25, %s8242_s13 }
 0x225   : > { %v5975_v36 = vsel %vm8149_vm10, %v2266_v7, %v2281_v35  ;;  %vm8151_vm0 = vnez %v7802_v24  ;;  %v1500_v41 = vmax.f32 %v1498_v6, %v1499_v63  ;;  %v1507_v46 = vsel %vm8152_vm8, %v1470_v9, -inf  ;;  %vm8161_vm6 = vmmov %vm8150_vm3  ;;  %s8234_s12 = scalar_select %p6298_p13, 1, 0 }
 0x226   : > { %v2284_v40 = vsel %vm8151_vm0, %v5975_v36, -inf  ;;  %v1508_v28 = vsel %vm8153_vm12, %v1471_v45, -inf  ;;  %v1483_v24 = vrot.slane %v1482_v4, 4  ;;  %v1492_v12 = vrot.slane %v1491_v39, 4  ;;  %vm8162_vm14 = vmmov %vm8150_vm3  ;;  %p7552_p3 = scmp.le.s32.totalorder %s8221_s19, %s8220_s2  ;;  %s8256_s19 = sld [smem:[#allocation52_spill]] }
 0x227   : > { %v2285_v5 = vsel %vm8156_vm9, %v2284_v40, -inf  ;;  %v1509_v33 = vmax.f32 %v1507_v46, %v1508_v28  ;;  %v1501_v9 = vrot.slane %v1500_v41, 4  ;;  %v1516_v45 = vsel %vm8161_vm6, %v1472_v48, -inf  ;;  %vm8163_vm10 = vmmov %vm8150_vm3  ;;  %v6071_v46 = vpop.xlane.xlu0 %844  ;;  %8235 = sst [smem:[#allocation37_spill]] %s8234_s12  ;;  %p8257_p8 = scmp.le.s32.totalorder %s8224_s15, %s8223_s21 }
 0x228   : > { %2286 = vmax.xlane.f32.xlu1 %v2285_v5  ;;  %v1517_v32 = vsel %vm8162_vm14, %v1473_v15, -inf  ;;  %v1525_v58 = vsel %vm8163_vm10, %v1474_v57, -inf  ;;  %v1484_v29 = vmax.f32 %v1482_v4, %v1483_v24  ;;  %v1493_v17 = vmax.f32 %v1491_v39, %v1492_v12  ;;  %v6038_v15 = vpop.xlane.xlu1 %857  ;;  %vm8170_vm0 = vmmov %vm8150_vm3  ;;  %p6331_p10 = por %p7553_p9, %p7552_p3  ;;  %p7564_p3 = scmp.le.s32.totalorder %s8247_s16, %s8246_s27 }
 0x229   : > { %v1510_v48 = vrot.slane %v1509_v33, 4  ;;  %v1518_v3 = vmax.f32 %v1516_v45, %v1517_v32  ;;  %v1502_v57 = vmax.f32 %v1500_v41, %v1501_v9  ;;  %v1526_v59 = vsel %vm8150_vm3, %v1475_v25, -inf  ;;  %vm8171_vm8 = vmmov %vm8170_vm0  ;;  %p7572_p13 = scmp.le.s32.totalorder %s8245_s28, %s8244_s22  ;;  %s8265_s12 = sld [smem:[#allocation53_spill]] }
 0x22a   : > { %v1534_v51 = vsel %vm8170_vm0, %v1476_v16, -inf  ;;  %v1535_v60 = vsel %vm8171_vm8, %v1477_v23, -inf  ;;  %v1485_v7 = vrot.slane %v1484_v29, 2  ;;  %v1494_v35 = vrot.slane %v1493_v17, 2  ;;  %vm8172_vm12 = vmmov %vm8170_vm0  ;;  %s8250_s6 = scalar_select %p6331_p10, 1, 0 }
 0x22b   : > { %v1511_v52 = vmax.f32 %v1509_v33, %v1510_v48  ;;  %v1519_v50 = vrot.slane %v1518_v3, 4  ;;  %v1503_v0 = vrot.slane %v1502_v57, 2  ;;  %v1527_v25 = vmax.f32 %v1525_v58, %v1526_v59  ;;  %vm8173_vm9 = vmmov %vm8170_vm0  ;;  %p6361_p9 = por %p7572_p13, %p7558_p0  ;;  %p8260_p0 = scmp.le.s32.totalorder %s8252_s10, %s4654_s7 }
 0x22c   : > { %v1536_v11 = vmax.f32 %v1534_v51, %v1535_v60  ;;  %v1543_v16 = vsel %vm8172_vm12, %v1478_v30, -inf  ;;  %v1486_v23 = vmax.f32 %v1484_v29, %v1485_v7  ;;  %v1495_v6 = vmax.f32 %v1493_v17, %v1494_v35  ;;  %v6083_v5 = vpop.xlane.xlu1 %883  ;;  %8251 = sst [smem:[#allocation38_spill]] %s8250_s6  ;;  %s8272_s27 = sld [smem:[#allocation58_spill]] }
 0x22d   : > { %v1512_v4 = vrot.slane %v1511_v52, 2  ;;  %v1520_v39 = vmax.f32 %v1518_v3, %v1519_v50  ;;  %v1504_v63 = vmax.f32 %v1502_v57, %v1503_v0  ;;  %v1528_v40 = vrot.slane %v1527_v25, 4  ;;  %p6381_p10 = por %p7572_p13, %p8260_p0 }
 0x22e   : > { %v1537_v41 = vrot.slane %v1536_v11, 4  ;;  %v1544_v30 = vsel %vm8173_vm9, %v1479_v21, -inf  ;;  %v1487_v8 = vrot.slane %v1486_v23, 1  ;;  %v1496_v53 = vrot.slane %v1495_v6, 1 }
 0x22f   : > { %v1513_v21 = vmax.f32 %v1511_v52, %v1512_v4  ;;  %v1521_v28 = vrot.slane %v1520_v39, 2  ;;  %v1505_v24 = vrot.slane %v1504_v63, 1  ;;  %v1529_v12 = vmax.f32 %v1527_v25, %v1528_v40  ;;  %v6116_v25 = vpop.xlane.xlu0 %870  ;;  %s8261_s6 = scalar_select %p6381_p10, 1, 0 }
 0x230   : > { %v1538_v33 = vmax.f32 %v1536_v11, %v1537_v41  ;;  %v1545_v9 = vmax.f32 %v1543_v16, %v1544_v30  ;;  %v1488_v45 = vmax.f32 %v1486_v23, %v1487_v8  ;;  %v1497_v32 = vmax.f32 %v1495_v6, %v1496_v53  ;;  %v6139_v4 = vpop.xlane.xlu1 %1094 }
 0x231   : > { %v1514_v58 = vrot.slane %v1513_v21, 1  ;;  %v1522_v29 = vmax.f32 %v1520_v39, %v1521_v28  ;;  %v1506_v17 = vmax.f32 %v1504_v63, %v1505_v24  ;;  %v1530_v48 = vrot.slane %v1529_v12, 2  ;;  %8262 = sst [smem:[#allocation43_spill]] %s8261_s6 }
 0x232   : > { %v1539_v3 = vrot.slane %v1538_v33, 2  ;;  %v1546_v57 = vrot.slane %v1545_v9, 4  ;;  %vm8183_vm5 = vcmask 1041409   ;;  %v2882_v7 = vstv %s6012_s11  ;;  %s8279_s6 = scalar_select %p5897_p11, 1, 0 }
 0x233   : > { %v1515_v59 = vmax.f32 %v1513_v21, %v1514_v58  ;;  %v1523_v51 = vrot.slane %v1522_v29, 1  ;;  %v1561_v60 = vsel %vm8183_vm5, %v1497_v32, %v1488_v45  ;;  %v1531_v35 = vmax.f32 %v1529_v12, %v1530_v48  ;;  %v3281_v45 = vld [vmem:[%s4340_s24 + $0x20] sm:$0xff]  ;;  %v3282_v58 = vld [vmem:[%s4340_s24 + $0x30] sm:$0xff]  ;;  %p8294_p1 = scmp.le.s32.totalorder %s8272_s27, %s4707_s4  ;;  %s8304_s4 = sld [smem:[#allocation65_spill]] }
 0x234   : > { %v1540_v52 = vmax.f32 %v1538_v33, %v1539_v3  ;;  %v1547_v50 = vmax.f32 %v1545_v9, %v1546_v57  ;;  %vm8184_vm6 = vcmask 1042434   ;;  %vm8185_vm14 = vcmask 1043459   ;;  %v3280_v33 = vld [vmem:[%s4340_s24 + $0x10] sm:$0xff]  ;;  %v3283_v3 = vld [vmem:[%s4340_s24 + $0x8] sm:$0xff]  ;;  %v6226_v23 = vpop.xlane.xlu1 %2512  ;;  %s8307_s27 = sld [smem:[#allocation27_spill]] }
 0x235   : > { %v1562_v0 = vsel %vm8184_vm6, %v1506_v17, %v1561_v60  ;;  %v1524_v11 = vmax.f32 %v1522_v29, %v1523_v51  ;;  %vm6120_vm10 = vcmp.ge.s32.totalorder %v3559_v1, %v2882_v7  ;;  %vm6125_vm3 = vcmp.ge.s32.totalorder %v3572_v2, %v2882_v7  ;;  %v6210_v60 = vpop.xlane.xlu0 %1082 }
 0x236   : > { %v1563_v16 = vsel %vm8185_vm14, %v1515_v59, %v1562_v0  ;;  %v1532_v39 = vrot.slane %v1531_v35, 1  ;;  %v1541_v63 = vrot.slane %v1540_v52, 1  ;;  %v1548_v40 = vrot.slane %v1547_v50, 2  ;;  %v3284_v59 = vld [vmem:[%s4340_s24 + $0x18] sm:$0xff] }
 0x237   : > { %v2885_v41 = vstv %s6059_s0  ;;  %vm8196_vm0 = vcmask 1044484   ;;  %v2294_v8 = vsel %vm4767_vm15, %v5975_v36, -inf  ;;  %vm8199_vm5 = vcmask 130048   ;;  %s8278_s0 = scalar_select %p5866_p6, 1, 0 }
 0x238   : > { %v1564_v30 = vsel %vm8196_vm0, %v1524_v11, %v1563_v16  ;;  %vm2886_vm8 = vcmp.lt.s32.totalorder %v3559_v1, %v2885_v41  ;;  %vm2887_vm12 = vcmp.lt.s32.totalorder %v3572_v2, %v2885_v41  ;;  %v1533_v53 = vmax.f32 %v1531_v35, %v1532_v39  ;;  %v3285_v35 = vld [vmem:[%s4340_s24 + $0x28] sm:$0xff]  ;;  %v3287_v11 = vld [vmem:[%s4340_s24 + $0x40] sm:$0xff]  ;;  %p8285_p6 = scmp.le.s32.totalorder %s8209_s23, %s8208_s17  ;;  %s8301_s17 = sld [smem:[#allocation26_spill]] }
 0x239   : > { %v1542_v21 = vmax.f32 %v1540_v52, %v1541_v63  ;;  %v1549_v28 = vmax.f32 %v1547_v50, %v1548_v40  ;;  %vm6162_vm9 = vmand %vm6120_vm10, %vm2886_vm8  ;;  %v6167_v1 = vsel %vm8199_vm5, %v2294_v8, -inf  ;;  %vm8207_vm6 = vcmask 1045509   ;;  %v3286_v50 = vld [vmem:[%s4340_s24 + $0x38] sm:$0xff]  ;;  %v3288_v39 = vld [vmem:[%s4340_s24 + $0x48] sm:$0xff] }
 0x23a   : > { %vm6183_vm15 = vmand %vm6125_vm3, %vm2887_vm12  ;;  %v2894_v12 = vsel %vm6162_vm9, %v3279_v26, -inf  ;;  %v2896_v9 = vsel %vm6162_vm9, %v3280_v33, -inf  ;;  %v2898_v32 = vsel %vm6162_vm9, %v3281_v45, -inf  ;;  %v2900_v29 = vsel %vm6162_vm9, %v3282_v58, -inf  ;;  %v3289_v40 = vld [vmem:[%s4340_s24 + $0x50] sm:$0xff]  ;;  %v6249_v58 = vld [vmem:[%s4340_s24 + $0x78] sm:$0xff] }
 0x23b   : > { %v1550_v17 = vrot.slane %v1549_v28, 1  ;;  %v1565_v48 = vsel %vm8207_vm6, %v1533_v53, %v1564_v30  ;;  %v2895_v57 = vsel %vm6183_vm15, %v3283_v3, -inf  ;;  %v2897_v51 = vsel %vm6183_vm15, %v3284_v59, -inf  ;;  %v3290_v30 = vld [vmem:[%s4340_s24 + $0x58] sm:$0xff]  ;;  %v3291_v53 = vld [vmem:[%s4340_s24 + $0x60] sm:$0xff]  ;;  %v3293_v33 = vld [vmem:[%s4340_s24 + $0x70] sm:$0xff] }
 0x23c   : > { %vm8210_vm14 = vcmask 1046534   ;;  %v2899_v52 = vsel %vm6183_vm15, %v3285_v35, -inf  ;;  %v2901_v0 = vsel %vm6183_vm15, %v3286_v50, -inf  ;;  %v2902_v16 = vsel %vm6162_vm9, %v3287_v11, -inf  ;;  %vm8214_vm3 = vmmov %vm8199_vm5 }
 0x23d   : > { %v1566_v7 = vsel %vm8210_vm14, %v1542_v21, %v1565_v48  ;;  %v1551_v6 = vmax.f32 %v1549_v28, %v1550_v17  ;;  %v2903_v63 = vsel %vm6183_vm15, %v3288_v39, -inf  ;;  %v2904_v41 = vsel %vm6162_vm9, %v3289_v40, -inf  ;;  %v3292_v28 = vld [vmem:[%s4340_s24 + $0x68] sm:$0xff]  ;;  %vm8215_vm0 = vmmov %vm8214_vm3  ;;  %s8218_s24 = scalar_select %p6268_p4, 1, 0 }
 0x23e   : > { %v2905_v8 = vsel %vm6183_vm15, %v3290_v30, -inf  ;;  %v2906_v21 = vsel %vm6162_vm9, %v3291_v53, -inf  ;;  %v2907_v26 = vsel %vm6183_vm15, %v3292_v28, -inf  ;;  %v2908_v45 = vsel %vm6162_vm9, %v3293_v33, -inf  ;;  %vm8216_vm8 = vmmov %vm8215_vm0  ;;  %p6371_p4 = por %p8257_p8, %p7564_p3  ;;  %p7565_p8 = scmp.le.s32.totalorder %s8256_s19, %s4662_s1 }
 0x23f   : > { %v2909_v17 = vsel %vm6183_vm15, %v6249_v58, -inf  ;;  %vm8213_vm10 = vcmask 1047559   ;;  %v2910_v3 = vsel %vm8214_vm3, %v2894_v12, -inf  ;;  %v2911_v24 = vsel %vm8215_vm0, %v2895_v57, -inf  ;;  %8219 = sst [smem:[#allocation32_spill]] %s8218_s24  ;;  %vm8222_vm12 = vmmov %vm8215_vm0  ;;  %p7584_p3 = scmp.le.s32.totalorder %s4705_s14, %s4692_s29 }
 0x240   : > { %v6257_v48 = vsel %vm8213_vm10, %v1551_v6, %v1566_v7  ;;  %v2919_v59 = vsel %vm8216_vm8, %v2896_v9, -inf  ;;  %v2912_v12 = vmax.f32 %v2910_v3, %v2911_v24  ;;  %v2920_v9 = vsel %vm8222_vm12, %v2897_v51, -inf  ;;  %vm8229_vm9 = vmmov %vm8215_vm0  ;;  %v6302_v51 = vpop.xlane.xlu0 %1797  ;;  %s8258_s24 = scalar_select %p6371_p4, 1, 0 }
 0x241   : > { %v1569_v35 = vsel %vm4372_vm11, %v6257_v48, -inf  ;;  %v1579_v7 = vsel %vm4354_vm13, %v6257_v48, -inf  ;;  %vm8230_vm11 = vmmov %vm8215_vm0  ;;  %v2921_v50 = vmax.f32 %v2919_v59, %v2920_v9  ;;  %vm8263_vm15 = vcmask 1041409   ;;  %p6418_p0 = por %p7572_p13, %p7565_p8  ;;  %p7573_p8 = scmp.le.s32.totalorder %s4688_s18, %s8265_s12 }
 0x242   : > { %v1570_v42 = vsel %vm8229_vm9, %v1569_v35, -inf  ;;  %v1580_v57 = vsel %vm8230_vm11, %v1579_v7, -inf  ;;  %vm8231_vm5 = vmmov %vm8215_vm0  ;;  %v2913_v11 = vrot.slane %v2912_v12, 4  ;;  %8259 = sst [smem:[#allocation41_spill]] %s8258_s24  ;;  %s8308_s14 = sld [smem:[#allocation62_spill]] }
 0x243   : > { %v2928_v43 = vsel %vm8231_vm5, %v2898_v32, -inf  ;;  %1571 = vmax.xlane.f32.xlu0 %v1570_v42  ;;  %1581 = vmax.xlane.f32.xlu1 %v1580_v57  ;;  %vm8236_vm13 = vmmov %vm8215_vm0  ;;  %v6311_v32 = vpop.xlane.xlu1 %2524  ;;  %v2922_v30 = vrot.slane %v2921_v50, 4  ;;  %s8281_s24 = scalar_select %p5907_p12, 1, 0 }
 0x244   : > { %v2929_v6 = vsel %vm8236_vm13, %v2899_v52, -inf  ;;  %vm8237_vm6 = vmmov %vm8215_vm0  ;;  %v2914_v52 = vmax.f32 %v2912_v12, %v2913_v11  ;;  %vm8266_vm13 = vcmask 1042434   ;;  %p6472_p11 = por %p8285_p6, %p7573_p8  ;;  %p8290_p12 = pmov %p8285_p6 }
 0x245   : > { %v2937_v39 = vsel %vm8237_vm6, %v2900_v29, -inf  ;;  %vm8238_vm14 = vmmov %vm8215_vm0  ;;  %v2930_v53 = vmax.f32 %v2928_v43, %v2929_v6  ;;  %vm8267_vm6 = vnez %v7813_v62  ;;  %p8295_p6 = scmp.le.s32.totalorder %s8224_s15, %s8223_s21 }
 0x246   : > { %v2938_v40 = vsel %vm8238_vm14, %v2901_v0, -inf  ;;  %vm8239_vm10 = vmmov %vm8215_vm0  ;;  %v2955_v0 = vsel %vm8215_vm0, %v2904_v41, -inf  ;;  %v2915_v7 = vrot.slane %v2914_v52, 2  ;;  %vm8268_vm14 = vcmask 1043459   ;;  %p6485_p13 = por %p8290_p12, %p7584_p3 }
 0x247   : > { %v2939_v28 = vmax.f32 %v2937_v39, %v2938_v40  ;;  %v2946_v33 = vsel %vm8239_vm10, %v2902_v16, -inf  ;;  %vm8240_vm3 = vmmov %vm8215_vm0  ;;  %v2923_v16 = vmax.f32 %v2921_v50, %v2922_v30  ;;  %v2931_v24 = vrot.slane %v2930_v53, 4  ;;  %v6339_v50 = vpop.xlane.xlu0 %1809  ;;  %v6344_v6 = vpop.xlane.xlu1 %1821  ;;  %p6501_p8 = por %p8295_p6, %p8294_p1  ;;  %p8313_p1 = scmp.ne.s32.totalorder %s8307_s27, 0 }
 0x248   : > { %v2947_v29 = vsel %vm8240_vm3, %v2903_v63, -inf  ;;  %vm8241_vm8 = vmmov %vm8215_vm0  ;;  %s8291_s11 = scalar_select %p6485_p13, 1, 0 }
 0x249   : > { %v2956_v3 = vsel %vm8241_vm8, %v2905_v8, -inf  ;;  %v2940_v59 = vrot.slane %v2939_v28, 4  ;;  %v2948_v35 = vmax.f32 %v2946_v33, %v2947_v29  ;;  %vm8248_vm12 = vmmov %vm8215_vm0  ;;  %v2924_v12 = vrot.slane %v2923_v16, 2  ;;  %s8296_s20 = scalar_select %p6501_p8, 1, 0 }
 0x24a   : > { %v2957_v63 = vmax.f32 %v2955_v0, %v2956_v3  ;;  %v2964_v41 = vsel %vm8248_vm12, %v2906_v21, -inf  ;;  %vm8249_vm9 = vmmov %vm8215_vm0  ;;  %v2932_v9 = vmax.f32 %v2930_v53, %v2931_v24  ;;  %v2916_v21 = vmax.f32 %v2914_v52, %v2915_v7  ;;  %8292 = sst [smem:[#allocation23_spill]] %s8291_s11 }
 0x24b   : > { %v2965_v8 = vsel %vm8249_vm9, %v2907_v26, -inf  ;;  %v2941_v42 = vmax.f32 %v2939_v28, %v2940_v59  ;;  %v2949_v57 = vrot.slane %v2948_v35, 4  ;;  %vm8253_vm11 = vmmov %vm8215_vm0  ;;  %v2925_v39 = vmax.f32 %v2923_v16, %v2924_v12  ;;  %s8314_s23 = scalar_select %p8313_p1, 1, 0 }
 0x24c   : > { %v2958_v43 = vrot.slane %v2957_v63, 4  ;;  %v2966_v26 = vmax.f32 %v2964_v41, %v2965_v8  ;;  %v2973_v11 = vsel %vm8253_vm11, %v2908_v45, -inf  ;;  %v2933_v40 = vrot.slane %v2932_v9, 2  ;;  %vm8254_vm5 = vmmov %vm8215_vm0  ;;  %v6385_v41 = vpop.xlane.xlu0 %1106  ;;  %s8316_s11 = sld [smem:[#allocation68_spill]] }
 0x24d   : > { %v2942_v30 = vrot.slane %v2941_v42, 2  ;;  %v2950_v53 = vmax.f32 %v2948_v35, %v2949_v57  ;;  %v2917_v28 = vrot.slane %v2916_v21, 1  ;;  %v2974_v45 = vsel %vm8254_vm5, %v2909_v17, -inf  ;;  %v6392_v57 = vpop.xlane.xlu1 %1118  ;;  %vm8271_vm10 = vmmov %vm8215_vm0  ;;  %s8388_s2 = scalar_select %p6371_p4, 1, 0 }
 0x24e   : > { %v2959_v33 = vmax.f32 %v2957_v63, %v2958_v43  ;;  %v2967_v52 = vrot.slane %v2966_v26, 4  ;;  %v2926_v29 = vrot.slane %v2925_v39, 1  ;;  %v2934_v0 = vmax.f32 %v2932_v9, %v2933_v40  ;;  %vm8273_vm3 = vmmov %vm8215_vm0 }
 0x24f   : > { %v2943_v3 = vmax.f32 %v2941_v42, %v2942_v30  ;;  %v2951_v16 = vrot.slane %v2950_v53, 2  ;;  %v2918_v2 = vmax.f32 %v2916_v21, %v2917_v28  ;;  %v2975_v24 = vmax.f32 %v2973_v11, %v2974_v45 }
 0x250   : > { %v2960_v58 = vrot.slane %v2959_v33, 2  ;;  %v2968_v17 = vmax.f32 %v2966_v26, %v2967_v52  ;;  %v2927_v59 = vmax.f32 %v2925_v39, %v2926_v29  ;;  %v2935_v35 = vrot.slane %v2934_v0, 1 }
 0x251   : > { %v2944_v7 = vrot.slane %v2943_v3, 1  ;;  %v2952_v63 = vmax.f32 %v2950_v53, %v2951_v16  ;;  %v2976_v9 = vrot.slane %v2975_v24, 4  ;;  %v2304_v42 = vsel %vm4776_vm2, %v5975_v36, -inf  ;;  %vm8264_vm2 = vmmov %vm8215_vm0 }
 0x252   : > { %v2961_v8 = vmax.f32 %v2959_v33, %v2960_v58  ;;  %v2969_v12 = vrot.slane %v2968_v17, 2  ;;  %v2936_v21 = vmax.f32 %v2934_v0, %v2935_v35  ;;  %v2991_v11 = vsel %vm8263_vm15, %v2927_v59, %v2918_v2  ;;  %v6436_v2 = vpop.xlane.xlu0 %2536  ;;  %vm8276_vm12 = vmmov %vm8264_vm2  ;;  %v6444_v35 = vpop.xlane.xlu1 %2548 }
 0x253   : > { %v2945_v43 = vmax.f32 %v2943_v3, %v2944_v7  ;;  %v2953_v26 = vrot.slane %v2952_v63, 1  ;;  %v2977_v40 = vmax.f32 %v2975_v24, %v2976_v9  ;;  %v6398_v30 = vsel %vm8264_vm2, %v2304_v42, -inf  ;;  %v8280_v7 = vld [vmem:[#allocation21_spill] sm:$0xff] }
 0x254   : > { %v2962_v39 = vrot.slane %v2961_v8, 1  ;;  %v2970_v61 = vmax.f32 %v2968_v17, %v2969_v12  ;;  %v2992_v28 = vsel %vm8266_vm13, %v2936_v21, %v2991_v11  ;;  %v1589_v33 = vsel %vm7928_vm7, %v6257_v48, -inf }
 0x255   : > { %v2954_v53 = vmax.f32 %v2952_v63, %v2953_v26  ;;  %v1599_v52 = vsel %vm8267_vm6, %v6257_v48, -inf  ;;  %v2978_v0 = vrot.slane %v2977_v40, 2  ;;  %v2993_v3 = vsel %vm8268_vm14, %v2945_v43, %v2992_v28 }
 0x256   : > { %v2963_v45 = vmax.f32 %v2961_v8, %v2962_v39  ;;  %v2971_v29 = vrot.slane %v2970_v61, 1  ;;  %vm8270_vm7 = vcmask 1044484   ;;  %v6426_v62 = vsel %vm8271_vm10, %v1589_v33, -inf }
 0x257   : > { %v2994_v44 = vsel %vm8270_vm7, %v2954_v53, %v2993_v3  ;;  %v6429_v48 = vsel %vm8273_vm3, %v1599_v52, -inf  ;;  %vm8274_vm0 = vnez %v7825_v56  ;;  %v2979_v17 = vmax.f32 %v2977_v40, %v2978_v0 }
 0x258   : > { %v2314_v16 = vsel %vm8274_vm0, %v5975_v36, -inf  ;;  %v2972_v58 = vmax.f32 %v2970_v61, %v2971_v29  ;;  %vm8275_vm8 = vcmask 1045509   ;;  %v353_v56 = vstv %s8278_s0  ;;  %s8286_s0 = scalar_select %p6472_p11, 1, 0 }
 0x259   : > { %v2995_v24 = vsel %vm8275_vm8, %v2963_v45, %v2994_v44  ;;  %v6440_v59 = vsel %vm8276_vm12, %v2314_v16, -inf  ;;  %v323_v36 = vstv %s8279_s6  ;;  %vm326_vm9 = vcmp.eq.s32.totalorder %v8280_v7, 0  ;;  %s8288_s6 = sld [smem:[#allocation59_spill]] }
 0x25a   : > { %v368_v63 = vstv %s8281_s24  ;;  %v2980_v8 = vrot.slane %v2979_v17, 1  ;;  %vm8282_vm11 = vcmask 1046534   ;;  %vm354_vm5 = vcmp.eq.s32.totalorder %v353_v56, 1  ;;  %8287 = sst [smem:[#allocation22_spill]] %s8286_s0  ;;  %s8289_s24 = sld [smem:[#allocation60_spill]] }
 0x25b   : > { %v2996_v12 = vsel %vm8282_vm11, %v2972_v58, %v2995_v24  ;;  %vm324_vm15 = vcmp.eq.s32.totalorder %v323_v36, 1  ;;  %v355_v9 = vsel %vm354_vm5, 0.0, %v5706_v37  ;;  %vm369_vm2 = vcmp.eq.s32.totalorder %v368_v63, 1  ;;  %vm8302_vm11 = vmmov %vm8276_vm12  ;;  %s8309_s0 = sld [smem:[#allocation63_spill]] }
 0x25c   : > { %v325_v42 = vsel %vm324_vm15, 0.0, %v5762_v49  ;;  %v338_v21 = vstv %s8284_s5  ;;  %v2981_v43 = vmax.f32 %v2979_v17, %v2980_v8  ;;  %v370_v37 = vsel %vm369_vm2, 0.0, %v5776_v10  ;;  %s8293_s5 = scalar_select %p5991_p5, 1, 0  ;;  %v6505_v10 = vpop.xlane.xlu0 %1833 }
 0x25d   : > { %v329_v26 = vsel %vm326_vm9, %v325_v42, 0.0  ;;  %vm339_vm13 = vcmp.eq.s32.totalorder %v338_v21, 1  ;;  %vm341_vm6 = vcmp.eq.s32.totalorder %v8280_v7, 1  ;;  %vm356_vm14 = vcmp.eq.s32.totalorder %v8280_v7, 2  ;;  %p8311_p5 = scmp.ne.s32.totalorder %s8301_s17, 0  ;;  %s8320_s17 = sld [smem:[#allocation13_spill]] }
 0x25e   : > { %v340_v49 = vsel %vm339_vm13, 0.0, %v5812_v22  ;;  %v515_v11 = vstv %s8293_s5  ;;  %vm8297_vm7 = vcmask 1047559   ;;  %vm371_vm3 = vcmp.eq.s32.totalorder %v8280_v7, 3  ;;  %v6513_v22 = vpop.xlane.xlu1 %1964  ;;  %s8303_s5 = sld [smem:[#allocation64_spill]] }
 0x25f   : > { %v2997_v39 = vsel %vm8297_vm7, %v2981_v43, %v2996_v12  ;;  %v344_v61 = vsel %vm341_vm6, %v340_v49, %v329_v26  ;;  %vm516_vm10 = vcmp.eq.s32.totalorder %v515_v11, 1  ;;  %vm8299_vm0 = vnez %v8085_v54  ;;  %s8312_s29 = scalar_select %p8311_p5, 1, 0 }
 0x260   : > { %p7583_p12 = scmp.le.s32.totalorder %s8289_s24, %s8288_s6  ;;  %v2999_v40 = vsel %vm8083_vm4, %v2997_v39, -inf  ;;  %v3009_v53 = vsel %vm7949_vm1, %v2997_v39, -inf  ;;  %v3019_v28 = vsel %vm8299_vm0, %v2997_v39, -inf  ;;  %vm8300_vm8 = vnez %v8087_v14  ;;  %vm8305_vm4 = vmmov %vm8302_vm11  ;;  %v6560_v16 = vpop.xlane.xlu0 %1249  ;;  %p8318_p5 = scmp.le.s32.totalorder %s8224_s15, %s8223_s21 }
 0x261   : > { %v3029_v33 = vsel %vm8300_vm8, %v2997_v39, -inf  ;;  %v3000_v52 = vsel %vm8276_vm12, %v2999_v40, -inf  ;;  %v3010_v34 = vsel %vm8302_vm11, %v3009_v53, -inf  ;;  %v6528_v45 = vsel %vm8305_vm4, %v3019_v28, -inf  ;;  %vm8306_vm5 = vmmov %vm8305_vm4  ;;  %p7587_p6 = scmp.le.s32.totalorder %s8309_s0, %s8308_s14  ;;  %s8325_s21 = sld [smem:[#allocation28_spill]] }
 0x262   : > { %v6531_v55 = vsel %vm8306_vm5, %v3029_v33, -inf  ;;  %3001 = vmax.xlane.f32.xlu0 %v3000_v52  ;;  %3011 = vmax.xlane.f32.xlu1 %v3010_v34  ;;  %v359_v54 = vsel %vm356_vm14, %v355_v9, %v344_v61  ;;  %v517_v14 = vsel %vm516_vm10, 0.0, %v5817_v20  ;;  %v502_v29 = vstv %s8310_s3  ;;  %s8315_s3 = sld [smem:[#allocation67_spill]]  ;;  %p6574_p1 = por %p8318_p5, %p7583_p12  ;;  %v6578_v24 = vpop.xlane.xlu1 %1259 }
 0x263   : > { %vm505_vm1 = vcmp.eq.s32.totalorder %v8280_v7, 4  ;;  %v374_v0 = vsel %vm371_vm3, %v370_v37, %v359_v54  ;;  %vm503_vm15 = vcmp.eq.s32.totalorder %v502_v29, 1  ;;  %v541_v3 = vstv %s8312_s29  ;;  %s8317_s29 = scalar_select %p6067_p2, 1, 0 }
 0x264   : > { %vm518_vm2 = vcmp.eq.s32.totalorder %v8280_v7, 5  ;;  %p7586_p7 = scmp.le.s32.totalorder %s8304_s4, %s8303_s5  ;;  %v504_v20 = vsel %vm503_vm15, 0.0, %v5824_v13  ;;  %vm542_vm13 = vcmp.eq.s32.totalorder %v541_v3, 1  ;;  %v528_v44 = vstv %s8314_s23  ;;  %p8321_p5 = scmp.ne.s32.totalorder %s8179_s8, 0 }
 0x265   : > { %vm531_vm7 = vcmp.eq.s32.totalorder %v8280_v7, 6  ;;  %v508_v58 = vsel %vm505_vm1, %v504_v20, %v374_v0  ;;  %v543_v17 = vsel %vm542_vm13, 0.0, %v5826_v38  ;;  %vm529_vm10 = vcmp.eq.s32.totalorder %v528_v44, 1  ;;  %s8319_s27 = scalar_select %p6574_p1, 1, 0 }
 0x266   : > { %v688_v13 = vstv %s8317_s29  ;;  %2296 = vmax.xlane.f32.xlu0 %v6167_v1  ;;  %2306 = vmax.xlane.f32.xlu1 %v6398_v30  ;;  %v521_v38 = vsel %vm518_vm2, %v517_v14, %v508_v58  ;;  %v530_v56 = vsel %vm529_vm10, 0.0, %v5870_v31  ;;  %vm544_vm8 = vcmp.eq.s32.totalorder %v8280_v7, 7  ;;  %s8322_s30 = scalar_select %p8321_p5, 1, 0  ;;  %v6665_v42 = vpop.xlane.xlu1 %2689 }
 0x267   : > { %vm689_vm0 = vcmp.eq.s32.totalorder %v688_v13, 1  ;;  %v534_v1 = vsel %vm531_vm7, %v530_v56, %v521_v38  ;;  %vm678_vm12 = vcmp.eq.s32.totalorder %v8280_v7, 8  ;;  %p8323_p12 = scmp.le.s32.totalorder %s8245_s28, %s8244_s22  ;;  %p8326_p2 = scmp.ne.s32.totalorder %s8180_s9, 0  ;;  %vm7597_vm4 = vcmp.eq.s32.totalorder %v8280_v7, 9 }
 0x268   : > { %v690_v30 = vsel %vm689_vm0, 0.0, %v5878_v18  ;;  %v675_v36 = vstv %s8322_s30  ;;  %v547_v31 = vsel %vm544_vm8, %v543_v17, %v534_v1  ;;  %s8328_s29 = sld [smem:[#allocation35_spill]]  ;;  %s8329_s6 = sld [smem:[#allocation34_spill]]  ;;  %vm7596_vm15 = vcmp.eq.s32.totalorder %v8280_v7, 10 }
 0x269   : > { %p6601_p3 = por %p8323_p12, %p7586_p7  ;;  %vm676_vm11 = vcmp.eq.s32.totalorder %v675_v36, 1  ;;  %s8330_s8 = sld [smem:[#allocation31_spill]]  ;;  %vm7594_vm0 = vcmp.eq.s32.totalorder %v8280_v7, 11 }
 0x26a   : > { %s8327_s23 = scalar_select %p8326_p2, 1, 0  ;;  %v677_v63 = vsel %vm676_vm11, 0.0, %v5954_v47  ;;  %1591 = vmax.xlane.f32.xlu0 %v6426_v62  ;;  %1601 = vmax.xlane.f32.xlu1 %v6429_v48  ;;  %vm851_vm11 = vcmp.eq.s32.totalorder %v8280_v7, 12  ;;  %v6739_v33 = vpop.xlane.xlu1 %1984 }
 0x26b   : > { %s8324_s15 = scalar_select %p6601_p3, 1, 0  ;;  %v681_v12 = vsel %vm678_vm12, %v677_v63, %v547_v31 }
 0x26c   : > { %v714_v18 = vstv %s8327_s23  ;;  %s8331_s30 = sld [smem:[#allocation30_spill]]  ;;  %p8332_p12 = scmp.le.s32.totalorder %s8243_s25, %s8242_s13  ;;  %v694_v62 = vsel %vm7597_vm4, %v690_v30, %v681_v12  ;;  %vm895_vm4 = vcmask 125952  }
 0x26d   : > { %vm715_vm5 = vcmp.eq.s32.totalorder %v714_v18, 1  ;;  %p8334_p2 = scmp.ne.s32.totalorder %s8182_s26, 0  ;;  %s8336_s28 = sld [smem:[#allocation29_spill]] }
 0x26e   : > { %p6618_p5 = por %p7587_p6, %p8332_p12  ;;  %v716_v9 = vsel %vm715_vm5, 0.0, %v5966_v19  ;;  %p8337_p12 = scmp.ne.s32.totalorder %s8325_s21, 0  ;;  %v6657_v19 = vpop.xlane.xlu0 %2679  ;;  %3021 = vmax.xlane.f32.xlu0 %v6528_v45  ;;  %3031 = vmax.xlane.f32.xlu1 %v6531_v55 }
 0x26f   : > { %s8335_s9 = scalar_select %p8334_p2, 1, 0 }
 0x270   : > { %s8333_s22 = scalar_select %p6618_p5, 1, 0 }
 0x271   : > { %v701_v8 = vstv %s8335_s9  ;;  %s8338_s26 = scalar_select %p8337_p12, 1, 0 }
 0x272   : > { %vm702_vm13 = vcmp.eq.s32.totalorder %v701_v8, 1  ;;  %p8339_p2 = scmp.le.s32.totalorder %s8328_s29, %s8329_s6  ;;  %p8340_p7 = scmp.le.s32.totalorder %s8316_s11, %s8315_s3  ;;  %2316 = vmax.xlane.f32.xlu0 %v6440_v59 }
 0x273   : > { %v861_v47 = vstv %s8338_s26  ;;  %p8343_p1 = scmp.le.s32.totalorder %s8330_s8, %s8331_s30  ;;  %s8345_s23 = sld [smem:[#allocation109_spill]]  ;;  %v703_v48 = vsel %vm702_vm13, 0.0, %v6024_v27  ;;  %vm864_vm13 = vcmp.eq.s32.totalorder %v8280_v7, 13 }
 0x274   : > { %p6643_p6 = por %p8340_p7, %p8339_p2  ;;  %p8344_p8 = pmov %p8340_p7  ;;  %vm862_vm10 = vcmp.eq.s32.totalorder %v861_v47, 1  ;;  %v707_v21 = vsel %vm7596_vm15, %v703_v48, %v694_v62  ;;  %vm890_vm15 = vcmp.eq.s32.totalorder %v8280_v7, 15 }
 0x275   : > { %s8347_s21 = sld [smem:[#allocation71_spill]]  ;;  %s8348_s26 = sld [smem:[#allocation72_spill]]  ;;  %v863_v43 = vsel %vm862_vm10, 0.0, %v6038_v15  ;;  %v720_v27 = vsel %vm7594_vm0, %v716_v9, %v707_v21  ;;  %vm7603_vm0 = vcmp.eq.s32.totalorder %v8280_v7, 14 }
 0x276   : > { %s8341_s9 = scalar_select %p6643_p6, 1, 0 }
 0x277   : > { %p6653_p13 = por %p8344_p8, %p8343_p1  ;;  %s8349_s8 = sld [smem:[#allocation32_spill]] }
 0x278   : > { %8342 = sst [smem:[#allocation24_spill]] %s8341_s9  ;;  %p8350_p8 = scmp.ne.s32.totalorder %s8336_s28, 0 }
 0x279   : > { %s8346_s13 = scalar_select %p6653_p13, 1, 0 }
 0x27a   : > { %s8351_s6 = scalar_select %p8350_p8, 1, 0 }
 0x27b   : > { %p8352_p7 = scmp.ne.s32.totalorder %s8345_s23, 0  ;;  %s8354_s25 = sand.u32 1, %s8320_s17  }
 0x27c   : > { %v848_v26 = vstv %s8351_s6  ;;  %s6683_s5 = sshll.u32 %s8354_s25, 4  ;;  %s8355_s6 = sld [smem:[#allocation33_spill]] }
 0x27d   : > { %vm849_vm5 = vcmp.eq.s32.totalorder %v848_v26, 1  ;;  %s8353_s30 = scalar_select %p8352_p7, 1, 0 }
 0x27e   : > { %v850_v15 = vsel %vm849_vm5, 0.0, %v6071_v46  ;;  %p8356_p12 = scmp.ne.s32.totalorder %s8349_s8, 0  ;;  %s8358_s25 = sld [smem:[#allocation37_spill]] }
 0x27f   : > { %v887_v37 = vstv %s8353_s30  ;;  %s8359_s28 = sld [smem:[#allocation38_spill]]  ;;  %s8360_s29 = sld [smem:[#allocation39_spill]]  ;;  %v854_v11 = vsel %vm851_vm11, %v850_v15, %v720_v27 }
 0x280   : > { %vm888_vm10 = vcmp.eq.s32.totalorder %v887_v37, 1  ;;  %s8357_s30 = scalar_select %p8356_p12, 1, 0  ;;  %v867_v46 = vsel %vm864_vm13, %v863_v43, %v854_v11 }
 0x281   : > { %s8361_s17 = sld [smem:[#allocation36_spill]]  ;;  %v889_v39 = vsel %vm888_vm10, 0.0, %v6083_v5  ;;  %p8366_p8 = scmp.le.s32.totalorder %s8252_s10, %s4654_s7  ;;  %v6719_v5 = vpop.xlane.xlu0 %1974 }
 0x282   : > { %v874_v49 = vstv %s8357_s30  ;;  %s8362_s30 = sld [smem:[#allocation48_spill]]  ;;  %s8363_s23 = sld [smem:[#allocation46_spill]] }
 0x283   : > { %vm875_vm5 = vcmp.eq.s32.totalorder %v874_v49, 1  ;;  %p8364_p2 = scmp.ne.s32.totalorder %s8355_s6, 0  ;;  %p8367_p7 = scmp.le.s32.totalorder %s8309_s0, %s8308_s14 }
 0x284   : > { %v876_v61 = vsel %vm875_vm5, 0.0, %v6116_v25  ;;  %p8369_p1 = scmp.ne.s32.totalorder %s8358_s25, 0  ;;  %p8383_p6 = scmp.le.s32.totalorder %s8309_s0, %s8308_s14 }
 0x285   : > { %s8365_s4 = scalar_select %p8364_p2, 1, 0  ;;  %v880_v53 = vsel %vm7603_vm0, %v876_v61, %v867_v46 }
 0x286   : > { %p6715_p12 = por %p8367_p7, %p8366_p8  ;;  %p8371_p2 = scmp.ne.s32.totalorder %s8359_s28, 0  ;;  %v893_v52 = vsel %vm890_vm15, %v889_v39, %v880_v53 }
 0x287   : > { %v1098_v40 = vstv %s8365_s4  ;;  %s8370_s6 = scalar_select %p8369_p1, 1, 0  ;;  %v894_v45 = vpack.c.bf16 %v893_v52, %v893_v52 }
 0x288   : > { %vm1099_vm10 = vcmp.eq.s32.totalorder %v1098_v40, 1  ;;  %s8372_s4 = scalar_select %p8371_p2, 1, 0 }
 0x289   : > { %v1086_v25 = vstv %s8370_s6  ;;  %p8373_p8 = scmp.le.s32.totalorder %s8360_s29, %s8361_s17  ;;  %p8374_p7 = scmp.le.s32.totalorder %s8348_s26, %s8347_s21  ;;  %v1100_v34 = vsel %vm1099_vm10, 0.0, %v6139_v4 }
 0x28a   : > { %v2516_v28 = vstv %s8372_s4  ;;  %vm1087_vm5 = vcmp.eq.s32.totalorder %v1086_v25, 1  ;;  %p8377_p1 = scmp.le.s32.totalorder %s8362_s30, %s8363_s23  ;;  %s8453_s8 = sld [smem:[#allocation89_spill]] }
 0x28b   : > { %p6735_p13 = por %p8374_p7, %p8373_p8  ;;  %vm2517_vm0 = vcmp.eq.s32.totalorder %v2516_v28, 1  ;;  %p8378_p2 = pmov %p8374_p7  ;;  %v1088_v55 = vsel %vm1087_vm5, 0.0, %v6210_v60 }
 0x28c   : > { %v2518_v59 = vsel %vm2517_vm0, 0.0, %v6226_v23  ;;  %s8381_s6 = scalar_select %p6361_p9, 1, 0  ;;  %v1089_v4 = vsel %vm326_vm9, %v1088_v55, 0.0  ;;  %v2528_v23 = vstv %s8388_s2 }
 0x28d   : > { %p6751_p8 = por %p8378_p2, %p8377_p1  ;;  %p8382_p7 = scmp.le.s32.totalorder %s8256_s19, %s4662_s1  ;;  %v2519_v60 = vsel %vm326_vm9, %v2518_v59, 0.0  ;;  %v1101_v14 = vsel %vm341_vm6, %v1100_v34, %v1089_v4  ;;  %vm2529_vm10 = vcmp.eq.s32.totalorder %v2528_v23, 1 }
 0x28e   : > { %v1801_v54 = vstv %s8381_s6  ;;  %p8385_p1 = scmp.le.s32.totalorder %s4688_s18, %s8265_s12  ;;  %p8386_p2 = scmp.le.s32.totalorder %s8316_s11, %s8315_s3  ;;  %v2530_v20 = vsel %vm2529_vm10, 0.0, %v6311_v32  ;;  %v6828_v32 = vpop.xlane.xlu1 %1279 }
 0x28f   : > { %p6766_p5 = por %p8383_p6, %p8382_p7  ;;  %vm1802_vm0 = vcmp.eq.s32.totalorder %v1801_v54, 1  ;;  %s6790_s12 = scalar_lea.vmem [#allocation8], %s6683_s5  ;;  %v2531_v58 = vsel %vm341_vm6, %v2530_v20, %v2519_v60 }
 0x290   : > { %p6776_p3 = por %p8386_p2, %p8385_p1  ;;  %8389 = sst [smem:[#allocation26_spill]] %s6790_s12  ;;  %896 = vst.msk [vmem:[%s6790_s12] sm:$0xf] %vm895_vm4, %v894_v45  ;;  %v1803_v29 = vsel %vm1802_vm0, 0.0, %v6302_v51  ;;  %v6810_v51 = vpop.xlane.xlu0 %1269 }
 0x291   : > { %s8391_s1 = sld [smem:[#allocation56_spill]]  ;;  %s8392_s19 = sld [smem:[#allocation55_spill]]  ;;  %v1804_v3 = vsel %vm326_vm9, %v1803_v29, 0.0 }
 0x292   : > { %s8393_s7 = scalar_select %p6381_p10, 1, 0  ;;  %v2710_v21 = vpop.xlane.xlu1 %2709 }
 0x293   : > { %s8394_s2 = sld [smem:[#allocation23_spill]]  ;;  %p8398_p9 = pmov %p8386_p2 }
 0x294   : > { %v1813_v0 = vstv %s8393_s7  ;;  %s8395_s6 = scalar_select %p6418_p0, 1, 0 }
 0x295   : > { %vm1814_vm5 = vcmp.eq.s32.totalorder %v1813_v0, 1  ;;  %s8396_s28 = scalar_select %p6472_p11, 1, 0 }
 0x296   : > { %v1825_v44 = vstv %s8395_s6  ;;  %v1815_v17 = vsel %vm1814_vm5, 0.0, %v6339_v50  ;;  %s8400_s6 = sld [smem:[#allocation58_spill]]  ;;  %s8401_s7 = sld [smem:[#allocation57_spill]]  ;;  %v2126_v25 = vpop.xlane.xlu1 %2125 }
 0x297   : > { %vm1826_vm0 = vcmp.eq.s32.totalorder %v1825_v44, 1  ;;  %v1110_v13 = vstv %s8396_s28  ;;  %p8397_p4 = scmp.le.s32.totalorder %s8391_s1, %s8392_s19  ;;  %s8402_s12 = sld [smem:[#allocation59_spill]]  ;;  %v1816_v50 = vsel %vm341_vm6, %v1815_v17, %v1804_v3 }
 0x298   : > { %v1827_v38 = vsel %vm1826_vm0, 0.0, %v6344_v6  ;;  %vm1111_vm9 = vcmp.eq.s32.totalorder %v1110_v13, 1  ;;  %p8405_p11 = scmp.ne.s32.totalorder %s8296_s20, 0  ;;  %p8409_p6 = scmp.ne.s32.totalorder %s8319_s27, 0 }
 0x299   : > { %p6824_p10 = por %p8398_p9, %p8397_p4  ;;  %p8403_p0 = scmp.ne.s32.totalorder %s8394_s2, 0  ;;  %v1828_v1 = vsel %vm356_vm14, %v1827_v38, %v1816_v50  ;;  %v1112_v30 = vsel %vm1111_vm9, 0.0, %v6385_v41 }
 0x29a   : > { %s8406_s3 = scalar_select %p8405_p11, 1, 0  ;;  %v1113_v6 = vsel %vm356_vm14, %v1112_v30, %v1101_v14 }
 0x29b   : > { %s8404_s18 = scalar_select %p8403_p0, 1, 0 }
 0x29c   : > { %v2540_v36 = vstv %s8406_s3  ;;  %s8407_s2 = sld [smem:[#allocation85_spill]]  ;;  %p8411_p7 = scmp.le.s32.totalorder %s8400_s6, %s8401_s7 }
 0x29d   : > { %v1122_v56 = vstv %s8404_s18  ;;  %s8408_s18 = sld [smem:[#allocation86_spill]]  ;;  %vm2541_vm6 = vcmp.eq.s32.totalorder %v2540_v36, 1  ;;  %p8412_p1 = scmp.le.s32.totalorder %s8348_s26, %s8347_s21 }
 0x29e   : > { %vm1123_vm10 = vcmp.eq.s32.totalorder %v1122_v56, 1  ;;  %s8410_s11 = scalar_select %p8409_p6, 1, 0 }
 0x29f   : > { %v1124_v31 = vsel %vm1123_vm10, 0.0, %v6392_v57  ;;  %p6858_p2 = por %p8412_p1, %p8411_p7  ;;  %p8414_p4 = scmp.le.s32.totalorder %s8289_s24, %s8402_s12  ;;  %v2542_v57 = vsel %vm2541_vm6, 0.0, %v6436_v2  ;;  %v2700_v2 = vpop.xlane.xlu0 %2699 }
 0x2a0   : > { %v2552_v18 = vstv %s8410_s11  ;;  %p8415_p9 = pmov %p8412_p1  ;;  %s8416_s3 = sld [smem:[#allocation24_spill]]  ;;  %v1125_v41 = vsel %vm371_vm3, %v1124_v31, %v1113_v6  ;;  %v2543_v8 = vsel %vm356_vm14, %v2542_v57, %v2531_v58  ;;  %v1421_v58 = vpop.xlane.xlu1 %1420 }
 0x2a1   : > { %s8418_s27 = sld [smem:[#allocation65_spill]]  ;;  %s8419_s5 = sld [smem:[#allocation64_spill]]  ;;  %vm2553_vm5 = vcmp.eq.s32.totalorder %v2552_v18, 1 }
 0x2a2   : > { %p6868_p0 = por %p8415_p9, %p8414_p4  ;;  %s8420_s11 = sld [smem:[#allocation87_spill]]  ;;  %v2554_v12 = vsel %vm2553_vm5, 0.0, %v6444_v35 }
 0x2a3   : > { %s8421_s19 = sld [smem:[#allocation88_spill]]  ;;  %p8422_p11 = scmp.ne.s32.totalorder %s8324_s15, 0  ;;  %v2555_v47 = vsel %vm371_vm3, %v2554_v12, %v2543_v8  ;;  %v1995_v61 = vpop.xlane.xlu0 %1994 }
 0x2a4   : > { %p8424_p6 = scmp.ne.s32.totalorder %s8333_s22, 0  ;;  %p2106_p7 = scmp.le.s32.totalorder %s8408_s18, %s8407_s2  ;;  %v2851_v57 = vpop.xlane.xlu1 %2850 }
 0x2a5   : > { %s8423_s12 = scalar_select %p8422_p11, 1, 0 }
 0x2a6   : > { %s8425_s26 = scalar_select %p8424_p6, 1, 0 }
 0x2a7   : > { %v1837_v63 = vstv %s8423_s12  ;;  %p8426_p1 = scmp.ne.s32.totalorder %s8416_s3, 0  ;;  %p8428_p4 = scmp.le.s32.totalorder %s8418_s27, %s8419_s5  ;;  %v1411_v3 = vpop.xlane.xlu0 %1410 }
 0x2a8   : > { %vm1838_vm0 = vcmp.eq.s32.totalorder %v1837_v63, 1  ;;  %v1968_v9 = vstv %s8425_s26  ;;  %p8429_p9 = scmp.le.s32.totalorder %s8309_s0, %s8308_s14  ;;  %s8431_s22 = sld [smem:[#allocation42_spill]] }
 0x2a9   : > { %v1839_v62 = vsel %vm1838_vm0, 0.0, %v6505_v10  ;;  %vm1969_vm9 = vcmp.eq.s32.totalorder %v1968_v9, 1  ;;  %s8427_s12 = scalar_select %p8426_p1, 1, 0 }
 0x2aa   : > { %p6900_p11 = por %p8429_p9, %p8428_p4  ;;  %s8432_s26 = sld [smem:[#allocation40_spill]]  ;;  %v1840_v35 = vsel %vm371_vm3, %v1839_v62, %v1828_v1  ;;  %v1970_v10 = vsel %vm1969_vm9, 0.0, %v6513_v22  ;;  %v2146_v62 = vpop.xlane.xlu1 %2145 }
 0x2ab   : > { %v1253_v48 = vstv %s8427_s12  ;;  %p1391_p6 = scmp.le.s32.totalorder %s8421_s19, %s8420_s11  ;;  %p8433_p1 = scmp.ne.s32.totalorder %s8346_s13, 0  ;;  %v1971_v26 = vsel %vm505_vm1, %v1970_v10, %v1840_v35 }
 0x2ac   : > { %vm1254_vm14 = vcmp.eq.s32.totalorder %v1253_v48, 1  ;;  %s8435_s14 = sld [smem:[#allocation35_spill]]  ;;  %s8436_s0 = sld [smem:[#allocation34_spill]] }
 0x2ad   : > { %s8434_s3 = scalar_select %p8433_p1, 1, 0  ;;  %v1255_v27 = vsel %vm1254_vm14, 0.0, %v6560_v16 }
 0x2ae   : > { %s8437_s21 = scalar_select %p6735_p13, 1, 0  ;;  %v1256_v37 = vsel %vm505_vm1, %v1255_v27, %v1125_v41  ;;  %v2841_v41 = vpop.xlane.xlu0 %2840 }
 0x2af   : > { %v1263_v43 = vstv %s8434_s3  ;;  %s8438_s3 = sld [smem:[#allocation31_spill]]  ;;  %s8439_s24 = sld [smem:[#allocation30_spill]] }
 0x2b0   : > { %vm1264_vm10 = vcmp.eq.s32.totalorder %v1263_v43, 1  ;;  %v2683_v22 = vstv %s8437_s21  ;;  %s8440_s12 = scalar_select %p6751_p8, 1, 0 }
 0x2b1   : > { %v1265_v15 = vsel %vm1264_vm10, 0.0, %v6578_v24  ;;  %vm2684_vm3 = vcmp.eq.s32.totalorder %v2683_v22, 1  ;;  %p8441_p4 = scmp.le.s32.totalorder %s8431_s22, %s8432_s26  ;;  %s8455_s28 = sld [smem:[#allocation50_spill]] }
 0x2b2   : > { %v2693_v16 = vstv %s8440_s12  ;;  %v1266_v49 = vsel %vm518_vm2, %v1265_v15, %v1256_v37  ;;  %v2685_v11 = vsel %vm2684_vm3, 0.0, %v6657_v19  ;;  %s8443_s21 = scalar_select %p6715_p12, 1, 0 }
 0x2b3   : > { %p6934_p13 = por %p2106_p7, %p8441_p4  ;;  %vm2694_vm6 = vcmp.eq.s32.totalorder %v2693_v16, 1  ;;  %p8444_p9 = scmp.le.s32.totalorder %s8435_s14, %s8436_s0  ;;  %v2686_v39 = vsel %vm505_vm1, %v2685_v11, %v2555_v47  ;;  %v2136_v47 = vpop.xlane.xlu0 %2135 }
 0x2b4   : > { %v1978_v24 = vstv %s8443_s21  ;;  %v2695_v46 = vsel %vm2694_vm6, 0.0, %v6665_v42  ;;  %s8446_s12 = scalar_select %p6766_p5, 1, 0 }
 0x2b5   : > { %p6950_p8 = por %p1391_p6, %p8444_p9  ;;  %vm1979_vm5 = vcmp.eq.s32.totalorder %v1978_v24, 1  ;;  %p8447_p12 = scmp.le.s32.totalorder %s8438_s3, %s8439_s24  ;;  %v2696_v40 = vsel %vm518_vm2, %v2695_v46, %v2686_v39 }
 0x2b6   : > { %v1988_v19 = vstv %s8446_s12  ;;  %v1980_v53 = vsel %vm1979_vm5, 0.0, %v6719_v5  ;;  %s8449_s21 = scalar_select %p6776_p3, 1, 0  ;;  %vm8461_vm5 = vcmp.eq.s32.totalorder %v8280_v7, 9 }
 0x2b7   : > { %p6966_p1 = por %p1391_p6, %p8447_p12  ;;  %vm1989_vm1 = vcmp.eq.s32.totalorder %v1988_v19, 1  ;;  %v1981_v28 = vsel %vm518_vm2, %v1980_v53, %v1971_v26  ;;  %s8456_s20 = sld [smem:[#allocation49_spill]]  ;;  %v1431_v26 = vpop.xlane.xlu0 %1430 }
 0x2b8   : > { %v1273_v42 = vstv %s8449_s21  ;;  %s1997_s4 = scalar_select %p6900_p11, 1, 0  ;;  %v1990_v52 = vsel %vm1989_vm1, 0.0, %v6739_v33 }
 0x2b9   : > { %vm1274_vm0 = vcmp.eq.s32.totalorder %v1273_v42, 1  ;;  %s8450_s12 = scalar_select %p6824_p10, 1, 0  ;;  %v1991_v5 = vsel %vm531_vm7, %v1990_v52, %v1981_v28 }
 0x2ba   : > { %s2128_s13 = scalar_select %p6934_p13, 1, 0  ;;  %v1275_v45 = vsel %vm1274_vm0, 0.0, %v6810_v51  ;;  %v1998_v23 = vstv %s1997_s4 }
 0x2bb   : > { %v1283_v34 = vstv %s8450_s12  ;;  %s8451_s10 = scalar_select %p6858_p2, 1, 0  ;;  %v1276_v33 = vsel %vm531_vm7, %v1275_v45, %v1266_v49  ;;  %vm1999_vm10 = vcmp.eq.s32.totalorder %v1998_v23, 1  ;;  %v2861_v37 = vpop.xlane.xlu0 %2860  ;;  %v7092_v49 = vpop.xlane.xlu1 %1440 }
 0x2bc   : > { %vm1284_vm9 = vcmp.eq.s32.totalorder %v1283_v34, 1  ;;  %s1413_s15 = scalar_select %p6950_p8, 1, 0  ;;  %v2129_v0 = vstv %s2128_s13  ;;  %v2000_v44 = vsel %vm1999_vm10, 0.0, %v1995_v61  ;;  %vm8474_vm10 = vcmp.eq.s32.totalorder %v8280_v7, 10 }
 0x2bd   : > { %v2703_v55 = vstv %s8451_s10  ;;  %v1285_v59 = vsel %vm1284_vm9, 0.0, %v6828_v32  ;;  %s8452_s16 = scalar_select %p6868_p0, 1, 0  ;;  %vm2130_vm3 = vcmp.eq.s32.totalorder %v2129_v0, 1  ;;  %v2001_v17 = vsel %vm544_vm8, %v2000_v44, %v1991_v5 }
 0x2be   : > { %vm2704_vm2 = vcmp.eq.s32.totalorder %v2703_v55, 1  ;;  %s8454_s21 = sld [smem:[#allocation103_spill]]  ;;  %v1286_v4 = vsel %vm544_vm8, %v1285_v59, %v1276_v33  ;;  %v1414_v51 = vstv %s1413_s15  ;;  %s8457_s13 = sld [smem:[#allocation52_spill]]  ;;  %v2131_v13 = vsel %vm2130_vm3, 0.0, %v2126_v25  ;;  %vm8475_vm3 = vmmov %vm8474_vm10 }
 0x2bf   : > { %v2713_v54 = vstv %s8452_s16  ;;  %s1423_s12 = scalar_select %p6966_p1, 1, 0  ;;  %v2705_v60 = vsel %vm2704_vm2, 0.0, %v2700_v2  ;;  %v2132_v50 = vsel %vm678_vm12, %v2131_v13, %v2001_v17  ;;  %vm8470_vm2 = vmmov %vm8461_vm5  ;;  %v2871_v24 = vpop.xlane.xlu1 %2870  ;;  %v2156_v39 = vpop.xlane.xlu0 %2155 }
 0x2c0   : > { %vm2714_vm14 = vcmp.eq.s32.totalorder %v2713_v54, 1  ;;  %v2706_v14 = vsel %vm531_vm7, %v2705_v60, %v2696_v40  ;;  %s8458_s25 = sld [smem:[#allocation51_spill]]  ;;  %s8459_s9 = sld [smem:[#allocation54_spill]]  ;;  %vm1415_vm7 = vcmp.eq.s32.totalorder %v1414_v51, 1 }
 0x2c1   : > { %v2715_v29 = vsel %vm2714_vm14, 0.0, %v2710_v21  ;;  %s8460_s4 = sld [smem:[#allocation53_spill]]  ;;  %v1424_v32 = vstv %s1423_s12  ;;  %v1416_v38 = vsel %vm1415_vm7, 0.0, %v1411_v3  ;;  %p8462_p5 = scmp.le.s32.totalorder %s8360_s29, %s8361_s17 }
 0x2c2   : > { %v2716_v20 = vsel %vm544_vm8, %v2715_v29, %v2706_v14  ;;  %vm1425_vm6 = vcmp.eq.s32.totalorder %v1424_v32, 1  ;;  %v1417_v56 = vsel %vm678_vm12, %v1416_v38, %v1286_v4  ;;  %p8463_p2 = scmp.le.s32.totalorder %s8362_s30, %s8363_s23  ;;  %p8464_p11 = scmp.le.s32.totalorder %s8455_s28, %s8456_s20 }
 0x2c3   : > { %v1426_v1 = vsel %vm1425_vm6, 0.0, %v1421_v58  ;;  %p8468_p1 = scmp.le.s32.totalorder %s8400_s6, %s8401_s7  ;;  %vm8476_vm6 = vmmov %vm8475_vm3  ;;  %s8482_s16 = sld [smem:[#allocation107_spill]]  ;;  %v2287_v61 = vpop.xlane.xlu1 %2286 }
 0x2c4   : > { %p2821_p3 = scmp.le.s32.totalorder %s8454_s21, %s8453_s8  ;;  %v1427_v30 = vsel %vm8461_vm5, %v1426_v1, %v1417_v56  ;;  %p2137_p4 = por %p2106_p7, %p8464_p11 }
 0x2c5   : > { %s8485_s2 = sld [smem:[#allocation108_spill]]  ;;  %s8486_s18 = sld [smem:[#allocation25_spill]] }
 0x2c6   : > { %p2842_p10 = por %p2821_p3, %p8462_p5  ;;  %p2852_p0 = por %p2821_p3, %p8463_p2 }
 0x2c7   : > { %p8465_p13 = scmp.le.s32.totalorder %s8457_s13, %s8458_s25  ;;  %p8466_p8 = scmp.le.s32.totalorder %s8459_s9, %s8460_s4 }
 0x2c8   : > { %s2843_s10 = scalar_select %p2842_p10, 1, 0 }
 0x2c9   : > { %p2147_p9 = por %p2106_p7, %p8465_p13  ;;  %p7048_p12 = por %p1391_p6, %p8466_p8 }
 0x2ca   : > { %s2853_s15 = scalar_select %p2852_p0, 1, 0  ;;  %v2844_v36 = vstv %s2843_s10 }
 0x2cb   : > { %s2138_s12 = scalar_select %p2137_p4, 1, 0  ;;  %vm2845_vm8 = vcmp.eq.s32.totalorder %v2844_v36, 1 }
 0x2cc   : > { %v2854_v6 = vstv %s2853_s15  ;;  %s2148_s23 = scalar_select %p2147_p9, 1, 0  ;;  %v2846_v63 = vsel %vm2845_vm8, 0.0, %v2841_v41 }
 0x2cd   : > { %vm2855_vm1 = vcmp.eq.s32.totalorder %v2854_v6, 1  ;;  %s1433_s20 = scalar_select %p7048_p12, 1, 0  ;;  %v2139_v31 = vstv %s2138_s12  ;;  %v2847_v12 = vsel %vm678_vm12, %v2846_v63, %v2716_v20  ;;  %vm8473_vm12 = vmmov %vm8470_vm2 }
 0x2ce   : > { %v2149_v18 = vstv %s2148_s23  ;;  %p7060_p5 = por %p2821_p3, %p8468_p1  ;;  %v2856_v8 = vsel %vm2855_vm1, 0.0, %v2851_v57  ;;  %vm2140_vm0 = vcmp.eq.s32.totalorder %v2139_v31, 1  ;;  %s8471_s10 = sld [smem:[#allocation105_spill]]  ;;  %vm8488_vm1 = vcmp.eq.s32.totalorder %v8280_v7, 11 }
 0x2cf   : > { %vm2150_vm9 = vcmp.eq.s32.totalorder %v2149_v18, 1  ;;  %v2857_v9 = vsel %vm8470_vm2, %v2856_v8, %v2847_v12  ;;  %v1434_v2 = vstv %s1433_s20  ;;  %s8472_s15 = sld [smem:[#allocation104_spill]]  ;;  %v2141_v48 = vsel %vm2140_vm0, 0.0, %v2136_v47  ;;  %p8477_p10 = scmp.le.s32.totalorder %s8418_s27, %s8419_s5 }
 0x2d0   : > { %s2863_s23 = scalar_select %p7060_p5, 1, 0  ;;  %v2151_v21 = vsel %vm2150_vm9, 0.0, %v2146_v62  ;;  %v2142_v35 = vsel %vm8473_vm12, %v2141_v48, %v2132_v50  ;;  %vm1435_vm14 = vcmp.eq.s32.totalorder %v1434_v2, 1  ;;  %v1572_v28 = vpop.xlane.xlu0 %1571  ;;  %v1582_v52 = vpop.xlane.xlu1 %1581 }
 0x2d1   : > { %v2152_v10 = vsel %vm8474_vm10, %v2151_v21, %v2142_v35  ;;  %v1436_v27 = vsel %vm1435_vm14, 0.0, %v1431_v26  ;;  %p2157_p2 = por %p2106_p7, %p8477_p10  ;;  %p8478_p0 = scmp.le.s32.totalorder %s8431_s22, %s8432_s26  ;;  %vm8523_vm14 = vmmov %vm8488_vm1 }
 0x2d2   : > { %v2864_v43 = vstv %s2863_s23  ;;  %v7076_v22 = vsel %vm8475_vm3, %v1436_v27, %v1427_v30  ;;  %s8480_s20 = sld [smem:[#allocation55_spill]]  ;;  %s8481_s4 = sld [smem:[#allocation106_spill]] }
 0x2d3   : > { %vm2865_vm7 = vcmp.eq.s32.totalorder %v2864_v43, 1  ;;  %s8483_s12 = sld [smem:[#allocation60_spill]]  ;;  %s8484_s23 = sld [smem:[#allocation59_spill]] }
 0x2d4   : > { %v2866_v15 = vsel %vm2865_vm7, 0.0, %v2861_v37  ;;  %s2158_s7 = scalar_select %p2157_p2, 1, 0 }
 0x2d5   : > { %v2867_v16 = vsel %vm8476_vm6, %v2866_v15, %v2857_v9  ;;  %p8479_p11 = scmp.le.s32.totalorder %s8471_s10, %s8472_s15  ;;  %s8487_s22 = sld [smem:[#allocation46_spill]] }
 0x2d6   : > { %v2159_v11 = vstv %s2158_s7  ;;  %s8489_s7 = sld [smem:[#allocation49_spill]]  ;;  %s8494_s5 = sld [smem:[#allocation53_spill]] }
 0x2d7   : > { %p2288_p4 = por %p8479_p11, %p8478_p0  ;;  %vm2160_vm5 = vcmp.eq.s32.totalorder %v2159_v11, 1  ;;  %p8499_p10 = scmp.le.s32.totalorder %s8360_s29, %s8361_s17 }
 0x2d8   : > { %v2161_v19 = vsel %vm2160_vm5, 0.0, %v2156_v39  ;;  %p8490_p7 = scmp.le.s32.totalorder %s8391_s1, %s8480_s20  ;;  %p1552_p9 = scmp.le.s32.totalorder %s8482_s16, %s8481_s4 }
 0x2d9   : > { %s2289_s6 = scalar_select %p2288_p4, 1, 0  ;;  %v2162_v40 = vsel %vm8488_vm1, %v2161_v19, %v2152_v10 }
 0x2da   : > { %p7106_p13 = por %p1391_p6, %p8490_p7  ;;  %p8492_p8 = scmp.le.s32.totalorder %s8483_s12, %s8484_s23 }
 0x2db   : > { %v2290_v46 = vstv %s2289_s6  ;;  %p8495_p6 = scmp.le.s32.totalorder %s8435_s14, %s8436_s0  ;;  %p8500_p2 = scmp.le.s32.totalorder %s8485_s2, %s8486_s18 }
 0x2dc   : > { %vm2291_vm8 = vcmp.eq.s32.totalorder %v2290_v46, 1  ;;  %p7118_p12 = por %p2821_p3, %p8492_p8  ;;  %p8497_p3 = scmp.le.s32.totalorder %s8438_s3, %s8439_s24 }
 0x2dd   : > { %v2292_v53 = vsel %vm2291_vm8, 0.0, %v2287_v61  ;;  %s1443_s19 = scalar_select %p7106_p13, 1, 0 }
 0x2de   : > { %v7098_v42 = vsel %vm851_vm11, %v2292_v53, %v2162_v40  ;;  %p7130_p1 = por %p1552_p9, %p8495_p6  ;;  %p7142_p5 = por %p1552_p9, %p8497_p3 }
 0x2df   : > { %s2873_s8 = scalar_select %p7118_p12, 1, 0  ;;  %v1444_v45 = vstv %s1443_s19 }
 0x2e0   : > { %p7152_p0 = por %p8500_p2, %p8499_p10  ;;  %p8502_p11 = scmp.le.s32.totalorder %s8362_s30, %s8487_s22  ;;  %vm1445_vm12 = vcmp.eq.s32.totalorder %v1444_v45, 1 }
 0x2e1   : > { %s1574_s0 = scalar_select %p7130_p1, 1, 0  ;;  %v2874_v25 = vstv %s2873_s8  ;;  %v1446_v58 = vsel %vm1445_vm12, 0.0, %v7092_v49 }
 0x2e2   : > { %p8503_p4 = pmov %p8500_p2  ;;  %s8505_s17 = sld [smem:[#allocation58_spill]]  ;;  %vm2875_vm0 = vcmp.eq.s32.totalorder %v2874_v25, 1  ;;  %v1447_v30 = vsel %vm8488_vm1, %v1446_v58, %v7076_v22 }
 0x2e3   : > { %s1584_s3 = scalar_select %p7142_p5, 1, 0  ;;  %v2876_v55 = vsel %vm2875_vm0, 0.0, %v2871_v24  ;;  %v1575_v33 = vstv %s1574_s0  ;;  %vm8527_vm0 = vcmp.eq.s32.totalorder %v8280_v7, 14 }
 0x2e4   : > { %p7164_p7 = por %p8503_p4, %p8502_p11  ;;  %s8506_s29 = sld [smem:[#allocation57_spill]]  ;;  %v2877_v14 = vsel %vm8523_vm14, %v2876_v55, %v2867_v16  ;;  %vm1576_vm10 = vcmp.eq.s32.totalorder %v1575_v33, 1 }
 0x2e5   : > { %s3004_s6 = scalar_select %p7152_p0, 1, 0  ;;  %v1585_v4 = vstv %s1584_s3  ;;  %v1577_v32 = vsel %vm1576_vm10, 0.0, %v1572_v28 }
 0x2e6   : > { %p8507_p13 = scmp.le.s32.totalorder %s8455_s28, %s8489_s7  ;;  %p8508_p8 = scmp.le.s32.totalorder %s8471_s10, %s8472_s15  ;;  %vm1586_vm6 = vcmp.eq.s32.totalorder %v1585_v4, 1  ;;  %v1578_v18 = vsel %vm851_vm11, %v1577_v32, %v1447_v30 }
 0x2e7   : > { %s3014_s30 = scalar_select %p7164_p7, 1, 0  ;;  %v3005_v34 = vstv %s3004_s6  ;;  %v1587_v56 = vsel %vm1586_vm6, 0.0, %v1582_v52 }
 0x2e8   : > { %p7178_p12 = por %p8508_p8, %p8507_p13  ;;  %p8510_p6 = scmp.le.s32.totalorder %s8457_s13, %s8458_s25  ;;  %vm3006_vm9 = vcmp.eq.s32.totalorder %v3005_v34, 1  ;;  %v1588_v63 = vsel %vm864_vm13, %v1587_v56, %v1578_v18 }
 0x2e9   : > { %p8511_p1 = pmov %p8508_p8  ;;  %p8513_p5 = scmp.le.s32.totalorder %s8459_s9, %s8494_s5  ;;  %v3015_v5 = vstv %s3014_s30 }
 0x2ea   : > { %s2299_s7 = scalar_select %p7178_p12, 1, 0  ;;  %vm3016_vm2 = vcmp.eq.s32.totalorder %v3015_v5, 1 }
 0x2eb   : > { %p7190_p3 = por %p8511_p1, %p8510_p6  ;;  %p7200_p10 = por %p1552_p9, %p8513_p5 }
 0x2ec   : > { %p8515_p2 = scmp.le.s32.totalorder %s8391_s1, %s8480_s20  ;;  %p8517_p11 = scmp.le.s32.totalorder %s8505_s17, %s8506_s29  ;;  %v2300_v59 = vstv %s2299_s7 }
 0x2ed   : > { %s2309_s5 = scalar_select %p7190_p3, 1, 0  ;;  %vm2301_vm3 = vcmp.eq.s32.totalorder %v2300_v59, 1 }
 0x2ee   : > { %p7212_p0 = por %p1552_p9, %p8515_p2  ;;  %p7226_p7 = por %p8503_p4, %p8517_p11 }
 0x2ef   : > { %s1594_s25 = scalar_select %p7200_p10, 1, 0  ;;  %v2310_v54 = vstv %s2309_s5  ;;  %v3002_v60 = vpop.xlane.xlu0 %3001  ;;  %v3012_v23 = vpop.xlane.xlu1 %3011 }
 0x2f0   : > { %s1604_s9 = scalar_select %p7212_p0, 1, 0  ;;  %v3007_v29 = vsel %vm3006_vm9, 0.0, %v3002_v60  ;;  %v3017_v0 = vsel %vm3016_vm2, 0.0, %v3012_v23  ;;  %vm2311_vm7 = vcmp.eq.s32.totalorder %v2310_v54, 1  ;;  %vm8530_vm9 = vmmov %vm8527_vm0 }
 0x2f1   : > { %s8519_s20 = sld [smem:[#allocation64_spill]]  ;;  %p8520_p9 = scmp.le.s32.totalorder %s8483_s12, %s8484_s23  ;;  %v3008_v3 = vsel %vm851_vm11, %v3007_v29, %v2877_v14  ;;  %v1595_v44 = vstv %s1594_s25  ;;  %vm8532_vm11 = vmmov %vm8527_vm0 }
 0x2f2   : > { %p8521_p13 = pmov %p8503_p4  ;;  %p8525_p6 = pmov %p8511_p1  ;;  %v3018_v20 = vsel %vm864_vm13, %v3017_v0, %v3008_v3  ;;  %v1605_v51 = vstv %s1604_s9  ;;  %vm1596_vm5 = vcmp.eq.s32.totalorder %v1595_v44, 1 }
 0x2f3   : > { %s3024_s16 = scalar_select %p7226_p7, 1, 0  ;;  %v2297_v17 = vpop.xlane.xlu0 %2296  ;;  %v2307_v13 = vpop.xlane.xlu1 %2306  ;;  %vm1606_vm8 = vcmp.eq.s32.totalorder %v1605_v51, 1 }
 0x2f4   : > { %p7238_p8 = por %p8521_p13, %p8520_p9  ;;  %v2302_v50 = vsel %vm2301_vm3, 0.0, %v2297_v17  ;;  %v2312_v38 = vsel %vm2311_vm7, 0.0, %v2307_v13  ;;  %s8528_s10 = sld [smem:[#allocation26_spill]] }
 0x2f5   : > { %v2303_v1 = vsel %vm864_vm13, %v2302_v50, %v7098_v42  ;;  %v3025_v6 = vstv %s3024_s16  ;;  %s8529_s15 = sld [smem:[#allocation16_spill]]  ;;  %s8531_s2 = sld [smem:[#allocation13_spill]] }
 0x2f6   : > { %s3034_s23 = scalar_select %p7238_p8, 1, 0  ;;  %v2313_v36 = vsel %vm8527_vm0, %v2312_v38, %v2303_v1  ;;  %vm3026_vm2 = vcmp.eq.s32.totalorder %v3025_v6, 1 }
 0x2f7   : > { %p8524_p12 = scmp.le.s32.totalorder %s8418_s27, %s8519_s20  ;;  %v1592_v41 = vpop.xlane.xlu0 %1591  ;;  %v1602_v57 = vpop.xlane.xlu1 %1601  ;;  %s8533_s18 = sld [smem:[#allocation19_spill]] }
 0x2f8   : > { %v3035_v31 = vstv %s3034_s23  ;;  %v1597_v8 = vsel %vm1596_vm5, 0.0, %v1592_v41  ;;  %v1607_v12 = vsel %vm1606_vm8, 0.0, %v1602_v57  ;;  %s8534_s14 = sld [smem:[#allocation111_spill]]  ;;  %s3420_s29 = smov [#allocation8]  }
 0x2f9   : > { %p7254_p1 = por %p8525_p6, %p8524_p12  ;;  %v1598_v9 = vsel %vm8530_vm9, %v1597_v8, %v1588_v63  ;;  %vm3036_vm12 = vcmp.eq.s32.totalorder %v3035_v31, 1  ;;  %s3349_s6 = sshll.u32 %s3420_s29, 4  ;;  %s3350_s6 = int_to_ptr.vmem [resolvable:$false] %s3349_s6 }
 0x2fa   : > { %v1608_v2 = vsel %vm890_vm15, %v1607_v12, %v1598_v9  ;;  %s3056_s11 = sshll.u32 %s8528_s10, 4  ;;  %s3351_s26 = scalar_lea.vmem %s3350_s6, 512  ;;  %s7298_s11 = int_to_ptr.vmem [resolvable:$true] %s3056_s11 }
 0x2fb   : > { %s2319_s27 = scalar_select %p7254_p1, 1, 0  ;;  %v1609_v62 = vpack.c.bf16 %v1608_v2, %v1608_v2  ;;  %v3022_v48 = vpop.xlane.xlu0 %3021  ;;  %v3032_v21 = vpop.xlane.xlu1 %3031 }
 0x2fc   : > { %v3027_v35 = vsel %vm3026_vm2, 0.0, %v3022_v48  ;;  %v3037_v10 = vsel %vm3036_vm12, 0.0, %v3032_v21  ;;  %s3155_s19 = sshll.u32 %s8529_s15, 8  ;;  %s8535_s24 = sand.u32 1, %s8531_s2  }
 0x2fd   : > { %v2320_v47 = vstv %s2319_s27  ;;  %3137 = vst.msk [vmem:[%s8528_s10 + $0x4] sm:$0xf] %vm895_vm4, %v1609_v62  ;;  %v3028_v43 = vsel %vm8532_vm11, %v3027_v35, %v3018_v20  ;;  %s7304_s3 = scalar_lea.sflag [#allocation7], %s8535_s24  ;;  %s3345_s17 = scalar_lea.vmem %s7298_s11, 256 }
 0x2fe   : > { %vm2321_vm13 = vcmp.eq.s32.totalorder %v2320_v47, 1  ;;  %v3038_v26 = vsel %vm890_vm15, %v3037_v10, %v3028_v43  ;;  %s7296_s0 = scalar_lea.hbm %s8534_s14, %s3155_s19  ;;  %p3346_p3 = scmp.ne.s32.totalorder %s7298_s11, %s3345_s17 }
 0x2ff   : > { %v3039_v27 = vpack.c.bf16 %v3038_v26, %v3038_v26  ;;  %v2317_v22 = vpop.xlane.xlu0 %2316  ;;  %p8536_p5 = scmp.ne.s32.totalorder %s8533_s18, 0  ;;  %p3352_p0 = scmp.lt.s32.totalorder %s7298_s11, %s3350_s6 }
 0x300   : > { %v2322_v37 = vsel %vm2321_vm13, 0.0, %v2317_v22  ;;  %p3353_p11 = scmp.lt.s32.totalorder %s3351_s26, %s3345_s17 }
 0x301   : > { %3143 = vst.msk [vmem:[%s8528_s10 + $0xc] sm:$0xf] %vm895_vm4, %v3039_v27  ;;  %v2323_v15 = vsel %vm890_vm15, %v2322_v37, %v2313_v36  ;;  %p3347_p10 = pnand %p3346_p3, %p8536_p5 }
 0x302   : > { %v2324_v16 = vpack.c.bf16 %v2323_v15, %v2323_v15  ;;  %p3354_p4 = por %p3353_p11, %p3352_p0 }
 0x303   : > { %p3348_p2 = pneg %p3347_p10 }
 0x304   : > { %3140 = vst.msk [vmem:[%s8528_s10 + $0x8] sm:$0xf] %vm895_vm4, %v2324_v16 }
 0x305   : > { %p3355_p7 = pnand %p3354_p4, %p3348_p2 }
 0x307   : > { %3358 = shalt.err (!%p3355_p7)
}
 0x308   : > { %s3359_s30 = scalar_lea.hbm %s7296_s0, 256  ;;  %s3363_s7 = scalar_lea.hbm %s8534_s14, 512 }
 0x309   : > { %p3360_p9 = scmp.ne.s32.totalorder %s7296_s0, %s3359_s30  ;;  %p3364_p12 = scmp.lt.u32.totalorder %s7296_s0, %s8534_s14 }
 0x30a   : > { %p3365_p6 = scmp.lt.u32.totalorder %s3363_s7, %s3359_s30  ;;  %p3367_p3 = scmp.lt.u32.totalorder %s3359_s30, %s7296_s0 }
 0x30b   : > { %p3361_p13 = pnand %p3360_p9, %p8536_p5 }
 0x30c   : > { %p3366_p1 = por %p3365_p6, %p3364_p12 }
 0x30d   : > { %p3362_p8 = pneg %p3361_p13 }
 0x30e   : > { %p3368_p10 = por %p3367_p3, %p3366_p1 }
 0x310   : > { %p3369_p2 = pnand %p3368_p10, %p3362_p8 }
 0x312   : > { %3372 = shalt.err (!%p3369_p2)
}
 0x313   : > { %s3421_s25 = smov 64   ;;  %s3422_s1 = smov 4  }
 0x314   : > { %3163 = dma.vmem_to_hbm [thread:$0]  (%p8536_p5), %s7298_s11, 256, %s7296_s0, %s7304_s3, %s3421_s25, %s3421_s25, %s3422_s1  }
 0x315 PF: > { %s8537_s9 = sld [smem:[#allocation15_spill]]  ;;  %s8538_s20 = sld [smem:[#allocation12_spill]] }
 0x316   : > { %s8539_s4 = sld [smem:[#allocation20_spill]] }
 0x31b   : > { %p3175_p0 = scmp.ge.s32.totalorder %s8537_s9, 2  ;;  %s3071_s16 = sand.u32 1, %s8538_s20  }
 0x31c   : > { %p8540_p11 = scmp.ne.s32.totalorder %s8539_s4, 0  ;;  %s3072_s12 = scalar_lea.sflag [#allocation7], %s3071_s16 }
 0x31e   : > { %p3170_p4 = pnand %p3175_p0, %p8540_p11 }
 0x320   : > { %3396 = dma.done.wait (!%p3170_p4), %s3072_s12, 256  }
 0x321   : > { %3398 = vsyncadd (!%p3170_p4), %s3072_s12, 4294967040  ;;  %s8541_s28 = sld [smem:[#allocation17_spill]]  ;;  %s8542_s0 = sld [smem:[#allocation13_spill]] }
 0x322   : > { %s8543_s27 = sld [smem:[#allocation14_spill]]  ;;  %s8544_s1 = sld [smem:[#allocation18_spill]] }
 0x327   : > { %p22_p7 = scmp.ge.s32.totalorder %s8541_s28, 4  }
 0x329   :  { %24 = sbr.rel (!%p22_p7) target bundleno = 27 (0x1b), region = 68 }
 0x330   :  { %3077 = vsyncpa [#allocation6], 1 }
 0x331   :  { %3079 = vsyncpa [#allocation6 + $0x1], 1 }
 0x332   :  { %3080 = vsyncpa [#allocation7], 1 }
 0x333   :  { %3082 = vsyncpa [#allocation7 + $0x1], 1 }

</bundles_post_ra>
